<compile_context>
chip_gen: v5e
topology: v5e:2x2
jax: 0.10.0
libtpu: 0.0.40
codegen_flags: <defaults>
</compile_context>

<pallas_src>
import jax
import jax.numpy as jnp
import numpy as np
from jax.experimental import pallas as pl
from jax.experimental.pallas import tpu as pltpu

_EPS = 1e-5

_vmem_limit_cache = None


def _vmem_limit_bytes():
    """Generation-aware VMEM limit: ~75% of physical capacity, 64 MiB fallback."""
    global _vmem_limit_cache
    if _vmem_limit_cache is None:
        limit = 64 * 1024 * 1024
        try:
            info = pltpu.get_tpu_info()
            cap = getattr(info, "vmem_capacity_bytes", None)
            if cap:
                limit = min(int(cap) * 3 // 4, 112 * 1024 * 1024)
        except Exception:
            pass
        _vmem_limit_cache = limit
    return _vmem_limit_cache


# ---------------------------------------------------------------------------
# Kernel 1: 3x3 conv (stride 1), in-kernel zero halo (bf16), optional fused
# per-channel affine + ReLU on the input (folds the previous BN+ReLU),
# bf16 MXU operands with f32 accumulation, per-block BN statistics.
# ---------------------------------------------------------------------------
def _make_conv3x3_kernel(fuse_pre_bn_relu, use_col_slab, H, W, Cin, Cout):
    def kernel(*refs):
        i = 0
        x_ref = refs[i]; i += 1
        w_ref = refs[i]; i += 1
        if fuse_pre_bn_relu:
            sc_ref = refs[i]; i += 1
            bi_ref = refs[i]; i += 1
        y_ref = refs[i]; i += 1
        bsum_ref = refs[i]; i += 1
        bcss_ref = refs[i]; i += 1
        xp_ref = refs[i]; i += 1
        col_ref = refs[i] if use_col_slab else None

        # ---- zero only the 1-element halo border (interior is fully
        #      overwritten below).  Done every step so correctness never
        #      depends on which core ran grid step 0 (v7x megacore safe).
        zrow = jnp.zeros((1, W + 2, Cin), xp_ref.dtype)
        zcol = jnp.zeros((H + 2, 1, Cin), xp_ref.dtype)
        xp_ref[0:1, :, :] = zrow
        xp_ref[H + 1:H + 2, :, :] = zrow
        xp_ref[:, 0:1, :] = zcol
        xp_ref[:, W + 1:W + 2, :] = zcol

        # ---- input block; optionally apply the previous layer's folded BN
        #      affine + ReLU here (elementwise in f32), then cast to bf16 ONCE.
        xv = x_ref[0].astype(jnp.float32)                        # (H, W, Cin)
        if fuse_pre_bn_relu:
            xv = jnp.maximum(
                xv * sc_ref[0][None, None, :] + bi_ref[0][None, None, :], 0.0)
        xp_ref[1:H + 1, 1:W + 1, :] = xv.astype(jnp.bfloat16)

        if use_col_slab:
            # Cin % 128 == 0: lane-aligned slab writes, one fat-K MXU matmul.
            for kh in range(3):
                for kw in range(3):
                    t = kh * 3 + kw
                    col_ref[:, t * Cin:(t + 1) * Cin] = (
                        xp_ref[kh:kh + H, kw:kw + W, :].reshape(H * W, Cin))
            acc = jnp.dot(col_ref[...], w_ref[...],
                          preferred_element_type=jnp.float32)    # (H*W, Cout)
        else:
            # Cin not lane-aligned: skip the slab, 9 accumulating K=Cin matmuls
            # straight from the bf16 halo (no masked slab stores, less VMEM).
            acc = jnp.zeros((H * W, Cout), jnp.float32)
            for kh in range(3):
                for kw in range(3):
                    t = kh * 3 + kw
                    tap = xp_ref[kh:kh + H, kw:kw + W, :].reshape(H * W, Cin)
                    acc = acc + jnp.dot(tap, w_ref[t * Cin:(t + 1) * Cin, :],
                                        preferred_element_type=jnp.float32)

        # NOTE: no conv bias — exactly cancelled by training-mode BN mean.
        y_ref[0] = acc.astype(y_ref.dtype)

        # ---- per-block BN statistics from the f32 accumulator, two-pass
        #      (centered) in VMEM.  Per-block outputs keep the batch grid axis
        #      'parallel' (no serial accumulator).
        bsum = jnp.sum(acc, axis=0)                              # (Cout,)
        bmean = bsum * (1.0 / (H * W))
        d = acc - bmean[None, :]
        bsum_ref[...] = bsum.reshape(1, 1, Cout)
        bcss_ref[...] = jnp.sum(d * d, axis=0).reshape(1, 1, Cout)

    return kernel


def _conv3x3_pallas(x_nhwc, w2d_bf16, pre_scale=None, pre_bias=None,
                    y_dtype=jnp.float32):
    """x_nhwc: (N,H,W,Cin);  w2d_bf16: (9*Cin, Cout) bf16.
    Returns y (N, H*W, Cout) in y_dtype, block sums, block centered-SSQ."""
    N, H, W, Cin = x_nhwc.shape
    K2, Cout = w2d_bf16.shape
    fuse = pre_scale is not None
    use_col_slab = (Cin % 128 == 0)
    kernel = _make_conv3x3_kernel(fuse, use_col_slab, H, W, Cin, Cout)

    # Weight block index never changes; single-buffer when it is big (v7x VMEM).
    if Cout >= 256:
        w_spec = pl.BlockSpec((K2, Cout), lambda n: (0, 0),
                              pipeline_mode=pl.Buffered(1))
    else:
        w_spec = pl.BlockSpec((K2, Cout), lambda n: (0, 0))

    in_specs = [pl.BlockSpec((1, H, W, Cin), lambda n: (n, 0, 0, 0)), w_spec]
    args = [x_nhwc, w2d_bf16]
    if fuse:
        in_specs += [pl.BlockSpec((1, Cin), lambda n: (0, 0)),
                     pl.BlockSpec((1, Cin), lambda n: (0, 0))]
        args += [pre_scale.reshape(1, Cin), pre_bias.reshape(1, Cin)]

    scratch_shapes = [pltpu.VMEM((H + 2, W + 2, Cin), jnp.bfloat16)]   # halo
    if use_col_slab:
        scratch_shapes.append(pltpu.VMEM((H * W, 9 * Cin), jnp.bfloat16))

    return pl.pallas_call(
        kernel,
        out_shape=(jax.ShapeDtypeStruct((N, H * W, Cout), y_dtype),
                   jax.ShapeDtypeStruct((N, 1, Cout), jnp.float32),
                   jax.ShapeDtypeStruct((N, 1, Cout), jnp.float32)),
        grid=(N,),
        in_specs=in_specs,
        out_specs=(pl.BlockSpec((1, H * W, Cout), lambda n: (n, 0, 0)),
                   pl.BlockSpec((1, 1, Cout), lambda n: (n, 0, 0)),
                   pl.BlockSpec((1, 1, Cout), lambda n: (n, 0, 0))),
        scratch_shapes=scratch_shapes,
        compiler_params=pltpu.CompilerParams(
            dimension_semantics=("parallel",),
            vmem_limit_bytes=_vmem_limit_bytes()),
    )(*args)


# ---------------------------------------------------------------------------
# Kernel 2: folded BN2 + residual add + ReLU.
# ---------------------------------------------------------------------------
def _bn_add_relu_kernel(y_ref, id_ref, sc_ref, bi_ref, out_ref):
    out_ref[0] = jnp.maximum(
        y_ref[0] * sc_ref[0][None, :] + bi_ref[0][None, :] + id_ref[0], 0.0)


def _bn_add_relu_pallas(y3, id3, scale2d, bias2d):
    N, R, L = y3.shape
    return pl.pallas_call(
        _bn_add_relu_kernel,
        out_shape=jax.ShapeDtypeStruct((N, R, L), jnp.float32),
        grid=(N,),
        in_specs=[pl.BlockSpec((1, R, L), lambda n: (n, 0, 0)),
                  pl.BlockSpec((1, R, L), lambda n: (n, 0, 0)),
                  pl.BlockSpec((1, L), lambda n: (0, 0)),
                  pl.BlockSpec((1, L), lambda n: (0, 0))],
        out_specs=pl.BlockSpec((1, R, L), lambda n: (n, 0, 0)),
        compiler_params=pltpu.CompilerParams(
            dimension_semantics=("parallel",),
            vmem_limit_bytes=_vmem_limit_bytes()),
    )(y3, id3, scale2d, bias2d)


# ---------------------------------------------------------------------------
# Wrapper glue: BN fold from per-block stats (stable parallel combine).
# ---------------------------------------------------------------------------
def _bn_fold_from_block_stats(bsum, bcss, gamma, beta, hw, eps):
    bsum = bsum[:, 0, :]                                   # (N, C)
    bcss = bcss[:, 0, :]                                   # (N, C)
    count = bsum.shape[0] * hw
    mean = jnp.sum(bsum, axis=0) / count                   # (C,)
    bmean = bsum / hw                                      # (N, C)
    var = (jnp.sum(bcss, axis=0)
           + hw * jnp.sum(jnp.square(bmean - mean[None, :]), axis=0)) / count
    scale = gamma * jax.lax.rsqrt(var + eps)
    bias = beta - mean * scale
    return scale, bias


def basic_block_forward_nhwc(x_nhwc, params, eps=_EPS):
    """NHWC end-to-end path (no boundary transposes)."""
    x = x_nhwc.astype(jnp.float32)
    N, H, W, C = x.shape

    # HWIO weights reshaped to (9*Cin, Cout) matching the tap order (kh major,
    # kw minor, cin innermost); cast to bf16 once here (never per grid step).
    w1 = params["w1"].reshape(9 * C, C).astype(jnp.bfloat16)
    w2 = params["w2"].reshape(9 * C, C).astype(jnp.bfloat16)

    # conv1 (+ per-block stats).  Intermediate y1 stored bf16 to halve the
    # HBM write+read between the convs; BN1 fold still from f32 stats.
    y1, s1, c1 = _conv3x3_pallas(x, w1, y_dtype=jnp.bfloat16)
    sc1, bi1 = _bn_fold_from_block_stats(s1, c1, params["g1"], params["be1"],
                                         H * W, eps)

    # conv2 with bn1 + relu fused into its input path (+ per-block stats).
    y1_nhwc = y1.reshape(N, H, W, C)                 # contiguous, free reshape
    y2, s2, c2 = _conv3x3_pallas(y1_nhwc, w2, sc1, bi1, y_dtype=jnp.float32)
    sc2, bi2 = _bn_fold_from_block_stats(s2, c2, params["g2"], params["be2"],
                                         H * W, eps)

    # bn2 + residual + relu.  Lane-dense W*C tiling only needed when C < 128.
    if C >= 128:
        y2_p = y2                                    # (N, H*W, C)
        x_p = x.reshape(N, H * W, C)
        sc_p = sc2.reshape(1, C)
        bi_p = bi2.reshape(1, C)
    else:
        y2_p = y2.reshape(N, H, W * C)
        x_p = x.reshape(N, H, W * C)
        sc_p = jnp.tile(sc2, W).reshape(1, W * C)
        bi_p = jnp.tile(bi2, W).reshape(1, W * C)
    out = _bn_add_relu_pallas(y2_p, x_p, sc_p, bi_p)
    return out.reshape(N, H, W, C)


def basic_block_forward(x_nchw, params, eps=_EPS):
    # TODO(synk): these full-tensor transposes are only for NCHW (PyTorch) API
    # compatibility — run the surrounding model NHWC and call
    # basic_block_forward_nhwc directly to avoid two extra HBM passes.
    x = jnp.transpose(x_nchw, (0, 2, 3, 1))
    out = basic_block_forward_nhwc(x, params, eps)
    return jnp.transpose(out, (0, 3, 1, 2))          # NHWC -> NCHW


# ---------------------------------------------------------------------------
# Deterministic parameter init (shapes from the module __init__).
# Conv weights stored as HWIO: (3, 3, Cin, Cout).  Biases are created (module
# has bias=True) but are mathematically cancelled by training-mode BN; the
# reference below applies them, the Pallas path does not.
# ---------------------------------------------------------------------------
def init_params(key, cin, cout):
    k = jax.random.split(key, 4)
    w1 = jax.random.normal(k[0], (3, 3, cin, cout), jnp.float32) / np.sqrt(9.0 * cin)
    b1 = 0.01 * jax.random.normal(k[1], (cout,), jnp.float32)
    w2 = jax.random.normal(k[2], (3, 3, cout, cout), jnp.float32) / np.sqrt(9.0 * cout)
    b2 = 0.01 * jax.random.normal(k[3], (cout,), jnp.float32)
    return dict(
        w1=w1, b1=b1, g1=jnp.ones((cout,), jnp.float32), be1=jnp.zeros((cout,), jnp.float32),
        w2=w2, b2=b2, g2=jnp.ones((cout,), jnp.float32), be2=jnp.zeros((cout,), jnp.float32),
    )


# ---------------------------------------------------------------------------
# Reference (precision-matched: bf16 conv operands, f32 accumulation / BN),
# including the conv biases that the kernel path drops.
# ---------------------------------------------------------------------------
def ref_forward(x_nchw, params, eps=_EPS):
    x = jnp.transpose(x_nchw, (0, 2, 3, 1)).astype(jnp.float32)

    def conv(x_, w, b):
        y = jax.lax.conv_general_dilated(
            x_.astype(jnp.bfloat16), w.astype(jnp.bfloat16),
            window_strides=(1, 1), padding=((1, 1), (1, 1)),
            dimension_numbers=("NHWC", "HWIO", "NHWC"),
            preferred_element_type=jnp.float32)
        return y + b[None, None, None, :]

    def bn(y, g, b):
        m = jnp.mean(y, axis=(0, 1, 2))
        v = jnp.mean(jnp.square(y - m), axis=(0, 1, 2))
        return (y - m) * jax.lax.rsqrt(v + eps) * g + b

    out = jax.nn.relu(bn(conv(x, params["w1"], params["b1"]), params["g1"], params["be1"]))
    out = bn(conv(out, params["w2"], params["b2"]), params["g2"], params["be2"])
    out = jax.nn.relu(out + x)
    return jnp.transpose(out, (0, 3, 1, 2))


if __name__ == "__main__":
    key = jax.random.PRNGKey(0)
    kx, kp = jax.random.split(key)

    N, C, H, W = 2, 4, 16, 16                 # small shapes; BasicBlock w/o downsample
    x = jax.random.normal(kx, (N, C, H, W), jnp.float32)
    params = init_params(kp, C, C)

    out = jax.jit(basic_block_forward)(x, params)
    jax.block_until_ready(out)

    ref = ref_forward(x, params)
    assert out.shape == (N, C, H, W)
    # Tolerance reflects bf16 MXU operands + bf16 storage of the intermediate
    # y1 (reference is precision-matched on the matmuls; remaining diffs are
    # storage rounding, f32 summation order, and bias-cancellation rounding).
    np.testing.assert_allclose(np.asarray(out), np.asarray(ref), rtol=2e-2, atol=2e-2)

    print("KERNEL_OK")
</pallas_src>

<mosaic_0001>
module attributes {stable_mosaic.version = 11 : i64} {
  func.func @kernel(%arg0: i32, %arg1: memref<1x16x16x4xf32, #tpu.memory_space<vmem>>, %arg2: memref<36x4xbf16, #tpu.memory_space<vmem>>, %arg3: memref<1x256x4xbf16, #tpu.memory_space<vmem>>, %arg4: memref<1x1x4xf32, #tpu.memory_space<vmem>>, %arg5: memref<1x1x4xf32, #tpu.memory_space<vmem>>, %arg6: memref<18x18x4xbf16, #tpu.memory_space<vmem>>) attributes {dimension_semantics = [#tpu.dimension_semantics<parallel>], iteration_bounds = array<i64: 2>, scalar_prefetch = 0 : i64, scratch_operands = 1 : i64, tpu.core_type = #tpu.core_type<tc>, window_params = [{transform_indices = @transform_0, window_bounds = array<i64: 1, 16, 16, 4>}, {pipeline_mode = #tpu.pipeline_mode<synchronous>, transform_indices = @transform_1, window_bounds = array<i64: 36, 4>}, {transform_indices = @transform_2, window_bounds = array<i64: 1, 256, 4>}, {transform_indices = @transform_3, window_bounds = array<i64: 1, 1, 4>}, {transform_indices = @transform_4, window_bounds = array<i64: 1, 1, 4>}]} {
    %cst = arith.constant 0.000000e+00 : bf16
    %0 = vector.broadcast %cst : bf16 to vector<1x18x4xbf16>
    %cst_0 = arith.constant 0.000000e+00 : bf16
    %1 = vector.broadcast %cst_0 : bf16 to vector<18x1x4xbf16>
    %c0 = arith.constant 0 : index
    %c0_1 = arith.constant 0 : index
    %c0_2 = arith.constant 0 : index
    %2 = vector.load %arg6[%c0, %c0_1, %c0_2] : memref<18x18x4xbf16, #tpu.memory_space<vmem>>, vector<1x18x4xbf16>
    tpu.vector_store %arg6[%c0, %c0_1, %c0_2], %0 {strides = array<i32>} : memref<18x18x4xbf16, #tpu.memory_space<vmem>>, vector<1x18x4xbf16>,
    %c17 = arith.constant 17 : index
    %c0_3 = arith.constant 0 : index
    %c0_4 = arith.constant 0 : index
    %3 = vector.load %arg6[%c17, %c0_3, %c0_4] : memref<18x18x4xbf16, #tpu.memory_space<vmem>>, vector<1x18x4xbf16>
    tpu.vector_store %arg6[%c17, %c0_3, %c0_4], %0 {strides = array<i32>} : memref<18x18x4xbf16, #tpu.memory_space<vmem>>, vector<1x18x4xbf16>,
    %c0_5 = arith.constant 0 : index
    %c0_6 = arith.constant 0 : index
    %c0_7 = arith.constant 0 : index
    %4 = vector.load %arg6[%c0_5, %c0_6, %c0_7] : memref<18x18x4xbf16, #tpu.memory_space<vmem>>, vector<18x1x4xbf16>
    tpu.vector_store %arg6[%c0_5, %c0_6, %c0_7], %1 {strides = array<i32>} : memref<18x18x4xbf16, #tpu.memory_space<vmem>>, vector<18x1x4xbf16>,
    %c0_8 = arith.constant 0 : index
    %c17_9 = arith.constant 17 : index
    %c0_10 = arith.constant 0 : index
    %5 = vector.load %arg6[%c0_8, %c17_9, %c0_10] : memref<18x18x4xbf16, #tpu.memory_space<vmem>>, vector<18x1x4xbf16>
    tpu.vector_store %arg6[%c0_8, %c17_9, %c0_10], %1 {strides = array<i32>} : memref<18x18x4xbf16, #tpu.memory_space<vmem>>, vector<18x1x4xbf16>,
    %c0_11 = arith.constant 0 : index
    %c0_12 = arith.constant 0 : index
    %c0_13 = arith.constant 0 : index
    %c0_14 = arith.constant 0 : index
    %6 = vector.load %arg1[%c0_11, %c0_12, %c0_13, %c0_14] : memref<1x16x16x4xf32, #tpu.memory_space<vmem>>, vector<1x16x16x4xf32>
    %7 = vector.shape_cast %6 : vector<1x16x16x4xf32> to vector<16x16x4xf32>
    %8 = arith.truncf %7 : vector<16x16x4xf32> to vector<16x16x4xbf16>
    %c1 = arith.constant 1 : index
    %c1_15 = arith.constant 1 : index
    %c0_16 = arith.constant 0 : index
    %9 = vector.load %arg6[%c1, %c1_15, %c0_16] : memref<18x18x4xbf16, #tpu.memory_space<vmem>>, vector<16x16x4xbf16>
    tpu.vector_store %arg6[%c1, %c1_15, %c0_16], %8 {strides = array<i32>} : memref<18x18x4xbf16, #tpu.memory_space<vmem>>, vector<16x16x4xbf16>,
    %cst_17 = arith.constant 0.000000e+00 : f32
    %10 = vector.broadcast %cst_17 : f32 to vector<256x4xf32>
    %c0_18 = arith.constant 0 : index
    %c0_19 = arith.constant 0 : index
    %c0_20 = arith.constant 0 : index
    %11 = vector.load %arg6[%c0_18, %c0_19, %c0_20] : memref<18x18x4xbf16, #tpu.memory_space<vmem>>, vector<16x16x4xbf16>
    %12 = vector.shape_cast %11 : vector<16x16x4xbf16> to vector<256x4xbf16>
    %c0_21 = arith.constant 0 : index
    %c0_22 = arith.constant 0 : index
    %13 = vector.load %arg2[%c0_21, %c0_22] : memref<36x4xbf16, #tpu.memory_space<vmem>>, vector<4x4xbf16>
    %cst_23 = arith.constant dense<0.000000e+00> : vector<256x4xf32>
    %14 = tpu.matmul %12, %13, %cst_23 {dimension_numbers = #tpu.dot_dimension_numbers<[1], [0], [0], [1], [0, 0, 1, 1], [], []>} : vector<256x4xbf16>, vector<4x4xbf16>, vector<256x4xf32> -> vector<256x4xf32>
    %15 = arith.addf %10, %14 : vector<256x4xf32>
    %c0_24 = arith.constant 0 : index
    %c1_25 = arith.constant 1 : index
    %c0_26 = arith.constant 0 : index
    %16 = vector.load %arg6[%c0_24, %c1_25, %c0_26] : memref<18x18x4xbf16, #tpu.memory_space<vmem>>, vector<16x16x4xbf16>
    %17 = vector.shape_cast %16 : vector<16x16x4xbf16> to vector<256x4xbf16>
    %c4 = arith.constant 4 : index
    %c0_27 = arith.constant 0 : index
    %18 = vector.load %arg2[%c4, %c0_27] : memref<36x4xbf16, #tpu.memory_space<vmem>>, vector<4x4xbf16>
    %cst_28 = arith.constant dense<0.000000e+00> : vector<256x4xf32>
    %19 = tpu.matmul %17, %18, %cst_28 {dimension_numbers = #tpu.dot_dimension_numbers<[1], [0], [0], [1], [0, 0, 1, 1], [], []>} : vector<256x4xbf16>, vector<4x4xbf16>, vector<256x4xf32> -> vector<256x4xf32>
    %20 = arith.addf %15, %19 : vector<256x4xf32>
    %c0_29 = arith.constant 0 : index
    %c2 = arith.constant 2 : index
    %c0_30 = arith.constant 0 : index
    %21 = vector.load %arg6[%c0_29, %c2, %c0_30] : memref<18x18x4xbf16, #tpu.memory_space<vmem>>, vector<16x16x4xbf16>
    %22 = vector.shape_cast %21 : vector<16x16x4xbf16> to vector<256x4xbf16>
    %c8 = arith.constant 8 : index
    %c0_31 = arith.constant 0 : index
    %23 = vector.load %arg2[%c8, %c0_31] : memref<36x4xbf16, #tpu.memory_space<vmem>>, vector<4x4xbf16>
    %cst_32 = arith.constant dense<0.000000e+00> : vector<256x4xf32>
    %24 = tpu.matmul %22, %23, %cst_32 {dimension_numbers = #tpu.dot_dimension_numbers<[1], [0], [0], [1], [0, 0, 1, 1], [], []>} : vector<256x4xbf16>, vector<4x4xbf16>, vector<256x4xf32> -> vector<256x4xf32>
    %25 = arith.addf %20, %24 : vector<256x4xf32>
    %c1_33 = arith.constant 1 : index
    %c0_34 = arith.constant 0 : index
    %c0_35 = arith.constant 0 : index
    %26 = vector.load %arg6[%c1_33, %c0_34, %c0_35] : memref<18x18x4xbf16, #tpu.memory_space<vmem>>, vector<16x16x4xbf16>
    %27 = vector.shape_cast %26 : vector<16x16x4xbf16> to vector<256x4xbf16>
    %c12 = arith.constant 12 : index
    %c0_36 = arith.constant 0 : index
    %28 = vector.load %arg2[%c12, %c0_36] : memref<36x4xbf16, #tpu.memory_space<vmem>>, vector<4x4xbf16>
    %cst_37 = arith.constant dense<0.000000e+00> : vector<256x4xf32>
    %29 = tpu.matmul %27, %28, %cst_37 {dimension_numbers = #tpu.dot_dimension_numbers<[1], [0], [0], [1], [0, 0, 1, 1], [], []>} : vector<256x4xbf16>, vector<4x4xbf16>, vector<256x4xf32> -> vector<256x4xf32>
    %30 = arith.addf %25, %29 : vector<256x4xf32>
    %c1_38 = arith.constant 1 : index
    %c1_39 = arith.constant 1 : index
    %c0_40 = arith.constant 0 : index
    %31 = vector.load %arg6[%c1_38, %c1_39, %c0_40] : memref<18x18x4xbf16, #tpu.memory_space<vmem>>, vector<16x16x4xbf16>
    %32 = vector.shape_cast %31 : vector<16x16x4xbf16> to vector<256x4xbf16>
    %c16 = arith.constant 16 : index
    %c0_41 = arith.constant 0 : index
    %33 = vector.load %arg2[%c16, %c0_41] : memref<36x4xbf16, #tpu.memory_space<vmem>>, vector<4x4xbf16>
    %cst_42 = arith.constant dense<0.000000e+00> : vector<256x4xf32>
    %34 = tpu.matmul %32, %33, %cst_42 {dimension_numbers = #tpu.dot_dimension_numbers<[1], [0], [0], [1], [0, 0, 1, 1], [], []>} : vector<256x4xbf16>, vector<4x4xbf16>, vector<256x4xf32> -> vector<256x4xf32>
    %35 = arith.addf %30, %34 : vector<256x4xf32>
    %c1_43 = arith.constant 1 : index
    %c2_44 = arith.constant 2 : index
    %c0_45 = arith.constant 0 : index
    %36 = vector.load %arg6[%c1_43, %c2_44, %c0_45] : memref<18x18x4xbf16, #tpu.memory_space<vmem>>, vector<16x16x4xbf16>
    %37 = vector.shape_cast %36 : vector<16x16x4xbf16> to vector<256x4xbf16>
    %c20 = arith.constant 20 : index
    %c0_46 = arith.constant 0 : index
    %38 = vector.load %arg2[%c20, %c0_46] : memref<36x4xbf16, #tpu.memory_space<vmem>>, vector<4x4xbf16>
    %cst_47 = arith.constant dense<0.000000e+00> : vector<256x4xf32>
    %39 = tpu.matmul %37, %38, %cst_47 {dimension_numbers = #tpu.dot_dimension_numbers<[1], [0], [0], [1], [0, 0, 1, 1], [], []>} : vector<256x4xbf16>, vector<4x4xbf16>, vector<256x4xf32> -> vector<256x4xf32>
    %40 = arith.addf %35, %39 : vector<256x4xf32>
    %c2_48 = arith.constant 2 : index
    %c0_49 = arith.constant 0 : index
    %c0_50 = arith.constant 0 : index
    %41 = vector.load %arg6[%c2_48, %c0_49, %c0_50] : memref<18x18x4xbf16, #tpu.memory_space<vmem>>, vector<16x16x4xbf16>
    %42 = vector.shape_cast %41 : vector<16x16x4xbf16> to vector<256x4xbf16>
    %c24 = arith.constant 24 : index
    %c0_51 = arith.constant 0 : index
    %43 = vector.load %arg2[%c24, %c0_51] : memref<36x4xbf16, #tpu.memory_space<vmem>>, vector<4x4xbf16>
    %cst_52 = arith.constant dense<0.000000e+00> : vector<256x4xf32>
    %44 = tpu.matmul %42, %43, %cst_52 {dimension_numbers = #tpu.dot_dimension_numbers<[1], [0], [0], [1], [0, 0, 1, 1], [], []>} : vector<256x4xbf16>, vector<4x4xbf16>, vector<256x4xf32> -> vector<256x4xf32>
    %45 = arith.addf %40, %44 : vector<256x4xf32>
    %c2_53 = arith.constant 2 : index
    %c1_54 = arith.constant 1 : index
    %c0_55 = arith.constant 0 : index
    %46 = vector.load %arg6[%c2_53, %c1_54, %c0_55] : memref<18x18x4xbf16, #tpu.memory_space<vmem>>, vector<16x16x4xbf16>
    %47 = vector.shape_cast %46 : vector<16x16x4xbf16> to vector<256x4xbf16>
    %c28 = arith.constant 28 : index
    %c0_56 = arith.constant 0 : index
    %48 = vector.load %arg2[%c28, %c0_56] : memref<36x4xbf16, #tpu.memory_space<vmem>>, vector<4x4xbf16>
    %cst_57 = arith.constant dense<0.000000e+00> : vector<256x4xf32>
    %49 = tpu.matmul %47, %48, %cst_57 {dimension_numbers = #tpu.dot_dimension_numbers<[1], [0], [0], [1], [0, 0, 1, 1], [], []>} : vector<256x4xbf16>, vector<4x4xbf16>, vector<256x4xf32> -> vector<256x4xf32>
    %50 = arith.addf %45, %49 : vector<256x4xf32>
    %c2_58 = arith.constant 2 : index
    %c2_59 = arith.constant 2 : index
    %c0_60 = arith.constant 0 : index
    %51 = vector.load %arg6[%c2_58, %c2_59, %c0_60] : memref<18x18x4xbf16, #tpu.memory_space<vmem>>, vector<16x16x4xbf16>
    %52 = vector.shape_cast %51 : vector<16x16x4xbf16> to vector<256x4xbf16>
    %c32 = arith.constant 32 : index
    %c0_61 = arith.constant 0 : index
    %53 = vector.load %arg2[%c32, %c0_61] : memref<36x4xbf16, #tpu.memory_space<vmem>>, vector<4x4xbf16>
    %cst_62 = arith.constant dense<0.000000e+00> : vector<256x4xf32>
    %54 = tpu.matmul %52, %53, %cst_62 {dimension_numbers = #tpu.dot_dimension_numbers<[1], [0], [0], [1], [0, 0, 1, 1], [], []>} : vector<256x4xbf16>, vector<4x4xbf16>, vector<256x4xf32> -> vector<256x4xf32>
    %55 = arith.addf %50, %54 : vector<256x4xf32>
    %56 = arith.truncf %55 : vector<256x4xf32> to vector<256x4xbf16>
    %c0_63 = arith.constant 0 : index
    %c0_64 = arith.constant 0 : index
    %c0_65 = arith.constant 0 : index
    %57 = vector.load %arg3[%c0_63, %c0_64, %c0_65] : memref<1x256x4xbf16, #tpu.memory_space<vmem>>, vector<1x256x4xbf16>
    %58 = vector.shape_cast %57 : vector<1x256x4xbf16> to vector<256x4xbf16>
    %59 = vector.shape_cast %56 : vector<256x4xbf16> to vector<1x256x4xbf16>
    tpu.vector_store %arg3[%c0_63, %c0_64, %c0_65], %59 {strides = array<i32>} : memref<1x256x4xbf16, #tpu.memory_space<vmem>>, vector<1x256x4xbf16>,
    %cst_66 = arith.constant dense<0.000000e+00> : vector<4xf32>
    %60 = vector.multi_reduction <add>, %55, %cst_66 [0] : vector<256x4xf32> to vector<4xf32>
    %cst_67 = arith.constant 3.906250e-03 : f32
    %61 = vector.broadcast %cst_67 : f32 to vector<4xf32>
    %62 = arith.mulf %60, %61 : vector<4xf32>
    %63 = vector.shape_cast %62 : vector<4xf32> to vector<1x4xf32>
    %64 = vector.broadcast %63 : vector<1x4xf32> to vector<256x4xf32>
    %65 = arith.subf %55, %64 : vector<256x4xf32>
    %66 = vector.shape_cast %60 : vector<4xf32> to vector<1x1x4xf32>
    %c0_68 = arith.constant 0 : index
    %c0_69 = arith.constant 0 : index
    %c0_70 = arith.constant 0 : index
    %67 = vector.load %arg4[%c0_68, %c0_69, %c0_70] : memref<1x1x4xf32, #tpu.memory_space<vmem>>, vector<1x1x4xf32>
    tpu.vector_store %arg4[%c0_68, %c0_69, %c0_70], %66 {strides = array<i32>} : memref<1x1x4xf32, #tpu.memory_space<vmem>>, vector<1x1x4xf32>,
    %68 = arith.mulf %65, %65 : vector<256x4xf32>
    %cst_71 = arith.constant dense<0.000000e+00> : vector<4xf32>
    %69 = vector.multi_reduction <add>, %68, %cst_71 [0] : vector<256x4xf32> to vector<4xf32>
    %70 = vector.shape_cast %69 : vector<4xf32> to vector<1x1x4xf32>
    %c0_72 = arith.constant 0 : index
    %c0_73 = arith.constant 0 : index
    %c0_74 = arith.constant 0 : index
    %71 = vector.load %arg5[%c0_72, %c0_73, %c0_74] : memref<1x1x4xf32, #tpu.memory_space<vmem>>, vector<1x1x4xf32>
    tpu.vector_store %arg5[%c0_72, %c0_73, %c0_74], %70 {strides = array<i32>} : memref<1x1x4xf32, #tpu.memory_space<vmem>>, vector<1x1x4xf32>,
    return
  }
  func.func @transform_0(%arg0: i32) -> (i32, i32, i32, i32) {
    %c0_i32 = arith.constant 0 : i32
    %c0_i32_0 = arith.constant 0 : i32
    %c0_i32_1 = arith.constant 0 : i32
    %c0_i32_2 = arith.constant 0 : i32
    return %arg0, %c0_i32, %c0_i32_0, %c0_i32_1 : i32, i32, i32, i32
  }
  func.func @transform_1(%arg0: i32) -> (i32, i32) {
    %c0_i32 = arith.constant 0 : i32
    %c0_i32_0 = arith.constant 0 : i32
    %c0_i32_1 = arith.constant 0 : i32
    return %c0_i32, %c0_i32_0 : i32, i32
  }
  func.func @transform_2(%arg0: i32) -> (i32, i32, i32) {
    %c0_i32 = arith.constant 0 : i32
    %c0_i32_0 = arith.constant 0 : i32
    %c0_i32_1 = arith.constant 0 : i32
    return %arg0, %c0_i32, %c0_i32_0 : i32, i32, i32
  }
  func.func @transform_3(%arg0: i32) -> (i32, i32, i32) {
    %c0_i32 = arith.constant 0 : i32
    %c0_i32_0 = arith.constant 0 : i32
    %c0_i32_1 = arith.constant 0 : i32
    return %arg0, %c0_i32, %c0_i32_0 : i32, i32, i32
  }
  func.func @transform_4(%arg0: i32) -> (i32, i32, i32) {
    %c0_i32 = arith.constant 0 : i32
    %c0_i32_0 = arith.constant 0 : i32
    %c0_i32_1 = arith.constant 0 : i32
    return %arg0, %c0_i32, %c0_i32_0 : i32, i32, i32
  }
}

module attributes {stable_mosaic.version = 11 : i64} {
  func.func @kernel(%arg0: i32, %arg1: memref<1x16x16x4xbf16, #tpu.memory_space<vmem>>, %arg2: memref<36x4xbf16, #tpu.memory_space<vmem>>, %arg3: memref<1x4xf32, #tpu.memory_space<vmem>>, %arg4: memref<1x4xf32, #tpu.memory_space<vmem>>, %arg5: memref<1x256x4xf32, #tpu.memory_space<vmem>>, %arg6: memref<1x1x4xf32, #tpu.memory_space<vmem>>, %arg7: memref<1x1x4xf32, #tpu.memory_space<vmem>>, %arg8: memref<18x18x4xbf16, #tpu.memory_space<vmem>>) attributes {dimension_semantics = [#tpu.dimension_semantics<parallel>], iteration_bounds = array<i64: 2>, scalar_prefetch = 0 : i64, scratch_operands = 1 : i64, tpu.core_type = #tpu.core_type<tc>, window_params = [{transform_indices = @transform_0, window_bounds = array<i64: 1, 16, 16, 4>}, {pipeline_mode = #tpu.pipeline_mode<synchronous>, transform_indices = @transform_1, window_bounds = array<i64: 36, 4>}, {pipeline_mode = #tpu.pipeline_mode<synchronous>, transform_indices = @transform_2, window_bounds = array<i64: 1, 4>}, {pipeline_mode = #tpu.pipeline_mode<synchronous>, transform_indices = @transform_3, window_bounds = array<i64: 1, 4>}, {transform_indices = @transform_4, window_bounds = array<i64: 1, 256, 4>}, {transform_indices = @transform_5, window_bounds = array<i64: 1, 1, 4>}, {transform_indices = @transform_6, window_bounds = array<i64: 1, 1, 4>}]} {
    %cst = arith.constant 0.000000e+00 : bf16
    %0 = vector.broadcast %cst : bf16 to vector<1x18x4xbf16>
    %cst_0 = arith.constant 0.000000e+00 : bf16
    %1 = vector.broadcast %cst_0 : bf16 to vector<18x1x4xbf16>
    %c0 = arith.constant 0 : index
    %c0_1 = arith.constant 0 : index
    %c0_2 = arith.constant 0 : index
    %2 = vector.load %arg8[%c0, %c0_1, %c0_2] : memref<18x18x4xbf16, #tpu.memory_space<vmem>>, vector<1x18x4xbf16>
    tpu.vector_store %arg8[%c0, %c0_1, %c0_2], %0 {strides = array<i32>} : memref<18x18x4xbf16, #tpu.memory_space<vmem>>, vector<1x18x4xbf16>,
    %c17 = arith.constant 17 : index
    %c0_3 = arith.constant 0 : index
    %c0_4 = arith.constant 0 : index
    %3 = vector.load %arg8[%c17, %c0_3, %c0_4] : memref<18x18x4xbf16, #tpu.memory_space<vmem>>, vector<1x18x4xbf16>
    tpu.vector_store %arg8[%c17, %c0_3, %c0_4], %0 {strides = array<i32>} : memref<18x18x4xbf16, #tpu.memory_space<vmem>>, vector<1x18x4xbf16>,
    %c0_5 = arith.constant 0 : index
    %c0_6 = arith.constant 0 : index
    %c0_7 = arith.constant 0 : index
    %4 = vector.load %arg8[%c0_5, %c0_6, %c0_7] : memref<18x18x4xbf16, #tpu.memory_space<vmem>>, vector<18x1x4xbf16>
    tpu.vector_store %arg8[%c0_5, %c0_6, %c0_7], %1 {strides = array<i32>} : memref<18x18x4xbf16, #tpu.memory_space<vmem>>, vector<18x1x4xbf16>,
    %c0_8 = arith.constant 0 : index
    %c17_9 = arith.constant 17 : index
    %c0_10 = arith.constant 0 : index
    %5 = vector.load %arg8[%c0_8, %c17_9, %c0_10] : memref<18x18x4xbf16, #tpu.memory_space<vmem>>, vector<18x1x4xbf16>
    tpu.vector_store %arg8[%c0_8, %c17_9, %c0_10], %1 {strides = array<i32>} : memref<18x18x4xbf16, #tpu.memory_space<vmem>>, vector<18x1x4xbf16>,
    %c0_11 = arith.constant 0 : index
    %c0_12 = arith.constant 0 : index
    %c0_13 = arith.constant 0 : index
    %c0_14 = arith.constant 0 : index
    %6 = vector.load %arg1[%c0_11, %c0_12, %c0_13, %c0_14] : memref<1x16x16x4xbf16, #tpu.memory_space<vmem>>, vector<1x16x16x4xbf16>
    %7 = vector.shape_cast %6 : vector<1x16x16x4xbf16> to vector<16x16x4xbf16>
    %8 = arith.extf %7 : vector<16x16x4xbf16> to vector<16x16x4xf32>
    %c0_15 = arith.constant 0 : index
    %c0_16 = arith.constant 0 : index
    %9 = vector.load %arg3[%c0_15, %c0_16] : memref<1x4xf32, #tpu.memory_space<vmem>>, vector<1x4xf32>
    %10 = vector.shape_cast %9 : vector<1x4xf32> to vector<4xf32>
    %11 = vector.shape_cast %10 : vector<4xf32> to vector<1x1x4xf32>
    %12 = vector.broadcast %11 : vector<1x1x4xf32> to vector<16x16x4xf32>
    %13 = arith.mulf %8, %12 : vector<16x16x4xf32>
    %c0_17 = arith.constant 0 : index
    %c0_18 = arith.constant 0 : index
    %14 = vector.load %arg4[%c0_17, %c0_18] : memref<1x4xf32, #tpu.memory_space<vmem>>, vector<1x4xf32>
    %15 = vector.shape_cast %14 : vector<1x4xf32> to vector<4xf32>
    %16 = vector.shape_cast %15 : vector<4xf32> to vector<1x1x4xf32>
    %17 = vector.broadcast %16 : vector<1x1x4xf32> to vector<16x16x4xf32>
    %18 = arith.addf %13, %17 : vector<16x16x4xf32>
    %cst_19 = arith.constant 0.000000e+00 : f32
    %19 = vector.broadcast %cst_19 : f32 to vector<16x16x4xf32>
    %20 = arith.maximumf %18, %19 : vector<16x16x4xf32>
    %21 = arith.truncf %20 : vector<16x16x4xf32> to vector<16x16x4xbf16>
    %c1 = arith.constant 1 : index
    %c1_20 = arith.constant 1 : index
    %c0_21 = arith.constant 0 : index
    %22 = vector.load %arg8[%c1, %c1_20, %c0_21] : memref<18x18x4xbf16, #tpu.memory_space<vmem>>, vector<16x16x4xbf16>
    tpu.vector_store %arg8[%c1, %c1_20, %c0_21], %21 {strides = array<i32>} : memref<18x18x4xbf16, #tpu.memory_space<vmem>>, vector<16x16x4xbf16>,
    %cst_22 = arith.constant 0.000000e+00 : f32
    %23 = vector.broadcast %cst_22 : f32 to vector<256x4xf32>
    %c0_23 = arith.constant 0 : index
    %c0_24 = arith.constant 0 : index
    %c0_25 = arith.constant 0 : index
    %24 = vector.load %arg8[%c0_23, %c0_24, %c0_25] : memref<18x18x4xbf16, #tpu.memory_space<vmem>>, vector<16x16x4xbf16>
    %25 = vector.shape_cast %24 : vector<16x16x4xbf16> to vector<256x4xbf16>
    %c0_26 = arith.constant 0 : index
    %c0_27 = arith.constant 0 : index
    %26 = vector.load %arg2[%c0_26, %c0_27] : memref<36x4xbf16, #tpu.memory_space<vmem>>, vector<4x4xbf16>
    %cst_28 = arith.constant dense<0.000000e+00> : vector<256x4xf32>
    %27 = tpu.matmul %25, %26, %cst_28 {dimension_numbers = #tpu.dot_dimension_numbers<[1], [0], [0], [1], [0, 0, 1, 1], [], []>} : vector<256x4xbf16>, vector<4x4xbf16>, vector<256x4xf32> -> vector<256x4xf32>
    %28 = arith.addf %23, %27 : vector<256x4xf32>
    %c0_29 = arith.constant 0 : index
    %c1_30 = arith.constant 1 : index
    %c0_31 = arith.constant 0 : index
    %29 = vector.load %arg8[%c0_29, %c1_30, %c0_31] : memref<18x18x4xbf16, #tpu.memory_space<vmem>>, vector<16x16x4xbf16>
    %30 = vector.shape_cast %29 : vector<16x16x4xbf16> to vector<256x4xbf16>
    %c4 = arith.constant 4 : index
    %c0_32 = arith.constant 0 : index
    %31 = vector.load %arg2[%c4, %c0_32] : memref<36x4xbf16, #tpu.memory_space<vmem>>, vector<4x4xbf16>
    %cst_33 = arith.constant dense<0.000000e+00> : vector<256x4xf32>
    %32 = tpu.matmul %30, %31, %cst_33 {dimension_numbers = #tpu.dot_dimension_numbers<[1], [0], [0], [1], [0, 0, 1, 1], [], []>} : vector<256x4xbf16>, vector<4x4xbf16>, vector<256x4xf32> -> vector<256x4xf32>
    %33 = arith.addf %28, %32 : vector<256x4xf32>
    %c0_34 = arith.constant 0 : index
    %c2 = arith.constant 2 : index
    %c0_35 = arith.constant 0 : index
    %34 = vector.load %arg8[%c0_34, %c2, %c0_35] : memref<18x18x4xbf16, #tpu.memory_space<vmem>>, vector<16x16x4xbf16>
    %35 = vector.shape_cast %34 : vector<16x16x4xbf16> to vector<256x4xbf16>
    %c8 = arith.constant 8 : index
    %c0_36 = arith.constant 0 : index
    %36 = vector.load %arg2[%c8, %c0_36] : memref<36x4xbf16, #tpu.memory_space<vmem>>, vector<4x4xbf16>
    %cst_37 = arith.constant dense<0.000000e+00> : vector<256x4xf32>
    %37 = tpu.matmul %35, %36, %cst_37 {dimension_numbers = #tpu.dot_dimension_numbers<[1], [0], [0], [1], [0, 0, 1, 1], [], []>} : vector<256x4xbf16>, vector<4x4xbf16>, vector<256x4xf32> -> vector<256x4xf32>
    %38 = arith.addf %33, %37 : vector<256x4xf32>
    %c1_38 = arith.constant 1 : index
    %c0_39 = arith.constant 0 : index
    %c0_40 = arith.constant 0 : index
    %39 = vector.load %arg8[%c1_38, %c0_39, %c0_40] : memref<18x18x4xbf16, #tpu.memory_space<vmem>>, vector<16x16x4xbf16>
    %40 = vector.shape_cast %39 : vector<16x16x4xbf16> to vector<256x4xbf16>
    %c12 = arith.constant 12 : index
    %c0_41 = arith.constant 0 : index
    %41 = vector.load %arg2[%c12, %c0_41] : memref<36x4xbf16, #tpu.memory_space<vmem>>, vector<4x4xbf16>
    %cst_42 = arith.constant dense<0.000000e+00> : vector<256x4xf32>
    %42 = tpu.matmul %40, %41, %cst_42 {dimension_numbers = #tpu.dot_dimension_numbers<[1], [0], [0], [1], [0, 0, 1, 1], [], []>} : vector<256x4xbf16>, vector<4x4xbf16>, vector<256x4xf32> -> vector<256x4xf32>
    %43 = arith.addf %38, %42 : vector<256x4xf32>
    %c1_43 = arith.constant 1 : index
    %c1_44 = arith.constant 1 : index
    %c0_45 = arith.constant 0 : index
    %44 = vector.load %arg8[%c1_43, %c1_44, %c0_45] : memref<18x18x4xbf16, #tpu.memory_space<vmem>>, vector<16x16x4xbf16>
    %45 = vector.shape_cast %44 : vector<16x16x4xbf16> to vector<256x4xbf16>
    %c16 = arith.constant 16 : index
    %c0_46 = arith.constant 0 : index
    %46 = vector.load %arg2[%c16, %c0_46] : memref<36x4xbf16, #tpu.memory_space<vmem>>, vector<4x4xbf16>
    %cst_47 = arith.constant dense<0.000000e+00> : vector<256x4xf32>
    %47 = tpu.matmul %45, %46, %cst_47 {dimension_numbers = #tpu.dot_dimension_numbers<[1], [0], [0], [1], [0, 0, 1, 1], [], []>} : vector<256x4xbf16>, vector<4x4xbf16>, vector<256x4xf32> -> vector<256x4xf32>
    %48 = arith.addf %43, %47 : vector<256x4xf32>
    %c1_48 = arith.constant 1 : index
    %c2_49 = arith.constant 2 : index
    %c0_50 = arith.constant 0 : index
    %49 = vector.load %arg8[%c1_48, %c2_49, %c0_50] : memref<18x18x4xbf16, #tpu.memory_space<vmem>>, vector<16x16x4xbf16>
    %50 = vector.shape_cast %49 : vector<16x16x4xbf16> to vector<256x4xbf16>
    %c20 = arith.constant 20 : index
    %c0_51 = arith.constant 0 : index
    %51 = vector.load %arg2[%c20, %c0_51] : memref<36x4xbf16, #tpu.memory_space<vmem>>, vector<4x4xbf16>
    %cst_52 = arith.constant dense<0.000000e+00> : vector<256x4xf32>
    %52 = tpu.matmul %50, %51, %cst_52 {dimension_numbers = #tpu.dot_dimension_numbers<[1], [0], [0], [1], [0, 0, 1, 1], [], []>} : vector<256x4xbf16>, vector<4x4xbf16>, vector<256x4xf32> -> vector<256x4xf32>
    %53 = arith.addf %48, %52 : vector<256x4xf32>
    %c2_53 = arith.constant 2 : index
    %c0_54 = arith.constant 0 : index
    %c0_55 = arith.constant 0 : index
    %54 = vector.load %arg8[%c2_53, %c0_54, %c0_55] : memref<18x18x4xbf16, #tpu.memory_space<vmem>>, vector<16x16x4xbf16>
    %55 = vector.shape_cast %54 : vector<16x16x4xbf16> to vector<256x4xbf16>
    %c24 = arith.constant 24 : index
    %c0_56 = arith.constant 0 : index
    %56 = vector.load %arg2[%c24, %c0_56] : memref<36x4xbf16, #tpu.memory_space<vmem>>, vector<4x4xbf16>
    %cst_57 = arith.constant dense<0.000000e+00> : vector<256x4xf32>
    %57 = tpu.matmul %55, %56, %cst_57 {dimension_numbers = #tpu.dot_dimension_numbers<[1], [0], [0], [1], [0, 0, 1, 1], [], []>} : vector<256x4xbf16>, vector<4x4xbf16>, vector<256x4xf32> -> vector<256x4xf32>
    %58 = arith.addf %53, %57 : vector<256x4xf32>
    %c2_58 = arith.constant 2 : index
    %c1_59 = arith.constant 1 : index
    %c0_60 = arith.constant 0 : index
    %59 = vector.load %arg8[%c2_58, %c1_59, %c0_60] : memref<18x18x4xbf16, #tpu.memory_space<vmem>>, vector<16x16x4xbf16>
    %60 = vector.shape_cast %59 : vector<16x16x4xbf16> to vector<256x4xbf16>
    %c28 = arith.constant 28 : index
    %c0_61 = arith.constant 0 : index
    %61 = vector.load %arg2[%c28, %c0_61] : memref<36x4xbf16, #tpu.memory_space<vmem>>, vector<4x4xbf16>
    %cst_62 = arith.constant dense<0.000000e+00> : vector<256x4xf32>
    %62 = tpu.matmul %60, %61, %cst_62 {dimension_numbers = #tpu.dot_dimension_numbers<[1], [0], [0], [1], [0, 0, 1, 1], [], []>} : vector<256x4xbf16>, vector<4x4xbf16>, vector<256x4xf32> -> vector<256x4xf32>
    %63 = arith.addf %58, %62 : vector<256x4xf32>
    %c2_63 = arith.constant 2 : index
    %c2_64 = arith.constant 2 : index
    %c0_65 = arith.constant 0 : index
    %64 = vector.load %arg8[%c2_63, %c2_64, %c0_65] : memref<18x18x4xbf16, #tpu.memory_space<vmem>>, vector<16x16x4xbf16>
    %65 = vector.shape_cast %64 : vector<16x16x4xbf16> to vector<256x4xbf16>
    %c32 = arith.constant 32 : index
    %c0_66 = arith.constant 0 : index
    %66 = vector.load %arg2[%c32, %c0_66] : memref<36x4xbf16, #tpu.memory_space<vmem>>, vector<4x4xbf16>
    %cst_67 = arith.constant dense<0.000000e+00> : vector<256x4xf32>
    %67 = tpu.matmul %65, %66, %cst_67 {dimension_numbers = #tpu.dot_dimension_numbers<[1], [0], [0], [1], [0, 0, 1, 1], [], []>} : vector<256x4xbf16>, vector<4x4xbf16>, vector<256x4xf32> -> vector<256x4xf32>
    %68 = arith.addf %63, %67 : vector<256x4xf32>
    %c0_68 = arith.constant 0 : index
    %c0_69 = arith.constant 0 : index
    %c0_70 = arith.constant 0 : index
    %69 = vector.load %arg5[%c0_68, %c0_69, %c0_70] : memref<1x256x4xf32, #tpu.memory_space<vmem>>, vector<1x256x4xf32>
    %70 = vector.shape_cast %69 : vector<1x256x4xf32> to vector<256x4xf32>
    %71 = vector.shape_cast %68 : vector<256x4xf32> to vector<1x256x4xf32>
    tpu.vector_store %arg5[%c0_68, %c0_69, %c0_70], %71 {strides = array<i32>} : memref<1x256x4xf32, #tpu.memory_space<vmem>>, vector<1x256x4xf32>,
    %cst_71 = arith.constant dense<0.000000e+00> : vector<4xf32>
    %72 = vector.multi_reduction <add>, %68, %cst_71 [0] : vector<256x4xf32> to vector<4xf32>
    %cst_72 = arith.constant 3.906250e-03 : f32
    %73 = vector.broadcast %cst_72 : f32 to vector<4xf32>
    %74 = arith.mulf %72, %73 : vector<4xf32>
    %75 = vector.shape_cast %74 : vector<4xf32> to vector<1x4xf32>
    %76 = vector.broadcast %75 : vector<1x4xf32> to vector<256x4xf32>
    %77 = arith.subf %68, %76 : vector<256x4xf32>
    %78 = vector.shape_cast %72 : vector<4xf32> to vector<1x1x4xf32>
    %c0_73 = arith.constant 0 : index
    %c0_74 = arith.constant 0 : index
    %c0_75 = arith.constant 0 : index
    %79 = vector.load %arg6[%c0_73, %c0_74, %c0_75] : memref<1x1x4xf32, #tpu.memory_space<vmem>>, vector<1x1x4xf32>
    tpu.vector_store %arg6[%c0_73, %c0_74, %c0_75], %78 {strides = array<i32>} : memref<1x1x4xf32, #tpu.memory_space<vmem>>, vector<1x1x4xf32>,
    %80 = arith.mulf %77, %77 : vector<256x4xf32>
    %cst_76 = arith.constant dense<0.000000e+00> : vector<4xf32>
    %81 = vector.multi_reduction <add>, %80, %cst_76 [0] : vector<256x4xf32> to vector<4xf32>
    %82 = vector.shape_cast %81 : vector<4xf32> to vector<1x1x4xf32>
    %c0_77 = arith.constant 0 : index
    %c0_78 = arith.constant 0 : index
    %c0_79 = arith.constant 0 : index
    %83 = vector.load %arg7[%c0_77, %c0_78, %c0_79] : memref<1x1x4xf32, #tpu.memory_space<vmem>>, vector<1x1x4xf32>
    tpu.vector_store %arg7[%c0_77, %c0_78, %c0_79], %82 {strides = array<i32>} : memref<1x1x4xf32, #tpu.memory_space<vmem>>, vector<1x1x4xf32>,
    return
  }
  func.func @transform_0(%arg0: i32) -> (i32, i32, i32, i32) {
    %c0_i32 = arith.constant 0 : i32
    %c0_i32_0 = arith.constant 0 : i32
    %c0_i32_1 = arith.constant 0 : i32
    %c0_i32_2 = arith.constant 0 : i32
    return %arg0, %c0_i32, %c0_i32_0, %c0_i32_1 : i32, i32, i32, i32
  }
  func.func @transform_1(%arg0: i32) -> (i32, i32) {
    %c0_i32 = arith.constant 0 : i32
    %c0_i32_0 = arith.constant 0 : i32
    %c0_i32_1 = arith.constant 0 : i32
    return %c0_i32, %c0_i32_0 : i32, i32
  }
  func.func @transform_2(%arg0: i32) -> (i32, i32) {
    %c0_i32 = arith.constant 0 : i32
    %c0_i32_0 = arith.constant 0 : i32
    %c0_i32_1 = arith.constant 0 : i32
    return %c0_i32, %c0_i32_0 : i32, i32
  }
  func.func @transform_3(%arg0: i32) -> (i32, i32) {
    %c0_i32 = arith.constant 0 : i32
    %c0_i32_0 = arith.constant 0 : i32
    %c0_i32_1 = arith.constant 0 : i32
    return %c0_i32, %c0_i32_0 : i32, i32
  }
  func.func @transform_4(%arg0: i32) -> (i32, i32, i32) {
    %c0_i32 = arith.constant 0 : i32
    %c0_i32_0 = arith.constant 0 : i32
    %c0_i32_1 = arith.constant 0 : i32
    return %arg0, %c0_i32, %c0_i32_0 : i32, i32, i32
  }
  func.func @transform_5(%arg0: i32) -> (i32, i32, i32) {
    %c0_i32 = arith.constant 0 : i32
    %c0_i32_0 = arith.constant 0 : i32
    %c0_i32_1 = arith.constant 0 : i32
    return %arg0, %c0_i32, %c0_i32_0 : i32, i32, i32
  }
  func.func @transform_6(%arg0: i32) -> (i32, i32, i32) {
    %c0_i32 = arith.constant 0 : i32
    %c0_i32_0 = arith.constant 0 : i32
    %c0_i32_1 = arith.constant 0 : i32
    return %arg0, %c0_i32, %c0_i32_0 : i32, i32, i32
  }
}

module attributes {stable_mosaic.version = 11 : i64} {
  func.func @_bn_add_relu_kernel(%arg0: i32, %arg1: memref<1x16x64xf32, #tpu.memory_space<vmem>>, %arg2: memref<1x16x64xf32, #tpu.memory_space<vmem>>, %arg3: memref<1x64xf32, #tpu.memory_space<vmem>>, %arg4: memref<1x64xf32, #tpu.memory_space<vmem>>, %arg5: memref<1x16x64xf32, #tpu.memory_space<vmem>>) attributes {dimension_semantics = [#tpu.dimension_semantics<parallel>], iteration_bounds = array<i64: 2>, scalar_prefetch = 0 : i64, scratch_operands = 0 : i64, tpu.core_type = #tpu.core_type<tc>, window_params = [{transform_indices = @transform_0, window_bounds = array<i64: 1, 16, 64>}, {transform_indices = @transform_1, window_bounds = array<i64: 1, 16, 64>}, {pipeline_mode = #tpu.pipeline_mode<synchronous>, transform_indices = @transform_2, window_bounds = array<i64: 1, 64>}, {pipeline_mode = #tpu.pipeline_mode<synchronous>, transform_indices = @transform_3, window_bounds = array<i64: 1, 64>}, {transform_indices = @transform_4, window_bounds = array<i64: 1, 16, 64>}]} {
    %c0 = arith.constant 0 : index
    %c0_0 = arith.constant 0 : index
    %c0_1 = arith.constant 0 : index
    %0 = vector.load %arg1[%c0, %c0_0, %c0_1] : memref<1x16x64xf32, #tpu.memory_space<vmem>>, vector<1x16x64xf32>
    %1 = vector.shape_cast %0 : vector<1x16x64xf32> to vector<16x64xf32>
    %c0_2 = arith.constant 0 : index
    %c0_3 = arith.constant 0 : index
    %2 = vector.load %arg3[%c0_2, %c0_3] : memref<1x64xf32, #tpu.memory_space<vmem>>, vector<1x64xf32>
    %3 = vector.shape_cast %2 : vector<1x64xf32> to vector<64xf32>
    %4 = vector.shape_cast %3 : vector<64xf32> to vector<1x64xf32>
    %5 = vector.broadcast %4 : vector<1x64xf32> to vector<16x64xf32>
    %6 = arith.mulf %1, %5 : vector<16x64xf32>
    %c0_4 = arith.constant 0 : index
    %c0_5 = arith.constant 0 : index
    %7 = vector.load %arg4[%c0_4, %c0_5] : memref<1x64xf32, #tpu.memory_space<vmem>>, vector<1x64xf32>
    %8 = vector.shape_cast %7 : vector<1x64xf32> to vector<64xf32>
    %9 = vector.shape_cast %8 : vector<64xf32> to vector<1x64xf32>
    %10 = vector.broadcast %9 : vector<1x64xf32> to vector<16x64xf32>
    %11 = arith.addf %6, %10 : vector<16x64xf32>
    %c0_6 = arith.constant 0 : index
    %c0_7 = arith.constant 0 : index
    %c0_8 = arith.constant 0 : index
    %12 = vector.load %arg2[%c0_6, %c0_7, %c0_8] : memref<1x16x64xf32, #tpu.memory_space<vmem>>, vector<1x16x64xf32>
    %13 = vector.shape_cast %12 : vector<1x16x64xf32> to vector<16x64xf32>
    %14 = arith.addf %11, %13 : vector<16x64xf32>
    %cst = arith.constant 0.000000e+00 : f32
    %15 = vector.broadcast %cst : f32 to vector<16x64xf32>
    %16 = arith.maximumf %14, %15 : vector<16x64xf32>
    %c0_9 = arith.constant 0 : index
    %c0_10 = arith.constant 0 : index
    %c0_11 = arith.constant 0 : index
    %17 = vector.load %arg5[%c0_9, %c0_10, %c0_11] : memref<1x16x64xf32, #tpu.memory_space<vmem>>, vector<1x16x64xf32>
    %18 = vector.shape_cast %17 : vector<1x16x64xf32> to vector<16x64xf32>
    %19 = vector.shape_cast %16 : vector<16x64xf32> to vector<1x16x64xf32>
    tpu.vector_store %arg5[%c0_9, %c0_10, %c0_11], %19 {strides = array<i32>} : memref<1x16x64xf32, #tpu.memory_space<vmem>>, vector<1x16x64xf32>,
    return
  }
  func.func @transform_0(%arg0: i32) -> (i32, i32, i32) {
    %c0_i32 = arith.constant 0 : i32
    %c0_i32_0 = arith.constant 0 : i32
    %c0_i32_1 = arith.constant 0 : i32
    return %arg0, %c0_i32, %c0_i32_0 : i32, i32, i32
  }
  func.func @transform_1(%arg0: i32) -> (i32, i32, i32) {
    %c0_i32 = arith.constant 0 : i32
    %c0_i32_0 = arith.constant 0 : i32
    %c0_i32_1 = arith.constant 0 : i32
    return %arg0, %c0_i32, %c0_i32_0 : i32, i32, i32
  }
  func.func @transform_2(%arg0: i32) -> (i32, i32) {
    %c0_i32 = arith.constant 0 : i32
    %c0_i32_0 = arith.constant 0 : i32
    %c0_i32_1 = arith.constant 0 : i32
    return %c0_i32, %c0_i32_0 : i32, i32
  }
  func.func @transform_3(%arg0: i32) -> (i32, i32) {
    %c0_i32 = arith.constant 0 : i32
    %c0_i32_0 = arith.constant 0 : i32
    %c0_i32_1 = arith.constant 0 : i32
    return %c0_i32, %c0_i32_0 : i32, i32
  }
  func.func @transform_4(%arg0: i32) -> (i32, i32, i32) {
    %c0_i32 = arith.constant 0 : i32
    %c0_i32_0 = arith.constant 0 : i32
    %c0_i32_1 = arith.constant 0 : i32
    return %arg0, %c0_i32, %c0_i32_0 : i32, i32, i32
  }
}

</mosaic_0001>

<bundles_post_ra>
// kernel: tile.13
= control target key start
LH: loop header
LB: loop body
LE: loop exit
PB: predicated region body
PF: predicated region fallthrough
CT: control target
= control target key end

     0   :  { %s28_s0 = inlined_call_operand.vmem [shape: f32[4], index: 0, kind: input, shape index: {}]   ;;  %s29_s1 = inlined_call_operand.vmem [shape: f32[16,4], index: 1, kind: output, shape index: {}]  }
   0x1   :  { %v4_v0 = vld [vmem:[%s28_s0] ss:$0 sm:$0xff] }
   0x2   :  { %5 = vst [vmem:[%s29_s1] sm:$0xff] %v4_v0 }
   0x3   :  { %8 = vst [vmem:[%s29_s1 + $0x8] sm:$0xff] %v4_v0 }

// kernel: tile.14
= control target key start
LH: loop header
LB: loop body
LE: loop exit
PB: predicated region body
PF: predicated region fallthrough
CT: control target
= control target key end

     0   :  { %s131_s10 = smov 60   ;;  %s132_s11 = smov 52   ;;  %vm3_vm0 = vcmask 31744   ;;  %vm9_vm1 = vcmask 523744   ;;  %vm15_vm2 = vcmask 490944   ;;  %vm21_vm3 = vcmask 458144   ;;  %s207_s0 = inlined_call_operand.vmem [shape: f32[16,4], index: 0, kind: input, shape index: {}]   ;;  %s208_s1 = inlined_call_operand.vmem [shape: f32[1,64], index: 1, kind: output, shape index: {}]  }
   0x1   :  { %v101_v0 = vld [vmem:[%s207_s0 + $0xf] sm:$0x1]   ;;  %v103_v1 = vld [vmem:[%s207_s0 + $0xd] sm:$0x1]   ;;  %v105_v2 = vld [vmem:[%s207_s0 + $0xb] sm:$0x1]  }
   0x2   :  { %7 = vrot.lane.b32.xlu0 %v101_v0, %s131_s10  ;;  %19 = vrot.lane.b32.xlu1 %v103_v1, %s132_s11  ;;  %s133_s14 = smov 44   ;;  %v102_v3 = vld [vmem:[%s207_s0 + $0xe] sm:$0x1]   ;;  %v104_v4 = vld [vmem:[%s207_s0 + $0xc] sm:$0x1]   ;;  %s134_s19 = smov 56  }
   0x3   :  { %31 = vrot.lane.b32.xlu2 %v105_v2, %s133_s14  ;;  %s135_s20 = smov 48   ;;  %v106_v5 = vld [vmem:[%s207_s0 + $0xa] sm:$0x1]   ;;  %s136_s23 = smov 40   ;;  %v107_v6 = vld [vmem:[%s207_s0 + $0x9] sm:$0x1]  }
   0x4   :  { %v108_v7 = vld [vmem:[%s207_s0 + $0x8] sm:$0x1]   ;;  %s137_s28 = smov 36   ;;  %s138_s29 = smov 32   ;;  %v109_v8 = vld [vmem:[%s207_s0 + $0x7] sm:$0x1]  }
   0x5   :  { %s139_s3 = smov 28   ;;  %v110_v9 = vld [vmem:[%s207_s0 + $0x6] sm:$0x1]   ;;  %v111_v10 = vld [vmem:[%s207_s0 + $0x5] sm:$0x1]   ;;  %s140_s8 = smov 24  }
   0x6   :  { %s141_s9 = smov 20   ;;  %v112_v11 = vld [vmem:[%s207_s0 + $0x4] sm:$0x1]   ;;  %s142_s12 = smov 16   ;;  %v113_v12 = vld [vmem:[%s207_s0 + $0x3] sm:$0x1]  }
   0x7   :  { %v114_v13 = vld [vmem:[%s207_s0 + $0x2] sm:$0x1]   ;;  %s143_s17 = smov 12   ;;  %s144_s18 = smov 8   ;;  %v115_v14 = vld [vmem:[%s207_s0 + $0x1] sm:$0x1]  }
   0x8   :  { %s145_s21 = smov 4   ;;  %v2_v15 = vld [vmem:[%s207_s0] sm:$0x1]   ;;  %vm27_vm4 = vcmask 425344   ;;  %vm33_vm5 = vcmask 392544   ;;  %vm39_vm6 = vcmask 359744  }
   0x9   :  { %4 = vst.msk [vmem:[#allocation0] sm:$0x1] %vm3_vm0, %v2_v15   ;;  %vm45_vm7 = vcmask 326944   ;;  %vm51_vm8 = vcmask 294144   ;;  %vm57_vm9 = vcmask 261344   ;;  %vm63_vm10 = vcmask 228544  }
   0xa   :  { %13 = vrot.lane.b32.xlu0 %v102_v3, %s134_s19  ;;  %25 = vrot.lane.b32.xlu1 %v104_v4, %s135_s20  ;;  %vm69_vm11 = vcmask 195744   ;;  %vm75_vm12 = vcmask 162944   ;;  %vm81_vm13 = vcmask 130144   ;;  %vm87_vm14 = vcmask 97344  }
   0xb   :  { %37 = vrot.lane.b32.xlu2 %v106_v5, %s136_s23  ;;  %vm93_vm15 = vcmask 64544  }
  0x12   :  { %43 = vrot.lane.b32.xlu0 %v107_v6, %s137_s28  ;;  %49 = vrot.lane.b32.xlu1 %v108_v7, %s138_s29 }
  0x13   :  { %55 = vrot.lane.b32.xlu2 %v109_v8, %s139_s3 }
  0x1a   :  { %61 = vrot.lane.b32.xlu0 %v110_v9, %s140_s8  ;;  %67 = vrot.lane.b32.xlu1 %v111_v10, %s141_s9 }
  0x1b   :  { %73 = vrot.lane.b32.xlu2 %v112_v11, %s142_s12 }
  0x22   :  { %79 = vrot.lane.b32.xlu0 %v113_v12, %s143_s17  ;;  %85 = vrot.lane.b32.xlu1 %v114_v13, %s144_s18 }
  0x23   :  { %91 = vrot.lane.b32.xlu2 %v115_v14, %s145_s21 }
  0x5d   :  { %v32_v16 = vpop.permute.xlu2 %31  }
  0x65   :  { %v38_v17 = vpop.permute.xlu2 %37  }
  0x6d   :  { %v56_v18 = vpop.permute.xlu2 %55  }
  0x74   :  { %v8_v19 = vpop.permute.xlu0 %7   ;;  %v20_v20 = vpop.permute.xlu1 %19  }
  0x75   :  { %10 = vst.msk [vmem:[#allocation0] sm:$0x1] %vm9_vm1, %v8_v19   ;;  %v74_v21 = vpop.permute.xlu2 %73  }
  0x7c   :  { %v14_v22 = vpop.permute.xlu0 %13   ;;  %v26_v23 = vpop.permute.xlu1 %25  }
  0x7d   :  { %16 = vst.msk [vmem:[#allocation0] sm:$0x1] %vm15_vm2, %v14_v22   ;;  %v92_v24 = vpop.permute.xlu2 %91  }
  0x7e   :  { %22 = vst.msk [vmem:[#allocation0] sm:$0x1] %vm21_vm3, %v20_v20  }
  0x7f   :  { %28 = vst.msk [vmem:[#allocation0] sm:$0x1] %vm27_vm4, %v26_v23  }
  0x80   :  { %34 = vst.msk [vmem:[#allocation0] sm:$0x1] %vm33_vm5, %v32_v16  }
  0x81   :  { %40 = vst.msk [vmem:[#allocation0] sm:$0x1] %vm39_vm6, %v38_v17  }
  0x84   :  { %v44_v25 = vpop.permute.xlu0 %43   ;;  %v50_v26 = vpop.permute.xlu1 %49  }
  0x85   :  { %46 = vst.msk [vmem:[#allocation0] sm:$0x1] %vm45_vm7, %v44_v25  }
  0x86   :  { %52 = vst.msk [vmem:[#allocation0] sm:$0x1] %vm51_vm8, %v50_v26  }
  0x87   :  { %58 = vst.msk [vmem:[#allocation0] sm:$0x1] %vm57_vm9, %v56_v18  }
  0x8c   :  { %v62_v27 = vpop.permute.xlu0 %61   ;;  %v68_v28 = vpop.permute.xlu1 %67  }
  0x8d   :  { %64 = vst.msk [vmem:[#allocation0] sm:$0x1] %vm63_vm10, %v62_v27  }
  0x8e   :  { %70 = vst.msk [vmem:[#allocation0] sm:$0x1] %vm69_vm11, %v68_v28  }
  0x8f   :  { %76 = vst.msk [vmem:[#allocation0] sm:$0x1] %vm75_vm12, %v74_v21  }
  0x94   :  { %v80_v29 = vpop.permute.xlu0 %79   ;;  %v86_v30 = vpop.permute.xlu1 %85  }
  0x95   :  { %82 = vst.msk [vmem:[#allocation0] sm:$0x1] %vm81_vm13, %v80_v29  }
  0x96   :  { %88 = vst.msk [vmem:[#allocation0] sm:$0x1] %vm87_vm14, %v86_v30  }
  0x97   :  { %94 = vst.msk [vmem:[#allocation0] sm:$0x1] %vm93_vm15, %v92_v24  }
  0x9e   :  { %v97_v31 = vld [vmem:[#allocation0] sm:$0x1] }
  0x9f   :  { %100 = vst [vmem:[%s208_s1] sm:$0x1] %v97_v31 }

// kernel: basic_block_forward.5
= control target key start
LH: loop header
LB: loop body
LE: loop exit
PB: predicated region body
PF: predicated region fallthrough
CT: control target
= control target key end

     0   :  { %s367_s15 = smov 0   ;;  %s393_s0 = inlined_call_operand.vmem [shape: f32[2,16,64], index: 0, kind: input, shape index: {}]   ;;  %s394_s1 = inlined_call_operand.vmem [shape: f32[2,16,64], index: 1, kind: input, shape index: {}]   ;;  %s395_s2 = inlined_call_operand.vmem [shape: f32[1,64], index: 2, kind: input, shape index: {}]   ;;  %s396_s3 = inlined_call_operand.vmem [shape: f32[1,64], index: 3, kind: input, shape index: {}]   ;;  %s397_s4 = inlined_call_operand.vmem [shape: f32[2,16,64], index: 4, kind: output, shape index: {}]  }
   0x1 LB: > { %s308_s16 = sadd.s32 4294967295, %s340_s15   ;;  %p312_p0 = scmp.ge.s32.totalorder %s340_s15, 1  ;;  %s340_s15 = sphi %s367_s15, %s14_s15  }
   0x2   : > { %p172_p1 = scmp.lt.s32.totalorder %s340_s15, 3 }
   0x4   : > { %p173_p2 = pnand %p312_p0, %p172_p1 }
   0x5   : > { %p203_p3 = scmp.lt.s32.totalorder (!%p173_p2), %s308_s16, 1 }
   0x6   : > { %176 = sbr.rel (%p173_p2) target bundleno = 25 (0x19), region = 36 }
   0xb   : > { %s399_s16 = smov (!%p203_p3, %s308_s16), 1  ;;  %v332_v0 = vld [vmem:[%s395_s2] ss:$0 sm:$0xff]  ;;  %vm238_vm0 = vcmask 523264  }
   0xc   : > { %s321_s19 = sshll.u32 %s399_s16, 4  ;;  %v333_v1 = vld [vmem:[%s396_s3] ss:$0 sm:$0xff] }
   0xd   : > { %s207_s22 = scalar_lea.vmem %s393_s0, %s321_s19  ;;  %s212_s25 = scalar_lea.vmem %s394_s1, %s321_s19 }
   0xe   : > { %v218_v2 = vld [vmem:[%s207_s22] sm:$0xff]  ;;  %v219_v3 = vld [vmem:[%s207_s22 + $0x8] sm:$0xff]  ;;  %s217_s30 = scalar_lea.vmem %s397_s4, %s321_s19 }
   0xf   : > { %v224_v4 = vmul.f32 %v332_v0, %v218_v2  ;;  %v225_v5 = vmul.f32 %v332_v0, %v219_v3  ;;  %v232_v6 = vld [vmem:[%s212_s25] sm:$0xff]  ;;  %v233_v7 = vld [vmem:[%s212_s25 + $0x8] sm:$0xff] }
  0x11   : > { %v230_v8 = vadd.f32 %v333_v1, %v224_v4  ;;  %v231_v9 = vadd.f32 %v333_v1, %v225_v5 }
  0x13   : > { %v234_v10 = vadd.f32 %v232_v6, %v230_v8  ;;  %v235_v11 = vadd.f32 %v233_v7, %v231_v9 }
  0x15   : > { %v236_v12 = vmax.f32 %v234_v10, 0.0  ;;  %v237_v13 = vmax.f32 %v235_v11, 0.0 }
  0x17   : > { %239 = vst.msk [vmem:[%s217_s30] sm:$0xff] %vm238_vm0, %v236_v12 }
  0x18   : > { %240 = vst.msk [vmem:[%s217_s30 + $0x8] sm:$0xff] %vm238_vm0, %v237_v13 }
  0x19 PF: > { %s14_s15 = sadd.s32 1, %s340_s15  }
  0x1a   : > { %p11_p4 = scmp.ge.s32.totalorder %s14_s15, 4  }
  0x1c   :  { %13 = sbr.rel (!%p11_p4) target bundleno = 1 (0x1), region = 69 }

// kernel: basic_block_forward.3
= control target key start
LH: loop header
LB: loop body
LE: loop exit
PB: predicated region body
PF: predicated region fallthrough
CT: control target
= control target key end

     0   :  { %s5678_s15 = smov 0   ;;  %s7483_s0 = inlined_call_operand.vmem [shape: f32[2,16,16,4], index: 0, kind: input, shape index: {}]   ;;  %s7484_s1 = inlined_call_operand.vmem [shape: bf16[36,4], index: 1, kind: input, shape index: {}]   ;;  %s7485_s2 = inlined_call_operand.vmem [shape: bf16[2,256,4], index: 2, kind: output, shape index: {0}]   ;;  %s7486_s3 = inlined_call_operand.vmem [shape: f32[2,1,4], index: 3, kind: output, shape index: {1}]   ;;  %s7487_s4 = inlined_call_operand.vmem [shape: f32[2,1,4], index: 4, kind: output, shape index: {2}]  }
   0x1 LB: > { %s5131_s16 = sadd.s32 4294967295, %s5650_s15   ;;  %p5135_p0 = scmp.ge.s32.totalorder %s5650_s15, 1  ;;  %s5650_s15 = sphi %s5678_s15, %s15_s15  }
   0x2   : > { %p167_p1 = scmp.lt.s32.totalorder %s5650_s15, 3 }
   0x4   : > { %p168_p2 = pnand %p5135_p0, %p167_p1 }
   0x6   : > { %171 = sbr.rel (%p168_p2) target bundleno = 926 (0x39e), region = 28 }
   0xb   : > { %v1275_v0 = vld [vmem:[%s7484_s1] sm:$0xc]  ;;  %p199_p3 = scmp.lt.s32.totalorder %s5131_s16, 1  ;;  %vm219_vm0 = vcmask 24576   ;;  %vm226_vm1 = vsmask.f32 256 }
   0xc   : > { %v1325_v1 = vunpack.c.l.b16 %v1275_v0  ;;  %v240_v2 = vld [vmem:[#allocation2 + $0x30] sm:$0x1]  ;;  %vm282_vm2 = vsmask.f32 7938  ;;  %vm1377_vm3 = vcmask 1041408   ;;  %vm5693_vm4 = vmand %vm219_vm0, %vm226_vm1  ;;  %vm216_vm5 = vcmask 27648  }
   0xd   : > { %s7527_s16 = smov (!%p199_p3, %s5131_s16), 1  ;;  %v296_v4 = vld [vmem:[#allocation2 + $0x38] sm:$0x1]  ;;  %v241_v6 = vsel %vm5693_vm4, 0, %v240_v2  ;;  %vm5701_vm6 = vmand %vm219_vm0, %vm282_vm2  ;;  %vm402_vm7 = vsmask.f32 4368 }
   0xe   : > { %v1326_v5 = vpack.c.b16 %v1325_v1, %v1325_v1  ;;  %s5526_s19 = sshll.u32 %s7527_s16, 8  ;;  %242 = vst [vmem:[#allocation2 + $0x30] sm:$0x1] %v241_v6  ;;  %v297_v8 = vsel %vm5701_vm6, 0, %v296_v4  ;;  %v252_v10 = vld [vmem:[#allocation2 + $0x60] sm:$0x1]  ;;  %vm5730_vm8 = vmor %vm226_vm1, %vm402_vm7  ;;  %s211_s21 = scalar_lea.vmem %s7486_s3, %s7527_s16 }
   0xf   : > { %s5711_s22 = scalar_lea.vmem %s7483_s0, %s5526_s19  ;;  %298 = vst [vmem:[#allocation2 + $0x38] sm:$0x1] %v297_v8  ;;  %v253_v13 = vsel %vm5693_vm4, 0, %v252_v10  ;;  %v5652_v14 = vmov 0   ;;  %v308_v18 = vld [vmem:[#allocation2 + $0x68] sm:$0x1]  ;;  %vm5736_vm9 = vmand %vm216_vm5, %vm282_vm2  ;;  %s214_s24 = scalar_lea.vmem %s7487_s4, %s7527_s16 }
  0x10   : > { %v1327_v9 = vrot.slane %v1326_v5, 2  ;;  %v344_v11 = vld [vmem:[%s5711_s22 + $0x30] sm:$0xff]  ;;  %v345_v12 = vld [vmem:[%s5711_s22 + $0x38] sm:$0xff]  ;;  %217 = vst.msk [vmem:[#allocation2] sm:$0xf] %vm216_vm5, %v5652_v14  ;;  %v309_v20 = vsel %vm5701_vm6, 0, %v308_v18 }
  0x11   : > { %v376_v16 = vpack.c.bf16 %v344_v11, %v344_v11  ;;  %v377_v17 = vpack.c.bf16 %v345_v12, %v345_v12  ;;  %254 = vst [vmem:[#allocation2 + $0x60] sm:$0x1] %v253_v13  ;;  %v352_v19 = vld [vmem:[%s5711_s22 + $0x70] sm:$0xff]  ;;  %v353_v21 = vld [vmem:[%s5711_s22 + $0x78] sm:$0xff]  ;;  %v346_v56 = vld [vmem:[%s5711_s22 + $0x40] sm:$0xff]  ;;  %vm1328_vm12 = vcmask 31744  }
  0x12   : > { %v1379_v15 = vsel %vm1377_vm3, %v1327_v9, 0  ;;  %v384_v22 = vpack.c.bf16 %v352_v19, %v352_v19  ;;  %v264_v23 = vld [vmem:[#allocation2 + $0x90] sm:$0x1]  ;;  %v320_v24 = vld [vmem:[#allocation2 + $0x98] sm:$0x1]  ;;  %v385_v29 = vpack.c.bf16 %v353_v21, %v353_v21  ;;  %v347_v62 = vld [vmem:[%s5711_s22 + $0x48] sm:$0xff]  ;;  %v5760_v9 = vpack.c.bf16 %v346_v56, %v346_v56 }
  0x13   : > { %5576 = vmatpush.bf16.msra.mxu1 %v1379_v15  ;;  %5577 = vmatpush.bf16.msra.mxu2 %v1379_v15  ;;  %v456_v25 = vshrl.u32 %v376_v16, 16  ;;  %v459_v26 = vshll.u32 %v376_v16, 16  ;;  %v464_v27 = vshrl.u32 %v377_v17, 16  ;;  %v467_v28 = vshll.u32 %v377_v17, 16  ;;  %310 = vst [vmem:[#allocation2 + $0x68] sm:$0x1] %v309_v20 }
  0x14   : > { %5578 = vmatpush.bf16.msra.mxu3 %v1379_v15  ;;  %1388 = vmatpush.bf16.msra.mxu0 %v1379_v15  ;;  %v524_v30 = vshrl.u32 %v384_v22, 16  ;;  %v527_v31 = vshll.u32 %v384_v22, 16  ;;  %v265_v32 = vsel %vm5693_vm4, 0, %v264_v23  ;;  %v360_v33 = vld [vmem:[%s5711_s22 + $0xb0] sm:$0xff]  ;;  %v361_v34 = vld [vmem:[%s5711_s22 + $0xb8] sm:$0xff]  ;;  %v532_v44 = vshrl.u32 %v385_v29, 16 }
  0x15   : > { %v458_v36 = vrot.slane %v456_v25, 7  ;;  %v466_v37 = vrot.slane %v464_v27, 7  ;;  %v748_v38 = vld [vmem:[#allocation2 + $0x30] sm:$0xf]  ;;  %266 = vst [vmem:[#allocation2 + $0x90] sm:$0x1] %v265_v32  ;;  %v392_v39 = vpack.c.bf16 %v360_v33, %v360_v33  ;;  %v393_v40 = vpack.c.bf16 %v361_v34, %v361_v34 }
  0x16   : > { %v752_v42 = vld [vmem:[#allocation2 + $0x38] sm:$0x1]  ;;  %v526_v43 = vrot.slane %v524_v30, 7  ;;  %v535_v45 = vshll.u32 %v385_v29, 16  ;;  %v321_v46 = vsel %vm5701_vm6, 0, %v320_v24  ;;  %v534_v53 = vrot.slane %v532_v44, 7 }
  0x17   : > { %v461_v47 = vor.u32 %v459_v26, %v458_v36  ;;  %v462_v48 = vrot.slane %v458_v36, 4  ;;  %v469_v49 = vor.u32 %v467_v28, %v466_v37  ;;  %v471_v50 = vrot.slane %v466_v37, 4  ;;  %322 = vst [vmem:[#allocation2 + $0x98] sm:$0x1] %v321_v46  ;;  %v5751_v61 = vld [vmem:[#allocation2] sm:$0x1] }
  0x18   : > { %v529_v51 = vor.u32 %v527_v31, %v526_v43  ;;  %v530_v52 = vrot.slane %v526_v43, 4  ;;  %v776_v54 = vld [vmem:[#allocation2 + $0x60] sm:$0xf]  ;;  %v592_v55 = vshrl.u32 %v392_v39, 16  ;;  %v595_v60 = vshll.u32 %v392_v39, 16  ;;  %s5527_s13 = sshll.u32 %s7527_s16, 7 }
  0x19   : > { %v470_v57 = vsel %vm5730_vm8, %v462_v48, %v469_v49  ;;  %v749_v58 = vsel %vm5736_vm9, %v461_v47, %v748_v38  ;;  %v753_v59 = vsel %vm5693_vm4, %v471_v50, %v752_v42  ;;  %218 = vst.msk [vmem:[#allocation2 + $0x4] sm:$0xf] %vm216_vm5, %v5652_v14  ;;  %v537_v63 = vor.u32 %v535_v45, %v534_v53  ;;  %v1853_v8 = vld [vmem:[%s7484_s1 + $0x4] sm:$0x3]  ;;  %v5766_v15 = vld [vmem:[#allocation2 + $0x3c] sm:$0x1]  ;;  %s6890_s18 = scalar_lea.vmem %s7485_s2, %s5527_s13 }
  0x1a   : > { %750 = vst [vmem:[#allocation2 + $0x30] sm:$0xf] %v749_v58  ;;  %v539_v0 = vrot.slane %v534_v53, 4  ;;  %v777_v1 = vsel %vm5736_vm9, %v529_v51, %v776_v54  ;;  %v780_v2 = vld [vmem:[#allocation2 + $0x68] sm:$0x1]  ;;  %v594_v4 = vrot.slane %v592_v55, 7  ;;  %v5768_v16 = vpack.c.bf16 %v347_v62, %v347_v62 }
  0x1b   : > { %751 = vst.msk [vmem:[#allocation2 + $0x34] sm:$0xf] %vm216_vm5, %v470_v57  ;;  %v600_v5 = vshrl.u32 %v393_v40, 16  ;;  %v603_v6 = vshll.u32 %v393_v40, 16  ;;  %vm888_vm10 = vsmask.f32 3328  ;;  %v538_v10 = vsel %vm5730_vm8, %v530_v52, %v537_v63 }
  0x1c   : > { %754 = vst [vmem:[#allocation2 + $0x38] sm:$0x1] %v753_v59  ;;  %vm889_vm11 = vsmask.f32 7440  ;;  %v781_v11 = vsel %vm5693_vm4, %v539_v0, %v780_v2  ;;  %v597_v12 = vor.u32 %v595_v60, %v594_v4  ;;  %v804_v13 = vld [vmem:[#allocation2 + $0x90] sm:$0xf] }
  0x1d   : > { %778 = vst [vmem:[#allocation2 + $0x60] sm:$0xf] %v777_v1  ;;  %v598_v17 = vrot.slane %v594_v4, 4  ;;  %v602_v18 = vrot.slane %v600_v5, 7  ;;  %v1951_v19 = vsel %vm1377_vm3, %v1853_v8, 0  ;;  %v229_v20 = vsel %vm5693_vm4, 0, %v5751_v61  ;;  %vm5804_vm13 = vmor %vm888_vm10, %vm889_vm11 }
  0x1e   : > { %779 = vst.msk [vmem:[#allocation2 + $0x64] sm:$0xf] %vm216_vm5, %v538_v10  ;;  %v805_v21 = vsel %vm5736_vm9, %v597_v12, %v804_v13  ;;  %v808_v22 = vld [vmem:[#allocation2 + $0x98] sm:$0x1]  ;;  %1960 = vmatpush.bf16.msrb.mxu2 %v1951_v19  ;;  %v5777_v23 = vld [vmem:[#allocation2 + $0x44] sm:$0x1] }
  0x1f   : > { %782 = vst [vmem:[#allocation2 + $0x68] sm:$0x1] %v781_v11  ;;  %v605_v24 = vor.u32 %v603_v6, %v602_v18  ;;  %v607_v25 = vrot.slane %v602_v18, 4  ;;  %v244_v26 = vsel %vm5693_vm4, 0, %v5766_v15  ;;  %v300_v27 = vsel %vm5701_vm6, 0, %v5777_v23  ;;  %v354_v28 = vld [vmem:[%s5711_s22 + $0x80] sm:$0xff] }
  0x20   : > { %806 = vst [vmem:[#allocation2 + $0x90] sm:$0xf] %v805_v21  ;;  %v5786_v29 = vld [vmem:[#allocation2 + $0x4] sm:$0xf]  ;;  %v473_v30 = vshrl.u32 %v5760_v9, 16  ;;  %v476_v31 = vshll.u32 %v5760_v9, 16  ;;  %v5799_v45 = vpack.c.bf16 %v354_v28, %v354_v28 }
  0x21   : > { %v847_v32 = vld [vmem:[#allocation2 + $0x30] sm:$0xf]  ;;  %v606_v33 = vsel %vm5730_vm8, %v598_v17, %v605_v24  ;;  %v809_v34 = vsel %vm5693_vm4, %v607_v25, %v808_v22  ;;  %220 = vst.msk [vmem:[#allocation2 + $0x8] sm:$0x1] %vm219_vm0, %v5652_v14  ;;  %v901_v36 = vshll.u32 %v5786_v29, 16  ;;  %v481_v37 = vshrl.u32 %v5768_v16, 16 }
  0x22   : > { %v848_v38 = vld [vmem:[#allocation2 + $0x34] sm:$0xf]  ;;  %v988_v39 = vshrl.u32 %v847_v32, 16  ;;  %v991_v40 = vshll.u32 %v847_v32, 16  ;;  %807 = vst.msk [vmem:[#allocation2 + $0x94] sm:$0xf] %vm216_vm5, %v606_v33 }
  0x23   : > { %v876_v42 = vld [vmem:[#allocation2 + $0x38] sm:$0x1]  ;;  %v997_v43 = vshll.u32 %v848_v38, 16  ;;  %v1001_v44 = vshrl.u32 %v848_v38, 16  ;;  %810 = vst [vmem:[#allocation2 + $0x98] sm:$0x1] %v809_v34 }
  0x24   : > { %v990_v46 = vrot.slane %v988_v39, 4  ;;  %v993_v47 = vrot.slane %v991_v40, 5  ;;  %v1007_v48 = vshll.u32 %v876_v42, 16  ;;  %v855_v49 = vld [vmem:[#allocation2 + $0x60] sm:$0xf]  ;;  %v905_v50 = vshrl.u32 %v5786_v29, 16 }
  0x25   : > { %v999_v51 = vrot.slane %v997_v43, 5  ;;  %v1003_v52 = vrot.slane %v1001_v44, 4  ;;  %v856_v53 = vld [vmem:[#allocation2 + $0x64] sm:$0xf]  ;;  %v1084_v54 = vshrl.u32 %v855_v49, 16  ;;  %v1087_v55 = vshll.u32 %v855_v49, 16 }
  0x26   : > { %v994_v56 = vor.u32 %v993_v47, %v990_v46  ;;  %v1009_v57 = vrot.slane %v1007_v48, 5  ;;  %v880_v58 = vld [vmem:[#allocation2 + $0x68] sm:$0x1]  ;;  %v1093_v59 = vshll.u32 %v856_v53, 16  ;;  %v1097_v60 = vshrl.u32 %v856_v53, 16 }
  0x27   : > { %v1004_v62 = vor.u32 %v1003_v52, %v999_v51  ;;  %v1086_v63 = vrot.slane %v1084_v54, 4  ;;  %v1089_v0 = vrot.slane %v1087_v55, 5  ;;  %v1103_v1 = vshll.u32 %v880_v58, 16  ;;  %v863_v2 = vld [vmem:[#allocation2 + $0x90] sm:$0xf]  ;;  %v355_v18 = vld [vmem:[%s5711_s22 + $0x88] sm:$0xff] }
  0x28   : > { %v995_v4 = vrot.slane %v994_v56, 4  ;;  %v1095_v5 = vrot.slane %v1093_v59, 5  ;;  %v1099_v6 = vrot.slane %v1097_v60, 4  ;;  %230 = vst [vmem:[#allocation2] sm:$0x1] %v229_v20  ;;  %v5808_v8 = vrot.slane %v901_v36, 5 }
  0x29   : > { %v1005_v10 = vrot.slane %v1004_v62, 4  ;;  %v1090_v11 = vor.u32 %v1089_v0, %v1086_v63  ;;  %v1105_v12 = vrot.slane %v1103_v1, 5  ;;  %v864_v13 = vld [vmem:[#allocation2 + $0x94] sm:$0xf]  ;;  %v1180_v17 = vshrl.u32 %v863_v2, 16  ;;  %v362_v59 = vld [vmem:[%s5711_s22 + $0xc0] sm:$0xff] }
  0x2a   : > { %v1000_v19 = vsel %vm5804_vm13, %v995_v4, %v999_v51  ;;  %v1100_v21 = vor.u32 %v1099_v6, %v1095_v5  ;;  %v884_v22 = vld [vmem:[#allocation2 + $0x98] sm:$0x1]  ;;  %v1183_v24 = vshll.u32 %v863_v2, 16  ;;  %v1189_v25 = vshll.u32 %v864_v13, 16  ;;  %v284_v34 = vld [vmem:[#allocation2 + $0x8] sm:$0x1] }
  0x2b   : > { %v1010_v28 = vsel %vm5804_vm13, %v1005_v10, %v1009_v57  ;;  %v1284_v32 = vunpack.c.l.b16 %v1000_v19  ;;  %v1091_v20 = vrot.slane %v1090_v11, 4  ;;  %v1182_v33 = vrot.slane %v1180_v17, 4  ;;  %222 = vst.msk [vmem:[#allocation2 + $0xcc] sm:$0xf] %vm216_vm5, %v5652_v14  ;;  %v2106_v40 = vld [vmem:[%s7484_s1 + $0x4] sm:$0xc] }
  0x2c   : > { %v1285_v36 = vunpack.c.l.b16 %v1010_v28  ;;  %v1101_v38 = vrot.slane %v1100_v21, 4  ;;  %v1185_v39 = vrot.slane %v1183_v24, 5  ;;  %223 = vst.msk [vmem:[#allocation2 + $0xd0] sm:$0xf] %vm216_vm5, %v5652_v14  ;;  %v5822_v42 = vpack.c.bf16 %v355_v18, %v355_v18  ;;  %v871_v53 = vld [vmem:[%s7484_s1] sm:$0x3] }
  0x2d   : > { %v1096_v43 = vsel %vm5804_vm13, %v1091_v20, %v1095_v5  ;;  %v1191_v44 = vrot.slane %v1189_v25, 5  ;;  %v1193_v46 = vshrl.u32 %v864_v13, 16  ;;  %v1199_v47 = vshll.u32 %v884_v22, 16  ;;  %224 = vst.msk [vmem:[#allocation2 + $0xd4] sm:$0x1] %vm219_vm0, %v5652_v14 }
  0x2e   : > { %v1312_v48 = vpack.c.b16 %v1285_v36, %v1284_v32  ;;  %v1106_v49 = vsel %vm5804_vm13, %v1101_v38, %v1105_v12  ;;  %v1292_v51 = vunpack.c.l.b16 %v1096_v43  ;;  %v1186_v52 = vor.u32 %v1185_v39, %v1182_v33  ;;  %v2795_v54 = vld [vmem:[%s7484_s1 + $0x8] sm:$0x3]  ;;  %245 = vst [vmem:[#allocation2 + $0x3c] sm:$0x1] %v244_v26  ;;  %v255_v10 = vld [vmem:[#allocation2 + $0x6c] sm:$0x1] }
  0x2f   : > { %v1293_v14 = vunpack.c.l.b16 %v1106_v49  ;;  %v1195_v55 = vrot.slane %v1193_v46, 4  ;;  %v1201_v56 = vrot.slane %v1199_v47, 5  ;;  %v285_v57 = vsel %vm5701_vm6, 0, %v284_v34  ;;  %v839_v58 = vld [vmem:[#allocation2] sm:$0xf]  ;;  %v363_v43 = vld [vmem:[%s5711_s22 + $0xc8] sm:$0xff] }
  0x30   : > { %5144 = vmatmul.msk.bf16.vlgmr.msra.gmra.mxu1 %vm1328_vm12, %v1312_v48  ;;  %v1187_v60 = vrot.slane %v1186_v52, 4  ;;  %286 = vst [vmem:[#allocation2 + $0x8] sm:$0x1] %v285_v57  ;;  %v892_v62 = vshrl.u32 %v839_v58, 16  ;;  %v895_v63 = vshll.u32 %v839_v58, 16  ;;  %v907_v0 = vrot.slane %v905_v50, 4 }
  0x31   : > { %v1316_v1 = vpack.c.b16 %v1293_v14, %v1292_v51  ;;  %v1196_v15 = vor.u32 %v1195_v55, %v1191_v44  ;;  %v2188_v26 = vunpack.c.l.b16 %v2106_v40  ;;  %v1599_v2 = vsel %vm1377_vm3, %v871_v53, 0  ;;  %301 = vst [vmem:[#allocation2 + $0x44] sm:$0x1] %v300_v27  ;;  %v311_v19 = vld [vmem:[#allocation2 + $0x74] sm:$0x1] }
  0x32   : > { %v1192_v4 = vsel %vm5804_vm13, %v1187_v60, %v1191_v44  ;;  %v894_v5 = vrot.slane %v892_v62, 4  ;;  %v897_v6 = vrot.slane %v895_v63, 5  ;;  %1608 = vmatpush.bf16.msrb.mxu1 %v1599_v2  ;;  %v5853_v11 = vpack.c.bf16 %v362_v59, %v362_v59  ;;  %v323_v34 = vld [vmem:[#allocation2 + $0xa4] sm:$0x1]  ;;  %v5892_v59 = vld [vmem:[#allocation2 + $0xc] sm:$0x1] }
  0x33   : > { %5148 = vmatmul.msk.bf16.vlgmr.msra.gmra.mxu2 %vm1328_vm12, %v1316_v1  ;;  %v1197_v29 = vrot.slane %v1196_v15, 4  ;;  %v908_v50 = vor.u32 %v907_v0, %v5808_v8  ;;  %v2189_v12 = vpack.c.b16 %v2188_v26, %v2188_v26  ;;  %v2893_v13 = vsel %vm1377_vm3, %v2795_v54, 0 }
  0x34   : > { %v1300_v17 = vunpack.c.l.b16 %v1192_v4  ;;  %v898_v23 = vor.u32 %v897_v6, %v894_v5  ;;  %2902 = vmatpush.bf16.msrb.mxu0 %v2893_v13  ;;  %v475_v27 = vrot.slane %v473_v30, 7  ;;  %v483_v18 = vrot.slane %v481_v37, 7  ;;  %v267_v37 = vld [vmem:[#allocation2 + $0x9c] sm:$0x1]  ;;  %v338_v13 = vld [vmem:[%s5711_s22] sm:$0xff] }
  0x35   : > { %v1202_v21 = vsel %vm5804_vm13, %v1197_v29, %v1201_v56  ;;  %v2190_v22 = vrot.slane %v2189_v12, 2  ;;  %v484_v24 = vshll.u32 %v5768_v16, 16  ;;  %v256_v25 = vsel %vm5693_vm4, 0, %v255_v10  ;;  %v755_v33 = vld [vmem:[#allocation2 + $0x3c] sm:$0xf] }
  0x36   : > { %v1301_v28 = vunpack.c.l.b16 %v1202_v21  ;;  %v899_v32 = vrot.slane %v898_v23, 4  ;;  %v478_v20 = vor.u32 %v476_v31, %v475_v27  ;;  %v479_v30 = vrot.slane %v475_v27, 4  ;;  %257 = vst [vmem:[#allocation2 + $0x6c] sm:$0x1] %v256_v25  ;;  %v348_v21 = vld [vmem:[%s5711_s22 + $0x50] sm:$0xff] }
  0x37   : > { %v872_v36 = vld [vmem:[#allocation2 + $0x8] sm:$0x1]  ;;  %v2240_v38 = vsel %vm1377_vm3, %v2190_v22, 0  ;;  %v486_v39 = vor.u32 %v484_v24, %v483_v18  ;;  %v488_v40 = vrot.slane %v483_v18, 4  ;;  %v312_v16 = vsel %vm5701_vm6, 0, %v311_v19 }
  0x38   : > { %v1320_v44 = vpack.c.b16 %v1301_v28, %v1300_v17  ;;  %v904_v9 = vsel %vm5804_vm13, %v899_v32, %v5808_v8  ;;  %v909_v31 = vrot.slane %v908_v50, 4  ;;  %v911_v46 = vshll.u32 %v872_v36, 16  ;;  %2249 = vmatpush.bf16.msrb.mxu3 %v2240_v38  ;;  %v759_v47 = vld [vmem:[#allocation2 + $0x44] sm:$0x1]  ;;  %313 = vst [vmem:[#allocation2 + $0x74] sm:$0x1] %v312_v16 }
  0x39   : > { %v1276_v48 = vunpack.c.l.b16 %v904_v9  ;;  %v487_v49 = vsel %vm5730_vm8, %v479_v30, %v486_v39  ;;  %v756_v51 = vsel %vm5736_vm9, %v478_v20, %v755_v33  ;;  %v760_v52 = vsel %vm5693_vm4, %v488_v40, %v759_v47  ;;  %v287_v18 = vld [vmem:[#allocation2 + $0x14] sm:$0x1]  ;;  %v339_v19 = vld [vmem:[%s5711_s22 + $0x8] sm:$0xff]  ;;  %v349_v16 = vld [vmem:[%s5711_s22 + $0x58] sm:$0xff] }
  0x3a   : > { %5152 = vmatmul.msk.bf16.vlgmr.msra.gmra.mxu3 %vm1328_vm12, %v1320_v44  ;;  %v913_v53 = vrot.slane %v911_v46, 5  ;;  %757 = vst [vmem:[#allocation2 + $0x3c] sm:$0xf] %v756_v51  ;;  %v541_v8 = vshrl.u32 %v5799_v45, 16  ;;  %v544_v54 = vshll.u32 %v5799_v45, 16  ;;  %v549_v14 = vshrl.u32 %v5822_v42, 16 }
  0x3b   : > { %758 = vst.msk [vmem:[#allocation2 + $0x40] sm:$0xf] %vm216_vm5, %v487_v49  ;;  %v552_v55 = vshll.u32 %v5822_v42, 16  ;;  %v268_v56 = vsel %vm5693_vm4, 0, %v267_v37  ;;  %v324_v57 = vsel %vm5701_vm6, 0, %v323_v34  ;;  %v395_v58 = vpack.c.bf16 %v363_v43, %v363_v43  ;;  %v356_v43 = vld [vmem:[%s5711_s22 + $0x90] sm:$0xff] }
  0x3c   : > { %v914_v60 = vsel %vm5804_vm13, %v909_v31, %v913_v53  ;;  %761 = vst [vmem:[#allocation2 + $0x44] sm:$0x1] %v760_v52  ;;  %v543_v45 = vrot.slane %v541_v8, 7  ;;  %v551_v62 = vrot.slane %v549_v14, 7  ;;  %v609_v63 = vshrl.u32 %v5853_v11, 16 }
  0x3d   : > { %v1277_v0 = vunpack.c.l.b16 %v914_v60  ;;  %v783_v42 = vld [vmem:[#allocation2 + $0x6c] sm:$0xf]  ;;  %269 = vst [vmem:[#allocation2 + $0x9c] sm:$0x1] %v268_v56  ;;  %v612_v1 = vshll.u32 %v5853_v11, 16  ;;  %v617_v15 = vshrl.u32 %v395_v58, 16  ;;  %v5912_v37 = vpack.c.bf16 %v338_v13, %v338_v13 }
  0x3e   : > { %v546_v26 = vor.u32 %v544_v54, %v543_v45  ;;  %v547_v2 = vrot.slane %v543_v45, 4  ;;  %v554_v4 = vor.u32 %v552_v55, %v551_v62  ;;  %v556_v5 = vrot.slane %v551_v62, 4  ;;  %325 = vst [vmem:[#allocation2 + $0xa4] sm:$0x1] %v324_v57  ;;  %v357_v56 = vld [vmem:[%s5711_s22 + $0x98] sm:$0xff]  ;;  %v364_v45 = vld [vmem:[%s5711_s22 + $0xd0] sm:$0xff] }
  0x3f   : > { %v1308_v6 = vpack.c.b16 %v1277_v0, %v1276_v48  ;;  %v787_v10 = vld [vmem:[#allocation2 + $0x74] sm:$0x1]  ;;  %v611_v29 = vrot.slane %v609_v63, 7  ;;  %v619_v50 = vrot.slane %v617_v15, 7  ;;  %v620_v12 = vshll.u32 %v395_v58, 16 }
  0x40   : > { %v555_v17 = vsel %vm5730_vm8, %v547_v2, %v554_v4  ;;  %v784_v11 = vsel %vm5736_vm9, %v546_v26, %v783_v42  ;;  %v788_v23 = vsel %vm5693_vm4, %v556_v5, %v787_v10  ;;  %v232_v27 = vsel %vm5693_vm4, 0, %v5892_v59 }
  0x41   : > { %5140 = vmatmul.msk.bf16.vlgmr.msra.gmra.mxu0 %vm1328_vm12, %v1308_v6  ;;  %v849_v22 = vld [vmem:[#allocation2 + $0x3c] sm:$0xf]  ;;  %785 = vst [vmem:[#allocation2 + $0x6c] sm:$0xf] %v784_v11  ;;  %v614_v24 = vor.u32 %v612_v1, %v611_v29  ;;  %v615_v25 = vrot.slane %v611_v29, 4  ;;  %v622_v28 = vor.u32 %v620_v12, %v619_v50  ;;  %v624_v32 = vrot.slane %v619_v50, 4 }
  0x42   : > { %v850_v20 = vld [vmem:[#allocation2 + $0x40] sm:$0xf]  ;;  %v1012_v30 = vshrl.u32 %v849_v22, 16  ;;  %v1015_v33 = vshll.u32 %v849_v22, 16  ;;  %786 = vst.msk [vmem:[#allocation2 + $0x70] sm:$0xf] %vm216_vm5, %v555_v17  ;;  %v5916_v40 = vpack.c.bf16 %v339_v19, %v339_v19  ;;  %v5925_v53 = vpack.c.bf16 %v348_v21, %v348_v21 }
  0x43   : > { %v877_v34 = vld [vmem:[#allocation2 + $0x44] sm:$0x1]  ;;  %v1021_v36 = vshll.u32 %v850_v20, 16  ;;  %v1025_v38 = vshrl.u32 %v850_v20, 16  ;;  %789 = vst [vmem:[#allocation2 + $0x74] sm:$0x1] %v788_v23  ;;  %v623_v39 = vsel %vm5730_vm8, %v615_v25, %v622_v28  ;;  %v5935_v42 = vpack.c.bf16 %v349_v16, %v349_v16 }
  0x44   : > { %v1014_v44 = vrot.slane %v1012_v30, 4  ;;  %v1017_v9 = vrot.slane %v1015_v33, 5  ;;  %v1031_v31 = vshll.u32 %v877_v34, 16  ;;  %v811_v46 = vld [vmem:[#allocation2 + $0x9c] sm:$0xf]  ;;  %v288_v47 = vsel %vm5701_vm6, 0, %v287_v18 }
  0x45   : > { %v1023_v48 = vrot.slane %v1021_v36, 5  ;;  %v1027_v49 = vrot.slane %v1025_v38, 4  ;;  %v812_v51 = vsel %vm5736_vm9, %v614_v24, %v811_v46  ;;  %814 = vst.msk [vmem:[#allocation2 + $0xa0] sm:$0xf] %vm216_vm5, %v623_v39  ;;  %v815_v52 = vld [vmem:[#allocation2 + $0xa4] sm:$0x1]  ;;  %v5937_v1 = vpack.c.bf16 %v356_v43, %v356_v43 }
  0x46   : > { %v1018_v8 = vor.u32 %v1017_v9, %v1014_v44  ;;  %v1033_v54 = vrot.slane %v1031_v31, 5  ;;  %813 = vst [vmem:[#allocation2 + $0x9c] sm:$0xf] %v812_v51  ;;  %v816_v14 = vsel %vm5693_vm4, %v624_v32, %v815_v52  ;;  %v405_v55 = vshrl.u32 %v5912_v37, 16  ;;  %v246_v46 = vld [vmem:[#allocation2 + $0x48] sm:$0x1] }
  0x47   : > { %v1028_v57 = vor.u32 %v1027_v49, %v1023_v48  ;;  %817 = vst [vmem:[#allocation2 + $0xa4] sm:$0x1] %v816_v14  ;;  %v408_v58 = vshll.u32 %v5912_v37, 16  ;;  %v413_v59 = vshrl.u32 %v5916_v40, 16  ;;  %v416_v60 = vshll.u32 %v5916_v40, 16 }
  0x48   : > { %v1019_v62 = vrot.slane %v1018_v8, 4  ;;  %v857_v63 = vld [vmem:[#allocation2 + $0x6c] sm:$0xf]  ;;  %233 = vst [vmem:[#allocation2 + $0xc] sm:$0x1] %v232_v27  ;;  %v407_v0 = vrot.slane %v405_v55, 7  ;;  %v5939_v5 = vpack.c.bf16 %v357_v56, %v357_v56  ;;  %v5943_v12 = vpack.c.bf16 %v364_v45, %v364_v45 }
  0x49   : > { %v1029_v15 = vrot.slane %v1028_v57, 4  ;;  %v858_v26 = vld [vmem:[#allocation2 + $0x70] sm:$0xf]  ;;  %v1108_v2 = vshrl.u32 %v857_v63, 16  ;;  %v1111_v4 = vshll.u32 %v857_v63, 16  ;;  %v415_v20 = vrot.slane %v413_v59, 7 }
  0x4a   : > { %v1024_v6 = vsel %vm5804_vm13, %v1019_v62, %v1023_v48  ;;  %v881_v10 = vld [vmem:[#allocation2 + $0x74] sm:$0x1]  ;;  %v1117_v29 = vshll.u32 %v858_v26, 16  ;;  %v1121_v50 = vshrl.u32 %v858_v26, 16  ;;  %289 = vst [vmem:[#allocation2 + $0x14] sm:$0x1] %v288_v47  ;;  %v410_v31 = vor.u32 %v408_v58, %v407_v0 }
  0x4b   : > { %v1034_v13 = vsel %vm5804_vm13, %v1029_v15, %v1033_v54  ;;  %v1286_v17 = vunpack.c.l.b16 %v1024_v6  ;;  %v1110_v11 = vrot.slane %v1108_v2, 4  ;;  %v1113_v23 = vrot.slane %v1111_v4, 5  ;;  %v302_v8 = vld [vmem:[#allocation2 + $0x50] sm:$0x1]  ;;  %v258_v2 = vld [vmem:[#allocation2 + $0x78] sm:$0x1] }
  0x4c   : > { %v1287_v27 = vunpack.c.l.b16 %v1034_v13  ;;  %v1119_v18 = vrot.slane %v1117_v29, 5  ;;  %v1123_v19 = vrot.slane %v1121_v50, 4  ;;  %v1127_v21 = vshll.u32 %v881_v10, 16  ;;  %v866_v22 = vld [vmem:[#allocation2 + $0xa0] sm:$0xf] }
  0x4d   : > { %v1114_v24 = vor.u32 %v1113_v23, %v1110_v11  ;;  %v865_v25 = vld [vmem:[#allocation2 + $0x9c] sm:$0xf]  ;;  %v1213_v28 = vshll.u32 %v866_v22, 16  ;;  %v1217_v32 = vshrl.u32 %v866_v22, 16  ;;  %v411_v51 = vrot.slane %v407_v0, 4 }
  0x4e   : > { %v1313_v30 = vpack.c.b16 %v1287_v27, %v1286_v17  ;;  %v1124_v33 = vor.u32 %v1123_v19, %v1119_v18  ;;  %v1129_v37 = vrot.slane %v1127_v21, 5  ;;  %v885_v34 = vld [vmem:[#allocation2 + $0xa4] sm:$0x1]  ;;  %v1204_v36 = vshrl.u32 %v865_v25, 16  ;;  %v314_v4 = vld [vmem:[#allocation2 + $0x80] sm:$0x1] }
  0x4f   : > { %v1115_v38 = vrot.slane %v1114_v24, 4  ;;  %v1207_v39 = vshll.u32 %v865_v25, 16  ;;  %v1215_v40 = vrot.slane %v1213_v28, 5  ;;  %v1219_v16 = vrot.slane %v1217_v32, 4  ;;  %v727_v52 = vld [vmem:[#allocation2 + $0xc] sm:$0xf] }
  0x50   : > { %5145 = vmatmul.msk.bf16.gmra.mxu1 %vm1328_vm12, %v1313_v30  ;;  %v1125_v43 = vrot.slane %v1124_v33, 4  ;;  %v1206_v44 = vrot.slane %v1204_v36, 4  ;;  %v1223_v9 = vshll.u32 %v885_v34, 16  ;;  %v418_v56 = vor.u32 %v416_v60, %v415_v20  ;;  %v270_v50 = vld [vmem:[#allocation2 + $0xa8] sm:$0x1]  ;;  %v365_v32 = vld [vmem:[%s5711_s22 + $0xd8] sm:$0xff] }
  0x51   : > { %v1120_v47 = vsel %vm5804_vm13, %v1115_v38, %v1119_v18  ;;  %v1209_v48 = vrot.slane %v1207_v39, 5  ;;  %v1220_v49 = vor.u32 %v1219_v16, %v1215_v40  ;;  %v731_v57 = vld [vmem:[#allocation2 + $0x14] sm:$0x1]  ;;  %v420_v58 = vrot.slane %v415_v20, 4  ;;  %v326_v27 = vld [vmem:[#allocation2 + $0xb0] sm:$0x1] }
  0x52   : > { %v1130_v54 = vsel %vm5804_vm13, %v1125_v43, %v1129_v37  ;;  %v1294_v14 = vunpack.c.l.b16 %v1120_v47  ;;  %v1225_v55 = vrot.slane %v1223_v9, 5  ;;  %v419_v63 = vsel %vm5730_vm8, %v411_v51, %v418_v56 }
  0x53   : > { %v1295_v59 = vunpack.c.l.b16 %v1130_v54  ;;  %v1210_v45 = vor.u32 %v1209_v48, %v1206_v44  ;;  %v1221_v62 = vrot.slane %v1220_v49, 4  ;;  %v728_v15 = vsel %vm5736_vm9, %v410_v31, %v727_v52  ;;  %730 = vst.msk [vmem:[#allocation2 + $0x10] sm:$0xf] %vm216_vm5, %v419_v63 }
  0x54   : > { %v247_v0 = vsel %vm5693_vm4, 0, %v246_v46  ;;  %v303_v26 = vsel %vm5701_vm6, 0, %v302_v8  ;;  %729 = vst [vmem:[#allocation2 + $0xc] sm:$0xf] %v728_v15  ;;  %v732_v29 = vsel %vm5693_vm4, %v420_v58, %v731_v57  ;;  %v490_v17 = vshrl.u32 %v5925_v53, 16 }
  0x55   : > { %v1317_v60 = vpack.c.b16 %v1295_v59, %v1294_v14  ;;  %v1211_v6 = vrot.slane %v1210_v45, 4  ;;  %v1226_v10 = vsel %vm5804_vm13, %v1221_v62, %v1225_v55  ;;  %v493_v11 = vshll.u32 %v5925_v53, 16  ;;  %733 = vst [vmem:[#allocation2 + $0x14] sm:$0x1] %v732_v29  ;;  %v340_v29 = vld [vmem:[%s5711_s22 + $0x10] sm:$0xff] }
  0x56   : > { %v1303_v13 = vunpack.c.l.b16 %v1226_v10  ;;  %v498_v23 = vshrl.u32 %v5935_v42, 16  ;;  %v501_v19 = vshll.u32 %v5935_v42, 16  ;;  %v259_v21 = vsel %vm5693_vm4, 0, %v258_v2  ;;  %248 = vst [vmem:[#allocation2 + $0x48] sm:$0x1] %v247_v0 }
  0x57   : > { %5149 = vmatmul.msk.bf16.gmra.mxu2 %vm1328_vm12, %v1317_v60  ;;  %v1216_v18 = vsel %vm5804_vm13, %v1211_v6, %v1215_v40  ;;  %v315_v22 = vsel %vm5701_vm6, 0, %v314_v4  ;;  %v492_v53 = vrot.slane %v490_v17, 7  ;;  %v558_v28 = vshrl.u32 %v5937_v1, 16  ;;  %304 = vst [vmem:[#allocation2 + $0x50] sm:$0x1] %v303_v26 }
  0x58   : > { %v1302_v24 = vunpack.c.l.b16 %v1216_v18  ;;  %v500_v25 = vrot.slane %v498_v23, 7  ;;  %v561_v20 = vshll.u32 %v5937_v1, 16  ;;  %v566_v30 = vshrl.u32 %v5939_v5, 16  ;;  %260 = vst [vmem:[#allocation2 + $0x78] sm:$0x1] %v259_v21 }
  0x59   : > { %v569_v42 = vshll.u32 %v5939_v5, 16  ;;  %v271_v33 = vsel %vm5693_vm4, 0, %v270_v50  ;;  %v495_v34 = vor.u32 %v493_v11, %v492_v53  ;;  %v496_v36 = vrot.slane %v492_v53, 4  ;;  %316 = vst [vmem:[#allocation2 + $0x80] sm:$0x1] %v315_v22 }
  0x5a   : > { %v1321_v37 = vpack.c.b16 %v1303_v13, %v1302_v24  ;;  %v503_v38 = vor.u32 %v501_v19, %v500_v25  ;;  %v505_v39 = vrot.slane %v500_v25, 4  ;;  %v560_v40 = vrot.slane %v558_v28, 7  ;;  %272 = vst [vmem:[#allocation2 + $0xa8] sm:$0x1] %v271_v33  ;;  %v5990_v46 = vld [vmem:[#allocation2 + $0x10] sm:$0xf] }
  0x5b   : > { %v568_v16 = vrot.slane %v566_v30, 7  ;;  %v327_v43 = vsel %vm5701_vm6, 0, %v326_v27  ;;  %v841_v1 = vld [vmem:[#allocation2 + $0xc] sm:$0xf]  ;;  %v397_v44 = vpack.c.bf16 %v365_v32, %v365_v32  ;;  %v626_v9 = vshrl.u32 %v5943_v12, 16 }
  0x5c   : > { %5153 = vmatmul.msk.bf16.gmra.mxu3 %vm1328_vm12, %v1321_v37  ;;  %v504_v5 = vsel %vm5730_vm8, %v496_v36, %v503_v38  ;;  %v629_v31 = vshll.u32 %v5943_v12, 16  ;;  %v916_v47 = vshrl.u32 %v841_v1, 16  ;;  %v919_v48 = vshll.u32 %v841_v1, 16  ;;  %v5993_v52 = vld [vmem:[#allocation2 + $0x14] sm:$0x1] }
  0x5d   : > { %765 = vst.msk [vmem:[#allocation2 + $0x4c] sm:$0xf] %vm216_vm5, %v504_v5  ;;  %v563_v49 = vor.u32 %v561_v20, %v560_v40  ;;  %v571_v51 = vor.u32 %v569_v42, %v568_v16  ;;  %v925_v8 = vshll.u32 %v5990_v46, 16  ;;  %v929_v54 = vshrl.u32 %v5990_v46, 16  ;;  %v762_v59 = vld [vmem:[#allocation2 + $0x48] sm:$0xf] }
  0x5e   : > { %v564_v14 = vrot.slane %v560_v40, 4  ;;  %v573_v55 = vrot.slane %v568_v16, 4  ;;  %v918_v56 = vrot.slane %v916_v47, 4  ;;  %v921_v57 = vrot.slane %v919_v48, 5  ;;  %v766_v15 = vld [vmem:[#allocation2 + $0x50] sm:$0x1] }
  0x5f   : > { %v935_v12 = vshll.u32 %v5993_v52, 16  ;;  %v628_v45 = vrot.slane %v626_v9, 7  ;;  %v927_v62 = vrot.slane %v925_v8, 5  ;;  %v931_v58 = vrot.slane %v929_v54, 4  ;;  %328 = vst [vmem:[#allocation2 + $0xb0] sm:$0x1] %v327_v43 }
  0x60   : > { %v763_v63 = vsel %vm5736_vm9, %v495_v34, %v762_v59  ;;  %v572_v0 = vsel %vm5730_vm8, %v564_v14, %v571_v51  ;;  %v234_v26 = vld [vmem:[#allocation2 + $0x18] sm:$0x1]  ;;  %v922_v2 = vor.u32 %v921_v57, %v918_v56  ;;  %v767_v60 = vsel %vm5693_vm4, %v505_v39, %v766_v15  ;;  %v794_v17 = vld [vmem:[#allocation2 + $0x80] sm:$0x1] }
  0x61   : > { %v937_v4 = vrot.slane %v935_v12, 5  ;;  %764 = vst [vmem:[#allocation2 + $0x48] sm:$0xf] %v763_v63  ;;  %v790_v6 = vld [vmem:[#allocation2 + $0x78] sm:$0xf]  ;;  %v631_v10 = vor.u32 %v629_v31, %v628_v45  ;;  %v932_v50 = vor.u32 %v931_v58, %v927_v62  ;;  %v632_v11 = vrot.slane %v628_v45, 4 }
  0x62   : > { %768 = vst [vmem:[#allocation2 + $0x50] sm:$0x1] %v767_v60  ;;  %v791_v13 = vsel %vm5736_vm9, %v563_v49, %v790_v6  ;;  %v634_v23 = vshrl.u32 %v397_v44, 16  ;;  %v923_v27 = vrot.slane %v922_v2, 4  ;;  %v795_v18 = vsel %vm5693_vm4, %v573_v55, %v794_v17  ;;  %v818_v21 = vld [vmem:[#allocation2 + $0xa8] sm:$0xf] }
  0x63   : > { %792 = vst [vmem:[#allocation2 + $0x78] sm:$0xf] %v791_v13  ;;  %v637_v19 = vshll.u32 %v397_v44, 16  ;;  %v290_v22 = vld [vmem:[#allocation2 + $0x20] sm:$0x1]  ;;  %v933_v24 = vrot.slane %v932_v50, 4  ;;  %v819_v28 = vsel %vm5736_vm9, %v631_v10, %v818_v21  ;;  %v6012_v32 = vpack.c.bf16 %v340_v29, %v340_v29 }
  0x64   : > { %v852_v53 = vld [vmem:[#allocation2 + $0x4c] sm:$0xf]  ;;  %793 = vst.msk [vmem:[#allocation2 + $0x7c] sm:$0xf] %vm216_vm5, %v572_v0  ;;  %v636_v25 = vrot.slane %v634_v23, 7  ;;  %v928_v20 = vsel %vm5804_vm13, %v923_v27, %v927_v62  ;;  %v235_v33 = vsel %vm5693_vm4, 0, %v234_v26 }
  0x65   : > { %v1045_v30 = vshll.u32 %v852_v53, 16  ;;  %v1049_v42 = vshrl.u32 %v852_v53, 16  ;;  %796 = vst [vmem:[#allocation2 + $0x80] sm:$0x1] %v795_v18  ;;  %v938_v37 = vsel %vm5804_vm13, %v933_v24, %v937_v4  ;;  %v1278_v34 = vunpack.c.l.b16 %v928_v20  ;;  %v341_v39 = vld [vmem:[%s5711_s22 + $0x18] sm:$0xff]  ;;  %v350_v40 = vld [vmem:[%s5711_s22 + $0x60] sm:$0xff] }
  0x66   : > { %v639_v36 = vor.u32 %v637_v19, %v636_v25  ;;  %v641_v38 = vrot.slane %v636_v25, 4  ;;  %820 = vst [vmem:[#allocation2 + $0xa8] sm:$0xf] %v819_v28  ;;  %v1279_v16 = vunpack.c.l.b16 %v938_v37  ;;  %v822_v5 = vld [vmem:[#allocation2 + $0xb0] sm:$0x1]  ;;  %v291_v47 = vsel %vm5701_vm6, 0, %v290_v22 }
  0x67   : > { %v1047_v43 = vrot.slane %v1045_v30, 5  ;;  %v1051_v1 = vrot.slane %v1049_v42, 4  ;;  %236 = vst [vmem:[#allocation2 + $0x18] sm:$0x1] %v235_v33  ;;  %v422_v48 = vshrl.u32 %v6012_v32, 16  ;;  %v351_v49 = vld [vmem:[%s5711_s22 + $0x68] sm:$0xff]  ;;  %v6031_v12 = vpack.c.bf16 %v341_v39, %v341_v39 }
  0x68   : > { %v851_v44 = vld [vmem:[#allocation2 + $0x48] sm:$0xf]  ;;  %v640_v9 = vsel %vm5730_vm8, %v632_v11, %v639_v36  ;;  %v823_v31 = vsel %vm5693_vm4, %v641_v38, %v822_v5  ;;  %v1309_v51 = vpack.c.b16 %v1279_v16, %v1278_v34  ;;  %v6035_v45 = vpack.c.bf16 %v350_v40, %v350_v40  ;;  %292 = vst [vmem:[#allocation2 + $0x20] sm:$0x1] %v291_v47  ;;  %v358_v42 = vld [vmem:[%s5711_s22 + $0xa0] sm:$0xff] }
  0x69   : > { %v878_v8 = vld [vmem:[#allocation2 + $0x50] sm:$0x1]  ;;  %v1036_v54 = vshrl.u32 %v851_v44, 16  ;;  %v1039_v14 = vshll.u32 %v851_v44, 16  ;;  %v1052_v55 = vor.u32 %v1051_v1, %v1047_v43  ;;  %821 = vst.msk [vmem:[#allocation2 + $0xac] sm:$0xf] %vm216_vm5, %v640_v9  ;;  %v6038_v17 = vpack.c.bf16 %v351_v49, %v351_v49 }
  0x6a   : > { %v1055_v56 = vshll.u32 %v878_v8, 16  ;;  %v859_v57 = vld [vmem:[#allocation2 + $0x78] sm:$0xf]  ;;  %824 = vst [vmem:[#allocation2 + $0xb0] sm:$0x1] %v823_v31  ;;  %v6033_v59 = vrot.slane %v422_v48, 7  ;;  %5141 = vmatmul.msk.bf16.gmra.mxu0 %vm1328_vm12, %v1309_v51  ;;  %v6046_v31 = vpack.c.bf16 %v358_v42, %v358_v42 }
  0x6b   : > { %v1038_v62 = vrot.slane %v1036_v54, 4  ;;  %v1041_v58 = vrot.slane %v1039_v14, 5  ;;  %v1053_v63 = vrot.slane %v1052_v55, 4  ;;  %v860_v15 = vld [vmem:[#allocation2 + $0x7c] sm:$0xf]  ;;  %v1132_v0 = vshrl.u32 %v859_v57, 16 }
  0x6c   : > { %v1057_v26 = vrot.slane %v1055_v56, 5  ;;  %v882_v2 = vld [vmem:[#allocation2 + $0x80] sm:$0x1]  ;;  %v1135_v4 = vshll.u32 %v859_v57, 16  ;;  %v1141_v60 = vshll.u32 %v860_v15, 16  ;;  %v1145_v6 = vshrl.u32 %v860_v15, 16 }
  0x6d   : > { %v1042_v10 = vor.u32 %v1041_v58, %v1038_v62  ;;  %v1134_v29 = vrot.slane %v1132_v0, 4  ;;  %v1151_v50 = vshll.u32 %v882_v2, 16  ;;  %v867_v13 = vld [vmem:[#allocation2 + $0xa8] sm:$0xf]  ;;  %v425_v30 = vshll.u32 %v6012_v32, 16 }
  0x6e   : > { %v1058_v11 = vsel %vm5804_vm13, %v1053_v63, %v1057_v26  ;;  %v1137_v23 = vrot.slane %v1135_v4, 5  ;;  %v1143_v27 = vrot.slane %v1141_v60, 5  ;;  %v1147_v18 = vrot.slane %v1145_v6, 4  ;;  %v249_v49 = vld [vmem:[#allocation2 + $0x54] sm:$0x1] }
  0x6f   : > { %v1043_v19 = vrot.slane %v1042_v10, 4  ;;  %v1289_v21 = vunpack.c.l.b16 %v1058_v11  ;;  %v1153_v22 = vrot.slane %v1151_v50, 5  ;;  %v1228_v24 = vshrl.u32 %v867_v13, 16  ;;  %v734_v55 = vld [vmem:[#allocation2 + $0x18] sm:$0xf] }
  0x70   : > { %v1138_v53 = vor.u32 %v1137_v23, %v1134_v29  ;;  %v1148_v25 = vor.u32 %v1147_v18, %v1143_v27  ;;  %v868_v28 = vld [vmem:[#allocation2 + $0xac] sm:$0xf]  ;;  %v1231_v20 = vshll.u32 %v867_v13, 16  ;;  %v305_v56 = vld [vmem:[#allocation2 + $0x5c] sm:$0x1]  ;;  %v427_v62 = vor.u32 %v425_v30, %v6033_v59 }
  0x71   : > { %v1048_v33 = vsel %vm5804_vm13, %v1043_v19, %v1047_v43  ;;  %v886_v37 = vld [vmem:[#allocation2 + $0xb0] sm:$0x1]  ;;  %v1230_v34 = vrot.slane %v1228_v24, 4  ;;  %v1237_v36 = vshll.u32 %v868_v28, 16  ;;  %v1241_v38 = vshrl.u32 %v868_v28, 16 }
  0x72   : > { %v1288_v39 = vunpack.c.l.b16 %v1048_v33  ;;  %v1139_v40 = vrot.slane %v1138_v53, 4  ;;  %v1149_v16 = vrot.slane %v1148_v25, 4  ;;  %v1233_v1 = vrot.slane %v1231_v20, 5  ;;  %v261_v4 = vld [vmem:[#allocation2 + $0x84] sm:$0x1] }
  0x73   : > { %v1239_v5 = vrot.slane %v1237_v36, 5  ;;  %v1243_v44 = vrot.slane %v1241_v38, 4  ;;  %v1247_v9 = vshll.u32 %v886_v37, 16  ;;  %v428_v58 = vrot.slane %v6033_v59, 4  ;;  %v317_v29 = vld [vmem:[#allocation2 + $0x8c] sm:$0x1] }
  0x74   : > { %v1314_v47 = vpack.c.b16 %v1289_v21, %v1288_v39  ;;  %v1144_v32 = vsel %vm5804_vm13, %v1139_v40, %v1143_v27  ;;  %v1154_v43 = vsel %vm5804_vm13, %v1149_v16, %v1153_v22  ;;  %v1234_v48 = vor.u32 %v1233_v1, %v1230_v34  ;;  %v738_v13 = vld [vmem:[#allocation2 + $0x20] sm:$0x1]  ;;  %v359_v22 = vld [vmem:[%s5711_s22 + $0xa8] sm:$0xff]  ;;  %v273_v20 = vld [vmem:[#allocation2 + $0xb4] sm:$0x1] }
  0x75   : > { %v1296_v51 = vunpack.c.l.b16 %v1144_v32  ;;  %v1297_v8 = vunpack.c.l.b16 %v1154_v43  ;;  %v1244_v54 = vor.u32 %v1243_v44, %v1239_v5  ;;  %v1249_v14 = vrot.slane %v1247_v9, 5  ;;  %v366_v37 = vld [vmem:[%s5711_s22 + $0xe0] sm:$0xff]  ;;  %v329_v39 = vld [vmem:[#allocation2 + $0xbc] sm:$0x1]  ;;  %v367_v44 = vld [vmem:[%s5711_s22 + $0xe8] sm:$0xff] }
  0x76   : > { %5146 = vmatmul.msk.bf16.gmra.mxu1 %vm1328_vm12, %v1314_v47  ;;  %v1235_v57 = vrot.slane %v1234_v48, 4  ;;  %v430_v63 = vshrl.u32 %v6031_v12, 16  ;;  %v433_v26 = vshll.u32 %v6031_v12, 16  ;;  %v250_v2 = vsel %vm5693_vm4, 0, %v249_v49 }
  0x77   : > { %v1318_v15 = vpack.c.b16 %v1297_v8, %v1296_v51  ;;  %v1245_v0 = vrot.slane %v1244_v54, 4  ;;  %v735_v10 = vsel %vm5736_vm9, %v427_v62, %v734_v55  ;;  %251 = vst [vmem:[#allocation2 + $0x54] sm:$0x1] %v250_v2  ;;  %v306_v59 = vsel %vm5701_vm6, 0, %v305_v56 }
  0x78   : > { %v1240_v60 = vsel %vm5804_vm13, %v1235_v57, %v1239_v5  ;;  %v432_v6 = vrot.slane %v430_v63, 7  ;;  %736 = vst [vmem:[#allocation2 + $0x18] sm:$0xf] %v735_v10  ;;  %v507_v11 = vshrl.u32 %v6035_v45, 16  ;;  %v510_v23 = vshll.u32 %v6035_v45, 16 }
  0x79   : > { %5150 = vmatmul.msk.bf16.gmra.mxu2 %vm1328_vm12, %v1318_v15  ;;  %v1250_v12 = vsel %vm5804_vm13, %v1245_v0, %v1249_v14  ;;  %v1304_v50 = vunpack.c.l.b16 %v1240_v60  ;;  %307 = vst [vmem:[#allocation2 + $0x5c] sm:$0x1] %v306_v59  ;;  %v515_v21 = vshrl.u32 %v6038_v17, 16  ;;  %v518_v53 = vshll.u32 %v6038_v17, 16 }
  0x7a   : > { %v1305_v27 = vunpack.c.l.b16 %v1250_v12  ;;  %v435_v18 = vor.u32 %v433_v26, %v432_v6  ;;  %v437_v19 = vrot.slane %v432_v6, 4  ;;  %v509_v24 = vrot.slane %v507_v11, 7 }
  0x7b   : > { %v262_v25 = vsel %vm5693_vm4, 0, %v261_v4  ;;  %v318_v28 = vsel %vm5701_vm6, 0, %v317_v29  ;;  %v517_v33 = vrot.slane %v515_v21, 7  ;;  %v391_v36 = vpack.c.bf16 %v359_v22, %v359_v22  ;;  %v342_v4 = vld [vmem:[%s5711_s22 + $0x20] sm:$0xff] }
  0x7c   : > { %v1322_v30 = vpack.c.b16 %v1305_v27, %v1304_v50  ;;  %v436_v45 = vsel %vm5730_vm8, %v428_v58, %v435_v18  ;;  %v739_v42 = vsel %vm5693_vm4, %v437_v19, %v738_v13  ;;  %263 = vst [vmem:[#allocation2 + $0x84] sm:$0x1] %v262_v25  ;;  %v512_v17 = vor.u32 %v510_v23, %v509_v24 }
  0x7d   : > { %737 = vst.msk [vmem:[#allocation2 + $0x1c] sm:$0xf] %vm216_vm5, %v436_v45  ;;  %v513_v34 = vrot.slane %v509_v24, 4  ;;  %v575_v38 = vshrl.u32 %v6046_v31, 16  ;;  %v520_v40 = vor.u32 %v518_v53, %v517_v33  ;;  %v522_v16 = vrot.slane %v517_v33, 4 }
  0x7e   : > { %5154 = vmatmul.msk.bf16.gmra.mxu3 %vm1328_vm12, %v1322_v30  ;;  %740 = vst [vmem:[#allocation2 + $0x20] sm:$0x1] %v739_v42  ;;  %v578_v1 = vshll.u32 %v6046_v31, 16  ;;  %v274_v5 = vsel %vm5693_vm4, 0, %v273_v20  ;;  %v769_v9 = vld [vmem:[#allocation2 + $0x54] sm:$0xf]  ;;  %v398_v43 = vpack.c.bf16 %v366_v37, %v366_v37  ;;  %v399_v2 = vpack.c.bf16 %v367_v44, %v367_v44 }
  0x7f   : > { %319 = vst [vmem:[#allocation2 + $0x8c] sm:$0x1] %v318_v28  ;;  %v577_v47 = vrot.slane %v575_v38, 7  ;;  %v583_v32 = vshrl.u32 %v391_v36, 16  ;;  %v843_v48 = vld [vmem:[#allocation2 + $0x18] sm:$0xf]  ;;  %v521_v49 = vsel %vm5730_vm8, %v513_v34, %v520_v40  ;;  %v770_v51 = vsel %vm5736_vm9, %v512_v17, %v769_v9 }
  0x80   : > { %v586_v8 = vshll.u32 %v391_v36, 16  ;;  %275 = vst [vmem:[#allocation2 + $0xb4] sm:$0x1] %v274_v5  ;;  %v330_v31 = vsel %vm5701_vm6, 0, %v329_v39  ;;  %v940_v54 = vshrl.u32 %v843_v48, 16  ;;  %v943_v14 = vshll.u32 %v843_v48, 16 }
  0x81   : > { %771 = vst [vmem:[#allocation2 + $0x54] sm:$0xf] %v770_v51  ;;  %v773_v55 = vld [vmem:[#allocation2 + $0x5c] sm:$0x1]  ;;  %v580_v56 = vor.u32 %v578_v1, %v577_v47  ;;  %v581_v62 = vrot.slane %v577_v47, 4  ;;  %v585_v58 = vrot.slane %v583_v32, 7  ;;  %v6117_v42 = vpack.c.bf16 %v342_v4, %v342_v4 }
  0x82   : > { %772 = vst.msk [vmem:[#allocation2 + $0x58] sm:$0xf] %vm216_vm5, %v521_v49  ;;  %v774_v57 = vsel %vm5693_vm4, %v522_v16, %v773_v55  ;;  %v643_v63 = vshrl.u32 %v398_v43, 16  ;;  %v942_v15 = vrot.slane %v940_v54, 4  ;;  %v945_v0 = vrot.slane %v943_v14, 5 }
  0x83   : > { %775 = vst [vmem:[#allocation2 + $0x5c] sm:$0x1] %v774_v57  ;;  %v797_v26 = vld [vmem:[#allocation2 + $0x84] sm:$0xf]  ;;  %v588_v6 = vor.u32 %v586_v8, %v585_v58  ;;  %v590_v10 = vrot.slane %v585_v58, 4  ;;  %v646_v19 = vshll.u32 %v398_v43, 16 }
  0x84   : > { %v6099_v60 = vld [vmem:[#allocation2 + $0x1c] sm:$0xf]  ;;  %v798_v59 = vsel %vm5736_vm9, %v580_v56, %v797_v26  ;;  %331 = vst [vmem:[#allocation2 + $0xbc] sm:$0x1] %v330_v31  ;;  %v6103_v29 = vrot.slane %v643_v63, 7  ;;  %v946_v50 = vor.u32 %v945_v0, %v942_v15  ;;  %v651_v45 = vshrl.u32 %v399_v2, 16 }
  0x85   : > { %v6105_v12 = vld [vmem:[#allocation2 + $0x20] sm:$0x1]  ;;  %v949_v13 = vshll.u32 %v6099_v60, 16  ;;  %v953_v11 = vshrl.u32 %v6099_v60, 16  ;;  %799 = vst [vmem:[#allocation2 + $0x84] sm:$0xf] %v798_v59  ;;  %v589_v27 = vsel %vm5730_vm8, %v581_v62, %v588_v6 }
  0x86   : > { %v959_v23 = vshll.u32 %v6105_v12, 16  ;;  %v801_v18 = vld [vmem:[#allocation2 + $0x8c] sm:$0x1]  ;;  %v649_v21 = vrot.slane %v6103_v29, 4  ;;  %v947_v22 = vrot.slane %v946_v50, 4  ;;  %v648_v30 = vor.u32 %v646_v19, %v6103_v29 }
  0x87   : > { %v951_v24 = vrot.slane %v949_v13, 5  ;;  %v955_v53 = vrot.slane %v953_v11, 4  ;;  %800 = vst.msk [vmem:[#allocation2 + $0x88] sm:$0xf] %vm216_vm5, %v589_v27  ;;  %v802_v25 = vsel %vm5693_vm4, %v590_v10, %v801_v18  ;;  %v653_v1 = vrot.slane %v651_v45, 7  ;;  %v343_v63 = vld [vmem:[%s5711_s22 + $0x28] sm:$0xff] }
  0x88   : > { %v961_v28 = vrot.slane %v959_v23, 5  ;;  %v853_v20 = vld [vmem:[#allocation2 + $0x54] sm:$0xf]  ;;  %803 = vst [vmem:[#allocation2 + $0x8c] sm:$0x1] %v802_v25  ;;  %v654_v49 = vshll.u32 %v399_v2, 16 }
  0x89   : > { %v952_v33 = vsel %vm5804_vm13, %v947_v22, %v951_v24  ;;  %v956_v37 = vor.u32 %v955_v53, %v951_v24  ;;  %v6121_v17 = vld [vmem:[#allocation2 + $0x58] sm:$0xf]  ;;  %v1060_v34 = vshrl.u32 %v853_v20, 16  ;;  %v1063_v36 = vshll.u32 %v853_v20, 16  ;;  %v825_v13 = vld [vmem:[#allocation2 + $0xb4] sm:$0xf] }
  0x8a   : > { %v1280_v38 = vunpack.c.l.b16 %v952_v33  ;;  %v6123_v39 = vld [vmem:[#allocation2 + $0x5c] sm:$0x1]  ;;  %v1069_v40 = vshll.u32 %v6121_v17, 16  ;;  %v1073_v16 = vshrl.u32 %v6121_v17, 16  ;;  %v658_v51 = vrot.slane %v653_v1, 4 }
  0x8b   : > { %v957_v5 = vrot.slane %v956_v37, 4  ;;  %v1062_v44 = vrot.slane %v1060_v34, 4  ;;  %v1065_v9 = vrot.slane %v1063_v36, 5  ;;  %v1079_v47 = vshll.u32 %v6123_v39, 16  ;;  %v829_v18 = vld [vmem:[#allocation2 + $0xbc] sm:$0x1] }
  0x8c   : > { %v1071_v32 = vrot.slane %v1069_v40, 5  ;;  %v1075_v43 = vrot.slane %v1073_v16, 4  ;;  %v861_v48 = vld [vmem:[#allocation2 + $0x84] sm:$0xf]  ;;  %v656_v58 = vor.u32 %v654_v49, %v653_v1  ;;  %v375_v22 = vpack.c.bf16 %v343_v63, %v343_v63  ;;  %v293_v20 = vld [vmem:[#allocation2 + $0x2c] sm:$0x1] }
  0x8d   : > { %v962_v8 = vsel %vm5804_vm13, %v957_v5, %v961_v28  ;;  %v1066_v31 = vor.u32 %v1065_v9, %v1062_v44  ;;  %v1081_v54 = vrot.slane %v1079_v47, 5  ;;  %v1156_v14 = vshrl.u32 %v861_v48, 16  ;;  %v237_v19 = vld [vmem:[#allocation2 + $0x24] sm:$0x1] }
  0x8e   : > { %v1281_v55 = vunpack.c.l.b16 %v962_v8  ;;  %v1076_v56 = vor.u32 %v1075_v43, %v1071_v32  ;;  %v862_v57 = vld [vmem:[#allocation2 + $0x88] sm:$0xf]  ;;  %v1159_v62 = vshll.u32 %v861_v48, 16  ;;  %v657_v37 = vsel %vm5730_vm8, %v649_v21, %v656_v58 }
  0x8f   : > { %v1067_v15 = vrot.slane %v1066_v31, 4  ;;  %v883_v0 = vld [vmem:[#allocation2 + $0x8c] sm:$0x1]  ;;  %v1158_v26 = vrot.slane %v1156_v14, 4  ;;  %v1165_v4 = vshll.u32 %v862_v57, 16  ;;  %v1169_v6 = vshrl.u32 %v862_v57, 16 }
  0x90   : > { %v1310_v10 = vpack.c.b16 %v1281_v55, %v1280_v38  ;;  %v1077_v2 = vrot.slane %v1076_v56, 4  ;;  %v1161_v59 = vrot.slane %v1159_v62, 5  ;;  %v1175_v50 = vshll.u32 %v883_v0, 16  ;;  %828 = vst.msk [vmem:[#allocation2 + $0xb8] sm:$0xf] %vm216_vm5, %v657_v37 }
  0x91   : > { %v1072_v11 = vsel %vm5804_vm13, %v1067_v15, %v1071_v32  ;;  %v1167_v23 = vrot.slane %v1165_v4, 5  ;;  %v1171_v27 = vrot.slane %v1169_v6, 4  ;;  %v826_v34 = vsel %vm5736_vm9, %v648_v30, %v825_v13  ;;  %v5588_v8 = vld [vmem:[#allocation2 + $0x8] sm:$0x1]  ;;  %v5589_v14 = vld [vmem:[#allocation2 + $0x4] sm:$0xf] }
  0x92   : > { %5142 = vmatmul.msk.bf16.gmra.mxu0 %vm1328_vm12, %v1310_v10  ;;  %v1082_v24 = vsel %vm5804_vm13, %v1077_v2, %v1081_v54  ;;  %v1290_v53 = vunpack.c.l.b16 %v1072_v11  ;;  %v1162_v25 = vor.u32 %v1161_v59, %v1158_v26  ;;  %v1177_v28 = vrot.slane %v1175_v50, 5  ;;  %827 = vst [vmem:[#allocation2 + $0xb4] sm:$0xf] %v826_v34  ;;  %v3450_v62 = vld [vmem:[%s7484_s1 + $0xc] sm:$0x3] }
  0x93   : > { %v1291_v45 = vunpack.c.l.b16 %v1082_v24  ;;  %v1172_v33 = vor.u32 %v1171_v27, %v1167_v23  ;;  %v830_v38 = vsel %vm5693_vm4, %v658_v51, %v829_v18  ;;  %v238_v40 = vsel %vm5693_vm4, 0, %v237_v19  ;;  %v1690_v51 = vld [vmem:[#allocation2] sm:$0xe] }
  0x94   : > { %v1163_v36 = vrot.slane %v1162_v25, 4  ;;  %v294_v29 = vsel %vm5701_vm6, 0, %v293_v20  ;;  %v439_v21 = vshrl.u32 %v6117_v42, 16  ;;  %831 = vst [vmem:[#allocation2 + $0xbc] sm:$0x1] %v830_v38  ;;  %v447_v5 = vshrl.u32 %v375_v22, 16 }
  0x95   : > { %v1315_v16 = vpack.c.b16 %v1291_v45, %v1290_v53  ;;  %v1173_v1 = vrot.slane %v1172_v33, 4  ;;  %v450_v44 = vshll.u32 %v375_v22, 16  ;;  %239 = vst [vmem:[#allocation2 + $0x24] sm:$0x1] %v238_v40  ;;  %v442_v43 = vshll.u32 %v6117_v42, 16 }
  0x96   : > { %v1168_v30 = vsel %vm5804_vm13, %v1163_v36, %v1167_v23  ;;  %v441_v32 = vrot.slane %v439_v21, 7  ;;  %295 = vst [vmem:[#allocation2 + $0x2c] sm:$0x1] %v294_v29  ;;  %v449_v49 = vrot.slane %v447_v5, 7  ;;  %v1746_v31 = vrot.slane %v5588_v8, 5 }
  0x97   : > { %5147 = vmatmul.msk.bf16.gmra.mxu1 %vm1328_vm12, %v1315_v16  ;;  %v1178_v9 = vsel %vm5804_vm13, %v1173_v1, %v1177_v28  ;;  %v1298_v47 = vunpack.c.l.b16 %v1168_v30  ;;  %v1743_v55 = vrot.slane %v5589_v14, 5  ;;  %vm1738_vm14 = vcmask 1042432   ;;  %v870_v26 = vld [vmem:[#allocation2 + $0xb8] sm:$0xf]  ;;  %v2363_v36 = vld [vmem:[#allocation2 + $0xc] sm:$0xf] }
  0x98   : > { %v1299_v48 = vunpack.c.l.b16 %v1178_v9  ;;  %v445_v54 = vrot.slane %v441_v32, 4  ;;  %v452_v57 = vor.u32 %v450_v44, %v449_v49  ;;  %vm1739_vm15 = vcmask 1046532   ;;  %v5528_v16 = vld [vmem:[#allocation2] sm:$0xff]  ;;  %v2364_v1 = vld [vmem:[#allocation2 + $0x10] sm:$0xf] }
  0x99   : > { %v869_v58 = vld [vmem:[#allocation2 + $0xb4] sm:$0xf]  ;;  %v444_v63 = vor.u32 %v442_v43, %v441_v32  ;;  %v454_v42 = vrot.slane %v449_v49, 4  ;;  %v5236_v15 = vrot.slane %v1690_v51, 9  ;;  %v3580_v0 = vsel %vm1377_vm3, %v3450_v62, 0  ;;  %vm6166_vm1 = vmor %vm1738_vm14, %vm1739_vm15 }
  0x9a   : > { %v1319_v56 = vpack.c.b16 %v1299_v48, %v1298_v47  ;;  %v1252_v4 = vshrl.u32 %v869_v58, 16  ;;  %v1255_v6 = vshll.u32 %v869_v58, 16  ;;  %v453_v10 = vsel %vm5730_vm8, %v445_v54, %v452_v57  ;;  %3589 = vmatpush.bf16.msra.mxu2 %v3580_v0  ;;  %v4135_v48 = vld [vmem:[%s7484_s1 + $0xc] sm:$0xc] }
  0x9b   : > { %v1745_v2 = vrot.slane %v1743_v55, 4  ;;  %v887_v59 = vld [vmem:[#allocation2 + $0xbc] sm:$0x1]  ;;  %v1261_v50 = vshll.u32 %v870_v26, 16  ;;  %v1265_v13 = vshrl.u32 %v870_v26, 16  ;;  %v1744_v37 = vsel %vm6166_vm1, %v5236_v15, %v1743_v55 }
  0x9c   : > { %5151 = vmatmul.msk.bf16.gmra.mxu2 %vm1328_vm12, %v1319_v56  ;;  %744 = vst.msk [vmem:[#allocation2 + $0x28] sm:$0xf] %vm216_vm5, %v453_v10  ;;  %v1254_v11 = vrot.slane %v1252_v4, 4  ;;  %v1257_v23 = vrot.slane %v1255_v6, 5  ;;  %v1271_v27 = vshll.u32 %v887_v59, 16  ;;  %v1854_v30 = vunpack.c.l.b16 %v1744_v37 }
  0x9d   : > { %v741_v18 = vld [vmem:[#allocation2 + $0x24] sm:$0xf]  ;;  %v1263_v22 = vrot.slane %v1261_v50, 5  ;;  %v1267_v24 = vrot.slane %v1265_v13, 4  ;;  %v745_v25 = vld [vmem:[#allocation2 + $0x2c] sm:$0x1]  ;;  %v1747_v34 = vsel %vm6166_vm1, %v1745_v2, %v1746_v31  ;;  %v4185_v56 = vunpack.c.l.b16 %v4135_v48 }
  0x9e   : > { %v742_v53 = vsel %vm5736_vm9, %v444_v63, %v741_v18  ;;  %v1258_v28 = vor.u32 %v1257_v23, %v1254_v11  ;;  %v746_v20 = vsel %vm5693_vm4, %v454_v42, %v745_v25  ;;  %v1273_v33 = vrot.slane %v1271_v27, 5  ;;  %v3192_v15 = vld [vmem:[%s7484_s1 + $0x8] sm:$0xc]  ;;  %v4536_v6 = vld [vmem:[%s7484_s1 + $0x10] sm:$0x3] }
  0x9f   : > { %743 = vst [vmem:[#allocation2 + $0x24] sm:$0xf] %v742_v53  ;;  %v1268_v45 = vor.u32 %v1267_v24, %v1263_v22  ;;  %v1855_v5 = vunpack.c.l.b16 %v1747_v34  ;;  %v2412_v44 = vshrl.u32 %v2363_v36, 16  ;;  %v2415_v51 = vshll.u32 %v2363_v36, 16  ;;  %v1691_v13 = vld [vmem:[#allocation2 + $0xc] sm:$0xe] }
  0xa0   : > { %747 = vst [vmem:[#allocation2 + $0x2c] sm:$0x1] %v746_v20  ;;  %v1259_v38 = vrot.slane %v1258_v28, 4  ;;  %v2421_v8 = vshll.u32 %v2364_v1, 16  ;;  %v2425_v55 = vshrl.u32 %v2364_v1, 16  ;;  %v4186_v50 = vpack.c.b16 %v4185_v56, %v4185_v56  ;;  %v5529_v48 = vld [vmem:[#allocation2 + $0xc] sm:$0xff] }
  0xa1   : > { %v1269_v40 = vrot.slane %v1268_v45, 4  ;;  %v1886_v42 = vpack.c.b16 %v1855_v5, %v1854_v30  ;;  %v2414_v4 = vrot.slane %v2412_v44, 4  ;;  %v2417_v59 = vrot.slane %v2415_v51, 5  ;;  %v2365_v20 = vld [vmem:[#allocation2 + $0x14] sm:$0x1] }
  0xa2   : > { %v1264_v29 = vsel %vm5804_vm13, %v1259_v38, %v1263_v22  ;;  %v2423_v27 = vrot.slane %v2421_v8, 5  ;;  %v3242_v18 = vunpack.c.l.b16 %v3192_v15  ;;  %v2427_v24 = vrot.slane %v2425_v55, 4  ;;  %v2366_v51 = vld [vmem:[#allocation2 + $0x18] sm:$0xf]  ;;  %v5544_v55 = vld [vmem:[#allocation2 + $0xc] sm:$0xff] }
  0xa3   : > { %v6180_v21 = vld [vmem:[#allocation2 + $0x28] sm:$0xf]  ;;  %v1274_v9 = vsel %vm5804_vm13, %v1269_v40, %v1273_v33  ;;  %v1306_v47 = vunpack.c.l.b16 %v1264_v29  ;;  %v4187_v53 = vrot.slane %v4186_v50, 2  ;;  %v4634_v25 = vsel %vm1377_vm3, %v4536_v6, 0 }
  0xa4   : > { %v973_v32 = vshll.u32 %v6180_v21, 16  ;;  %v977_v43 = vshrl.u32 %v6180_v21, 16  ;;  %v1307_v49 = vunpack.c.l.b16 %v1274_v9  ;;  %v3243_v45 = vpack.c.b16 %v3242_v18, %v3242_v18  ;;  %4643 = vmatpush.bf16.msra.mxu0 %v4634_v25  ;;  %v2368_v18 = vld [vmem:[#allocation2 + $0x20] sm:$0x1] }
  0xa5   : > { %v5237_v33 = vrot.slane %v1691_v13, 9  ;;  %v1750_v37 = vrot.slane %v5990_v46, 5  ;;  %v4237_v36 = vsel %vm1377_vm3, %v4187_v53, 0  ;;  %v1753_v1 = vrot.slane %v5993_v52, 5 }
  0xa6   : > { %v845_v31 = vld [vmem:[#allocation2 + $0x24] sm:$0xf]  ;;  %v975_v54 = vrot.slane %v973_v32, 5  ;;  %v979_v14 = vrot.slane %v977_v43, 4  ;;  %v1323_v57 = vpack.c.b16 %v1307_v49, %v1306_v47  ;;  %4246 = vmatpush.bf16.msra.mxu3 %v4237_v36  ;;  %v3244_v40 = vrot.slane %v3243_v45, 2  ;;  %v5530_v45 = vld [vmem:[#allocation2 + $0x18] sm:$0xff] }
  0xa7   : > { %5220 = vmatmul.msk.bf16.vlgmr.msrb.gmra.mxu1 %vm1328_vm12, %v5528_v16  ;;  %v6190_v62 = vld [vmem:[#allocation2 + $0x2c] sm:$0x1]  ;;  %v964_v58 = vshrl.u32 %v845_v31, 16  ;;  %v967_v63 = vshll.u32 %v845_v31, 16  ;;  %v1752_v16 = vrot.slane %v1750_v37, 4  ;;  %v2418_v30 = vor.u32 %v2417_v59, %v2414_v4 }
  0xa8   : > { %v980_v0 = vor.u32 %v979_v14, %v975_v54  ;;  %v983_v26 = vshll.u32 %v6190_v62, 16  ;;  %5155 = vmatmul.msk.bf16.gmra.mxu3 %vm1328_vm12, %v1323_v57  ;;  %v2428_v5 = vor.u32 %v2427_v24, %v2423_v27  ;;  %v2431_v44 = vshll.u32 %v2365_v20, 16  ;;  %v2367_v14 = vld [vmem:[#allocation2 + $0x1c] sm:$0xf]  ;;  %v1692_v4 = vld [vmem:[#allocation2 + $0x18] sm:$0xe] }
  0xa9   : > { %v966_v10 = vrot.slane %v964_v58, 4  ;;  %v969_v2 = vrot.slane %v967_v63, 5  ;;  %v3294_v47 = vsel %vm1377_vm3, %v3244_v40, 0  ;;  %v1751_v46 = vsel %vm6166_vm1, %v5237_v33, %v1750_v37  ;;  %v5545_v40 = vld [vmem:[#allocation2 + $0x18] sm:$0xff] }
  0xaa   : > { %v981_v11 = vrot.slane %v980_v0, 4  ;;  %v985_v23 = vrot.slane %v983_v26, 5  ;;  %v1754_v32 = vsel %vm6166_vm1, %v1752_v16, %v1753_v1  ;;  %3303 = vmatpush.bf16.msra.mxu1 %v3294_v47  ;;  %v1856_v49 = vunpack.c.l.b16 %v1751_v46  ;;  %v1693_v46 = vld [vmem:[#allocation2 + $0x24] sm:$0xe] }
  0xab   : > { %v970_v22 = vor.u32 %v969_v2, %v966_v10  ;;  %v1857_v52 = vunpack.c.l.b16 %v1754_v32  ;;  %v2419_v8 = vrot.slane %v2418_v30, 4  ;;  %v2429_v31 = vrot.slane %v2428_v5, 4 }
  0xac   : > { %5252 = vmatmul.msk.bf16.vlgmr.msrb.gmra.mxu2 %vm1328_vm12, %v1886_v42  ;;  %v986_v28 = vsel %vm5804_vm13, %v981_v11, %v985_v23  ;;  %v2436_v56 = vshrl.u32 %v2366_v51, 16  ;;  %v2439_v57 = vshll.u32 %v2366_v51, 16  ;;  %v2445_v63 = vshll.u32 %v2367_v14, 16  ;;  %v2371_v51 = vld [vmem:[#allocation2 + $0x2c] sm:$0x1] }
  0xad   : > { %v971_v34 = vrot.slane %v970_v22, 4  ;;  %v1283_v38 = vunpack.c.l.b16 %v986_v28  ;;  %v1887_v58 = vpack.c.b16 %v1857_v52, %v1856_v49  ;;  %v2424_v42 = vsel %vm5804_vm13, %v2419_v8, %v2423_v27 }
  0xae   : > { %v2449_v0 = vshrl.u32 %v2367_v14, 16  ;;  %v1757_v26 = vrot.slane %v6099_v60, 5  ;;  %v2438_v6 = vrot.slane %v2436_v56, 4  ;;  %v2441_v10 = vrot.slane %v2439_v57, 5 }
  0xaf   : > { %v976_v29 = vsel %vm5804_vm13, %v971_v34, %v975_v54  ;;  %v2433_v54 = vrot.slane %v2431_v44, 5  ;;  %v2796_v2 = vunpack.c.l.b16 %v2424_v42  ;;  %v2447_v50 = vrot.slane %v2445_v63, 5  ;;  %v5531_v42 = vld [vmem:[#allocation2 + $0x24] sm:$0xff] }
  0xb0   : > { %v1282_v9 = vunpack.c.l.b16 %v976_v29  ;;  %v2451_v13 = vrot.slane %v2449_v0, 4  ;;  %v5238_v11 = vrot.slane %v1692_v4, 9  ;;  %v1759_v23 = vrot.slane %v1757_v26, 4 }
  0xb1   : > { %v2434_v15 = vsel %vm5804_vm13, %v2429_v31, %v2433_v54  ;;  %v1760_v27 = vrot.slane %v6105_v12, 5  ;;  %v2442_v22 = vor.u32 %v2441_v10, %v2438_v6  ;;  %v2455_v60 = vshll.u32 %v2368_v18, 16  ;;  %v2369_v12 = vld [vmem:[#allocation2 + $0x24] sm:$0xf] }
  0xb2   : > { %v1311_v43 = vpack.c.b16 %v1283_v38, %v1282_v9  ;;  %v2797_v59 = vunpack.c.l.b16 %v2434_v15  ;;  %v2452_v53 = vor.u32 %v2451_v13, %v2447_v50  ;;  %v1758_v25 = vsel %vm6166_vm1, %v5238_v11, %v1757_v26  ;;  %v2370_v38 = vld [vmem:[#allocation2 + $0x28] sm:$0xf]  ;;  %v2372_v26 = vld [vmem:[#allocation2 + $0x30] sm:$0xf] }
  0xb3   : > { %v1761_v28 = vsel %vm6166_vm1, %v1759_v23, %v1760_v27  ;;  %v2443_v20 = vrot.slane %v2442_v22, 4  ;;  %v1858_v33 = vunpack.c.l.b16 %v1758_v25  ;;  %v2457_v36 = vrot.slane %v2455_v60, 5  ;;  %v5590_v22 = vld [vmem:[#allocation2 + $0x34] sm:$0xf] }
  0xb4   : > { %5143 = vmatmul.msk.bf16.gmra.mxu0 %vm1328_vm12, %v1311_v43  ;;  %v2828_v24 = vpack.c.b16 %v2797_v59, %v2796_v2  ;;  %v1859_v37 = vunpack.c.l.b16 %v1761_v28  ;;  %v2453_v34 = vrot.slane %v2452_v53, 4  ;;  %v2460_v29 = vshrl.u32 %v2369_v12, 16  ;;  %v5546_v2 = vld [vmem:[#allocation2 + $0x24] sm:$0xff]  ;;  %v1694_v53 = vld [vmem:[#allocation2 + $0x30] sm:$0xe] }
  0xb5   : > { %v2448_v16 = vsel %vm5804_vm13, %v2443_v20, %v2447_v50  ;;  %v2463_v30 = vshll.u32 %v2369_v12, 16  ;;  %v2469_v5 = vshll.u32 %v2370_v38, 16  ;;  %v2473_v9 = vshrl.u32 %v2370_v38, 16  ;;  %v5591_v12 = vld [vmem:[#allocation2 + $0x38] sm:$0x1] }
  0xb6   : > { %v1888_v1 = vpack.c.b16 %v1859_v37, %v1858_v33  ;;  %v2458_v44 = vsel %vm5804_vm13, %v2453_v34, %v2457_v36  ;;  %v1764_v47 = vrot.slane %v6180_v21, 5  ;;  %v2798_v32 = vunpack.c.l.b16 %v2448_v16  ;;  %v6250_v33 = vpop.f32.mrf.mxu1 }
  0xb7   : > { %5221 = vmatmul.msk.bf16.gmra.mxu1 %vm1328_vm12, %v5529_v48  ;;  %v2799_v43 = vunpack.c.l.b16 %v2458_v44  ;;  %v2462_v48 = vrot.slane %v2460_v29, 4  ;;  %v2465_v49 = vrot.slane %v2463_v30, 5  ;;  %v2471_v52 = vrot.slane %v2469_v5, 5 }
  0xb8   : > { %5332 = vmatmul.msk.bf16.vlgmr.msrb.gmra.mxu3 %vm1328_vm12, %v5544_v55  ;;  %v2475_v8 = vrot.slane %v2473_v9, 4  ;;  %v5239_v31 = vrot.slane %v1693_v46, 9  ;;  %v1766_v54 = vrot.slane %v1764_v47, 4  ;;  %v1767_v14 = vrot.slane %v6190_v62, 5  ;;  %v2373_v62 = vld [vmem:[#allocation2 + $0x34] sm:$0xf] }
  0xb9   : > { %v2829_v55 = vpack.c.b16 %v2799_v43, %v2798_v32  ;;  %v2479_v56 = vshll.u32 %v2371_v51, 16  ;;  %v2466_v57 = vor.u32 %v2465_v49, %v2462_v48  ;;  %v2484_v59 = vshrl.u32 %v2372_v26, 16  ;;  %v2375_v49 = vld [vmem:[#allocation2 + $0x3c] sm:$0xf]  ;;  %v6257_v51 = vpop.f32.mrf.mxu2 }
  0xba   : > { %v2476_v21 = vor.u32 %v2475_v8, %v2471_v52  ;;  %v1768_v63 = vsel %vm6166_vm1, %v1766_v54, %v1767_v14  ;;  %v2487_v50 = vshll.u32 %v2372_v26, 16  ;;  %v2493_v11 = vshll.u32 %v2373_v62, 16  ;;  %v5547_v8 = vld [vmem:[#allocation2 + $0x30] sm:$0xff] }
  0xbb   : > { %v1861_v0 = vunpack.c.l.b16 %v1768_v63  ;;  %v2467_v4 = vrot.slane %v2466_v57, 4  ;;  %v2481_v10 = vrot.slane %v2479_v56, 5  ;;  %v2497_v18 = vshrl.u32 %v2373_v62, 16  ;;  %v5592_v63 = vld [vmem:[#allocation2 + $0x40] sm:$0xf] }
  0xbc   : > { %5253 = vmatmul.msk.bf16.gmra.mxu2 %vm1328_vm12, %v1887_v58  ;;  %v1765_v58 = vsel %vm6166_vm1, %v5239_v31, %v1764_v47  ;;  %v2477_v6 = vrot.slane %v2476_v21, 4  ;;  %v2486_v60 = vrot.slane %v2484_v59, 4  ;;  %v2489_v25 = vrot.slane %v2487_v50, 5  ;;  %v5532_v47 = vld [vmem:[#allocation2 + $0x30] sm:$0xff]  ;;  %v2377_v62 = vld [vmem:[#allocation2 + $0x44] sm:$0x1] }
  0xbd   : > { %v1860_v15 = vunpack.c.l.b16 %v1765_v58  ;;  %v2472_v23 = vsel %vm5804_vm13, %v2467_v4, %v2471_v52  ;;  %v2499_v37 = vrot.slane %v2497_v18, 4  ;;  %v5240_v34 = vrot.slane %v1694_v53, 9  ;;  %v2376_v52 = vld [vmem:[#allocation2 + $0x40] sm:$0xf] }
  0xbe   : > { %v2482_v27 = vsel %vm5804_vm13, %v2477_v6, %v2481_v10  ;;  %v2800_v28 = vunpack.c.l.b16 %v2472_v23  ;;  %v1774_v38 = vrot.slane %v5591_v12, 5  ;;  %v2490_v16 = vor.u32 %v2489_v25, %v2486_v60  ;;  %v6259_v31 = vpop.f32.mrf.mxu1  ;;  %v6272_v60 = vpop.f32.mrf.mxu3 }
  0xbf   : > { %v1889_v13 = vpack.c.b16 %v1861_v0, %v1860_v15  ;;  %v2801_v20 = vunpack.c.l.b16 %v2482_v27  ;;  %v2511_v56 = vshll.u32 %v2375_v49, 16  ;;  %v2517_v57 = vshll.u32 %v2376_v52, 16  ;;  %v1695_v15 = vld [vmem:[#allocation2 + $0x3c] sm:$0xe] }
  0xc0   : > { %v2491_v9 = vrot.slane %v2490_v16, 4  ;;  %v2521_v58 = vshrl.u32 %v2376_v52, 16  ;;  %v5241_v50 = vrot.slane %v1695_v15, 9  ;;  %v6279_v16 = vpop.f32.mrf.mxu0  ;;  %v1696_v52 = vld [vmem:[#allocation2 + $0x48] sm:$0xe] }
  0xc1   : > { %v2513_v6 = vrot.slane %v2511_v56, 5  ;;  %v2519_v10 = vrot.slane %v2517_v57, 5  ;;  %v6268_v59 = vpop.f32.mrf.mxu2 }
  0xc4   : > { %5348 = vmatmul.msk.bf16.vlgmr.msrb.gmra.mxu0 %vm1328_vm12, %v2828_v24  ;;  %v1771_v24 = vrot.slane %v5590_v22, 5  ;;  %v2527_v22 = vshll.u32 %v2377_v62, 16 }
  0xc6   : > { %v1773_v36 = vrot.slane %v1771_v24, 4  ;;  %v1772_v5 = vsel %vm6166_vm1, %v5240_v34, %v1771_v24  ;;  %v2378_v34 = vld [vmem:[#allocation2 + $0x48] sm:$0xf] }
  0xc7   : > { %5222 = vmatmul.msk.bf16.gmra.mxu1 %vm1328_vm12, %v5530_v45  ;;  %v2495_v45 = vrot.slane %v2493_v11, 5  ;;  %v1862_v46 = vunpack.c.l.b16 %v1772_v5  ;;  %v5593_v11 = vld [vmem:[#allocation2 + $0x44] sm:$0x1]  ;;  %v2535_v5 = vshll.u32 %v2378_v34, 16 }
  0xc8   : > { %5333 = vmatmul.msk.bf16.gmra.mxu3 %vm1328_vm12, %v5545_v40  ;;  %v2374_v40 = vld [vmem:[#allocation2 + $0x38] sm:$0x1]  ;;  %v1775_v44 = vsel %vm6166_vm1, %v1773_v36, %v1774_v38  ;;  %v1781_v23 = vrot.slane %v5593_v11, 5  ;;  %v2529_v38 = vrot.slane %v2527_v22, 5 }
  0xc9   : > { %v2500_v29 = vor.u32 %v2499_v37, %v2495_v45  ;;  %v2503_v30 = vshll.u32 %v2374_v40, 16  ;;  %v1863_v32 = vunpack.c.l.b16 %v1775_v44  ;;  %v2496_v54 = vsel %vm5804_vm13, %v2491_v9, %v2495_v45  ;;  %v2379_v40 = vld [vmem:[#allocation2 + $0x4c] sm:$0xf] }
  0xca   : > { %v2802_v0 = vunpack.c.l.b16 %v2496_v54 }
  0xcb   : > { %v2501_v43 = vrot.slane %v2500_v29, 4  ;;  %v2505_v48 = vrot.slane %v2503_v30, 5  ;;  %v1890_v14 = vpack.c.b16 %v1863_v32, %v1862_v46  ;;  %v2532_v30 = vshrl.u32 %v2378_v34, 16 }
  0xcc   : > { %5254 = vmatmul.msk.bf16.gmra.mxu2 %vm1328_vm12, %v1888_v1  ;;  %v2830_v1 = vpack.c.b16 %v2801_v20, %v2800_v28  ;;  %v5533_v20 = vld [vmem:[#allocation2 + $0x3c] sm:$0xff] }
  0xcd   : > { %v2506_v21 = vsel %vm5804_vm13, %v2501_v43, %v2505_v48  ;;  %v6270_v27 = vpop.f32.mrf.mxu1  ;;  %v2545_v43 = vshrl.u32 %v2379_v40, 16  ;;  %v5594_v48 = vld [vmem:[#allocation2 + $0x4c] sm:$0xf]  ;;  %v2534_v54 = vrot.slane %v2532_v30, 4 }
  0xce   : > { %v2803_v26 = vunpack.c.l.b16 %v2506_v21 }
  0xcf   : > { %v2547_v21 = vrot.slane %v2545_v43, 4  ;;  %v1697_v43 = vld [vmem:[#allocation2 + $0x54] sm:$0xe] }
  0xd0   : > { %v2831_v18 = vpack.c.b16 %v2803_v26, %v2802_v0  ;;  %v2380_v0 = vld [vmem:[#allocation2 + $0x50] sm:$0x1] }
  0xd4   : > { %5349 = vmatmul.msk.bf16.gmra.mxu0 %vm1328_vm12, %v2829_v55  ;;  %v2508_v55 = vshrl.u32 %v2375_v49, 16  ;;  %v1785_v49 = vrot.slane %v5594_v48, 5 }
  0xd5   : > { %v6281_v29 = vpop.f32.mrf.mxu1 }
  0xd6   : > { %v2510_v4 = vrot.slane %v2508_v55, 4 }
  0xd7   : > { %5223 = vmatmul.msk.bf16.gmra.mxu1 %vm1328_vm12, %v5531_v42  ;;  %v1778_v42 = vrot.slane %v5592_v63, 5  ;;  %v1787_v63 = vrot.slane %v1785_v49, 4 }
  0xd8   : > { %5334 = vmatmul.msk.bf16.gmra.mxu3 %vm1328_vm12, %v5546_v2  ;;  %v2523_v2 = vrot.slane %v2521_v58, 4  ;;  %v2514_v24 = vor.u32 %v2513_v6, %v2510_v4  ;;  %v5242_v58 = vrot.slane %v1696_v52, 9  ;;  %v6294_v6 = vpop.f32.mrf.mxu0 }
  0xd9   : > { %v1779_v25 = vsel %vm6166_vm1, %v5241_v50, %v1778_v42 }
  0xda   : > { %v2524_v53 = vor.u32 %v2523_v2, %v2519_v10  ;;  %v1864_v45 = vunpack.c.l.b16 %v1779_v25  ;;  %v2515_v36 = vrot.slane %v2514_v24, 4  ;;  %v6284_v44 = vpop.f32.mrf.mxu2  ;;  %v2551_v2 = vshll.u32 %v2380_v0, 16 }
  0xdc   : > { %5255 = vmatmul.msk.bf16.gmra.mxu2 %vm1328_vm12, %v1889_v13  ;;  %v1780_v13 = vrot.slane %v1778_v42, 4  ;;  %v2525_v12 = vrot.slane %v2524_v53, 4  ;;  %v2520_v46 = vsel %vm5804_vm13, %v2515_v36, %v2519_v10  ;;  %v5595_v42 = vld [vmem:[#allocation2 + $0x50] sm:$0x1]  ;;  %v2553_v25 = vrot.slane %v2551_v2, 5 }
  0xdd   : > { %v2804_v55 = vunpack.c.l.b16 %v2520_v46  ;;  %v1788_v15 = vrot.slane %v5595_v42, 5 }
  0xde   : > { %v1782_v28 = vsel %vm6166_vm1, %v1780_v13, %v1781_v23  ;;  %v2530_v32 = vsel %vm5804_vm13, %v2525_v12, %v2529_v38  ;;  %v1786_v13 = vsel %vm6166_vm1, %v5242_v58, %v1785_v49 }
  0xdf   : > { %v1865_v37 = vunpack.c.l.b16 %v1782_v28  ;;  %v2805_v56 = vunpack.c.l.b16 %v2530_v32  ;;  %v1789_v11 = vsel %vm6166_vm1, %v1787_v63, %v1788_v15  ;;  %v1866_v22 = vunpack.c.l.b16 %v1786_v13 }
  0xe0   : > { %v1867_v24 = vunpack.c.l.b16 %v1789_v11 }
  0xe1   : > { %v1891_v9 = vpack.c.b16 %v1865_v37, %v1864_v45  ;;  %v2832_v4 = vpack.c.b16 %v2805_v56, %v2804_v55  ;;  %v2382_v45 = vld [vmem:[#allocation2 + $0x58] sm:$0xf]  ;;  %v5549_v37 = vld [vmem:[#allocation2 + $0x48] sm:$0xff]  ;;  %v5243_v56 = vrot.slane %v1697_v43, 9  ;;  %v1698_v43 = vld [vmem:[#allocation2 + $0x60] sm:$0xe] }
  0xe2   : > { %v6298_v50 = vpop.f32.mrf.mxu2  ;;  %v1892_v36 = vpack.c.b16 %v1867_v24, %v1866_v22  ;;  %v2569_v30 = vshrl.u32 %v2382_v45, 16  ;;  %v2384_v24 = vld [vmem:[#allocation2 + $0x60] sm:$0xf] }
  0xe4   : > { %5350 = vmatmul.msk.bf16.gmra.mxu0 %vm1328_vm12, %v2830_v1  ;;  %v5548_v1 = vld [vmem:[#allocation2 + $0x3c] sm:$0xff]  ;;  %v2571_v55 = vrot.slane %v2569_v30, 4 }
  0xe7   : > { %5224 = vmatmul.msk.bf16.gmra.mxu1 %vm1328_vm12, %v5532_v47  ;;  %v2541_v47 = vshll.u32 %v2379_v40, 16  ;;  %v2565_v40 = vshll.u32 %v2382_v45, 16  ;;  %v2580_v45 = vshrl.u32 %v2384_v24, 16 }
  0xe8   : > { %5335 = vmatmul.msk.bf16.gmra.mxu3 %vm1328_vm12, %v5547_v8  ;;  %v6291_v8 = vpop.f32.mrf.mxu3 }
  0xe9   : > { %v2543_v57 = vrot.slane %v2541_v47, 5  ;;  %v1792_v47 = vrot.slane %v6121_v17, 5 }
  0xeb   : > { %v2548_v62 = vor.u32 %v2547_v21, %v2543_v57  ;;  %v1795_v21 = vrot.slane %v6123_v39, 5  ;;  %v1793_v0 = vsel %vm6166_vm1, %v5243_v56, %v1792_v47 }
  0xec   : > { %5256 = vmatmul.msk.bf16.gmra.mxu2 %vm1328_vm12, %v1890_v14  ;;  %v2537_v14 = vrot.slane %v2535_v5, 5  ;;  %v6312_v5 = vpop.f32.mrf.mxu0  ;;  %v1868_v13 = vunpack.c.l.b16 %v1793_v0 }
  0xed   : > { %v2549_v53 = vrot.slane %v2548_v62, 4 }
  0xee   : > { %v2538_v26 = vor.u32 %v2537_v14, %v2534_v54  ;;  %v2567_v54 = vrot.slane %v2565_v40, 5  ;;  %v2383_v14 = vld [vmem:[#allocation2 + $0x5c] sm:$0x1] }
  0xef   : > { %v2575_v17 = vshll.u32 %v2383_v14, 16 }
  0xf0   : > { %v2539_v23 = vrot.slane %v2538_v26, 4  ;;  %v6305_v28 = vpop.f32.mrf.mxu3  ;;  %v2572_v15 = vor.u32 %v2571_v55, %v2567_v54 }
  0xf2   : > { %v2544_v34 = vsel %vm5804_vm13, %v2539_v23, %v2543_v57  ;;  %v1794_v57 = vrot.slane %v1792_v47, 4  ;;  %v2573_v23 = vrot.slane %v2572_v15, 4  ;;  %v5597_v47 = vld [vmem:[#allocation2 + $0x68] sm:$0x1] }
  0xf3   : > { %v6296_v10 = vpop.f32.mrf.mxu1  ;;  %v2806_v46 = vunpack.c.l.b16 %v2544_v34 }
  0xf4   : > { %5351 = vmatmul.msk.bf16.gmra.mxu0 %vm1328_vm12, %v2831_v18  ;;  %v5534_v18 = vld [vmem:[#allocation2 + $0x48] sm:$0xff]  ;;  %v1796_v26 = vsel %vm6166_vm1, %v1794_v57, %v1795_v21  ;;  %v6328_v62 = vpop.f32.mrf.mxu0  ;;  %v5244_v57 = vrot.slane %v1698_v43, 9 }
  0xf5   : > { %v1869_v11 = vunpack.c.l.b16 %v1796_v26 }
  0xf7   : > { %5225 = vmatmul.msk.bf16.gmra.mxu1 %vm1328_vm12, %v5533_v20  ;;  %v2381_v20 = vld [vmem:[#allocation2 + $0x54] sm:$0xf] }
  0xf8   : > { %5336 = vmatmul.msk.bf16.gmra.mxu3 %vm1328_vm12, %v5548_v1  ;;  %v2556_v12 = vshrl.u32 %v2381_v20, 16  ;;  %v2559_v38 = vshll.u32 %v2381_v20, 16  ;;  %v2554_v1 = vsel %vm5804_vm13, %v2549_v53, %v2553_v25  ;;  %v6322_v58 = vpop.f32.mrf.mxu3  ;;  %v5550_v53 = vld [vmem:[#allocation2 + $0x54] sm:$0xff]  ;;  %v2385_v25 = vld [vmem:[#allocation2 + $0x64] sm:$0xf]  ;;  %v1893_v20 = vpack.c.b16 %v1869_v11, %v1868_v13 }
  0xf9   : > { %v2807_v48 = vunpack.c.l.b16 %v2554_v1  ;;  %v2593_v40 = vshrl.u32 %v2385_v25, 16  ;;  %v5596_v1 = vld [vmem:[#allocation2 + $0x64] sm:$0xf] }
  0xfa   : > { %v2558_v49 = vrot.slane %v2556_v12, 4  ;;  %v2561_v52 = vrot.slane %v2559_v38, 5  ;;  %v2589_v38 = vshll.u32 %v2385_v25, 16  ;;  %v1799_v30 = vrot.slane %v5596_v1, 5 }
  0xfb   : > { %v2833_v63 = vpack.c.b16 %v2807_v48, %v2806_v46  ;;  %v1802_v46 = vrot.slane %v5597_v47, 5  ;;  %v2595_v56 = vrot.slane %v2593_v40, 4 }
  0xfc   : > { %5257 = vmatmul.msk.bf16.gmra.mxu2 %vm1328_vm12, %v1891_v9  ;;  %v6315_v9 = vpop.f32.mrf.mxu1  ;;  %v6318_v32 = vpop.f32.mrf.mxu2  ;;  %v2562_v42 = vor.u32 %v2561_v52, %v2558_v49  ;;  %v2582_v52 = vrot.slane %v2580_v45, 4  ;;  %v2591_v55 = vrot.slane %v2589_v38, 5  ;;  %v1801_v21 = vrot.slane %v1799_v30, 4  ;;  %v2388_v38 = vld [vmem:[#allocation2 + $0x70] sm:$0xf] }
  0xfd   : > { %v1800_v13 = vsel %vm6166_vm1, %v5244_v57, %v1799_v30 }
  0xfe   : > { %v2563_v39 = vrot.slane %v2562_v42, 4  ;;  %v2596_v26 = vor.u32 %v2595_v56, %v2591_v55  ;;  %v1803_v11 = vsel %vm6166_vm1, %v1801_v21, %v1802_v46  ;;  %v5599_v56 = vld [vmem:[#allocation2 + $0x74] sm:$0x1]  ;;  %v1699_v21 = vld [vmem:[#allocation2 + $0x6c] sm:$0xe] }
  0xff   : > { %v1809_v57 = vrot.slane %v5599_v56, 5 }
 0x100   : > { %v2568_v34 = vsel %vm5804_vm13, %v2563_v39, %v2567_v54 }
 0x101   : > { %v6340_v12 = vpop.f32.mrf.mxu3  ;;  %v2808_v48 = vunpack.c.l.b16 %v2568_v34  ;;  %v2387_v34 = vld [vmem:[#allocation2 + $0x6c] sm:$0xf] }
 0x102   : > { %v2604_v47 = vshrl.u32 %v2387_v34, 16  ;;  %v2607_v46 = vshll.u32 %v2387_v34, 16 }
 0x104   : > { %5352 = vmatmul.msk.bf16.gmra.mxu0 %vm1328_vm12, %v2832_v4  ;;  %v5535_v4 = vld [vmem:[#allocation2 + $0x54] sm:$0xff]  ;;  %v6333_v22 = vpop.f32.mrf.mxu2 }
 0x107   : > { %5226 = vmatmul.msk.bf16.gmra.mxu1 %vm1328_vm12, %v5534_v18  ;;  %v2577_v18 = vrot.slane %v2575_v17, 5  ;;  %v2386_v17 = vld [vmem:[#allocation2 + $0x68] sm:$0x1] }
 0x108   : > { %5337 = vmatmul.msk.bf16.gmra.mxu3 %vm1328_vm12, %v5549_v37  ;;  %v2583_v37 = vshll.u32 %v2384_v24, 16  ;;  %v1870_v24 = vunpack.c.l.b16 %v1800_v13 }
 0x109   : > { %v6354_v39 = vpop.f32.mrf.mxu3 }
 0x10a   : > { %v2585_v54 = vrot.slane %v2583_v37, 5 }
 0x10c   : > { %5258 = vmatmul.msk.bf16.gmra.mxu2 %vm1328_vm12, %v1892_v36  ;;  %v2578_v36 = vsel %vm5804_vm13, %v2573_v23, %v2577_v18  ;;  %v2586_v0 = vor.u32 %v2585_v54, %v2582_v52  ;;  %v5536_v23 = vld [vmem:[#allocation2 + $0x60] sm:$0xff]  ;;  %v5598_v52 = vld [vmem:[#allocation2 + $0x70] sm:$0xf] }
 0x10d   : > { %v2809_v49 = vunpack.c.l.b16 %v2578_v36  ;;  %v5551_v36 = vld [vmem:[#allocation2 + $0x60] sm:$0xff]  ;;  %v1806_v54 = vrot.slane %v5598_v52, 5 }
 0x10e   : > { %v2587_v25 = vrot.slane %v2586_v0, 4  ;;  %v2606_v0 = vrot.slane %v2604_v47, 4 }
 0x10f   : > { %v2834_v15 = vpack.c.b16 %v2809_v49, %v2808_v48  ;;  %v2613_v49 = vshll.u32 %v2388_v38, 16 }
 0x110   : > { %v2592_v43 = vsel %vm5804_vm13, %v2587_v25, %v2591_v55 }
 0x111   : > { %v2615_v13 = vrot.slane %v2613_v49, 5 }
 0x114   : > { %v6330_v2 = vpop.f32.mrf.mxu1  ;;  %5353 = vmatmul.msk.bf16.gmra.mxu0 %vm1328_vm12, %v2833_v63  ;;  %v6346_v63 = vpop.f32.mrf.mxu0 }
 0x117   : > { %5227 = vmatmul.msk.bf16.gmra.mxu1 %vm1328_vm12, %v5535_v4  ;;  %v2599_v4 = vshll.u32 %v2386_v17, 16  ;;  %v2810_v17 = vunpack.c.l.b16 %v2592_v43 }
 0x118   : > { %5338 = vmatmul.msk.bf16.gmra.mxu3 %vm1328_vm12, %v5550_v53  ;;  %v1871_v53 = vunpack.c.l.b16 %v1803_v11 }
 0x119   : > { %v2601_v45 = vrot.slane %v2599_v4, 5 }
 0x11a   : > { %v1894_v30 = vpack.c.b16 %v1871_v53, %v1870_v24  ;;  %v2389_v24 = vld [vmem:[#allocation2 + $0x74] sm:$0x1] }
 0x11c   : > { %5259 = vmatmul.msk.bf16.gmra.mxu2 %vm1328_vm12, %v1893_v20  ;;  %v6344_v14 = vpop.f32.mrf.mxu1  ;;  %v2597_v20 = vrot.slane %v2596_v26, 4  ;;  %v6361_v1 = vpop.f32.mrf.mxu0  ;;  %v2609_v26 = vrot.slane %v2607_v46, 5  ;;  %v5537_v46 = vld [vmem:[#allocation2 + $0x6c] sm:$0xff] }
 0x11e   : > { %v2602_v48 = vsel %vm5804_vm13, %v2597_v20, %v2601_v45  ;;  %v2610_v20 = vor.u32 %v2609_v26, %v2606_v0 }
 0x11f   : > { %v6348_v42 = vpop.f32.mrf.mxu2 }
 0x120   : > { %v2611_v52 = vrot.slane %v2610_v20, 4 }
 0x124   : > { %v1610_v18 = vpop.f32.mrf.mxu1  ;;  %5354 = vmatmul.msk.bf16.gmra.mxu0 %vm1328_vm12, %v2834_v15  ;;  %v2811_v15 = vunpack.c.l.b16 %v2602_v48 }
 0x125   : > { %v1611_v37 = vadd.f32 %v1610_v18, %v6279_v16  ;;  %v2617_v16 = vshrl.u32 %v2388_v38, 16  ;;  %v1808_v18 = vrot.slane %v1806_v54, 4 }
 0x126   : > { %v2835_v25 = vpack.c.b16 %v2811_v15, %v2810_v17  ;;  %v2390_v17 = vld [vmem:[#allocation2 + $0x78] sm:$0xf] }
 0x127   : > { %v6358_v40 = vpop.f32.mrf.mxu2  ;;  %5228 = vmatmul.msk.bf16.gmra.mxu1 %vm1328_vm12, %v5536_v23  ;;  %v2619_v11 = vrot.slane %v2617_v16, 4  ;;  %v5245_v23 = vrot.slane %v1699_v21, 9 }
 0x128   : > { %5339 = vmatmul.msk.bf16.gmra.mxu3 %vm1328_vm12, %v5551_v36  ;;  %v2623_v36 = vshll.u32 %v2389_v24, 16  ;;  %v2616_v24 = vsel %vm5804_vm13, %v2611_v52, %v2615_v13 }
 0x129   : > { %v2620_v34 = vor.u32 %v2619_v11, %v2615_v13  ;;  %v1807_v38 = vsel %vm6166_vm1, %v5245_v23, %v1806_v54  ;;  %v5552_v54 = vld [vmem:[#allocation2 + $0x6c] sm:$0xff]  ;;  %v2628_v23 = vshrl.u32 %v2390_v17, 16 }
 0x12a   : > { %v1872_v48 = vunpack.c.l.b16 %v1807_v38  ;;  %v2625_v56 = vrot.slane %v2623_v36, 5  ;;  %v1700_v38 = vld [vmem:[#allocation2 + $0x78] sm:$0xe] }
 0x12b   : > { %v6369_v55 = vpop.f32.mrf.mxu3 }
 0x12c   : > { %5260 = vmatmul.msk.bf16.gmra.mxu2 %vm1328_vm12, %v1894_v30  ;;  %v1612_v4 = vpop.f32.mrf.mxu1  ;;  %7500 = vst [vmem:[#allocation3_spill] sm:$0xff] %v6369_v55  ;;  %v1810_v30 = vsel %vm6166_vm1, %v1808_v18, %v1809_v57  ;;  %v2391_v57 = vld [vmem:[#allocation2 + $0x7c] sm:$0xf]  ;;  %v2631_v18 = vshll.u32 %v2390_v17, 16 }
 0x12d   : > { %v1873_v49 = vunpack.c.l.b16 %v1810_v30  ;;  %v1613_v15 = vadd.f32 %v1612_v4, %v6294_v6  ;;  %v5600_v6 = vld [vmem:[#allocation2 + $0x7c] sm:$0xf]  ;;  %v2812_v30 = vunpack.c.l.b16 %v2616_v24 }
 0x12e   : > { %v1813_v4 = vrot.slane %v5600_v6, 5  ;;  %v2633_v13 = vrot.slane %v2631_v18, 5  ;;  %v5538_v18 = vld [vmem:[#allocation2 + $0x78] sm:$0xff] }
 0x12f   : > { %v1962_v53 = vpop.f32.mrf.mxu2  ;;  %v1895_v11 = vpack.c.b16 %v1873_v49, %v1872_v48 }
 0x130   : > { %v2042_v45 = vadd.f32 %v1962_v53, %v1611_v37  ;;  %v2621_v37 = vrot.slane %v2620_v34, 4  ;;  %v5601_v34 = vld [vmem:[#allocation2 + $0x80] sm:$0x1]  ;;  %v1815_v17 = vrot.slane %v1813_v4, 4 }
 0x131   : > { %v6375_v47 = vpop.f32.mrf.mxu0  ;;  %v1816_v36 = vrot.slane %v5601_v34, 5 }
 0x132   : > { %v2626_v53 = vsel %vm5804_vm13, %v2621_v37, %v2625_v56  ;;  %v5246_v56 = vrot.slane %v1700_v38, 9  ;;  %v2393_v38 = vld [vmem:[#allocation2 + $0x84] sm:$0xf] }
 0x133   : > { %v6378_v16 = vpop.f32.mrf.mxu3 }
 0x134   : > { %v1615_v43 = vpop.f32.mrf.mxu1  ;;  %5355 = vmatmul.msk.bf16.gmra.mxu0 %vm1328_vm12, %v2835_v25  ;;  %7501 = vst [vmem:[#allocation4_spill] sm:$0xff] %v6378_v16  ;;  %v2637_v25 = vshll.u32 %v2391_v57, 16  ;;  %v1814_v24 = vsel %vm6166_vm1, %v5246_v56, %v1813_v4  ;;  %v2394_v4 = vld [vmem:[#allocation2 + $0x88] sm:$0xf] }
 0x135   : > { %v1616_v21 = vadd.f32 %v1615_v43, %v6312_v5  ;;  %v2641_v5 = vshrl.u32 %v2391_v57, 16  ;;  %v2630_v43 = vrot.slane %v2628_v23, 4  ;;  %v2392_v57 = vld [vmem:[#allocation2 + $0x80] sm:$0x1] }
 0x136   : > { %v2639_v52 = vrot.slane %v2637_v25, 5  ;;  %v2647_v55 = vshll.u32 %v2392_v57, 16 }
 0x137   : > { %v1964_v0 = vpop.f32.mrf.mxu2  ;;  %5229 = vmatmul.msk.bf16.gmra.mxu1 %vm1328_vm12, %v5537_v46  ;;  %v2813_v46 = vunpack.c.l.b16 %v2626_v53  ;;  %v2643_v37 = vrot.slane %v2641_v5, 4  ;;  %v2634_v6 = vor.u32 %v2633_v13, %v2630_v43  ;;  %v1874_v5 = vunpack.c.l.b16 %v1814_v24 }
 0x138   : > { %v2043_v26 = vadd.f32 %v1964_v0, %v1613_v15  ;;  %5340 = vmatmul.msk.bf16.gmra.mxu3 %vm1328_vm12, %v5552_v54  ;;  %v2649_v43 = vrot.slane %v2647_v55, 5  ;;  %v2661_v24 = vshll.u32 %v2394_v4, 16 }
 0x139   : > { %v6387_v20 = vpop.f32.mrf.mxu0  ;;  %v2836_v0 = vpack.c.b16 %v2813_v46, %v2812_v30  ;;  %v2644_v34 = vor.u32 %v2643_v37, %v2639_v52  ;;  %v5553_v37 = vld [vmem:[#allocation2 + $0x78] sm:$0xff] }
 0x13b   : > { %v2251_v49 = vpop.f32.mrf.mxu3  ;;  %v2645_v46 = vrot.slane %v2644_v34, 4 }
 0x13c   : > { %5261 = vmatmul.msk.bf16.gmra.mxu2 %vm1328_vm12, %v1895_v11  ;;  %v1617_v48 = vpop.f32.mrf.mxu1  ;;  %v2331_v15 = vadd.f32 %v2251_v49, %v2042_v45  ;;  %v1817_v11 = vsel %vm6166_vm1, %v1815_v17, %v1816_v36  ;;  %v2652_v17 = vshrl.u32 %v2393_v38, 16 }
 0x13d   : > { %v1875_v45 = vunpack.c.l.b16 %v1817_v11  ;;  %v1618_v36 = vadd.f32 %v1617_v48, %v6328_v62  ;;  %v2650_v55 = vsel %vm5804_vm13, %v2645_v46, %v2649_v43  ;;  %v1701_v11 = vld [vmem:[#allocation2 + $0x84] sm:$0xe] }
 0x13e   : > { %v2654_v48 = vrot.slane %v2652_v17, 4  ;;  %v5247_v43 = vrot.slane %v1701_v11, 9 }
 0x13f   : > { %v1967_v54 = vpop.f32.mrf.mxu2 }
 0x140   : > { %v2044_v16 = vadd.f32 %v1967_v54, %v1616_v21  ;;  %v2635_v21 = vrot.slane %v2634_v6, 4  ;;  %v1896_v54 = vpack.c.b16 %v1875_v45, %v1874_v5  ;;  %v2815_v45 = vunpack.c.l.b16 %v2650_v55 }
 0x141   : > { %v2904_v23 = vpop.f32.mrf.mxu0 }
 0x142   : > { %v6395_v53 = vadd.f32 %v2904_v23, %v2331_v15  ;;  %v2655_v15 = vshll.u32 %v2393_v38, 16 }
 0x143   : > { %v2253_v30 = vpop.f32.mrf.mxu3 }
 0x144   : > { %v1620_v25 = vpop.f32.mrf.mxu1  ;;  %5356 = vmatmul.msk.bf16.gmra.mxu0 %vm1328_vm12, %v2836_v0  ;;  %v2332_v49 = vadd.f32 %v2253_v30, %v2043_v26  ;;  %v2640_v0 = vsel %vm5804_vm13, %v2635_v21, %v2639_v52  ;;  %v5602_v26 = vld [vmem:[#allocation2 + $0x88] sm:$0xf]  ;;  %v2657_v34 = vrot.slane %v2655_v15, 5  ;;  %v2663_v52 = vrot.slane %v2661_v24, 5 }
 0x145   : > { %v1621_v13 = vadd.f32 %v1620_v25, %v6346_v63  ;;  %v2665_v63 = vshrl.u32 %v2394_v4, 16  ;;  %v1820_v62 = vrot.slane %v5602_v26, 5  ;;  %v2814_v5 = vunpack.c.l.b16 %v2640_v0 }
 0x147   : > { %v1969_v56 = vpop.f32.mrf.mxu2  ;;  %5230 = vmatmul.msk.bf16.gmra.mxu1 %vm1328_vm12, %v5538_v18  ;;  %v5603_v18 = vld [vmem:[#allocation2 + $0x8c] sm:$0x1]  ;;  %v2667_v21 = vrot.slane %v2665_v63, 4  ;;  %v1822_v4 = vrot.slane %v1820_v62, 4  ;;  %v1821_v0 = vsel %vm6166_vm1, %v5247_v43, %v1820_v62  ;;  %v5539_v63 = vld [vmem:[#allocation2 + $0x84] sm:$0xff] }
 0x148   : > { %v2045_v57 = vadd.f32 %v1969_v56, %v1618_v36  ;;  %5341 = vmatmul.msk.bf16.gmra.mxu3 %vm1328_vm12, %v5553_v37  ;;  %v1823_v25 = vrot.slane %v5603_v18, 5  ;;  %v2395_v36 = vld [vmem:[#allocation2 + $0x8c] sm:$0x1]  ;;  %v2658_v56 = vor.u32 %v2657_v34, %v2654_v48  ;;  %v2396_v48 = vld [vmem:[#allocation2 + $0x90] sm:$0xf] }
 0x149   : > { %v2906_v6 = vpop.f32.mrf.mxu0  ;;  %v2671_v26 = vshll.u32 %v2395_v36, 16  ;;  %v2397_v62 = vld [vmem:[#allocation2 + $0x94] sm:$0xf]  ;;  %v2676_v43 = vshrl.u32 %v2396_v48, 16  ;;  %v2679_v36 = vshll.u32 %v2396_v48, 16 }
 0x14a   : > { %v6406_v23 = vadd.f32 %v2906_v6, %v2332_v49  ;;  %v2837_v49 = vpack.c.b16 %v2815_v45, %v2814_v5  ;;  %v2668_v6 = vor.u32 %v2667_v21, %v2663_v52  ;;  %v2659_v55 = vrot.slane %v2658_v56, 4 }
 0x14b   : > { %v2256_v30 = vpop.f32.mrf.mxu3  ;;  %v2673_v5 = vrot.slane %v2671_v26, 5  ;;  %v2685_v56 = vshll.u32 %v2397_v62, 16  ;;  %v5605_v26 = vld [vmem:[#allocation2 + $0x98] sm:$0x1] }
 0x14c   : > { %5262 = vmatmul.msk.bf16.gmra.mxu2 %vm1328_vm12, %v1896_v54  ;;  %v1622_v38 = vpop.f32.mrf.mxu1  ;;  %v2333_v37 = vadd.f32 %v2256_v30, %v2044_v16  ;;  %v1824_v54 = vsel %vm6166_vm1, %v1822_v4, %v1823_v25  ;;  %v1876_v16 = vunpack.c.l.b16 %v1821_v0  ;;  %v2669_v34 = vrot.slane %v2668_v6, 4  ;;  %v5554_v30 = vld [vmem:[#allocation2 + $0x84] sm:$0xff] }
 0x14d   : > { %v1623_v46 = vadd.f32 %v1622_v38, %v6361_v1  ;;  %v1877_v18 = vunpack.c.l.b16 %v1824_v54  ;;  %v2664_v25 = vsel %vm5804_vm13, %v2659_v55, %v2663_v52  ;;  %v1830_v0 = vrot.slane %v5605_v26, 5  ;;  %v1702_v54 = vld [vmem:[#allocation2 + $0x90] sm:$0xe] }
 0x14e   : > { %v2816_v52 = vunpack.c.l.b16 %v2664_v25 }
 0x14f   : > { %v1972_v17 = vpop.f32.mrf.mxu2 }
 0x150   : > { %v2046_v15 = vadd.f32 %v1972_v17, %v1621_v13  ;;  %v2674_v17 = vsel %vm5804_vm13, %v2669_v34, %v2673_v5  ;;  %v5248_v34 = vrot.slane %v1702_v54, 9 }
 0x151   : > { %v2909_v24 = vpop.f32.mrf.mxu0  ;;  %v2817_v55 = vunpack.c.l.b16 %v2674_v17  ;;  %v2399_v17 = vld [vmem:[#allocation2 + $0x9c] sm:$0xf] }
 0x152   : > { %v6414_v1 = vadd.f32 %v2909_v24, %v2333_v37  ;;  %v1897_v37 = vpack.c.b16 %v1877_v18, %v1876_v16 }
 0x153   : > { %v2258_v13 = vpop.f32.mrf.mxu3  ;;  %v2838_v25 = vpack.c.b16 %v2817_v55, %v2816_v52 }
 0x154   : > { %v1625_v11 = vpop.f32.mrf.mxu1  ;;  %5357 = vmatmul.msk.bf16.gmra.mxu0 %vm1328_vm12, %v2837_v49  ;;  %v2334_v38 = vadd.f32 %v2258_v13, %v2045_v57  ;;  %v2689_v49 = vshrl.u32 %v2397_v62, 16 }
 0x155   : > { %v1626_v45 = vadd.f32 %v1625_v11, %v6375_v47  ;;  %v5604_v47 = vld [vmem:[#allocation2 + $0x94] sm:$0xf]  ;;  %v2687_v11 = vrot.slane %v2685_v56, 5 }
 0x156   : > { %v1827_v57 = vrot.slane %v5604_v47, 5  ;;  %v2691_v48 = vrot.slane %v2689_v49, 4  ;;  %v5540_v49 = vld [vmem:[#allocation2 + $0x90] sm:$0xff] }
 0x157   : > { %v1974_v21 = vpop.f32.mrf.mxu2  ;;  %5231 = vmatmul.msk.bf16.gmra.mxu1 %vm1328_vm12, %v5539_v63  ;;  %v2681_v63 = vrot.slane %v2679_v36, 5 }
 0x158   : > { %v2047_v4 = vadd.f32 %v1974_v21, %v1623_v46  ;;  %5342 = vmatmul.msk.bf16.gmra.mxu3 %vm1328_vm12, %v5554_v30  ;;  %v2678_v46 = vrot.slane %v2676_v43, 4  ;;  %v1829_v5 = vrot.slane %v1827_v57, 4  ;;  %v2398_v30 = vld [vmem:[#allocation2 + $0x98] sm:$0x1] }
 0x159   : > { %v2911_v6 = vpop.f32.mrf.mxu0  ;;  %v2695_v56 = vshll.u32 %v2398_v30, 16 }
 0x15a   : > { %v6424_v24 = vadd.f32 %v2911_v6, %v2334_v38  ;;  %v2682_v38 = vor.u32 %v2681_v63, %v2678_v46  ;;  %v2692_v6 = vor.u32 %v2691_v48, %v2687_v11  ;;  %v1831_v43 = vsel %vm6166_vm1, %v1829_v5, %v1830_v0 }
 0x15b   : > { %v2261_v18 = vpop.f32.mrf.mxu3  ;;  %v2700_v46 = vshrl.u32 %v2399_v17, 16  ;;  %v2697_v0 = vrot.slane %v2695_v56, 5 }
 0x15c   : > { %7502 = vst [vmem:[#allocation5_spill] sm:$0xff] %v6424_v24  ;;  %5263 = vmatmul.msk.bf16.gmra.mxu2 %vm1328_vm12, %v1897_v37  ;;  %v1627_v16 = vpop.f32.mrf.mxu1  ;;  %v2335_v62 = vadd.f32 %v2261_v18, %v2046_v15  ;;  %v1828_v37 = vsel %vm6166_vm1, %v5248_v34, %v1827_v57  ;;  %v2683_v52 = vrot.slane %v2682_v38, 4  ;;  %v2693_v55 = vrot.slane %v2692_v6, 4  ;;  %v5555_v18 = vld [vmem:[#allocation2 + $0x90] sm:$0xff] }
 0x15d   : > { %v1628_v13 = vadd.f32 %v1627_v16, %v6387_v20  ;;  %v2400_v20 = vld [vmem:[#allocation2 + $0xa0] sm:$0xf]  ;;  %v1878_v54 = vunpack.c.l.b16 %v1828_v37  ;;  %v1879_v16 = vunpack.c.l.b16 %v1831_v43  ;;  %v2703_v57 = vshll.u32 %v2399_v17, 16  ;;  %v2401_v17 = vld [vmem:[#allocation2 + $0xa4] sm:$0x1] }
 0x15e   : > { %v2709_v48 = vshll.u32 %v2400_v20, 16  ;;  %v2713_v34 = vshrl.u32 %v2400_v20, 16  ;;  %v2702_v37 = vrot.slane %v2700_v46, 4  ;;  %v1703_v20 = vld [vmem:[#allocation2 + $0x9c] sm:$0xe] }
 0x15f   : > { %v1977_v21 = vpop.f32.mrf.mxu2  ;;  %v1898_v30 = vpack.c.b16 %v1879_v16, %v1878_v54 }
 0x160   : > { %v2048_v47 = vadd.f32 %v1977_v21, %v1626_v45  ;;  %v2688_v21 = vsel %vm5804_vm13, %v2683_v52, %v2687_v11  ;;  %v2711_v38 = vrot.slane %v2709_v48, 5  ;;  %v2715_v6 = vrot.slane %v2713_v34, 4 }
 0x161   : > { %v2914_v36 = vpop.f32.mrf.mxu0  ;;  %v2818_v16 = vunpack.c.l.b16 %v2688_v21  ;;  %v2719_v34 = vshll.u32 %v2401_v17, 16  ;;  %v2402_v17 = vld [vmem:[#allocation2 + $0xa8] sm:$0xf] }
 0x162   : > { %v6432_v26 = vadd.f32 %v2914_v36, %v2335_v62  ;;  %v5606_v36 = vld [vmem:[#allocation2 + $0xa0] sm:$0xf]  ;;  %v2716_v48 = vor.u32 %v2715_v6, %v2711_v38 }
 0x163   : > { %v2263_v45 = vpop.f32.mrf.mxu3  ;;  %v1834_v56 = vrot.slane %v5606_v36, 5 }
 0x164   : > { %7503 = vst [vmem:[#allocation6_spill] sm:$0xff] %v6432_v26  ;;  %v1630_v15 = vpop.f32.mrf.mxu1  ;;  %5358 = vmatmul.msk.bf16.gmra.mxu0 %vm1328_vm12, %v2838_v25  ;;  %v2336_v63 = vadd.f32 %v2263_v45, %v2047_v4  ;;  %v2705_v25 = vrot.slane %v2703_v57, 5  ;;  %v2698_v4 = vsel %vm5804_vm13, %v2693_v55, %v2697_v0  ;;  %v5249_v57 = vrot.slane %v1703_v20, 9  ;;  %v2403_v20 = vld [vmem:[#allocation2 + $0xac] sm:$0xf] }
 0x165   : > { %v2819_v45 = vunpack.c.l.b16 %v2698_v4  ;;  %v1631_v0 = vadd.f32 %v1630_v15, %v6250_v33 }
 0x166   : > { %v2706_v46 = vor.u32 %v2705_v25, %v2702_v37  ;;  %v1835_v21 = vsel %vm6166_vm1, %v5249_v57, %v1834_v56  ;;  %v2721_v37 = vrot.slane %v2719_v34, 5  ;;  %v5541_v25 = vld [vmem:[#allocation2 + $0x9c] sm:$0xff]  ;;  %v2724_v34 = vshrl.u32 %v2402_v17, 16 }
 0x167   : > { %v1979_v5 = vpop.f32.mrf.mxu2  ;;  %5232 = vmatmul.msk.bf16.gmra.mxu1 %vm1328_vm12, %v5540_v49  ;;  %v1880_v15 = vunpack.c.l.b16 %v1835_v21  ;;  %v2737_v21 = vshrl.u32 %v2403_v20, 16 }
 0x168   : > { %v2049_v62 = vadd.f32 %v1979_v5, %v1628_v13  ;;  %5343 = vmatmul.msk.bf16.gmra.mxu3 %vm1328_vm12, %v5555_v18  ;;  %v5607_v13 = vld [vmem:[#allocation2 + $0xa4] sm:$0x1]  ;;  %v1836_v18 = vrot.slane %v1834_v56, 4 }
 0x169   : > { %v2916_v43 = vpop.f32.mrf.mxu0  ;;  %v1837_v54 = vrot.slane %v5607_v13, 5  ;;  %v2717_v13 = vrot.slane %v2716_v48, 4 }
 0x16a   : > { %v6441_v49 = vadd.f32 %v2916_v43, %v2336_v63  ;;  %v2839_v63 = vpack.c.b16 %v2819_v45, %v2818_v16  ;;  %v2707_v43 = vrot.slane %v2706_v46, 4 }
 0x16b   : > { %v2266_v52 = vpop.f32.mrf.mxu3  ;;  %v2722_v46 = vsel %vm5804_vm13, %v2717_v13, %v2721_v37  ;;  %v5608_v13 = vld [vmem:[#allocation2 + $0xac] sm:$0xf] }
 0x16c   : > { %7504 = vst [vmem:[#allocation7_spill] sm:$0xff] %v6441_v49  ;;  %5264 = vmatmul.msk.bf16.gmra.mxu2 %vm1328_vm12, %v1898_v30  ;;  %v1632_v11 = vpop.f32.mrf.mxu1  ;;  %v2337_v55 = vadd.f32 %v2266_v52, %v2048_v47  ;;  %v1838_v30 = vsel %vm6166_vm1, %v1836_v18, %v1837_v54  ;;  %v2712_v56 = vsel %vm5804_vm13, %v2707_v43, %v2711_v38  ;;  %v276_v54 = vld [vmem:[#allocation2 + $0xc0] sm:$0x1]  ;;  %v1841_v37 = vrot.slane %v5608_v13, 5 }
 0x16d   : > { %v1881_v6 = vunpack.c.l.b16 %v1838_v30  ;;  %v5556_v52 = vld [vmem:[#allocation2 + $0x9c] sm:$0xff]  ;;  %v1633_v57 = vadd.f32 %v1632_v11, %v6259_v31  ;;  %v277_v18 = vsel %vm5693_vm4, 0, %v276_v54  ;;  %v2820_v11 = vunpack.c.l.b16 %v2712_v56 }
 0x16e   : > { %278 = vst [vmem:[#allocation2 + $0xc0] sm:$0x1] %v277_v18  ;;  %v2726_v54 = vrot.slane %v2724_v34, 4  ;;  %v1843_v13 = vrot.slane %v1841_v37, 4 }
 0x16f   : > { %v1982_v5 = vpop.f32.mrf.mxu2  ;;  %v1899_v43 = vpack.c.b16 %v1881_v6, %v1880_v15  ;;  %v2739_v15 = vrot.slane %v2737_v21, 4 }
 0x170   : > { %v2050_v36 = vadd.f32 %v1982_v5, %v1631_v0  ;;  %v369_v0 = vld [vmem:[%s5711_s22 + $0xf8] sm:$0xff]  ;;  %v2727_v5 = vshll.u32 %v2402_v17, 16 }
 0x171   : > { %v2919_v4 = vpop.f32.mrf.mxu0  ;;  %v401_v30 = vpack.c.bf16 %v369_v0, %v369_v0  ;;  %v5609_v0 = vld [vmem:[#allocation2 + $0xb0] sm:$0x1] }
 0x172   : > { %v6449_v47 = vadd.f32 %v2919_v4, %v2337_v55  ;;  %v368_v55 = vld [vmem:[%s5711_s22 + $0xf0] sm:$0xff] }
 0x173   : > { %v2268_v16 = vpop.f32.mrf.mxu3  ;;  %v400_v38 = vpack.c.bf16 %v368_v55, %v368_v55  ;;  %v668_v55 = vshrl.u32 %v401_v30, 16 }
 0x174   : > { %7505 = vst [vmem:[#allocation8_spill] sm:$0xff] %v6449_v47  ;;  %v1635_v33 = vpop.f32.mrf.mxu1  ;;  %5359 = vmatmul.msk.bf16.gmra.mxu0 %vm1328_vm12, %v2839_v63  ;;  %v2338_v45 = vadd.f32 %v2268_v16, %v2049_v62  ;;  %v2733_v63 = vshll.u32 %v2403_v20, 16  ;;  %v2821_v16 = vunpack.c.l.b16 %v2722_v46  ;;  %v1704_v47 = vld [vmem:[#allocation2 + $0xa8] sm:$0xe] }
 0x175   : > { %v660_v4 = vshrl.u32 %v400_v38, 16  ;;  %v663_v46 = vshll.u32 %v400_v38, 16  ;;  %v832_v49 = vld [vmem:[#allocation2 + $0xc0] sm:$0xf]  ;;  %v670_v24 = vrot.slane %v668_v55, 7 }
 0x176   : > { %v6468_v18 = vrot.slane %v2733_v63, 5  ;;  %v332_v63 = vld [vmem:[#allocation2 + $0xc8] sm:$0x1] }
 0x177   : > { %v1984_v48 = vpop.f32.mrf.mxu2  ;;  %5233 = vmatmul.msk.bf16.gmra.mxu1 %vm1328_vm12, %v5541_v25  ;;  %v2729_v25 = vrot.slane %v2727_v5, 5  ;;  %v662_v20 = vrot.slane %v660_v4, 7  ;;  %v1636_v5 = vadd.f32 %v1635_v33, %v6270_v27  ;;  %v671_v27 = vshll.u32 %v401_v30, 16 }
 0x178   : > { %v6462_v62 = vadd.f32 %v1984_v48, %v1633_v57  ;;  %5344 = vmatmul.msk.bf16.gmra.mxu3 %vm1328_vm12, %v5556_v52  ;;  %v2404_v57 = vld [vmem:[#allocation2 + $0xb0] sm:$0x1]  ;;  %v1844_v52 = vrot.slane %v5609_v0, 5  ;;  %v5250_v48 = vrot.slane %v1704_v47, 9  ;;  %v2740_v21 = vor.u32 %v2739_v15, %v6468_v18 }
 0x179   : > { %v2921_v31 = vpop.f32.mrf.mxu0  ;;  %v665_v4 = vor.u32 %v663_v46, %v662_v20  ;;  %v666_v38 = vrot.slane %v662_v20, 4 }
 0x17a   : > { %v6465_v17 = vadd.f32 %v2921_v31, %v2338_v45  ;;  %v2840_v45 = vpack.c.b16 %v2821_v16, %v2820_v11  ;;  %v2730_v31 = vor.u32 %v2729_v25, %v2726_v54  ;;  %v1842_v47 = vsel %vm6166_vm1, %v5250_v48, %v1841_v37  ;;  %v5542_v54 = vld [vmem:[#allocation2 + $0xa8] sm:$0xff]  ;;  %v2405_v25 = vld [vmem:[#allocation2 + $0xb4] sm:$0xf] }
 0x17b   : > { %v2271_v56 = vpop.f32.mrf.mxu3  ;;  %v833_v11 = vsel %vm5736_vm9, %v665_v4, %v832_v49  ;;  %v333_v16 = vsel %vm5701_vm6, 0, %v332_v63  ;;  %v1882_v37 = vunpack.c.l.b16 %v1842_v47  ;;  %v2741_v41 = vrot.slane %v2740_v21, 4  ;;  %v5610_v47 = vld [vmem:[#allocation2 + $0xb8] sm:$0xf] }
 0x17c   : > { %7506 = vst [vmem:[#allocation9_spill] sm:$0xff] %v6465_v17  ;;  %5265 = vmatmul.msk.bf16.gmra.mxu2 %vm1328_vm12, %v1899_v43  ;;  %v1637_v6 = vpop.f32.mrf.mxu1  ;;  %v2339_v34 = vadd.f32 %v2271_v56, %v2050_v36  ;;  %v2743_v17 = vshll.u32 %v2404_v57, 16  ;;  %v1845_v36 = vsel %vm6166_vm1, %v1843_v13, %v1844_v52  ;;  %v673_v57 = vor.u32 %v671_v27, %v670_v24  ;;  %v2406_v56 = vld [vmem:[#allocation2 + $0xb8] sm:$0xf]  ;;  %v5557_v13 = vld [vmem:[#allocation2 + $0xa8] sm:$0xff] }
 0x17d   : > { %834 = vst [vmem:[#allocation2 + $0xc0] sm:$0xf] %v833_v11  ;;  %v1883_v0 = vunpack.c.l.b16 %v1845_v36  ;;  %v2731_v20 = vrot.slane %v2730_v31, 4  ;;  %v1638_v46 = vadd.f32 %v1637_v6, %v6281_v29  ;;  %v2761_v63 = vshrl.u32 %v2406_v56, 16 }
 0x17e   : > { %334 = vst [vmem:[#allocation2 + $0xc8] sm:$0x1] %v333_v16  ;;  %v2745_v49 = vrot.slane %v2743_v17, 5  ;;  %v674_v52 = vsel %vm5730_vm8, %v666_v38, %v673_v57  ;;  %v675_v17 = vrot.slane %v670_v24, 4  ;;  %v1848_v36 = vrot.slane %v5610_v47, 5 }
 0x17f   : > { %v1987_v43 = vpop.f32.mrf.mxu2  ;;  %835 = vst.msk [vmem:[#allocation2 + $0xc4] sm:$0xf] %vm216_vm5, %v674_v52  ;;  %v1900_v21 = vpack.c.b16 %v1883_v0, %v1882_v37  ;;  %v2736_v35 = vsel %vm5804_vm13, %v2731_v20, %v6468_v18  ;;  %v2763_v27 = vrot.slane %v2761_v63, 4  ;;  %v5611_v24 = vld [vmem:[#allocation2 + $0xbc] sm:$0x1] }
 0x180   : > { %v6472_v26 = vadd.f32 %v1987_v43, %v1636_v5  ;;  %v2751_v5 = vshll.u32 %v2405_v25, 16  ;;  %v2746_v29 = vsel %vm5804_vm13, %v2741_v41, %v2745_v49  ;;  %v2407_v18 = vld [vmem:[#allocation2 + $0xbc] sm:$0x1]  ;;  %v2822_v37 = vunpack.c.l.b16 %v2736_v35 }
 0x181   : > { %v2924_v33 = vpop.f32.mrf.mxu0  ;;  %v2823_v0 = vunpack.c.l.b16 %v2746_v29  ;;  %v1850_v20 = vrot.slane %v1848_v36, 4 }
 0x182   : > { %v6482_v15 = vadd.f32 %v2924_v33, %v2339_v34  ;;  %v2748_v34 = vshrl.u32 %v2405_v25, 16  ;;  %v2753_v4 = vrot.slane %v2751_v5, 5  ;;  %v1705_v33 = vld [vmem:[#allocation2 + $0xb4] sm:$0xe] }
 0x183   : > { %v2273_v30 = vpop.f32.mrf.mxu3  ;;  %v2841_v5 = vpack.c.b16 %v2823_v0, %v2822_v37 }
 0x184   : > { %v1640_v55 = vpop.f32.mrf.mxu1  ;;  %5360 = vmatmul.msk.bf16.gmra.mxu0 %vm1328_vm12, %v2840_v45  ;;  %v2340_v48 = vadd.f32 %v2273_v30, %v6462_v62  ;;  %v2757_v45 = vshll.u32 %v2406_v56, 16  ;;  %v2750_v6 = vrot.slane %v2748_v34, 4  ;;  %v5251_v30 = vrot.slane %v1705_v33, 9 }
 0x185   : > { %v836_v11 = vld [vmem:[#allocation2 + $0xc8] sm:$0x1]  ;;  %v1641_v49 = vadd.f32 %v1640_v55, %v6296_v10 }
 0x186   : > { %v2759_v38 = vrot.slane %v2757_v45, 5  ;;  %v837_v57 = vsel %vm5693_vm4, %v675_v17, %v836_v11  ;;  %v2754_v52 = vor.u32 %v2753_v4, %v2750_v6  ;;  %v2408_v6 = vld [vmem:[#allocation2 + $0xc0] sm:$0xf]  ;;  %v2409_v47 = vld [vmem:[#allocation2 + $0xc4] sm:$0xf]  ;;  %v5558_v11 = vld [vmem:[#allocation2 + $0xb4] sm:$0xff] }
 0x187   : > { %v1989_v43 = vpop.f32.mrf.mxu2  ;;  %5234 = vmatmul.msk.bf16.gmra.mxu1 %vm1328_vm12, %v5542_v54  ;;  %v1851_v54 = vrot.slane %v5611_v24, 5  ;;  %838 = vst [vmem:[#allocation2 + $0xc8] sm:$0x1] %v837_v57  ;;  %v2772_v37 = vshrl.u32 %v2408_v6, 16  ;;  %v2775_v0 = vshll.u32 %v2408_v6, 16 }
 0x188   : > { %v2053_v31 = vadd.f32 %v1989_v43, %v1638_v46  ;;  %5345 = vmatmul.msk.bf16.gmra.mxu3 %vm1328_vm12, %v5557_v13  ;;  %v2767_v13 = vshll.u32 %v2407_v18, 16  ;;  %v1849_v43 = vsel %vm6166_vm1, %v5251_v30, %v1848_v36 }
 0x189   : > { %v2926_v62 = vpop.f32.mrf.mxu0  ;;  %v1852_v45 = vsel %vm6166_vm1, %v1850_v20, %v1851_v54  ;;  %v1884_v55 = vunpack.c.l.b16 %v1849_v43  ;;  %v2781_v20 = vshll.u32 %v2409_v47, 16  ;;  %v3016_v43 = vld [vmem:[#allocation2 + $0xc] sm:$0xe] }
 0x18a   : > { %v6497_v16 = vadd.f32 %v2926_v62, %v2340_v48  ;;  %v2764_v48 = vor.u32 %v2763_v27, %v2759_v38  ;;  %v2769_v35 = vrot.slane %v2767_v13, 5  ;;  %v5543_v62 = vld [vmem:[#allocation2 + $0xb4] sm:$0xff]  ;;  %v1885_v29 = vunpack.c.l.b16 %v1852_v45  ;;  %v5612_v27 = vld [vmem:[#allocation2 + $0x10] sm:$0xf] }
 0x18b   : > { %v2276_v56 = vpop.f32.mrf.mxu3  ;;  %v3082_v36 = vrot.slane %v5612_v27, 5 }
 0x18c   : > { %5266 = vmatmul.msk.bf16.gmra.mxu2 %vm1328_vm12, %v1900_v21  ;;  %v1642_v25 = vpop.f32.mrf.mxu1  ;;  %v2341_v41 = vadd.f32 %v2276_v56, %v6472_v26  ;;  %v2755_v21 = vrot.slane %v2754_v52, 4  ;;  %v2765_v17 = vrot.slane %v2764_v48, 4  ;;  %v1901_v30 = vpack.c.b16 %v1885_v29, %v1884_v55  ;;  %v5613_v52 = vld [vmem:[#allocation2 + $0x14] sm:$0x1] }
 0x18d   : > { %v1643_v24 = vadd.f32 %v1642_v25, %v6315_v9  ;;  %v3085_v48 = vrot.slane %v5613_v52, 5  ;;  %v6518_v25 = vld [vmem:[#allocation2 + $0x1c] sm:$0xf] }
 0x18e   : > { %v2760_v54 = vsel %vm5804_vm13, %v2755_v21, %v2759_v38  ;;  %v2770_v18 = vsel %vm5804_vm13, %v2765_v17, %v2769_v35  ;;  %v5364_v35 = vrot.slane %v3016_v43, 9  ;;  %v2410_v29 = vld [vmem:[#allocation2 + $0xc8] sm:$0x1] }
 0x18f   : > { %v1992_v46 = vpop.f32.mrf.mxu2  ;;  %v2824_v38 = vunpack.c.l.b16 %v2760_v54  ;;  %v2825_v13 = vunpack.c.l.b16 %v2770_v18 }
 0x190   : > { %v2054_v34 = vadd.f32 %v1992_v46, %v1641_v49  ;;  %v3703_v49 = vld [vmem:[#allocation2 + $0x18] sm:$0xf]  ;;  %v2774_v46 = vrot.slane %v2772_v37, 4 }
 0x191   : > { %v2929_v63 = vpop.f32.mrf.mxu0  ;;  %v3755_v6 = vshll.u32 %v3703_v49, 16  ;;  %v2842_v54 = vpack.c.b16 %v2825_v13, %v2824_v38 }
 0x192   : > { %v6508_v26 = vadd.f32 %v2929_v63, %v2341_v41  ;;  %v2785_v41 = vshrl.u32 %v2409_v47, 16  ;;  %v2783_v63 = vrot.slane %v2781_v20, 5  ;;  %v3765_v47 = vshrl.u32 %v6518_v25, 16 }
 0x193   : > { %v2278_v4 = vpop.f32.mrf.mxu3  ;;  %v2791_v20 = vshll.u32 %v2410_v29, 16 }
 0x194   : > { %v1645_v10 = vpop.f32.mrf.mxu1  ;;  %5361 = vmatmul.msk.bf16.gmra.mxu0 %vm1328_vm12, %v2841_v5  ;;  %v2342_v33 = vadd.f32 %v2278_v4, %v2053_v31  ;;  %v3084_v31 = vrot.slane %v3082_v36, 4  ;;  %v2777_v5 = vrot.slane %v2775_v0, 5  ;;  %v2787_v21 = vrot.slane %v2785_v41, 4 }
 0x195   : > { %v3761_v4 = vshll.u32 %v6518_v25, 16  ;;  %v3767_v43 = vrot.slane %v3765_v47, 4  ;;  %v2793_v13 = vrot.slane %v2791_v20, 5 }
 0x196   : > { %v2778_v18 = vor.u32 %v2777_v5, %v2774_v46 }
 0x197   : > { %v1994_v57 = vpop.f32.mrf.mxu2  ;;  %5235 = vmatmul.msk.bf16.gmra.mxu1 %vm1328_vm12, %v5543_v62  ;;  %v3752_v62 = vshrl.u32 %v3703_v49, 16 }
 0x198   : > { %v2055_v56 = vadd.f32 %v1994_v57, %v1643_v24  ;;  %5346 = vmatmul.msk.bf16.gmra.mxu3 %vm1328_vm12, %v5558_v11  ;;  %v1646_v11 = vadd.f32 %v1645_v10, %v6330_v2  ;;  %v3086_v24 = vsel %vm6166_vm1, %v3084_v31, %v3085_v48  ;;  %v6530_v10 = vld [vmem:[#allocation2 + $0x20] sm:$0x1] }
 0x199   : > { %v2931_v9 = vpop.f32.mrf.mxu0  ;;  %v3194_v0 = vunpack.c.l.b16 %v3086_v24  ;;  %v3754_v49 = vrot.slane %v3752_v62, 4 }
 0x19a   : > { %v6520_v45 = vadd.f32 %v2931_v9, %v2342_v33  ;;  %v3083_v33 = vsel %vm6166_vm1, %v5364_v35, %v3082_v36  ;;  %v3757_v9 = vrot.slane %v3755_v6, 5  ;;  %v2779_v35 = vrot.slane %v2778_v18, 4  ;;  %v5614_v18 = vld [vmem:[#allocation2 + $0x20] sm:$0x1] }
 0x19b   : > { %v2281_v55 = vpop.f32.mrf.mxu3  ;;  %v3193_v37 = vunpack.c.l.b16 %v3083_v33 }
 0x19c   : > { %5267 = vmatmul.msk.bf16.gmra.mxu2 %vm1328_vm12, %v1901_v30  ;;  %v1647_v17 = vpop.f32.mrf.mxu1  ;;  %v2343_v27 = vadd.f32 %v2281_v55, %v2054_v34  ;;  %v2788_v30 = vor.u32 %v2787_v21, %v2783_v63  ;;  %v3763_v34 = vrot.slane %v3761_v4, 5  ;;  %v3758_v46 = vor.u32 %v3757_v9, %v3754_v49  ;;  %v5559_v55 = vld [vmem:[#allocation2 + $0xc0] sm:$0xff] }
 0x19d   : > { %v3225_v52 = vpack.c.b16 %v3194_v0, %v3193_v37  ;;  %v3771_v21 = vshll.u32 %v6530_v10, 16  ;;  %v1648_v29 = vadd.f32 %v1647_v17, %v6344_v14  ;;  %v2784_v4 = vsel %vm5804_vm13, %v2779_v35, %v2783_v63  ;;  %v5615_v14 = vld [vmem:[#allocation2 + $0x1c] sm:$0xf]  ;;  %v3706_v37 = vld [vmem:[#allocation2 + $0x24] sm:$0xf] }
 0x19e   : > { %v2789_v31 = vrot.slane %v2788_v30, 4  ;;  %v3768_v5 = vor.u32 %v3767_v43, %v3763_v34  ;;  %v3759_v33 = vrot.slane %v3758_v46, 4  ;;  %v3089_v17 = vrot.slane %v5615_v14, 5  ;;  %v3017_v0 = vld [vmem:[#allocation2 + $0x18] sm:$0xe] }
 0x19f   : > { %v1997_v57 = vpop.f32.mrf.mxu2  ;;  %v2826_v63 = vunpack.c.l.b16 %v2784_v4  ;;  %v6546_v43 = vld [vmem:[#allocation2 + $0x28] sm:$0xf] }
 0x1a0   : > { %v2056_v41 = vadd.f32 %v1997_v57, %v1646_v11  ;;  %v2794_v11 = vsel %vm5804_vm13, %v2789_v31, %v2793_v13  ;;  %v3769_v24 = vrot.slane %v3768_v5, 4  ;;  %v3092_v57 = vrot.slane %v5614_v18, 5 }
 0x1a1   : > { %v2934_v2 = vpop.f32.mrf.mxu0  ;;  %v2827_v20 = vunpack.c.l.b16 %v2794_v11  ;;  %v3091_v9 = vrot.slane %v3089_v17, 4  ;;  %v3764_v31 = vsel %vm5804_vm13, %v3759_v33, %v3763_v34  ;;  %v3776_v13 = vshrl.u32 %v3706_v37, 16 }
 0x1a2   : > { %v6532_v36 = vadd.f32 %v2934_v2, %v2343_v27  ;;  %v5560_v27 = vld [vmem:[#allocation2 + $0x18] sm:$0xff] }
 0x1a3   : > { %v2283_v38 = vpop.f32.mrf.mxu3  ;;  %v2843_v4 = vpack.c.b16 %v2827_v20, %v2826_v63 }
 0x1a4   : > { %v1650_v48 = vpop.f32.mrf.mxu1  ;;  %5362 = vmatmul.msk.bf16.gmra.mxu0 %vm1328_vm12, %v2842_v54  ;;  %v2344_v62 = vadd.f32 %v2283_v38, %v2055_v56  ;;  %v3773_v54 = vrot.slane %v3771_v21, 5  ;;  %v3093_v21 = vsel %vm6166_vm1, %v3091_v9, %v3092_v57 }
 0x1a5   : > { %v1651_v35 = vadd.f32 %v1650_v48, %v6257_v51  ;;  %v3785_v51 = vshll.u32 %v6546_v43, 16  ;;  %v3789_v48 = vshrl.u32 %v6546_v43, 16 }
 0x1a6   : > { %v3774_v38 = vsel %vm5804_vm13, %v3769_v24, %v3773_v54  ;;  %v4360_v24 = vld [vmem:[#allocation2 + $0x18] sm:$0xe]  ;;  %v3778_v54 = vrot.slane %v3776_v13, 4 }
 0x1a7   : > { %v1999_v6 = vpop.f32.mrf.mxu2  ;;  %5380 = vmatmul.msk.bf16.vlgmr.msra.gmra.mxu1 %vm1328_vm12, %v3225_v52  ;;  %v5365_v52 = vrot.slane %v3017_v0, 9  ;;  %v4137_v33 = vunpack.c.l.b16 %v3774_v38  ;;  %v6560_v57 = vrot.slane %v3785_v51, 5  ;;  %v3791_v14 = vrot.slane %v3789_v48, 4  ;;  %v6564_v0 = vld [vmem:[#allocation2 + $0x2c] sm:$0x1] }
 0x1a8   : > { %v2057_v47 = vadd.f32 %v1999_v6, %v1648_v29  ;;  %5347 = vmatmul.msk.bf16.gmra.mxu3 %vm1328_vm12, %v5559_v55  ;;  %v3196_v6 = vunpack.c.l.b16 %v3093_v21  ;;  %v5492_v20 = vrot.slane %v4360_v24, 9  ;;  %v5561_v21 = vld [vmem:[#allocation2 + $0x24] sm:$0xff]  ;;  %v6577_v51 = vld [vmem:[#allocation2 + $0x34] sm:$0xf] }
 0x1a9   : > { %v2936_v56 = vpop.f32.mrf.mxu0  ;;  %v3090_v5 = vsel %vm6166_vm1, %v5365_v52, %v3089_v17  ;;  %v4429_v52 = vrot.slane %v6530_v10, 5  ;;  %v3792_v13 = vor.u32 %v3791_v14, %v6560_v57 }
 0x1aa   : > { %v6543_v30 = vadd.f32 %v2936_v56, %v2344_v62  ;;  %v3779_v62 = vshll.u32 %v3706_v37, 16  ;;  %v3195_v29 = vunpack.c.l.b16 %v3090_v5 }
 0x1ab   : > { %v2286_v2 = vpop.f32.mrf.mxu3 }
 0x1ac   : > { %5460 = vmatmul.msk.bf16.vlgmr.msra.gmra.mxu2 %vm1328_vm12, %v5560_v27  ;;  %v1652_v49 = vpop.f32.mrf.mxu1  ;;  %v2345_v46 = vadd.f32 %v2286_v2, %v2056_v41  ;;  %v4426_v27 = vrot.slane %v6518_v25, 5  ;;  %v4136_v41 = vunpack.c.l.b16 %v3764_v31  ;;  %v3781_v18 = vrot.slane %v3779_v62, 5 }
 0x1ad   : > { %v3226_v56 = vpack.c.b16 %v3196_v6, %v3195_v29  ;;  %v3709_v6 = vld [vmem:[#allocation2 + $0x30] sm:$0xf] }
 0x1ae   : > { %v4428_v25 = vrot.slane %v4426_v27, 4  ;;  %v4168_v2 = vpack.c.b16 %v4137_v33, %v4136_v41  ;;  %v3782_v38 = vor.u32 %v3781_v18, %v3778_v54  ;;  %v4427_v62 = vsel %vm6166_vm1, %v5492_v20, %v4426_v27  ;;  %v3018_v41 = vld [vmem:[#allocation2 + $0x24] sm:$0xe] }
 0x1af   : > { %v2002_v55 = vpop.f32.mrf.mxu2  ;;  %v4537_v27 = vunpack.c.l.b16 %v4427_v62  ;;  %v5366_v18 = vrot.slane %v3018_v41, 9  ;;  %v3803_v20 = vshll.u32 %v3709_v6, 16 }
 0x1b0   : > { %v2058_v34 = vadd.f32 %v2002_v55, %v1651_v35  ;;  %v1653_v35 = vadd.f32 %v1652_v49, %v6268_v59  ;;  %v4430_v10 = vsel %vm6166_vm1, %v4428_v25, %v4429_v52  ;;  %v5617_v59 = vld [vmem:[#allocation2 + $0x28] sm:$0xf]  ;;  %v3783_v48 = vrot.slane %v3782_v38, 4 }
 0x1b1   : > { %v2939_v11 = vpop.f32.mrf.mxu0  ;;  %v3096_v49 = vrot.slane %v5617_v59, 5  ;;  %v4538_v24 = vunpack.c.l.b16 %v4430_v10  ;;  %v3809_v25 = vshll.u32 %v6577_v51, 16  ;;  %v3813_v52 = vshrl.u32 %v6577_v51, 16 }
 0x1b2   : > { %v6562_v17 = vadd.f32 %v2939_v11, %v2345_v46  ;;  %v3795_v46 = vshll.u32 %v6564_v0, 16  ;;  %v3788_v38 = vsel %vm5804_vm13, %v3783_v48, %v6560_v57  ;;  %v6597_v57 = vld [vmem:[#allocation2 + $0x38] sm:$0x1] }
 0x1b3   : > { %v2288_v63 = vpop.f32.mrf.mxu3  ;;  %v4569_v10 = vpack.c.b16 %v4538_v24, %v4537_v27  ;;  %v6595_v59 = vrot.slane %v3809_v25, 5  ;;  %v4436_v24 = vrot.slane %v6564_v0, 5 }
 0x1b4   : > { %v1655_v37 = vpop.f32.mrf.mxu1  ;;  %5363 = vmatmul.msk.bf16.gmra.mxu0 %vm1328_vm12, %v2843_v4  ;;  %v2346_v9 = vadd.f32 %v2288_v63, %v2057_v47  ;;  %v5616_v47 = vld [vmem:[#allocation2 + $0x2c] sm:$0x1]  ;;  %v3793_v4 = vrot.slane %v3792_v13, 4  ;;  %v3797_v11 = vrot.slane %v3795_v46, 5  ;;  %v3800_v63 = vshrl.u32 %v3709_v6, 16 }
 0x1b5   : > { %v3099_v55 = vrot.slane %v5616_v47, 5  ;;  %v4138_v6 = vunpack.c.l.b16 %v3788_v38 }
 0x1b6   : > { %v3798_v13 = vsel %vm5804_vm13, %v3793_v4, %v3797_v11  ;;  %v3802_v47 = vrot.slane %v3800_v63, 4  ;;  %v3819_v63 = vshll.u32 %v6597_v57, 16 }
 0x1b7   : > { %v2004_v31 = vpop.f32.mrf.mxu2  ;;  %5381 = vmatmul.msk.bf16.gmra.mxu1 %vm1328_vm12, %v3226_v56  ;;  %v3098_v56 = vrot.slane %v3096_v49, 4  ;;  %v4139_v41 = vunpack.c.l.b16 %v3798_v13 }
 0x1b8   : > { %v2059_v5 = vadd.f32 %v2004_v31, %v1653_v35  ;;  %5476 = vmatmul.msk.bf16.vlgmr.msra.gmra.mxu3 %vm1328_vm12, %v4168_v2  ;;  %v1656_v35 = vadd.f32 %v1655_v37, %v6284_v44  ;;  %v4361_v37 = vld [vmem:[#allocation2 + $0x24] sm:$0xe] }
 0x1b9   : > { %v2941_v29 = vpop.f32.mrf.mxu0  ;;  %v3100_v31 = vsel %vm6166_vm1, %v3098_v56, %v3099_v55  ;;  %v3815_v55 = vrot.slane %v3813_v52, 4  ;;  %v5493_v11 = vrot.slane %v4361_v37, 9  ;;  %v4169_v25 = vpack.c.b16 %v4139_v41, %v4138_v6  ;;  %v3019_v37 = vld [vmem:[#allocation2 + $0x30] sm:$0xe]  ;;  %v6615_v41 = vld [vmem:[#allocation2 + $0x40] sm:$0xf] }
 0x1ba   : > { %v6579_v33 = vadd.f32 %v2941_v29, %v2346_v9  ;;  %v3097_v9 = vsel %vm6166_vm1, %v5366_v18, %v3096_v49  ;;  %v3198_v62 = vunpack.c.l.b16 %v3100_v31  ;;  %v3805_v29 = vrot.slane %v3803_v20, 5  ;;  %v5562_v31 = vld [vmem:[#allocation2 + $0x30] sm:$0xff] }
 0x1bb   : > { %v2291_v14 = vpop.f32.mrf.mxu3 }
 0x1bc   : > { %5461 = vmatmul.msk.bf16.gmra.mxu2 %vm1328_vm12, %v5561_v21  ;;  %v1657_v54 = vpop.f32.mrf.mxu1  ;;  %v2347_v2 = vadd.f32 %v2291_v14, %v2058_v34  ;;  %v3197_v21 = vunpack.c.l.b16 %v3097_v9  ;;  %v4433_v34 = vrot.slane %v6546_v43, 5  ;;  %v3806_v56 = vor.u32 %v3805_v29, %v3802_v47 }
 0x1bd   : > { %v3816_v14 = vor.u32 %v3815_v55, %v6595_v59  ;;  %v1658_v52 = vadd.f32 %v1657_v54, %v6298_v50  ;;  %v5619_v50 = vld [vmem:[#allocation2 + $0x34] sm:$0xf] }
 0x1be   : > { %v3227_v48 = vpack.c.b16 %v3198_v62, %v3197_v21  ;;  %v4435_v18 = vrot.slane %v4433_v34, 4  ;;  %v3807_v38 = vrot.slane %v3806_v56, 4  ;;  %v5618_v21 = vld [vmem:[#allocation2 + $0x38] sm:$0x1]  ;;  %v3103_v54 = vrot.slane %v5619_v50, 5 }
 0x1bf   : > { %v2007_v46 = vpop.f32.mrf.mxu2  ;;  %v3817_v13 = vrot.slane %v3816_v14, 4  ;;  %v3106_v62 = vrot.slane %v5618_v21, 5 }
 0x1c0   : > { %v2060_v44 = vadd.f32 %v2007_v46, %v1656_v35  ;;  %v4437_v0 = vsel %vm6166_vm1, %v4435_v18, %v4436_v24  ;;  %v3821_v46 = vrot.slane %v3819_v63, 5  ;;  %v3105_v6 = vrot.slane %v3103_v54, 4 }
 0x1c1   : > { %v2944_v49 = vpop.f32.mrf.mxu0  ;;  %v4540_v29 = vunpack.c.l.b16 %v4437_v0  ;;  %v3812_v18 = vsel %vm5804_vm13, %v3807_v38, %v6595_v59 }
 0x1c2   : > { %v6599_v4 = vadd.f32 %v2944_v49, %v2347_v2  ;;  %v4434_v2 = vsel %vm6166_vm1, %v5493_v11, %v4433_v34  ;;  %v5367_v49 = vrot.slane %v3019_v37, 9  ;;  %v3107_v63 = vsel %vm6166_vm1, %v3105_v6, %v3106_v62  ;;  %v6634_v37 = vld [vmem:[#allocation2 + $0x44] sm:$0x1] }
 0x1c3   : > { %v2293_v43 = vpop.f32.mrf.mxu3  ;;  %v4539_v34 = vunpack.c.l.b16 %v4434_v2 }
 0x1c4   : > { %v1660_v27 = vpop.f32.mrf.mxu1  ;;  %5508 = vmatmul.msk.bf16.vlgmr.msra.gmra.mxu0 %vm1328_vm12, %v4569_v10  ;;  %v2348_v20 = vadd.f32 %v2293_v43, %v2059_v5  ;;  %v3712_v10 = vld [vmem:[#allocation2 + $0x3c] sm:$0xf]  ;;  %v3822_v43 = vsel %vm5804_vm13, %v3817_v13, %v3821_v46  ;;  %v3104_v14 = vsel %vm6166_vm1, %v5367_v49, %v3103_v54  ;;  %v4362_v13 = vld [vmem:[#allocation2 + $0x30] sm:$0xe]  ;;  %v4443_v49 = vrot.slane %v6597_v57, 5 }
 0x1c5   : > { %v1661_v11 = vadd.f32 %v1660_v27, %v6318_v32  ;;  %v3824_v24 = vshrl.u32 %v3712_v10, 16  ;;  %v3833_v32 = vshll.u32 %v6615_v41, 16  ;;  %v3837_v27 = vshrl.u32 %v6615_v41, 16 }
 0x1c6   : > { %v4570_v2 = vpack.c.b16 %v4540_v29, %v4539_v34  ;;  %v4141_v38 = vunpack.c.l.b16 %v3822_v43  ;;  %v5494_v29 = vrot.slane %v4362_v13, 9 }
 0x1c7   : > { %v2009_v35 = vpop.f32.mrf.mxu2  ;;  %5382 = vmatmul.msk.bf16.gmra.mxu1 %vm1328_vm12, %v3227_v48  ;;  %v3826_v46 = vrot.slane %v3824_v24, 4  ;;  %v6630_v62 = vrot.slane %v3833_v32, 5  ;;  %v3839_v50 = vrot.slane %v3837_v27, 4  ;;  %v6647_v32 = vld [vmem:[#allocation2 + $0x4c] sm:$0xf] }
 0x1c8   : > { %v2061_v9 = vadd.f32 %v2009_v35, %v1658_v52  ;;  %5477 = vmatmul.msk.bf16.gmra.mxu3 %vm1328_vm12, %v4169_v25  ;;  %v3199_v52 = vunpack.c.l.b16 %v3104_v14  ;;  %v3200_v35 = vunpack.c.l.b16 %v3107_v63  ;;  %v5563_v63 = vld [vmem:[#allocation2 + $0x3c] sm:$0xff] }
 0x1c9   : > { %v2946_v5 = vpop.f32.mrf.mxu0  ;;  %v3840_v24 = vor.u32 %v3839_v50, %v6630_v62 }
 0x1ca   : > { %v6612_v47 = vadd.f32 %v2946_v5, %v2348_v20  ;;  %v3827_v20 = vshll.u32 %v3712_v10, 16  ;;  %v3228_v5 = vpack.c.b16 %v3200_v35, %v3199_v52  ;;  %v3715_v35 = vld [vmem:[#allocation2 + $0x48] sm:$0xf] }
 0x1cb   : > { %v2296_v48 = vpop.f32.mrf.mxu3 }
 0x1cc   : > { %5462 = vmatmul.msk.bf16.gmra.mxu2 %vm1328_vm12, %v5562_v31  ;;  %v1662_v55 = vpop.f32.mrf.mxu1  ;;  %v2349_v56 = vadd.f32 %v2296_v48, %v2060_v44  ;;  %v4440_v31 = vrot.slane %v6577_v51, 5  ;;  %v4140_v44 = vunpack.c.l.b16 %v3812_v18  ;;  %v3829_v21 = vrot.slane %v3827_v20, 5 }
 0x1ce   : > { %v4442_v51 = vrot.slane %v4440_v31, 4  ;;  %v4170_v48 = vpack.c.b16 %v4141_v38, %v4140_v44  ;;  %v3830_v43 = vor.u32 %v3829_v21, %v3826_v46  ;;  %v4441_v20 = vsel %vm6166_vm1, %v5494_v29, %v4440_v31  ;;  %v3020_v44 = vld [vmem:[#allocation2 + $0x3c] sm:$0xe] }
 0x1cf   : > { %v2012_v25 = vpop.f32.mrf.mxu2  ;;  %v4541_v31 = vunpack.c.l.b16 %v4441_v20  ;;  %v5368_v21 = vrot.slane %v3020_v44, 9  ;;  %v3851_v29 = vshll.u32 %v3715_v35, 16 }
 0x1d0   : > { %v2062_v59 = vadd.f32 %v2012_v25, %v1661_v11  ;;  %v1663_v11 = vadd.f32 %v1662_v55, %v6333_v22  ;;  %v4444_v57 = vsel %vm6166_vm1, %v4442_v51, %v4443_v49  ;;  %v5621_v22 = vld [vmem:[#allocation2 + $0x40] sm:$0xf]  ;;  %v3831_v27 = vrot.slane %v3830_v43, 4 }
 0x1d1   : > { %v2949_v0 = vpop.f32.mrf.mxu0  ;;  %v3110_v55 = vrot.slane %v5621_v22, 5  ;;  %v4542_v13 = vunpack.c.l.b16 %v4444_v57  ;;  %v3857_v51 = vshll.u32 %v6647_v32, 16  ;;  %v3861_v49 = vshrl.u32 %v6647_v32, 16 }
 0x1d2   : > { %v6632_v54 = vadd.f32 %v2949_v0, %v2349_v56  ;;  %v3843_v56 = vshll.u32 %v6634_v37, 16  ;;  %v3836_v43 = vsel %vm5804_vm13, %v3831_v27, %v6630_v62  ;;  %v6667_v62 = vld [vmem:[#allocation2 + $0x50] sm:$0x1] }
 0x1d3   : > { %v2298_v34 = vpop.f32.mrf.mxu3  ;;  %v4571_v57 = vpack.c.b16 %v4542_v13, %v4541_v31  ;;  %v6665_v22 = vrot.slane %v3857_v51, 5  ;;  %v4450_v13 = vrot.slane %v6634_v37, 5 }
 0x1d4   : > { %v1665_v10 = vpop.f32.mrf.mxu1  ;;  %5509 = vmatmul.msk.bf16.gmra.mxu0 %vm1328_vm12, %v4570_v2  ;;  %v2350_v6 = vadd.f32 %v2298_v34, %v2061_v9  ;;  %v5620_v9 = vld [vmem:[#allocation2 + $0x44] sm:$0x1]  ;;  %v3841_v2 = vrot.slane %v3840_v24, 4  ;;  %v3845_v0 = vrot.slane %v3843_v56, 5  ;;  %v3848_v34 = vshrl.u32 %v3715_v35, 16 }
 0x1d5   : > { %v3113_v25 = vrot.slane %v5620_v9, 5  ;;  %v4142_v35 = vunpack.c.l.b16 %v3836_v43 }
 0x1d6   : > { %v3846_v24 = vsel %vm5804_vm13, %v3841_v2, %v3845_v0  ;;  %v3850_v9 = vrot.slane %v3848_v34, 4  ;;  %v3867_v34 = vshll.u32 %v6667_v62, 16 }
 0x1d7   : > { %v2014_v18 = vpop.f32.mrf.mxu2  ;;  %5383 = vmatmul.msk.bf16.gmra.mxu1 %vm1328_vm12, %v3228_v5  ;;  %v3112_v5 = vrot.slane %v3110_v55, 4  ;;  %v4143_v44 = vunpack.c.l.b16 %v3846_v24 }
 0x1d8   : > { %v2063_v14 = vadd.f32 %v2014_v18, %v1663_v11  ;;  %5478 = vmatmul.msk.bf16.gmra.mxu3 %vm1328_vm12, %v4170_v48  ;;  %v1666_v11 = vadd.f32 %v1665_v10, %v6348_v42  ;;  %v4363_v10 = vld [vmem:[#allocation2 + $0x3c] sm:$0xe] }
 0x1d9   : > { %v2951_v52 = vpop.f32.mrf.mxu0  ;;  %v3114_v18 = vsel %vm6166_vm1, %v3112_v5, %v3113_v25  ;;  %v3863_v25 = vrot.slane %v3861_v49, 4  ;;  %v5495_v0 = vrot.slane %v4363_v10, 9  ;;  %v4171_v51 = vpack.c.b16 %v4143_v44, %v4142_v35  ;;  %v3021_v10 = vld [vmem:[#allocation2 + $0x48] sm:$0xe]  ;;  %v6685_v44 = vld [vmem:[#allocation2 + $0x58] sm:$0xf] }
 0x1da   : > { %v6649_v38 = vadd.f32 %v2951_v52, %v2350_v6  ;;  %v3111_v6 = vsel %vm6166_vm1, %v5368_v21, %v3110_v55  ;;  %v3202_v20 = vunpack.c.l.b16 %v3114_v18  ;;  %v3853_v52 = vrot.slane %v3851_v29, 5  ;;  %v5564_v18 = vld [vmem:[#allocation2 + $0x48] sm:$0xff] }
 0x1db   : > { %v2301_v50 = vpop.f32.mrf.mxu3 }
 0x1dc   : > { %5463 = vmatmul.msk.bf16.gmra.mxu2 %vm1328_vm12, %v5563_v63  ;;  %v1667_v46 = vpop.f32.mrf.mxu1  ;;  %v2351_v48 = vadd.f32 %v2301_v50, %v2062_v59  ;;  %v3201_v63 = vunpack.c.l.b16 %v3111_v6  ;;  %v4447_v59 = vrot.slane %v6615_v41, 5  ;;  %v3854_v5 = vor.u32 %v3853_v52, %v3850_v9 }
 0x1dd   : > { %v3864_v50 = vor.u32 %v3863_v25, %v6665_v22  ;;  %v1668_v49 = vadd.f32 %v1667_v46, %v6358_v40  ;;  %v5623_v40 = vld [vmem:[#allocation2 + $0x4c] sm:$0xf] }
 0x1de   : > { %v3229_v27 = vpack.c.b16 %v3202_v20, %v3201_v63  ;;  %v4449_v21 = vrot.slane %v4447_v59, 4  ;;  %v3855_v43 = vrot.slane %v3854_v5, 4  ;;  %v5622_v63 = vld [vmem:[#allocation2 + $0x50] sm:$0x1]  ;;  %v3117_v46 = vrot.slane %v5623_v40, 5 }
 0x1df   : > { %v2017_v56 = vpop.f32.mrf.mxu2  ;;  %v3865_v24 = vrot.slane %v3864_v50, 4  ;;  %v3120_v20 = vrot.slane %v5622_v63, 5 }
 0x1e0   : > { %v2064_v42 = vadd.f32 %v2017_v56, %v1666_v11  ;;  %v4451_v37 = vsel %vm6166_vm1, %v4449_v21, %v4450_v13  ;;  %v3869_v56 = vrot.slane %v3867_v34, 5  ;;  %v3119_v35 = vrot.slane %v3117_v46, 4 }
 0x1e1   : > { %v2954_v55 = vpop.f32.mrf.mxu0  ;;  %v4544_v52 = vunpack.c.l.b16 %v4451_v37  ;;  %v3860_v21 = vsel %vm5804_vm13, %v3855_v43, %v6665_v22 }
 0x1e2   : > { %v6669_v2 = vadd.f32 %v2954_v55, %v2351_v48  ;;  %v4448_v48 = vsel %vm6166_vm1, %v5495_v0, %v4447_v59  ;;  %v5369_v55 = vrot.slane %v3021_v10, 9  ;;  %v3121_v34 = vsel %vm6166_vm1, %v3119_v35, %v3120_v20  ;;  %v6704_v10 = vld [vmem:[#allocation2 + $0x5c] sm:$0x1] }
 0x1e3   : > { %v2303_v41 = vpop.f32.mrf.mxu3  ;;  %v4543_v59 = vunpack.c.l.b16 %v4448_v48 }
 0x1e4   : > { %v1670_v31 = vpop.f32.mrf.mxu1  ;;  %5510 = vmatmul.msk.bf16.gmra.mxu0 %vm1328_vm12, %v4571_v57  ;;  %v2352_v29 = vadd.f32 %v2303_v41, %v2063_v14  ;;  %v3718_v57 = vld [vmem:[#allocation2 + $0x54] sm:$0xf]  ;;  %v3870_v41 = vsel %vm5804_vm13, %v3865_v24, %v3869_v56  ;;  %v3118_v50 = vsel %vm6166_vm1, %v5369_v55, %v3117_v46  ;;  %v4364_v24 = vld [vmem:[#allocation2 + $0x48] sm:$0xe]  ;;  %v4457_v55 = vrot.slane %v6667_v62, 5 }
 0x1e5   : > { %v1671_v0 = vadd.f32 %v1670_v31, %v6272_v60  ;;  %v3872_v13 = vshrl.u32 %v3718_v57, 16  ;;  %v3881_v60 = vshll.u32 %v6685_v44, 16  ;;  %v3885_v31 = vshrl.u32 %v6685_v44, 16 }
 0x1e6   : > { %v4572_v48 = vpack.c.b16 %v4544_v52, %v4543_v59  ;;  %v4145_v43 = vunpack.c.l.b16 %v3870_v41  ;;  %v5496_v52 = vrot.slane %v4364_v24, 9 }
 0x1e7   : > { %v2019_v11 = vpop.f32.mrf.mxu2  ;;  %5384 = vmatmul.msk.bf16.gmra.mxu1 %vm1328_vm12, %v3229_v27  ;;  %v3874_v56 = vrot.slane %v3872_v13, 4  ;;  %v6700_v20 = vrot.slane %v3881_v60, 5  ;;  %v3887_v40 = vrot.slane %v3885_v31, 4  ;;  %v6717_v60 = vld [vmem:[#allocation2 + $0x64] sm:$0xf] }
 0x1e8   : > { %v2065_v6 = vadd.f32 %v2019_v11, %v1668_v49  ;;  %5479 = vmatmul.msk.bf16.gmra.mxu3 %vm1328_vm12, %v4171_v51  ;;  %v3203_v49 = vunpack.c.l.b16 %v3118_v50  ;;  %v3204_v11 = vunpack.c.l.b16 %v3121_v34  ;;  %v5565_v34 = vld [vmem:[#allocation2 + $0x54] sm:$0xff] }
 0x1e9   : > { %v2956_v14 = vpop.f32.mrf.mxu0  ;;  %v3888_v13 = vor.u32 %v3887_v40, %v6700_v20 }
 0x1ea   : > { %v6682_v9 = vadd.f32 %v2956_v14, %v2352_v29  ;;  %v3875_v29 = vshll.u32 %v3718_v57, 16  ;;  %v3230_v14 = vpack.c.b16 %v3204_v11, %v3203_v49  ;;  %v3721_v11 = vld [vmem:[#allocation2 + $0x60] sm:$0xf] }
 0x1eb   : > { %v2306_v27 = vpop.f32.mrf.mxu3 }
 0x1ec   : > { %5464 = vmatmul.msk.bf16.gmra.mxu2 %vm1328_vm12, %v5564_v18  ;;  %v1672_v25 = vpop.f32.mrf.mxu1  ;;  %v2353_v5 = vadd.f32 %v2306_v27, %v2064_v42  ;;  %v4454_v18 = vrot.slane %v6647_v32, 5  ;;  %v4144_v42 = vunpack.c.l.b16 %v3860_v21  ;;  %v3877_v63 = vrot.slane %v3875_v29, 5 }
 0x1ee   : > { %v4456_v32 = vrot.slane %v4454_v18, 4  ;;  %v4172_v27 = vpack.c.b16 %v4145_v43, %v4144_v42  ;;  %v3878_v41 = vor.u32 %v3877_v63, %v3874_v56  ;;  %v4455_v29 = vsel %vm6166_vm1, %v5496_v52, %v4454_v18  ;;  %v3022_v42 = vld [vmem:[#allocation2 + $0x54] sm:$0xe] }
 0x1ef   : > { %v2022_v51 = vpop.f32.mrf.mxu2  ;;  %v4545_v18 = vunpack.c.l.b16 %v4455_v29  ;;  %v5370_v63 = vrot.slane %v3022_v42, 9  ;;  %v3899_v52 = vshll.u32 %v3721_v11, 16 }
 0x1f0   : > { %v2066_v22 = vadd.f32 %v2022_v51, %v1671_v0  ;;  %v1673_v0 = vadd.f32 %v1672_v25, %v6291_v8  ;;  %v4458_v62 = vsel %vm6166_vm1, %v4456_v32, %v4457_v55  ;;  %v5625_v8 = vld [vmem:[#allocation2 + $0x58] sm:$0xf]  ;;  %v3879_v31 = vrot.slane %v3878_v41, 4 }
 0x1f1   : > { %v2959_v37 = vpop.f32.mrf.mxu0  ;;  %v3124_v25 = vrot.slane %v5625_v8, 5  ;;  %v4546_v24 = vunpack.c.l.b16 %v4458_v62  ;;  %v3905_v32 = vshll.u32 %v6717_v60, 16  ;;  %v3909_v55 = vshrl.u32 %v6717_v60, 16 }
 0x1f2   : > { %v6702_v46 = vadd.f32 %v2959_v37, %v2353_v5  ;;  %v3891_v5 = vshll.u32 %v6704_v10, 16  ;;  %v3884_v41 = vsel %vm5804_vm13, %v3879_v31, %v6700_v20  ;;  %v6737_v20 = vld [vmem:[#allocation2 + $0x68] sm:$0x1] }
 0x1f3   : > { %v2308_v59 = vpop.f32.mrf.mxu3  ;;  %v4573_v62 = vpack.c.b16 %v4546_v24, %v4545_v18  ;;  %v6735_v8 = vrot.slane %v3905_v32, 5  ;;  %v4464_v24 = vrot.slane %v6704_v10, 5 }
 0x1f4   : > { %v1675_v57 = vpop.f32.mrf.mxu1  ;;  %5511 = vmatmul.msk.bf16.gmra.mxu0 %vm1328_vm12, %v4572_v48  ;;  %v2354_v35 = vadd.f32 %v2308_v59, %v2065_v6  ;;  %v5624_v6 = vld [vmem:[#allocation2 + $0x5c] sm:$0x1]  ;;  %v3889_v48 = vrot.slane %v3888_v13, 4  ;;  %v3893_v37 = vrot.slane %v3891_v5, 5  ;;  %v3896_v59 = vshrl.u32 %v3721_v11, 16 }
 0x1f5   : > { %v3127_v51 = vrot.slane %v5624_v6, 5  ;;  %v4146_v11 = vunpack.c.l.b16 %v3884_v41 }
 0x1f6   : > { %v3894_v13 = vsel %vm5804_vm13, %v3889_v48, %v3893_v37  ;;  %v3898_v6 = vrot.slane %v3896_v59, 4  ;;  %v3915_v59 = vshll.u32 %v6737_v20, 16 }
 0x1f7   : > { %v2024_v21 = vpop.f32.mrf.mxu2  ;;  %5385 = vmatmul.msk.bf16.gmra.mxu1 %vm1328_vm12, %v3230_v14  ;;  %v3126_v14 = vrot.slane %v3124_v25, 4  ;;  %v4147_v42 = vunpack.c.l.b16 %v3894_v13 }
 0x1f8   : > { %v2067_v50 = vadd.f32 %v2024_v21, %v1673_v0  ;;  %5480 = vmatmul.msk.bf16.gmra.mxu3 %vm1328_vm12, %v4172_v27  ;;  %v1676_v0 = vadd.f32 %v1675_v57, %v6305_v28  ;;  %v4365_v57 = vld [vmem:[#allocation2 + $0x54] sm:$0xe] }
 0x1f9   : > { %v2961_v49 = vpop.f32.mrf.mxu0  ;;  %v3128_v21 = vsel %vm6166_vm1, %v3126_v14, %v3127_v51  ;;  %v3911_v51 = vrot.slane %v3909_v55, 4  ;;  %v5497_v37 = vrot.slane %v4365_v57, 9  ;;  %v4173_v32 = vpack.c.b16 %v4147_v42, %v4146_v11  ;;  %v3023_v57 = vld [vmem:[#allocation2 + $0x60] sm:$0xe]  ;;  %v6755_v42 = vld [vmem:[#allocation2 + $0x70] sm:$0xf] }
 0x1fa   : > { %v6719_v43 = vadd.f32 %v2961_v49, %v2354_v35  ;;  %v3125_v35 = vsel %vm6166_vm1, %v5370_v63, %v3124_v25  ;;  %v3206_v29 = vunpack.c.l.b16 %v3128_v21  ;;  %v3901_v49 = vrot.slane %v3899_v52, 5  ;;  %v5566_v21 = vld [vmem:[#allocation2 + $0x60] sm:$0xff] }
 0x1fb   : > { %v2311_v40 = vpop.f32.mrf.mxu3 }
 0x1fc   : > { %5465 = vmatmul.msk.bf16.gmra.mxu2 %vm1328_vm12, %v5565_v34  ;;  %v1677_v56 = vpop.f32.mrf.mxu1  ;;  %v2355_v27 = vadd.f32 %v2311_v40, %v2066_v22  ;;  %v3205_v34 = vunpack.c.l.b16 %v3125_v35  ;;  %v4461_v22 = vrot.slane %v6685_v44, 5  ;;  %v3902_v14 = vor.u32 %v3901_v49, %v3898_v6 }
 0x1fd   : > { %v3912_v40 = vor.u32 %v3911_v51, %v6735_v8  ;;  %v1678_v55 = vadd.f32 %v1677_v56, %v6322_v58  ;;  %v5627_v58 = vld [vmem:[#allocation2 + $0x64] sm:$0xf] }
 0x1fe   : > { %v3231_v31 = vpack.c.b16 %v3206_v29, %v3205_v34  ;;  %v4463_v63 = vrot.slane %v4461_v22, 4  ;;  %v3903_v41 = vrot.slane %v3902_v14, 4  ;;  %v5626_v34 = vld [vmem:[#allocation2 + $0x68] sm:$0x1]  ;;  %v3131_v56 = vrot.slane %v5627_v58, 5 }
 0x1ff   : > { %v2027_v5 = vpop.f32.mrf.mxu2  ;;  %v3913_v13 = vrot.slane %v3912_v40, 4  ;;  %v3134_v29 = vrot.slane %v5626_v34, 5 }
 0x200   : > { %v2068_v28 = vadd.f32 %v2027_v5, %v1676_v0  ;;  %v4465_v10 = vsel %vm6166_vm1, %v4463_v63, %v4464_v24  ;;  %v3917_v5 = vrot.slane %v3915_v59, 5  ;;  %v3133_v11 = vrot.slane %v3131_v56, 4 }
 0x201   : > { %v2964_v25 = vpop.f32.mrf.mxu0  ;;  %v4548_v49 = vunpack.c.l.b16 %v4465_v10  ;;  %v3908_v63 = vsel %vm5804_vm13, %v3903_v41, %v6735_v8 }
 0x202   : > { %v6739_v48 = vadd.f32 %v2964_v25, %v2355_v27  ;;  %v4462_v27 = vsel %vm6166_vm1, %v5497_v37, %v4461_v22  ;;  %v5371_v25 = vrot.slane %v3023_v57, 9  ;;  %v3135_v59 = vsel %vm6166_vm1, %v3133_v11, %v3134_v29  ;;  %v6774_v57 = vld [vmem:[#allocation2 + $0x74] sm:$0x1] }
 0x203   : > { %v2313_v44 = vpop.f32.mrf.mxu3  ;;  %v4547_v22 = vunpack.c.l.b16 %v4462_v27 }
 0x204   : > { %v1680_v18 = vpop.f32.mrf.mxu1  ;;  %5512 = vmatmul.msk.bf16.gmra.mxu0 %vm1328_vm12, %v4573_v62  ;;  %v2356_v52 = vadd.f32 %v2313_v44, %v2067_v50  ;;  %v3724_v62 = vld [vmem:[#allocation2 + $0x6c] sm:$0xf]  ;;  %v3918_v44 = vsel %vm5804_vm13, %v3913_v13, %v3917_v5  ;;  %v3132_v40 = vsel %vm6166_vm1, %v5371_v25, %v3131_v56  ;;  %v4366_v13 = vld [vmem:[#allocation2 + $0x60] sm:$0xe]  ;;  %v4471_v25 = vrot.slane %v6737_v20, 5 }
 0x205   : > { %v1681_v37 = vadd.f32 %v1680_v18, %v6340_v12  ;;  %v3920_v24 = vshrl.u32 %v3724_v62, 16  ;;  %v3929_v12 = vshll.u32 %v6755_v42, 16  ;;  %v3933_v18 = vshrl.u32 %v6755_v42, 16 }
 0x206   : > { %v4574_v27 = vpack.c.b16 %v4548_v49, %v4547_v22  ;;  %v4149_v41 = vunpack.c.l.b16 %v3918_v44  ;;  %v5498_v49 = vrot.slane %v4366_v13, 9 }
 0x207   : > { %v2029_v0 = vpop.f32.mrf.mxu2  ;;  %5386 = vmatmul.msk.bf16.gmra.mxu1 %vm1328_vm12, %v3231_v31  ;;  %v3922_v5 = vrot.slane %v3920_v24, 4  ;;  %v6770_v29 = vrot.slane %v3929_v12, 5  ;;  %v3935_v58 = vrot.slane %v3933_v18, 4 }
 0x208   : > { %v2069_v35 = vadd.f32 %v2029_v0, %v1678_v55  ;;  %5481 = vmatmul.msk.bf16.gmra.mxu3 %vm1328_vm12, %v4173_v32  ;;  %v3207_v55 = vunpack.c.l.b16 %v3132_v40  ;;  %v3208_v0 = vunpack.c.l.b16 %v3135_v59  ;;  %v5567_v59 = vld [vmem:[#allocation2 + $0x6c] sm:$0xff] }
 0x209   : > { %v2966_v50 = vpop.f32.mrf.mxu0  ;;  %v3936_v24 = vor.u32 %v3935_v58, %v6770_v29 }
 0x20a   : > { %v6752_v6 = vadd.f32 %v2966_v50, %v2356_v52  ;;  %v3923_v52 = vshll.u32 %v3724_v62, 16  ;;  %v3232_v50 = vpack.c.b16 %v3208_v0, %v3207_v55  ;;  %v6787_v0 = vld [vmem:[#allocation2 + $0x7c] sm:$0xf] }
 0x20b   : > { %v2316_v31 = vpop.f32.mrf.mxu3  ;;  %v3937_v12 = vrot.slane %v3936_v24, 4 }
 0x20c   : > { %5466 = vmatmul.msk.bf16.gmra.mxu2 %vm1328_vm12, %v5566_v21  ;;  %v1682_v51 = vpop.f32.mrf.mxu1  ;;  %v2357_v14 = vadd.f32 %v2316_v31, %v2068_v28  ;;  %v4468_v21 = vrot.slane %v6717_v60, 5  ;;  %v4148_v28 = vunpack.c.l.b16 %v3908_v63  ;;  %v3925_v34 = vrot.slane %v3923_v52, 5  ;;  %v3727_v52 = vld [vmem:[#allocation2 + $0x78] sm:$0xf] }
 0x20e   : > { %v4470_v60 = vrot.slane %v4468_v21, 4  ;;  %v4174_v31 = vpack.c.b16 %v4149_v41, %v4148_v28  ;;  %v3926_v63 = vor.u32 %v3925_v34, %v3922_v5  ;;  %v4469_v20 = vsel %vm6166_vm1, %v5498_v49, %v4468_v21  ;;  %v5629_v21 = vld [vmem:[#allocation2 + $0x74] sm:$0x1] }
 0x20f   : > { %v2032_v32 = vpop.f32.mrf.mxu2  ;;  %v3141_v34 = vrot.slane %v5629_v21, 5  ;;  %v4549_v58 = vunpack.c.l.b16 %v4469_v20 }
 0x210   : > { %v2070_v8 = vadd.f32 %v2032_v32, %v1681_v37  ;;  %v1683_v37 = vadd.f32 %v1682_v51, %v6354_v39  ;;  %v4472_v39 = vsel %vm6166_vm1, %v4470_v60, %v4471_v25  ;;  %v5628_v51 = vld [vmem:[#allocation2 + $0x70] sm:$0xf]  ;;  %v3953_v60 = vshll.u32 %v6787_v0, 16 }
 0x211   : > { %v2969_v10 = vpop.f32.mrf.mxu0  ;;  %v3138_v55 = vrot.slane %v5628_v51, 5  ;;  %v3957_v25 = vshrl.u32 %v6787_v0, 16 }
 0x212   : > { %v6772_v56 = vadd.f32 %v2969_v10, %v2357_v14  ;;  %v3939_v14 = vshll.u32 %v6774_v57, 16  ;;  %v3944_v10 = vshrl.u32 %v3727_v52, 16 }
 0x213   : > { %v2318_v22 = vpop.f32.mrf.mxu3  ;;  %v3140_v5 = vrot.slane %v3138_v55, 4 }
 0x214   : > { %7507 = vst [vmem:[#allocation10_spill] sm:$0xff] %v6772_v56  ;;  %v1685_v62 = vpop.f32.mrf.mxu1  ;;  %5513 = vmatmul.msk.bf16.gmra.mxu0 %vm1328_vm12, %v4574_v27  ;;  %v2358_v11 = vadd.f32 %v2318_v22, %v2069_v35  ;;  %v3927_v35 = vrot.slane %v3926_v63, 4  ;;  %v3941_v18 = vrot.slane %v3939_v14, 5  ;;  %v3024_v27 = vld [vmem:[#allocation2 + $0x6c] sm:$0xe]  ;;  %v4550_v22 = vunpack.c.l.b16 %v4472_v39 }
 0x215   : > { %v5372_v13 = vrot.slane %v3024_v27, 9  ;;  %v3955_v27 = vrot.slane %v3953_v60, 5  ;;  %v4373_v56 = vld [vmem:[#allocation2 + $0xb4] sm:$0xe] }
 0x216   : > { %v3932_v24 = vsel %vm5804_vm13, %v3927_v35, %v6770_v29  ;;  %v3942_v14 = vsel %vm5804_vm13, %v3937_v12, %v3941_v18  ;;  %v4575_v51 = vpack.c.b16 %v4550_v22, %v4549_v58 }
 0x217   : > { %v2034_v44 = vpop.f32.mrf.mxu2  ;;  %5387 = vmatmul.msk.bf16.gmra.mxu1 %vm1328_vm12, %v3232_v50  ;;  %v3947_v50 = vshll.u32 %v3727_v52, 16  ;;  %v4150_v21 = vunpack.c.l.b16 %v3932_v24 }
 0x218   : > { %v2071_v40 = vadd.f32 %v2034_v44, %v1683_v37  ;;  %5482 = vmatmul.msk.bf16.gmra.mxu3 %vm1328_vm12, %v4174_v31  ;;  %v7509_v37 = vld [vmem:[#allocation3_spill] sm:$0xff]  ;;  %v3142_v44 = vsel %vm6166_vm1, %v3140_v5, %v3141_v34  ;;  %v4151_v34 = vunpack.c.l.b16 %v3942_v14 }
 0x219   : > { %v2971_v32 = vpop.f32.mrf.mxu0  ;;  %v1686_v63 = vadd.f32 %v1685_v62, %v7509_v37  ;;  %v3946_v62 = vrot.slane %v3944_v10, 4  ;;  %v3949_v39 = vrot.slane %v3947_v50, 5  ;;  %v4478_v37 = vrot.slane %v6774_v57, 5  ;;  %v5568_v14 = vld [vmem:[#allocation2 + $0x78] sm:$0xff] }
 0x21a   : > { %v6789_v28 = vadd.f32 %v2971_v32, %v2358_v11  ;;  %v3139_v11 = vsel %vm6166_vm1, %v5372_v13, %v3138_v55  ;;  %v3210_v32 = vunpack.c.l.b16 %v3142_v44  ;;  %v4367_v55 = vld [vmem:[#allocation2 + $0x6c] sm:$0xe]  ;;  %v3959_v13 = vrot.slane %v3957_v25, 4 }
 0x21b   : > { %v2321_v49 = vpop.f32.mrf.mxu3  ;;  %v3209_v52 = vunpack.c.l.b16 %v3139_v11  ;;  %v5499_v12 = vrot.slane %v4367_v55, 9  ;;  %v3950_v10 = vor.u32 %v3949_v39, %v3946_v62  ;;  %v4175_v25 = vpack.c.b16 %v4151_v34, %v4150_v21 }
 0x21c   : > { %7508 = vst [vmem:[#allocation11_spill] sm:$0xff] %v6789_v28  ;;  %5467 = vmatmul.msk.bf16.gmra.mxu2 %vm1328_vm12, %v5567_v59  ;;  %v1687_v41 = vpop.f32.mrf.mxu1  ;;  %v2359_v31 = vadd.f32 %v2321_v49, %v2070_v8  ;;  %v4475_v8 = vrot.slane %v6755_v42, 5  ;;  %v6805_v49 = vld [vmem:[#allocation2 + $0x80] sm:$0x1]  ;;  %v3960_v58 = vor.u32 %v3959_v13, %v3955_v27 }
 0x21d   : > { %v3233_v29 = vpack.c.b16 %v3210_v32, %v3209_v52  ;;  %v3963_v22 = vshll.u32 %v6805_v49, 16 }
 0x21e   : > { %v4477_v18 = vrot.slane %v4475_v8, 4  ;;  %v3961_v52 = vrot.slane %v3960_v58, 4 }
 0x21f   : > { %v2037_v59 = vpop.f32.mrf.mxu2  ;;  %v3965_v32 = vrot.slane %v3963_v22, 5 }
 0x220   : > { %v2072_v20 = vadd.f32 %v2037_v59, %v1686_v63  ;;  %v7511_v63 = vld [vmem:[#allocation4_spill] sm:$0xff]  ;;  %v4479_v57 = vsel %vm6166_vm1, %v4477_v18, %v4478_v37  ;;  %v3951_v59 = vrot.slane %v3950_v10, 4 }
 0x221   : > { %v2974_v5 = vpop.f32.mrf.mxu0  ;;  %v1688_v11 = vadd.f32 %v1687_v41, %v7511_v63  ;;  %v3730_v41 = vld [vmem:[#allocation2 + $0x84] sm:$0xf]  ;;  %v4552_v13 = vunpack.c.l.b16 %v4479_v57  ;;  %v5631_v18 = vld [vmem:[#allocation2 + $0x80] sm:$0x1] }
 0x222   : > { %v6807_v35 = vadd.f32 %v2974_v5, %v2359_v31  ;;  %v4476_v31 = vsel %vm6166_vm1, %v5499_v12, %v4475_v8  ;;  %v3025_v5 = vld [vmem:[#allocation2 + $0x78] sm:$0xe]  ;;  %v3956_v21 = vsel %vm5804_vm13, %v3951_v59, %v3955_v27  ;;  %v3148_v37 = vrot.slane %v5631_v18, 5 }
 0x223   : > { %v2323_v50 = vpop.f32.mrf.mxu3  ;;  %v4551_v55 = vunpack.c.l.b16 %v4476_v31  ;;  %v3968_v58 = vshrl.u32 %v3730_v41, 16  ;;  %v3971_v22 = vshll.u32 %v3730_v41, 16  ;;  %v4152_v59 = vunpack.c.l.b16 %v3956_v21 }
 0x224   : > { %7510 = vst [vmem:[#allocation3_spill] sm:$0xff] %v6807_v35  ;;  %v6810_v42 = vpop.f32.mrf.mxu1  ;;  %5514 = vmatmul.msk.bf16.gmra.mxu0 %vm1328_vm12, %v4575_v51  ;;  %v2360_v60 = vadd.f32 %v2323_v50, %v2071_v40  ;;  %v5630_v40 = vld [vmem:[#allocation2 + $0x7c] sm:$0xf]  ;;  %v6821_v51 = vld [vmem:[#allocation2 + $0x88] sm:$0xf]  ;;  %v3966_v50 = vsel %vm5804_vm13, %v3961_v52, %v3965_v32  ;;  %v4482_v52 = vrot.slane %v6787_v0, 5 }
 0x225   : > { %v3145_v39 = vrot.slane %v5630_v40, 5  ;;  %v4368_v40 = vld [vmem:[#allocation2 + $0x78] sm:$0xe]  ;;  %v3970_v41 = vrot.slane %v3968_v58, 4  ;;  %v4485_v0 = vrot.slane %v6805_v49, 5 }
 0x226   : > { %v4484_v21 = vrot.slane %v4482_v52, 4 }
 0x227   : > { %v2039_v44 = vpop.f32.mrf.mxu2  ;;  %5388 = vmatmul.msk.bf16.gmra.mxu1 %vm1328_vm12, %v3233_v29  ;;  %v5373_v29 = vrot.slane %v3025_v5, 9  ;;  %v3147_v12 = vrot.slane %v3145_v39, 4 }
 0x228   : > { %v2073_v24 = vadd.f32 %v2039_v44, %v1688_v11  ;;  %5483 = vmatmul.msk.bf16.gmra.mxu3 %vm1328_vm12, %v4175_v25  ;;  %v3981_v11 = vshrl.u32 %v6821_v51, 16  ;;  %v4486_v49 = vsel %vm6166_vm1, %v4484_v21, %v4485_v0 }
 0x229   : > { %v2976_v62 = vpop.f32.mrf.mxu0  ;;  %v3146_v63 = vsel %vm6166_vm1, %v5373_v29, %v3145_v39  ;;  %v3149_v27 = vsel %vm6166_vm1, %v3147_v12, %v3148_v37  ;;  %v6845_v37 = vld [vmem:[#allocation2 + $0x8c] sm:$0x1] }
 0x22a   : > { %v6823_v8 = vadd.f32 %v2976_v62, %v2360_v60  ;;  %v3977_v60 = vshll.u32 %v6821_v51, 16  ;;  %v3211_v31 = vunpack.c.l.b16 %v3146_v63  ;;  %v3212_v57 = vunpack.c.l.b16 %v3149_v27  ;;  %v5569_v63 = vld [vmem:[#allocation2 + $0x84] sm:$0xff]  ;;  %v3733_v27 = vld [vmem:[#allocation2 + $0x90] sm:$0xf] }
 0x22b   : > { %v2326_v10 = vpop.f32.mrf.mxu3  ;;  %v4153_v62 = vunpack.c.l.b16 %v3966_v50  ;;  %v3983_v39 = vrot.slane %v3981_v11, 4  ;;  %v3385_v11 = vadd.f32 %v6810_v42, %v6395_v53  ;;  %v3995_v21 = vshll.u32 %v3733_v27, 16 }
 0x22c   : > { %7512 = vst [vmem:[#allocation4_spill] sm:$0xff] %v6823_v8  ;;  %5468 = vmatmul.msk.bf16.gmra.mxu2 %vm1328_vm12, %v5568_v14  ;;  %v6828_v34 = vpop.f32.mrf.mxu1  ;;  %v2361_v25 = vadd.f32 %v2326_v10, %v2072_v20  ;;  %v4576_v14 = vpack.c.b16 %v4552_v13, %v4551_v55  ;;  %v3973_v20 = vrot.slane %v3971_v22, 5  ;;  %v6839_v5 = vrot.slane %v3977_v60, 5 }
 0x22d   : > { %v3234_v29 = vpack.c.b16 %v3212_v57, %v3211_v31  ;;  %v5500_v13 = vrot.slane %v4368_v40, 9  ;;  %v4176_v50 = vpack.c.b16 %v4153_v62, %v4152_v59  ;;  %v5632_v59 = vld [vmem:[#allocation2 + $0x88] sm:$0xf] }
 0x22e   : > { %v3974_v58 = vor.u32 %v3973_v20, %v3970_v41  ;;  %v3984_v22 = vor.u32 %v3983_v39, %v6839_v5  ;;  %v3152_v62 = vrot.slane %v5632_v59, 5  ;;  %v3026_v20 = vld [vmem:[#allocation2 + $0x84] sm:$0xe]  ;;  %v3992_v39 = vshrl.u32 %v3733_v27, 16 }
 0x22f   : > { %v3591_v44 = vpop.f32.mrf.mxu2  ;;  %v4483_v31 = vsel %vm6166_vm1, %v5500_v13, %v4482_v52  ;;  %v5374_v52 = vrot.slane %v3026_v20, 9  ;;  %v4489_v59 = vrot.slane %v6821_v51, 5 }
 0x230   : > { %v3671_v40 = vadd.f32 %v3591_v44, %v3385_v11  ;;  %v4553_v0 = vunpack.c.l.b16 %v4483_v31  ;;  %v3994_v20 = vrot.slane %v3992_v39, 4  ;;  %v4492_v39 = vrot.slane %v6845_v37, 5 }
 0x231   : > { %v2979_v32 = vpop.f32.mrf.mxu0 }
 0x232   : > { %v6841_v18 = vadd.f32 %v2979_v32, %v2361_v25  ;;  %v3987_v25 = vshll.u32 %v6845_v37, 16  ;;  %v6859_v32 = vld [vmem:[#allocation2 + $0x94] sm:$0xf] }
 0x233   : > { %v2328_v55 = vpop.f32.mrf.mxu3  ;;  %v4001_v44 = vshll.u32 %v6859_v32, 16 }
 0x234   : > { %7513 = vst [vmem:[#allocation12_spill] sm:$0xff] %v6841_v18  ;;  %v6843_v12 = vpop.f32.mrf.mxu1  ;;  %5515 = vmatmul.msk.bf16.gmra.mxu0 %vm1328_vm12, %v4576_v14  ;;  %v2362_v10 = vadd.f32 %v2328_v55, %v2073_v24  ;;  %v3975_v24 = vrot.slane %v3974_v58, 4  ;;  %v3985_v14 = vrot.slane %v3984_v22, 4  ;;  %v3989_v41 = vrot.slane %v3987_v25, 5  ;;  %v5633_v55 = vld [vmem:[#allocation2 + $0x8c] sm:$0x1] }
 0x235   : > { %v3155_v13 = vrot.slane %v5633_v55, 5  ;;  %v4005_v22 = vshrl.u32 %v6859_v32, 16  ;;  %v3153_v25 = vsel %vm6166_vm1, %v5374_v52, %v3152_v62  ;;  %v3997_v55 = vrot.slane %v3995_v21, 5 }
 0x236   : > { %v3990_v27 = vsel %vm5804_vm13, %v3985_v14, %v3989_v41  ;;  %v6883_v14 = vld [vmem:[#allocation2 + $0x98] sm:$0x1] }
 0x237   : > { %v3593_v60 = vpop.f32.mrf.mxu2  ;;  %5389 = vmatmul.msk.bf16.gmra.mxu1 %vm1328_vm12, %v3234_v29  ;;  %v3154_v29 = vrot.slane %v3152_v62, 4  ;;  %v6881_v62 = vrot.slane %v4001_v44, 5  ;;  %v4007_v52 = vrot.slane %v4005_v22, 4  ;;  %v4011_v22 = vshll.u32 %v6883_v14, 16 }
 0x238   : > { %5484 = vmatmul.msk.bf16.gmra.mxu3 %vm1328_vm12, %v4176_v50  ;;  %v4554_v50 = vunpack.c.l.b16 %v4486_v49 }
 0x239   : > { %v2981_v57 = vpop.f32.mrf.mxu0  ;;  %v4008_v44 = vor.u32 %v4007_v52, %v6881_v62  ;;  %v3736_v52 = vld [vmem:[#allocation2 + $0x9c] sm:$0xf] }
 0x23a   : > { %v6861_v53 = vadd.f32 %v2981_v57, %v2362_v10  ;;  %v3980_v10 = vsel %vm5804_vm13, %v3975_v24, %v6839_v5  ;;  %v3213_v57 = vunpack.c.l.b16 %v3153_v25  ;;  %v3386_v5 = vadd.f32 %v6828_v34, %v6406_v23  ;;  %v4369_v24 = vld [vmem:[#allocation2 + $0x84] sm:$0xe] }
 0x23b   : > { %v4248_v58 = vpop.f32.mrf.mxu3  ;;  %v5501_v23 = vrot.slane %v4369_v24, 9  ;;  %v4491_v34 = vrot.slane %v4489_v59, 4 }
 0x23c   : > { %7514 = vst [vmem:[#allocation13_spill] sm:$0xff] %v6861_v53  ;;  %5469 = vmatmul.msk.bf16.gmra.mxu2 %vm1328_vm12, %v5569_v63  ;;  %v6864_v42 = vpop.f32.mrf.mxu1  ;;  %v3156_v63 = vsel %vm6166_vm1, %v3154_v29, %v3155_v13  ;;  %v4328_v11 = vadd.f32 %v4248_v58, %v3671_v40  ;;  %v4577_v53 = vpack.c.b16 %v4554_v50, %v4553_v0  ;;  %v4154_v29 = vunpack.c.l.b16 %v3980_v10 }
 0x23d   : > { %v3214_v49 = vunpack.c.l.b16 %v3156_v63  ;;  %v4155_v13 = vunpack.c.l.b16 %v3990_v27  ;;  %v3672_v58 = vadd.f32 %v3593_v60, %v3386_v5  ;;  %v3998_v0 = vor.u32 %v3997_v55, %v3994_v20  ;;  %v5634_v5 = vld [vmem:[#allocation2 + $0x94] sm:$0xf] }
 0x23e   : > { %v4490_v37 = vsel %vm6166_vm1, %v5501_v23, %v4489_v59  ;;  %v4013_v20 = vrot.slane %v4011_v22, 5  ;;  %v3159_v24 = vrot.slane %v5634_v5, 5  ;;  %v4019_v22 = vshll.u32 %v3736_v52, 16 }
 0x23f   : > { %v3596_v31 = vpop.f32.mrf.mxu2  ;;  %v3235_v51 = vpack.c.b16 %v3214_v49, %v3213_v57  ;;  %v4177_v10 = vpack.c.b16 %v4155_v13, %v4154_v29  ;;  %v3999_v27 = vrot.slane %v3998_v0, 4  ;;  %v3387_v57 = vadd.f32 %v6843_v12, %v6414_v1 }
 0x240   : > { %v4009_v49 = vrot.slane %v4008_v44, 4  ;;  %v4555_v29 = vunpack.c.l.b16 %v4490_v37  ;;  %v4016_v44 = vshrl.u32 %v3736_v52, 16 }
 0x241   : > { %v4645_v40 = vpop.f32.mrf.mxu0  ;;  %v3673_v13 = vadd.f32 %v3596_v31, %v3387_v57  ;;  %v4004_v1 = vsel %vm5804_vm13, %v3999_v27, %v6881_v62 }
 0x242   : > { %v6885_v41 = vadd.f32 %v4645_v40, %v4328_v11  ;;  %v5570_v11 = vld [vmem:[#allocation2 + $0x90] sm:$0xff]  ;;  %v4156_v52 = vunpack.c.l.b16 %v4004_v1 }
 0x243   : > { %v4250_v60 = vpop.f32.mrf.mxu3 }
 0x244   : > { %v6893_v21 = vpop.f32.mrf.mxu1  ;;  %5516 = vmatmul.msk.bf16.gmra.mxu0 %vm1328_vm12, %v4577_v53  ;;  %v4757_v50 = vpack.c.bf16 %v6885_v41, %v6885_v41  ;;  %v4329_v25 = vadd.f32 %v4250_v60, %v3672_v58  ;;  %v4493_v53 = vsel %vm6166_vm1, %v4491_v34, %v4492_v39  ;;  %v3027_v58 = vld [vmem:[#allocation2 + $0x90] sm:$0xe]  ;;  %v3161_v34 = vrot.slane %v3159_v24, 4  ;;  %v5635_v39 = vld [vmem:[#allocation2 + $0x98] sm:$0x1] }
 0x245   : > { %v4556_v59 = vunpack.c.l.b16 %v4493_v53  ;;  %v5375_v23 = vrot.slane %v3027_v58, 9  ;;  %v3162_v0 = vrot.slane %v5635_v39, 5  ;;  %v4014_v60 = vsel %vm5804_vm13, %v4009_v49, %v4013_v20  ;;  %v4370_v49 = vld [vmem:[#allocation2 + $0x90] sm:$0xe]  ;;  %v7515_v20 = vld [vmem:[#allocation5_spill] sm:$0xff] }
 0x246   : > { %4789 = vst.msk [vmem:[%s6890_s18] sm:$0xf] %vm216_vm5, %v4757_v50  ;;  %v3388_v5 = vadd.f32 %v6864_v42, %v7515_v20  ;;  %v4496_v58 = vrot.slane %v6859_v32, 5  ;;  %v4021_v39 = vrot.slane %v4019_v22, 5 }
 0x247   : > { %v3598_v63 = vpop.f32.mrf.mxu2  ;;  %5390 = vmatmul.msk.bf16.gmra.mxu1 %vm1328_vm12, %v3235_v51  ;;  %v6912_v51 = vld [vmem:[#allocation2 + $0xa0] sm:$0xf]  ;;  %v3163_v62 = vsel %vm6166_vm1, %v3161_v34, %v3162_v0  ;;  %v4018_v34 = vrot.slane %v4016_v44, 4 }
 0x248   : > { %5485 = vmatmul.msk.bf16.gmra.mxu3 %vm1328_vm12, %v4177_v10  ;;  %v3160_v10 = vsel %vm6166_vm1, %v5375_v23, %v3159_v24  ;;  %v4029_v37 = vshrl.u32 %v6912_v51, 16  ;;  %v3216_v57 = vunpack.c.l.b16 %v3163_v62  ;;  %v4157_v24 = vunpack.c.l.b16 %v4014_v60  ;;  %v6941_v62 = vld [vmem:[#allocation2 + $0xa4] sm:$0x1] }
 0x249   : > { %v4647_v55 = vpop.f32.mrf.mxu0  ;;  %v3215_v27 = vunpack.c.l.b16 %v3160_v10  ;;  %v5502_v10 = vrot.slane %v4370_v49, 9  ;;  %v4498_v1 = vrot.slane %v4496_v58, 4  ;;  %v4499_v60 = vrot.slane %v6883_v14, 5  ;;  %v7516_v49 = vld [vmem:[#allocation6_spill] sm:$0xff] }
 0x24a   : > { %v6910_v40 = vadd.f32 %v4647_v55, %v4329_v25  ;;  %v4025_v25 = vshll.u32 %v6912_v51, 16  ;;  %v4578_v55 = vpack.c.b16 %v4556_v59, %v4555_v29  ;;  %v4178_v44 = vpack.c.b16 %v4157_v24, %v4156_v52 }
 0x24b   : > { %v4253_v31 = vpop.f32.mrf.mxu3  ;;  %v3236_v29 = vpack.c.b16 %v3216_v57, %v3215_v27  ;;  %v4022_v22 = vor.u32 %v4021_v39, %v4018_v34  ;;  %v4035_v27 = vshll.u32 %v6941_v62, 16  ;;  %v5571_v57 = vld [vmem:[#allocation2 + $0x9c] sm:$0xff]  ;;  %v3389_v14 = vadd.f32 %v6893_v21, %v7516_v49  ;;  %v6959_v39 = vld [vmem:[#allocation2 + $0xac] sm:$0xf] }
 0x24c   : > { %5470 = vmatmul.msk.bf16.gmra.mxu2 %vm1328_vm12, %v5570_v11  ;;  %v6918_v12 = vpop.f32.mrf.mxu1  ;;  %v4758_v50 = vpack.c.bf16 %v6910_v40, %v6910_v40  ;;  %v4330_v53 = vadd.f32 %v4253_v31, %v3673_v13  ;;  %v6935_v0 = vrot.slane %v4025_v25, 5  ;;  %v3674_v31 = vadd.f32 %v3598_v63, %v3388_v5 }
 0x24d   : > { %v4500_v20 = vsel %vm6166_vm1, %v4498_v1, %v4499_v60  ;;  %v4023_v24 = vrot.slane %v4022_v22, 4  ;;  %v5637_v60 = vld [vmem:[#allocation2 + $0xa4] sm:$0x1] }
 0x24e   : > { %4790 = vst.msk [vmem:[%s6890_s18 + $0x4] sm:$0xf] %vm216_vm5, %v4758_v50  ;;  %v4031_v50 = vrot.slane %v4029_v37, 4  ;;  %v4497_v37 = vsel %vm6166_vm1, %v5502_v10, %v4496_v58  ;;  %v5636_v58 = vld [vmem:[#allocation2 + $0xa0] sm:$0xf]  ;;  %v4037_v10 = vrot.slane %v4035_v27, 5 }
 0x24f   : > { %v3601_v11 = vpop.f32.mrf.mxu2  ;;  %v4557_v52 = vunpack.c.l.b16 %v4497_v37  ;;  %v3166_v34 = vrot.slane %v5636_v58, 5  ;;  %v4558_v37 = vunpack.c.l.b16 %v4500_v20  ;;  %v4053_v27 = vshrl.u32 %v6959_v39, 16 }
 0x250   : > { %v4032_v25 = vor.u32 %v4031_v50, %v6935_v0 }
 0x251   : > { %v4650_v23 = vpop.f32.mrf.mxu0  ;;  %v3168_v1 = vrot.slane %v3166_v34, 4 }
 0x252   : > { %v6937_v13 = vadd.f32 %v4650_v23, %v4330_v53  ;;  %v4033_v23 = vrot.slane %v4032_v25, 4 }
 0x253   : > { %v4255_v42 = vpop.f32.mrf.mxu3 }
 0x254   : > { %v6939_v59 = vpop.f32.mrf.mxu1  ;;  %5517 = vmatmul.msk.bf16.gmra.mxu0 %vm1328_vm12, %v4578_v55  ;;  %v4759_v32 = vpack.c.bf16 %v6937_v13, %v6937_v13  ;;  %v4331_v63 = vadd.f32 %v4255_v42, %v3674_v31  ;;  %v3739_v55 = vld [vmem:[#allocation2 + $0xa8] sm:$0xf]  ;;  %v3675_v31 = vadd.f32 %v3601_v11, %v3389_v14  ;;  %v4049_v11 = vshll.u32 %v6959_v39, 16 }
 0x255   : > { %v4043_v22 = vshll.u32 %v3739_v55, 16  ;;  %v4038_v20 = vsel %vm5804_vm13, %v4033_v23, %v4037_v10  ;;  %v6986_v23 = vld [vmem:[#allocation2 + $0xb0] sm:$0x1] }
 0x256   : > { %4791 = vst.msk [vmem:[%s6890_s18 + $0x8] sm:$0xf] %vm216_vm5, %v4759_v32  ;;  %v4040_v32 = vshrl.u32 %v3739_v55, 16  ;;  %v6984_v35 = vrot.slane %v4049_v11, 5 }
 0x257   : > { %v3603_v53 = vpop.f32.mrf.mxu2  ;;  %5391 = vmatmul.msk.bf16.gmra.mxu1 %vm1328_vm12, %v3236_v29  ;;  %v3028_v29 = vld [vmem:[#allocation2 + $0x9c] sm:$0xe]  ;;  %v4045_v8 = vrot.slane %v4043_v22, 5 }
 0x258   : > { %5486 = vmatmul.msk.bf16.gmra.mxu3 %vm1328_vm12, %v4178_v44  ;;  %v5376_v42 = vrot.slane %v3028_v29, 9  ;;  %v3169_v44 = vrot.slane %v5637_v60, 5  ;;  %v4503_v60 = vrot.slane %v6912_v51, 5  ;;  %v4042_v18 = vrot.slane %v4040_v32, 4 }
 0x259   : > { %v4652_v5 = vpop.f32.mrf.mxu0 }
 0x25a   : > { %v6961_v50 = vadd.f32 %v4652_v5, %v4331_v63  ;;  %v3167_v49 = vsel %vm6166_vm1, %v5376_v42, %v3166_v34  ;;  %v3170_v14 = vsel %vm6166_vm1, %v3168_v1, %v3169_v44  ;;  %v4371_v42 = vld [vmem:[#allocation2 + $0x9c] sm:$0xe]  ;;  %v4055_v1 = vrot.slane %v4053_v27, 4 }
 0x25b   : > { %v4258_v63 = vpop.f32.mrf.mxu3  ;;  %v3217_v58 = vunpack.c.l.b16 %v3167_v49  ;;  %v3218_v29 = vunpack.c.l.b16 %v3170_v14  ;;  %v5503_v32 = vrot.slane %v4371_v42, 9  ;;  %v4505_v22 = vrot.slane %v4503_v60, 4  ;;  %v5638_v42 = vld [vmem:[#allocation2 + $0xac] sm:$0xf] }
 0x25c   : > { %5471 = vmatmul.msk.bf16.gmra.mxu2 %vm1328_vm12, %v5571_v57  ;;  %v6964_v21 = vpop.f32.mrf.mxu1  ;;  %v4760_v25 = vpack.c.bf16 %v6961_v50, %v6961_v50  ;;  %v4028_v57 = vsel %vm5804_vm13, %v4023_v24, %v6935_v0  ;;  %v4332_v55 = vadd.f32 %v4258_v63, %v3675_v31  ;;  %v4579_v0 = vpack.c.b16 %v4558_v37, %v4557_v52  ;;  %v7517_v24 = vld [vmem:[#allocation7_spill] sm:$0xff] }
 0x25d   : > { %v3390_v34 = vadd.f32 %v6918_v12, %v7517_v24  ;;  %v4158_v31 = vunpack.c.l.b16 %v4028_v57  ;;  %v3237_v51 = vpack.c.b16 %v3218_v29, %v3217_v58  ;;  %v4506_v52 = vrot.slane %v6941_v62, 5  ;;  %v5572_v62 = vld [vmem:[#allocation2 + $0xa8] sm:$0xff]  ;;  %v7518_v58 = vld [vmem:[#allocation8_spill] sm:$0xff] }
 0x25e   : > { %4792 = vst.msk [vmem:[%s6890_s18 + $0xc] sm:$0xf] %vm216_vm5, %v4760_v25  ;;  %v4159_v25 = vunpack.c.l.b16 %v4038_v20  ;;  %v4046_v12 = vor.u32 %v4045_v8, %v4042_v18  ;;  %v4056_v57 = vor.u32 %v4055_v1, %v6984_v35  ;;  %v4059_v49 = vshll.u32 %v6986_v23, 16 }
 0x25f   : > { %v3606_v5 = vpop.f32.mrf.mxu2  ;;  %v3676_v63 = vadd.f32 %v3603_v53, %v3390_v34  ;;  %v4504_v8 = vsel %vm6166_vm1, %v5503_v32, %v4503_v60  ;;  %v4507_v18 = vsel %vm6166_vm1, %v4505_v22, %v4506_v52  ;;  %v3391_v29 = vadd.f32 %v6939_v59, %v7518_v58  ;;  %v7010_v32 = vld [vmem:[#allocation2 + $0xb8] sm:$0xf] }
 0x260   : > { %v4179_v14 = vpack.c.b16 %v4159_v25, %v4158_v31  ;;  %v4047_v20 = vrot.slane %v4046_v12, 4  ;;  %v4061_v24 = vrot.slane %v4059_v49, 5  ;;  %v3173_v1 = vrot.slane %v5638_v42, 5 }
 0x261   : > { %v4655_v44 = vpop.f32.mrf.mxu0  ;;  %v4559_v25 = vunpack.c.l.b16 %v4504_v8  ;;  %v4560_v60 = vunpack.c.l.b16 %v4507_v18  ;;  %v4372_v8 = vld [vmem:[#allocation2 + $0xa8] sm:$0xe] }
 0x262   : > { %v6988_v10 = vadd.f32 %v4655_v44, %v4332_v55  ;;  %v3742_v44 = vld [vmem:[#allocation2 + $0xb4] sm:$0xf]  ;;  %v4052_v59 = vsel %vm5804_vm13, %v4047_v20, %v6984_v35  ;;  %v3175_v12 = vrot.slane %v3173_v1, 4  ;;  %v4073_v20 = vshll.u32 %v7010_v32, 16 }
 0x263   : > { %v4260_v27 = vpop.f32.mrf.mxu3 }
 0x264   : > { %v6991_v37 = vpop.f32.mrf.mxu1  ;;  %5518 = vmatmul.msk.bf16.gmra.mxu0 %vm1328_vm12, %v4579_v0  ;;  %v4761_v11 = vpack.c.bf16 %v6988_v10, %v6988_v10  ;;  %v4333_v53 = vadd.f32 %v4260_v27, %v3676_v63  ;;  %v4057_v0 = vrot.slane %v4056_v57, 4  ;;  %v3677_v63 = vadd.f32 %v3606_v5, %v3391_v29 }
 0x266   : > { %4793 = vst.msk [vmem:[%s6890_s18 + $0x10] sm:$0xf] %vm216_vm5, %v4761_v11  ;;  %v5639_v11 = vld [vmem:[#allocation2 + $0xb0] sm:$0x1]  ;;  %v4062_v49 = vsel %vm5804_vm13, %v4057_v0, %v4061_v24  ;;  %v4077_v0 = vshrl.u32 %v7010_v32, 16  ;;  %v7519_v24 = vld [vmem:[#allocation9_spill] sm:$0xff] }
 0x267   : > { %v3608_v55 = vpop.f32.mrf.mxu2  ;;  %5392 = vmatmul.msk.bf16.gmra.mxu1 %vm1328_vm12, %v3237_v51  ;;  %v3029_v51 = vld [vmem:[#allocation2 + $0xa8] sm:$0xe]  ;;  %v3176_v27 = vrot.slane %v5639_v11, 5  ;;  %v4160_v11 = vunpack.c.l.b16 %v4052_v59 }
 0x268   : > { %5487 = vmatmul.msk.bf16.gmra.mxu3 %vm1328_vm12, %v4179_v14  ;;  %v5377_v52 = vrot.slane %v3029_v51, 9  ;;  %v4510_v14 = vrot.slane %v6959_v39, 5  ;;  %v4580_v39 = vpack.c.b16 %v4560_v60, %v4559_v25  ;;  %v3392_v51 = vadd.f32 %v6964_v21, %v7519_v24  ;;  %v7040_v21 = vld [vmem:[#allocation2 + $0xbc] sm:$0x1] }
 0x269   : > { %v4657_v34 = vpop.f32.mrf.mxu0  ;;  %v3177_v18 = vsel %vm6166_vm1, %v3175_v12, %v3176_v27  ;;  %v4513_v12 = vrot.slane %v6986_v23, 5  ;;  %v4079_v25 = vrot.slane %v4077_v0, 4  ;;  %v3393_v0 = vadd.f32 %v6991_v37, %v6482_v15 }
 0x26a   : > { %v7008_v31 = vadd.f32 %v4657_v34, %v4333_v53  ;;  %v4064_v53 = vshrl.u32 %v3742_v44, 16  ;;  %v3174_v35 = vsel %vm6166_vm1, %v5377_v52, %v3173_v1  ;;  %v3220_v42 = vunpack.c.l.b16 %v3177_v18 }
 0x26b   : > { %v4263_v5 = vpop.f32.mrf.mxu3  ;;  %v3219_v34 = vunpack.c.l.b16 %v3174_v35  ;;  %v4161_v1 = vunpack.c.l.b16 %v4062_v49  ;;  %v5504_v52 = vrot.slane %v4372_v8, 9  ;;  %v3678_v27 = vadd.f32 %v3608_v55, %v3392_v51 }
 0x26c   : > { %5472 = vmatmul.msk.bf16.gmra.mxu2 %vm1328_vm12, %v5572_v62  ;;  %v7016_v22 = vpop.f32.mrf.mxu1  ;;  %v4762_v57 = vpack.c.bf16 %v7008_v31, %v7008_v31  ;;  %v4067_v62 = vshll.u32 %v3742_v44, 16  ;;  %v4334_v58 = vadd.f32 %v4263_v5, %v3677_v63  ;;  %v4512_v28 = vrot.slane %v4510_v14, 4 }
 0x26d   : > { %v3238_v35 = vpack.c.b16 %v3220_v42, %v3219_v34  ;;  %v7036_v18 = vrot.slane %v4073_v20, 5  ;;  %v4180_v59 = vpack.c.b16 %v4161_v1, %v4160_v11  ;;  %v4511_v49 = vsel %vm6166_vm1, %v5504_v52, %v4510_v14  ;;  %v5573_v42 = vld [vmem:[#allocation2 + $0xb4] sm:$0xff]  ;;  %v7057_v52 = vld [vmem:[#allocation2 + $0xc4] sm:$0xf] }
 0x26e   : > { %4794 = vst.msk [vmem:[%s6890_s18 + $0x14] sm:$0xf] %vm216_vm5, %v4762_v57  ;;  %v4066_v57 = vrot.slane %v4064_v53, 4  ;;  %v4069_v63 = vrot.slane %v4067_v62, 5  ;;  %v4514_v62 = vsel %vm6166_vm1, %v4512_v28, %v4513_v12  ;;  %v4083_v34 = vshll.u32 %v7040_v21, 16 }
 0x26f   : > { %v3611_v29 = vpop.f32.mrf.mxu2  ;;  %v4561_v24 = vunpack.c.l.b16 %v4511_v49  ;;  %v4562_v51 = vunpack.c.l.b16 %v4514_v62  ;;  %v5640_v1 = vld [vmem:[#allocation2 + $0xb8] sm:$0xf]  ;;  %v4520_v3 = vrot.slane %v7040_v21, 5 }
 0x270   : > { %v4070_v53 = vor.u32 %v4069_v63, %v4066_v57  ;;  %v3180_v28 = vrot.slane %v5640_v1, 5  ;;  %v4085_v57 = vrot.slane %v4083_v34, 5  ;;  %v3030_v63 = vld [vmem:[#allocation2 + $0xb4] sm:$0xe] }
 0x271   : > { %v4660_v44 = vpop.f32.mrf.mxu0  ;;  %v5378_v37 = vrot.slane %v3030_v63, 9 }
 0x272   : > { %v7034_v5 = vadd.f32 %v4660_v44, %v4334_v58  ;;  %v4080_v58 = vor.u32 %v4079_v25, %v7036_v18  ;;  %v4071_v11 = vrot.slane %v4070_v53, 4  ;;  %v3679_v44 = vadd.f32 %v3611_v29, %v3393_v0  ;;  %v5641_v25 = vld [vmem:[#allocation2 + $0xbc] sm:$0x1] }
 0x273   : > { %v4265_v55 = vpop.f32.mrf.mxu3  ;;  %v4097_v29 = vshll.u32 %v7057_v52, 16 }
 0x274   : > { %v7038_v60 = vpop.f32.mrf.mxu1  ;;  %5519 = vmatmul.msk.bf16.gmra.mxu0 %vm1328_vm12, %v4580_v39  ;;  %v4763_v23 = vpack.c.bf16 %v7034_v5, %v7034_v5  ;;  %v4335_v8 = vadd.f32 %v4265_v55, %v3678_v27  ;;  %v3745_v39 = vld [vmem:[#allocation2 + $0xc0] sm:$0xf]  ;;  %v4081_v27 = vrot.slane %v4080_v58, 4  ;;  %v4076_v62 = vsel %vm5804_vm13, %v4071_v11, %v7036_v18 }
 0x275   : > { %v4088_v55 = vshrl.u32 %v3745_v39, 16  ;;  %v4091_v53 = vshll.u32 %v3745_v39, 16  ;;  %v3181_v58 = vsel %vm6166_vm1, %v5378_v37, %v3180_v28  ;;  %v3394_v18 = vadd.f32 %v7016_v22, %v6497_v16  ;;  %v335_v37 = vld [vmem:[#allocation2 + $0xd4] sm:$0x1] }
 0x276   : > { %4795 = vst.msk [vmem:[%s6890_s18 + $0x18] sm:$0xf] %vm216_vm5, %v4763_v23  ;;  %v3183_v23 = vrot.slane %v5641_v25, 5  ;;  %v4086_v39 = vsel %vm5804_vm13, %v4081_v27, %v4085_v57  ;;  %v3221_v1 = vunpack.c.l.b16 %v3181_v58  ;;  %v4581_v25 = vpack.c.b16 %v4562_v51, %v4561_v24  ;;  %v7086_v58 = vld [vmem:[#allocation2 + $0xc8] sm:$0x1] }
 0x277   : > { %v3613_v20 = vpop.f32.mrf.mxu2  ;;  %5393 = vmatmul.msk.bf16.gmra.mxu1 %vm1328_vm12, %v3238_v35  ;;  %v3182_v35 = vrot.slane %v3180_v28, 4  ;;  %v4517_v11 = vrot.slane %v7010_v32, 5  ;;  %v4090_v28 = vrot.slane %v4088_v55, 4  ;;  %v4162_v57 = vunpack.c.l.b16 %v4076_v62 }
 0x278   : > { %5488 = vmatmul.msk.bf16.gmra.mxu3 %vm1328_vm12, %v4180_v59  ;;  %v336_v16 = vsel %vm5701_vm6, 0, %v335_v37  ;;  %v3680_v22 = vadd.f32 %v3613_v20, %v3394_v18  ;;  %v5505_v51 = vrot.slane %v4373_v56, 9  ;;  %v5642_v37 = vld [vmem:[#allocation2 + $0xc4] sm:$0xf] }
 0x279   : > { %v4662_v14 = vpop.f32.mrf.mxu0  ;;  %v3184_v34 = vsel %vm6166_vm1, %v3182_v35, %v3183_v23  ;;  %v4093_v35 = vrot.slane %v4091_v53, 5  ;;  %v7082_v23 = vrot.slane %v4097_v29, 5  ;;  %337 = vst [vmem:[#allocation2 + $0xd4] sm:$0x1] %v336_v16  ;;  %v4519_v55 = vrot.slane %v4517_v11, 4 }
 0x27a   : > { %v7059_v12 = vadd.f32 %v4662_v14, %v4335_v8  ;;  %v4101_v8 = vshrl.u32 %v7057_v52, 16  ;;  %v3222_v63 = vunpack.c.l.b16 %v3184_v34  ;;  %v4107_v34 = vshll.u32 %v7086_v58, 16 }
 0x27b   : > { %v4268_v49 = vpop.f32.mrf.mxu3  ;;  %v4094_v7 = vor.u32 %v4093_v35, %v4090_v28  ;;  %v4518_v21 = vsel %vm6166_vm1, %v5505_v51, %v4517_v11  ;;  %v3187_v35 = vrot.slane %v5642_v37, 5 }
 0x27c   : > { %5473 = vmatmul.msk.bf16.gmra.mxu2 %vm1328_vm12, %v5573_v42  ;;  %v7062_v15 = vpop.f32.mrf.mxu1  ;;  %v4764_v59 = vpack.c.bf16 %v7059_v12, %v7059_v12  ;;  %v279_v42 = vld [vmem:[#allocation2 + $0xcc] sm:$0x1]  ;;  %v4336_v0 = vadd.f32 %v4268_v49, %v3679_v44  ;;  %v4163_v49 = vunpack.c.l.b16 %v4086_v39  ;;  %v3239_v24 = vpack.c.b16 %v3222_v63, %v3221_v1  ;;  %v5574_v39 = vld [vmem:[#allocation2 + $0xc0] sm:$0xff] }
 0x27d   : > { %v280_v44 = vsel %vm5693_vm4, 0, %v279_v42  ;;  %v3395_v1 = vadd.f32 %v7038_v60, %v6508_v26  ;;  %v4095_v63 = vrot.slane %v4094_v7, 4  ;;  %v4109_v18 = vrot.slane %v4107_v34, 5 }
 0x27e   : > { %4796 = vst.msk [vmem:[%s6890_s18 + $0x1c] sm:$0xf] %vm216_vm5, %v4764_v59  ;;  %v4103_v59 = vrot.slane %v4101_v8, 4  ;;  %v4181_v20 = vpack.c.b16 %v4163_v49, %v4162_v57  ;;  %v4563_v11 = vunpack.c.l.b16 %v4518_v21  ;;  %v3031_v57 = vld [vmem:[#allocation2 + $0xc0] sm:$0xe] }
 0x27f   : > { %v3616_v14 = vpop.f32.mrf.mxu2  ;;  %281 = vst [vmem:[#allocation2 + $0xcc] sm:$0x1] %v280_v44  ;;  %v5379_v60 = vrot.slane %v3031_v57, 9  ;;  %v4374_v57 = vld [vmem:[#allocation2 + $0xc0] sm:$0xe] }
 0x280   : > { %v4104_v62 = vor.u32 %v4103_v59, %v7082_v23  ;;  %v7110_v59 = vld [vmem:[#allocation2 + $0xd0] sm:$0xf] }
 0x281   : > { %v4665_v27 = vpop.f32.mrf.mxu0  ;;  %v3188_v7 = vsel %vm6166_vm1, %v5379_v60, %v3187_v35 }
 0x282   : > { %v7090_v32 = vadd.f32 %v4665_v27, %v4336_v0  ;;  %v4521_v0 = vsel %vm6166_vm1, %v4519_v55, %v4520_v3  ;;  %v3681_v27 = vadd.f32 %v3616_v14, %v3395_v1  ;;  %v4100_v14 = vsel %vm5804_vm13, %v4095_v63, %v7082_v23 }
 0x283   : > { %v4270_v8 = vpop.f32.mrf.mxu3  ;;  %v4564_v16 = vunpack.c.l.b16 %v4521_v0  ;;  %v3223_v0 = vunpack.c.l.b16 %v3188_v7  ;;  %v3396_v1 = vadd.f32 %v7062_v15, %v6520_v45  ;;  %v5506_v15 = vrot.slane %v4374_v57, 9 }
 0x284   : > { %v7093_v53 = vpop.f32.mrf.mxu1  ;;  %5520 = vmatmul.msk.bf16.gmra.mxu0 %vm1328_vm12, %v4581_v25  ;;  %v4765_v29 = vpack.c.bf16 %v7090_v32, %v7090_v32  ;;  %v4337_v56 = vadd.f32 %v4270_v8, %v3680_v22  ;;  %v4105_v25 = vrot.slane %v4104_v62, 4  ;;  %v3189_v22 = vrot.slane %v3187_v35, 4 }
 0x285   : > { %v4121_v8 = vshll.u32 %v7110_v59, 16  ;;  %v4582_v63 = vpack.c.b16 %v4564_v16, %v4563_v11  ;;  %v4527_v16 = vrot.slane %v7086_v58, 5 }
 0x286   : > { %4797 = vst.msk [vmem:[%s6890_s18 + $0x20] sm:$0xf] %vm216_vm5, %v4765_v29  ;;  %v3748_v49 = vld [vmem:[#allocation2 + $0xcc] sm:$0xf]  ;;  %v4110_v29 = vsel %vm5804_vm13, %v4105_v25, %v4109_v18  ;;  %v4164_v25 = vunpack.c.l.b16 %v4100_v14  ;;  %v4524_v18 = vrot.slane %v7057_v52, 5 }
 0x287   : > { %v3618_v42 = vpop.f32.mrf.mxu2  ;;  %5394 = vmatmul.msk.bf16.gmra.mxu1 %vm1328_vm12, %v3239_v24  ;;  %v5643_v24 = vld [vmem:[#allocation2 + $0xc8] sm:$0x1]  ;;  %v4112_v34 = vshrl.u32 %v3748_v49, 16  ;;  %v4165_v35 = vunpack.c.l.b16 %v4110_v29  ;;  %v4123_v60 = vrot.slane %v4121_v8, 5 }
 0x288   : > { %5489 = vmatmul.msk.bf16.gmra.mxu3 %vm1328_vm12, %v4181_v20  ;;  %v3190_v51 = vrot.slane %v5643_v24, 5  ;;  %v4125_v20 = vshrl.u32 %v7110_v59, 16  ;;  %v3682_v37 = vadd.f32 %v3618_v42, %v3396_v1  ;;  %v4526_v11 = vrot.slane %v4524_v18, 4 }
 0x289   : > { %v4667_v28 = vpop.f32.mrf.mxu0  ;;  %v4182_v42 = vpack.c.b16 %v4165_v35, %v4164_v25  ;;  %v4525_v58 = vsel %vm6166_vm1, %v5506_v15, %v4524_v18  ;;  %v4531_v15 = vrot.slane %v7110_v59, 5 }
 0x28a   : > { %v7112_v44 = vadd.f32 %v4667_v28, %v4337_v56  ;;  %v3191_v62 = vsel %vm6166_vm1, %v3189_v22, %v3190_v51  ;;  %v4127_v22 = vrot.slane %v4125_v20, 4  ;;  %v4114_v51 = vrot.slane %v4112_v34, 4  ;;  %v5575_v34 = vld [vmem:[#allocation2 + $0xcc] sm:$0xff] }
 0x28b   : > { %v4273_v3 = vpop.f32.mrf.mxu3  ;;  %v3224_v23 = vunpack.c.l.b16 %v3191_v62  ;;  %v3397_v20 = vadd.f32 %v7093_v53, %v6532_v36  ;;  %v4565_v53 = vunpack.c.l.b16 %v4525_v58 }
 0x28c   : > { %5474 = vmatmul.msk.bf16.gmra.mxu2 %vm1328_vm12, %v5574_v39  ;;  %v7115_v26 = vpop.f32.mrf.mxu1  ;;  %v4766_v55 = vpack.c.bf16 %v7112_v44, %v7112_v44  ;;  %v4338_v56 = vadd.f32 %v4273_v3, %v3681_v27  ;;  %v4115_v39 = vshll.u32 %v3748_v49, 16  ;;  %v7137_v3 = vld [vmem:[#allocation2 + $0xd4] sm:$0x1]  ;;  %v4128_v14 = vor.u32 %v4127_v22, %v4123_v60 }
 0x28d   : > { %v3240_v27 = vpack.c.b16 %v3224_v23, %v3223_v0  ;;  %v4131_v62 = vshll.u32 %v7137_v3, 16  ;;  %v4528_v0 = vsel %vm6166_vm1, %v4526_v11, %v4527_v16  ;;  %v4375_v16 = vld [vmem:[#allocation2 + $0xcc] sm:$0xe] }
 0x28e   : > { %4798 = vst.msk [vmem:[%s6890_s18 + $0x24] sm:$0xf] %vm216_vm5, %v4766_v55  ;;  %v4117_v55 = vrot.slane %v4115_v39, 5  ;;  %v4129_v23 = vrot.slane %v4128_v14, 4 }
 0x28f   : > { %v3621_v21 = vpop.f32.mrf.mxu2  ;;  %v4133_v25 = vrot.slane %v4131_v62, 5 }
 0x290   : > { %v4118_v7 = vor.u32 %v4117_v55, %v4114_v51  ;;  %v3683_v1 = vadd.f32 %v3621_v21, %v3397_v20  ;;  %v3398_v51 = vadd.f32 %v7115_v26, %v6543_v30  ;;  %v4533_v30 = vrot.slane %v4531_v15, 4 }
 0x291   : > { %v4670_v28 = vpop.f32.mrf.mxu0  ;;  %v4134_v21 = vsel %vm5804_vm13, %v4129_v23, %v4133_v25  ;;  %v4534_v26 = vrot.slane %v7137_v3, 5 }
 0x292   : > { %v7135_v24 = vadd.f32 %v4670_v28, %v4338_v56 }
 0x293   : > { %v4275_v52 = vpop.f32.mrf.mxu3 }
 0x294   : > { %v3340_v49 = vpop.f32.mrf.mxu1  ;;  %5521 = vmatmul.msk.bf16.gmra.mxu0 %vm1328_vm12, %v4582_v63  ;;  %v4767_v45 = vpack.c.bf16 %v7135_v24, %v7135_v24  ;;  %v4339_v29 = vadd.f32 %v4275_v52, %v3682_v37  ;;  %v4119_v63 = vrot.slane %v4118_v7, 4  ;;  %v4566_v37 = vunpack.c.l.b16 %v4528_v0 }
 0x295   : > { %v4167_v52 = vunpack.c.l.b16 %v4134_v21  ;;  %v5507_v7 = vrot.slane %v4375_v16, 9 }
 0x296   : > { %4799 = vst.msk [vmem:[%s6890_s18 + $0x28] sm:$0xf] %vm216_vm5, %v4767_v45  ;;  %v4124_v57 = vsel %vm5804_vm13, %v4119_v63, %v4123_v60 }
 0x297   : > { %v3623_v8 = vpop.f32.mrf.mxu2  ;;  %5395 = vmatmul.msk.bf16.gmra.mxu1 %vm1328_vm12, %v3240_v27  ;;  %v4583_v27 = vpack.c.b16 %v4566_v37, %v4565_v53  ;;  %v4166_v45 = vunpack.c.l.b16 %v4124_v57  ;;  %v4532_v20 = vsel %vm6166_vm1, %v5507_v7, %v4531_v15 }
 0x298   : > { %5490 = vmatmul.msk.bf16.gmra.mxu3 %vm1328_vm12, %v4182_v42  ;;  %v3684_v11 = vadd.f32 %v3623_v8, %v3398_v51  ;;  %v3399_v8 = vadd.f32 %v3340_v49, %v6562_v17 }
 0x299   : > { %v4672_v56 = vpop.f32.mrf.mxu0 }
 0x29a   : > { %v7154_v39 = vadd.f32 %v4672_v56, %v4339_v29  ;;  %v4183_v29 = vpack.c.b16 %v4167_v52, %v4166_v45  ;;  %v4535_v56 = vsel %vm6166_vm1, %v4533_v30, %v4534_v26 }
 0x29b   : > { %v4278_v35 = vpop.f32.mrf.mxu3  ;;  %v4568_v63 = vunpack.c.l.b16 %v4535_v56 }
 0x29c   : > { %5475 = vmatmul.msk.bf16.gmra.mxu2 %vm1328_vm12, %v5575_v34  ;;  %v3342_v28 = vpop.f32.mrf.mxu1  ;;  %v4768_v36 = vpack.c.bf16 %v7154_v39, %v7154_v39  ;;  %v4340_v18 = vadd.f32 %v4278_v35, %v3683_v1  ;;  %v4567_v1 = vunpack.c.l.b16 %v4532_v20 }
 0x29d   : > { %v3400_v53 = vadd.f32 %v3342_v28, %v6579_v33 }
 0x29e   : > { %4800 = vst.msk [vmem:[%s6890_s18 + $0x2c] sm:$0xf] %vm216_vm5, %v4768_v36  ;;  %v4584_v36 = vpack.c.b16 %v4568_v63, %v4567_v1 }
 0x29f   : > { %v3626_v22 = vpop.f32.mrf.mxu2 }
 0x2a0   : > { %v3685_v0 = vadd.f32 %v3626_v22, %v3399_v8 }
 0x2a1   : > { %v4675_v55 = vpop.f32.mrf.mxu0 }
 0x2a2   : > { %v7168_v42 = vadd.f32 %v4675_v55, %v4340_v18 }
 0x2a3   : > { %v4280_v60 = vpop.f32.mrf.mxu3 }
 0x2a4   : > { %v3345_v14 = vpop.f32.mrf.mxu1  ;;  %5522 = vmatmul.msk.bf16.gmra.mxu0 %vm1328_vm12, %v4583_v27  ;;  %v4769_v61 = vpack.c.bf16 %v7168_v42, %v7168_v42  ;;  %v4341_v59 = vadd.f32 %v4280_v60, %v3684_v11 }
 0x2a5   : > { %v3401_v51 = vadd.f32 %v3345_v14, %v6599_v4 }
 0x2a6   : > { %4801 = vst.msk [vmem:[%s6890_s18 + $0x30] sm:$0xf] %vm216_vm5, %v4769_v61 }
 0x2a7   : > { %v3628_v62 = vpop.f32.mrf.mxu2 }
 0x2a8   : > { %5491 = vmatmul.msk.bf16.gmra.mxu3 %vm1328_vm12, %v4183_v29  ;;  %v3686_v35 = vadd.f32 %v3628_v62, %v3400_v53 }
 0x2a9   : > { %v4677_v34 = vpop.f32.mrf.mxu0 }
 0x2aa   : > { %v7182_v58 = vadd.f32 %v4677_v34, %v4341_v59 }
 0x2ab   : > { %v4283_v17 = vpop.f32.mrf.mxu3 }
 0x2ac   : > { %v3347_v3 = vpop.f32.mrf.mxu1  ;;  %v4770_v23 = vpack.c.bf16 %v7182_v58, %v7182_v58  ;;  %v4342_v49 = vadd.f32 %v4283_v17, %v3685_v0 }
 0x2ad   : > { %v3402_v61 = vadd.f32 %v3347_v3, %v6612_v47 }
 0x2ae   : > { %4802 = vst.msk [vmem:[%s6890_s18 + $0x34] sm:$0xf] %vm216_vm5, %v4770_v23 }
 0x2af   : > { %v3631_v25 = vpop.f32.mrf.mxu2 }
 0x2b0   : > { %v3687_v28 = vadd.f32 %v3631_v25, %v3401_v51 }
 0x2b1   : > { %v4680_v19 = vpop.f32.mrf.mxu0 }
 0x2b2   : > { %v7189_v37 = vadd.f32 %v4680_v19, %v4342_v49 }
 0x2b3   : > { %v4285_v21 = vpop.f32.mrf.mxu3 }
 0x2b4   : > { %v3350_v18 = vpop.f32.mrf.mxu1  ;;  %5523 = vmatmul.msk.bf16.gmra.mxu0 %vm1328_vm12, %v4584_v36  ;;  %v4771_v57 = vpack.c.bf16 %v7189_v37, %v7189_v37  ;;  %v4343_v22 = vadd.f32 %v4285_v21, %v3686_v35 }
 0x2b5   : > { %v3403_v62 = vadd.f32 %v3350_v18, %v6632_v54 }
 0x2b6   : > { %4803 = vst.msk [vmem:[%s6890_s18 + $0x38] sm:$0xf] %vm216_vm5, %v4771_v57 }
 0x2b7   : > { %v3633_v27 = vpop.f32.mrf.mxu2 }
 0x2b8   : > { %v3688_v4 = vadd.f32 %v3633_v27, %v3402_v61 }
 0x2b9   : > { %v4682_v55 = vpop.f32.mrf.mxu0 }
 0x2ba   : > { %v7197_v33 = vadd.f32 %v4682_v55, %v4343_v22 }
 0x2bb   : > { %v4288_v15 = vpop.f32.mrf.mxu3 }
 0x2bc   : > { %v3352_v45 = vpop.f32.mrf.mxu1  ;;  %v4772_v52 = vpack.c.bf16 %v7197_v33, %v7197_v33  ;;  %v4344_v11 = vadd.f32 %v4288_v15, %v3687_v28 }
 0x2bd   : > { %v3404_v1 = vadd.f32 %v3352_v45, %v6649_v38 }
 0x2be   : > { %4804 = vst.msk [vmem:[%s6890_s18 + $0x3c] sm:$0xf] %vm216_vm5, %v4772_v52 }
 0x2bf   : > { %v3636_v16 = vpop.f32.mrf.mxu2 }
 0x2c0   : > { %v3689_v47 = vadd.f32 %v3636_v16, %v3403_v62  ;;  %v4822_v16 = vsel %vm1328_vm12, %v6910_v40, 0.0 }
 0x2c1   : > { %v4685_v60 = vpop.f32.mrf.mxu0 }
 0x2c2   : > { %v7204_v29 = vadd.f32 %v4685_v60, %v4344_v11 }
 0x2c3   : > { %v4290_v30 = vpop.f32.mrf.mxu3 }
 0x2c4   : > { %v3355_v14 = vpop.f32.mrf.mxu1  ;;  %v4773_v7 = vpack.c.bf16 %v7204_v29, %v7204_v29  ;;  %v4345_v26 = vadd.f32 %v4290_v30, %v3688_v4 }
 0x2c5   : > { %v3405_v35 = vadd.f32 %v3355_v14, %v6669_v2  ;;  %v4824_v14 = vsel %vm1328_vm12, %v6937_v13, 0.0 }
 0x2c6   : > { %4805 = vst.msk [vmem:[%s6890_s18 + $0x40] sm:$0xf] %vm216_vm5, %v4773_v7 }
 0x2c7   : > { %v3638_v59 = vpop.f32.mrf.mxu2 }
 0x2c8   : > { %v3690_v54 = vadd.f32 %v3638_v59, %v3404_v1  ;;  %v4826_v59 = vsel %vm1328_vm12, %v6961_v50, 0.0 }
 0x2c9   : > { %v4687_v8 = vpop.f32.mrf.mxu0 }
 0x2ca   : > { %v7211_v34 = vadd.f32 %v4687_v8, %v4345_v26 }
 0x2cb   : > { %v4293_v0 = vpop.f32.mrf.mxu3 }
 0x2cc   : > { %v3357_v20 = vpop.f32.mrf.mxu1  ;;  %v4774_v56 = vpack.c.bf16 %v7211_v34, %v7211_v34  ;;  %v4346_v3 = vadd.f32 %v4293_v0, %v3689_v47 }
 0x2cd   : > { %v3406_v28 = vadd.f32 %v3357_v20, %v6682_v9  ;;  %v4821_v9 = vsel %vm1328_vm12, %v6885_v41, 0.0  ;;  %v4828_v20 = vsel %vm1328_vm12, %v6988_v10, 0.0 }
 0x2ce   : > { %4806 = vst.msk [vmem:[%s6890_s18 + $0x44] sm:$0xf] %vm216_vm5, %v4774_v56  ;;  %v4823_v30 = vadd.f32 %v4822_v16, %v4821_v9 }
 0x2cf   : > { %v3641_v23 = vpop.f32.mrf.mxu2 }
 0x2d0   : > { %v3691_v38 = vadd.f32 %v3641_v23, %v3405_v35  ;;  %v4825_v47 = vadd.f32 %v4824_v14, %v4823_v30  ;;  %v4844_v30 = vsel %vm1328_vm12, %v7168_v42, 0.0 }
 0x2d1   : > { %v4690_v63 = vpop.f32.mrf.mxu0 }
 0x2d2   : > { %v7218_v17 = vadd.f32 %v4690_v63, %v4346_v3  ;;  %v4827_v3 = vadd.f32 %v4826_v59, %v4825_v47 }
 0x2d3   : > { %v4295_v36 = vpop.f32.mrf.mxu3 }
 0x2d4   : > { %v3360_v49 = vpop.f32.mrf.mxu1  ;;  %v4775_v25 = vpack.c.bf16 %v7218_v17, %v7218_v17  ;;  %v4347_v53 = vadd.f32 %v4295_v36, %v3690_v54  ;;  %v4829_v63 = vadd.f32 %v4828_v20, %v4827_v3  ;;  %v4832_v54 = vsel %vm1328_vm12, %v7034_v5, 0.0 }
 0x2d5   : > { %v3407_v7 = vadd.f32 %v3360_v49, %v6702_v46  ;;  %v4830_v46 = vsel %vm1328_vm12, %v7008_v31, 0.0 }
 0x2d6   : > { %4807 = vst.msk [vmem:[%s6890_s18 + $0x48] sm:$0xf] %vm216_vm5, %v4775_v25  ;;  %v4831_v25 = vadd.f32 %v4830_v46, %v4829_v63 }
 0x2d7   : > { %v3643_v19 = vpop.f32.mrf.mxu2 }
 0x2d8   : > { %v3692_v2 = vadd.f32 %v3643_v19, %v3406_v28  ;;  %v4834_v19 = vsel %vm1328_vm12, %v7059_v12, 0.0 }
 0x2d9   : > { %v4692_v18 = vpop.f32.mrf.mxu0 }
 0x2da   : > { %v7225_v57 = vadd.f32 %v4692_v18, %v4347_v53 }
 0x2db   : > { %v4298_v22 = vpop.f32.mrf.mxu3 }
 0x2dc   : > { %v4776_v21 = vpack.c.bf16 %v7225_v57, %v7225_v57  ;;  %v3362_v27 = vpop.f32.mrf.mxu1  ;;  %v4348_v51 = vadd.f32 %v4298_v22, %v3691_v38  ;;  %v4833_v38 = vadd.f32 %v4832_v54, %v4831_v25 }
 0x2dd   : > { %v3408_v49 = vadd.f32 %v3362_v27, %v6719_v43  ;;  %v4838_v43 = vsel %vm1328_vm12, %v7112_v44, 0.0 }
 0x2de   : > { %4808 = vst.msk [vmem:[%s6890_s18 + $0x4c] sm:$0xf] %vm216_vm5, %v4776_v21  ;;  %v4836_v21 = vsel %vm1328_vm12, %v7090_v32, 0.0 }
 0x2df   : > { %v3646_v55 = vpop.f32.mrf.mxu2 }
 0x2e0   : > { %v3693_v8 = vadd.f32 %v3646_v55, %v3407_v7  ;;  %v4835_v55 = vadd.f32 %v4834_v19, %v4833_v38 }
 0x2e1   : > { %v4695_v45 = vpop.f32.mrf.mxu0 }
 0x2e2   : > { %v7232_v52 = vadd.f32 %v4695_v45, %v4348_v51  ;;  %v4837_v45 = vadd.f32 %v4836_v21, %v4835_v55 }
 0x2e3   : > { %v4300_v11 = vpop.f32.mrf.mxu3 }
 0x2e4   : > { %v4777_v15 = vpack.c.bf16 %v7232_v52, %v7232_v52  ;;  %v4349_v61 = vadd.f32 %v4300_v11, %v3692_v2  ;;  %v3365_v4 = vpop.f32.mrf.mxu1  ;;  %v4840_v2 = vsel %vm1328_vm12, %v7135_v24, 0.0  ;;  %v4839_v11 = vadd.f32 %v4838_v43, %v4837_v45 }
 0x2e6   : > { %4809 = vst.msk [vmem:[%s6890_s18 + $0x50] sm:$0xf] %vm216_vm5, %v4777_v15  ;;  %v3409_v15 = vadd.f32 %v3365_v4, %v6739_v48  ;;  %v4841_v14 = vadd.f32 %v4840_v2, %v4839_v11  ;;  %v4846_v48 = vsel %vm1328_vm12, %v7182_v58, 0.0  ;;  %v4860_v11 = vsel %vm1328_vm12, %v7232_v52, 0.0 }
 0x2e7   : > { %v3648_v60 = vpop.f32.mrf.mxu2 }
 0x2e8   : > { %v3694_v18 = vadd.f32 %v3648_v60, %v3408_v49  ;;  %v4852_v49 = vsel %vm1328_vm12, %v7204_v29, 0.0 }
 0x2e9   : > { %v4697_v26 = vpop.f32.mrf.mxu0 }
 0x2ea   : > { %v7247_v62 = vadd.f32 %v4697_v26, %v4349_v61  ;;  %v4842_v61 = vsel %vm1328_vm12, %v7154_v39, 0.0 }
 0x2eb   : > { %v4303_v0 = vpop.f32.mrf.mxu3 }
 0x2ec   : > { %v4778_v56 = vpack.c.bf16 %v7247_v62, %v7247_v62  ;;  %v4350_v23 = vadd.f32 %v4303_v0, %v3693_v8  ;;  %v3367_v53 = vpop.f32.mrf.mxu1  ;;  %v4843_v8 = vadd.f32 %v4842_v61, %v4841_v14  ;;  %v4862_v14 = vsel %vm1328_vm12, %v7247_v62, 0.0 }
 0x2ed   : > { %v3410_v0 = vadd.f32 %v3367_v53, %v6752_v6  ;;  %v4854_v6 = vsel %vm1328_vm12, %v7211_v34, 0.0 }
 0x2ee   : > { %4810 = vst.msk [vmem:[%s6890_s18 + $0x54] sm:$0xf] %vm216_vm5, %v4778_v56  ;;  %v4845_v20 = vadd.f32 %v4844_v30, %v4843_v8  ;;  %v4848_v56 = vsel %vm1328_vm12, %v7189_v37, 0.0  ;;  %v7521_v8 = vld [vmem:[#allocation11_spill] sm:$0xff] }
 0x2ef   : > { %v3651_v1 = vpop.f32.mrf.mxu2 }
 0x2f0   : > { %v3695_v9 = vadd.f32 %v3651_v1, %v3409_v15  ;;  %v4847_v3 = vadd.f32 %v4846_v48, %v4845_v20 }
 0x2f1   : > { %v4700_v36 = vpop.f32.mrf.mxu0 }
 0x2f2   : > { %v7262_v35 = vadd.f32 %v4700_v36, %v4350_v23  ;;  %v4850_v23 = vsel %vm1328_vm12, %v7197_v33, 0.0  ;;  %v4849_v54 = vadd.f32 %v4848_v56, %v4847_v3 }
 0x2f3   : > { %v4305_v51 = vpop.f32.mrf.mxu3 }
 0x2f4   : > { %v4779_v22 = vpack.c.bf16 %v7262_v35, %v7262_v35  ;;  %v4351_v27 = vadd.f32 %v4305_v51, %v3694_v18  ;;  %v3370_v7 = vpop.f32.mrf.mxu1  ;;  %v4851_v19 = vadd.f32 %v4850_v23, %v4849_v54  ;;  %v7520_v51 = vld [vmem:[#allocation10_spill] sm:$0xff] }
 0x2f5   : > { %v3411_v55 = vadd.f32 %v3370_v7, %v7520_v51 }
 0x2f6   : > { %4811 = vst.msk [vmem:[%s6890_s18 + $0x58] sm:$0xf] %vm216_vm5, %v4779_v22  ;;  %v4853_v38 = vadd.f32 %v4852_v49, %v4851_v19  ;;  %v4856_v22 = vsel %vm1328_vm12, %v7218_v17, 0.0 }
 0x2f7   : > { %v3653_v28 = vpop.f32.mrf.mxu2 }
 0x2f8   : > { %v3696_v63 = vadd.f32 %v3653_v28, %v3410_v0  ;;  %v4855_v43 = vadd.f32 %v4854_v6, %v4853_v38  ;;  %v4858_v28 = vsel %vm1328_vm12, %v7225_v57, 0.0  ;;  %v7522_v6 = vld [vmem:[#allocation3_spill] sm:$0xff] }
 0x2f9   : > { %v4702_v16 = vpop.f32.mrf.mxu0 }
 0x2fa   : > { %v7277_v60 = vadd.f32 %v4702_v16, %v4351_v27  ;;  %v4857_v15 = vadd.f32 %v4856_v22, %v4855_v43 }
 0x2fb   : > { %v4308_v59 = vpop.f32.mrf.mxu3 }
 0x2fc   : > { %v4780_v26 = vpack.c.bf16 %v7277_v60, %v7277_v60  ;;  %v4352_v4 = vadd.f32 %v4308_v59, %v3695_v9  ;;  %v3372_v18 = vpop.f32.mrf.mxu1  ;;  %v4859_v9 = vadd.f32 %v4858_v28, %v4857_v15  ;;  %v4864_v59 = vsel %vm1328_vm12, %v7262_v35, 0.0 }
 0x2fd   : > { %v3412_v48 = vadd.f32 %v3372_v18, %v7521_v8  ;;  %v4866_v56 = vsel %vm1328_vm12, %v7277_v60, 0.0 }
 0x2fe   : > { %4812 = vst.msk [vmem:[%s6890_s18 + $0x5c] sm:$0xf] %vm216_vm5, %v4780_v26  ;;  %v4861_v30 = vadd.f32 %v4860_v11, %v4859_v9 }
 0x2ff   : > { %v3656_v47 = vpop.f32.mrf.mxu2 }
 0x300   : > { %v3697_v2 = vadd.f32 %v3656_v47, %v3411_v55 }
 0x301   : > { %v4705_v46 = vpop.f32.mrf.mxu0 }
 0x302   : > { %v7292_v1 = vadd.f32 %v4705_v46, %v4352_v4  ;;  %v4863_v4 = vadd.f32 %v4862_v14, %v4861_v30 }
 0x303   : > { %v4310_v36 = vpop.f32.mrf.mxu3 }
 0x304   : > { %v4781_v25 = vpack.c.bf16 %v7292_v1, %v7292_v1  ;;  %v4353_v53 = vadd.f32 %v4310_v36, %v3696_v63  ;;  %v3375_v26 = vpop.f32.mrf.mxu1  ;;  %v4865_v46 = vadd.f32 %v4864_v59, %v4863_v4  ;;  %v4868_v23 = vsel %vm1328_vm12, %v7292_v1, 0.0 }
 0x306   : > { %4813 = vst.msk [vmem:[%s6890_s18 + $0x60] sm:$0xf] %vm216_vm5, %v4781_v25  ;;  %v4867_v49 = vadd.f32 %v4866_v56, %v4865_v46  ;;  %v7524_v56 = vld [vmem:[#allocation12_spill] sm:$0xff] }
 0x307   : > { %v3658_v21 = vpop.f32.mrf.mxu2 }
 0x308   : > { %v3698_v3 = vadd.f32 %v3658_v21, %v3412_v48  ;;  %v4869_v19 = vadd.f32 %v4868_v23, %v4867_v49 }
 0x309   : > { %v4707_v27 = vpop.f32.mrf.mxu0 }
 0x30a   : > { %v7307_v45 = vadd.f32 %v4707_v27, %v4353_v53  ;;  %v3413_v53 = vadd.f32 %v3375_v26, %v7522_v6 }
 0x30b   : > { %v4313_v61 = vpop.f32.mrf.mxu3 }
 0x30c   : > { %v4782_v16 = vpack.c.bf16 %v7307_v45, %v7307_v45  ;;  %v4354_v7 = vadd.f32 %v4313_v61, %v3697_v2  ;;  %v4870_v25 = vsel %vm1328_vm12, %v7307_v45, 0.0  ;;  %v3377_v22 = vpop.f32.mrf.mxu1  ;;  %v7523_v61 = vld [vmem:[#allocation4_spill] sm:$0xff] }
 0x30d   : > { %v4871_v38 = vadd.f32 %v4870_v25, %v4869_v19  ;;  %v3414_v9 = vadd.f32 %v3377_v22, %v7523_v61 }
 0x30e   : > { %4814 = vst.msk [vmem:[%s6890_s18 + $0x64] sm:$0xf] %vm216_vm5, %v4782_v16 }
 0x30f   : > { %v3661_v20 = vpop.f32.mrf.mxu2 }
 0x310   : > { %v3699_v55 = vadd.f32 %v3661_v20, %v3413_v53  ;;  %v7525_v53 = vld [vmem:[#allocation13_spill] sm:$0xff] }
 0x311   : > { %v4710_v47 = vpop.f32.mrf.mxu0 }
 0x312   : > { %v7322_v0 = vadd.f32 %v4710_v47, %v4354_v7 }
 0x313   : > { %v4315_v54 = vpop.f32.mrf.mxu3 }
 0x314   : > { %v4783_v63 = vpack.c.bf16 %v7322_v0, %v7322_v0  ;;  %v4355_v36 = vadd.f32 %v4315_v54, %v3698_v3  ;;  %v4872_v18 = vsel %vm1328_vm12, %v7322_v0, 0.0  ;;  %v3380_v26 = vpop.f32.mrf.mxu1 }
 0x315   : > { %v4873_v43 = vadd.f32 %v4872_v18, %v4871_v38  ;;  %v3415_v3 = vadd.f32 %v3380_v26, %v7524_v56 }
 0x316   : > { %4815 = vst.msk [vmem:[%s6890_s18 + $0x68] sm:$0xf] %vm216_vm5, %v4783_v63 }
 0x317   : > { %v3663_v27 = vpop.f32.mrf.mxu2 }
 0x318   : > { %v3700_v30 = vadd.f32 %v3663_v27, %v3414_v9 }
 0x319   : > { %v4712_v21 = vpop.f32.mrf.mxu0 }
 0x31a   : > { %v4752_v51 = vadd.f32 %v4712_v21, %v4355_v36 }
 0x31b   : > { %v4318_v15 = vpop.f32.mrf.mxu3 }
 0x31c   : > { %v4784_v28 = vpack.c.bf16 %v4752_v51, %v4752_v51  ;;  %v4874_v2 = vsel %vm1328_vm12, %v4752_v51, 0.0  ;;  %v4356_v16 = vadd.f32 %v4318_v15, %v3699_v55  ;;  %v3382_v19 = vpop.f32.mrf.mxu1 }
 0x31d   : > { %v4875_v11 = vadd.f32 %v4874_v2, %v4873_v43  ;;  %v3416_v38 = vadd.f32 %v3382_v19, %v7525_v53 }
 0x31e   : > { %4816 = vst.msk [vmem:[%s6890_s18 + $0x6c] sm:$0xf] %vm216_vm5, %v4784_v28 }
 0x31f   : > { %v3666_v47 = vpop.f32.mrf.mxu2 }
 0x320   : > { %v3701_v63 = vadd.f32 %v3666_v47, %v3415_v3 }
 0x321   : > { %v4715_v14 = vpop.f32.mrf.mxu0 }
 0x322   : > { %v4753_v7 = vadd.f32 %v4715_v14, %v4356_v16 }
 0x323   : > { %v4320_v48 = vpop.f32.mrf.mxu3 }
 0x324   : > { %v4785_v59 = vpack.c.bf16 %v4753_v7, %v4753_v7  ;;  %v4876_v8 = vsel %vm1328_vm12, %v4753_v7, 0.0  ;;  %v4357_v20 = vadd.f32 %v4320_v48, %v3700_v30 }
 0x325   : > { %v4877_v4 = vadd.f32 %v4876_v8, %v4875_v11 }
 0x326   : > { %4817 = vst.msk [vmem:[%s6890_s18 + $0x70] sm:$0xf] %vm216_vm5, %v4785_v59 }
 0x327   : > { %v3668_v6 = vpop.f32.mrf.mxu2 }
 0x328   : > { %v3702_v55 = vadd.f32 %v3668_v6, %v3416_v38 }
 0x329   : > { %v4717_v46 = vpop.f32.mrf.mxu0 }
 0x32a   : > { %v4754_v23 = vadd.f32 %v4717_v46, %v4357_v20 }
 0x32b   : > { %v4323_v25 = vpop.f32.mrf.mxu3 }
 0x32c   : > { %v4786_v54 = vpack.c.bf16 %v4754_v23, %v4754_v23  ;;  %v4878_v49 = vsel %vm1328_vm12, %v4754_v23, 0.0  ;;  %v4358_v18 = vadd.f32 %v4323_v25, %v3701_v63 }
 0x32d   : > { %v4879_v36 = vadd.f32 %v4878_v49, %v4877_v4 }
 0x32e   : > { %4818 = vst.msk [vmem:[%s6890_s18 + $0x74] sm:$0xf] %vm216_vm5, %v4786_v54 }
 0x331   : > { %v4720_v21 = vpop.f32.mrf.mxu0 }
 0x332   : > { %v4755_v22 = vadd.f32 %v4720_v21, %v4358_v18 }
 0x333   : > { %v4325_v2 = vpop.f32.mrf.mxu3 }
 0x334   : > { %v4787_v43 = vpack.c.bf16 %v4755_v22, %v4755_v22  ;;  %v4880_v27 = vsel %vm1328_vm12, %v4755_v22, 0.0  ;;  %v4359_v15 = vadd.f32 %v4325_v2, %v3702_v55 }
 0x335   : > { %v4881_v28 = vadd.f32 %v4880_v27, %v4879_v36 }
 0x336   : > { %4819 = vst.msk [vmem:[%s6890_s18 + $0x78] sm:$0xf] %vm216_vm5, %v4787_v43 }
 0x339   : > { %v4722_v11 = vpop.f32.mrf.mxu0 }
 0x33a   : > { %v4756_v16 = vadd.f32 %v4722_v11, %v4359_v15 }
 0x33c   : > { %v4788_v61 = vpack.c.bf16 %v4756_v16, %v4756_v16  ;;  %v4882_v9 = vsel %vm1328_vm12, %v4756_v16, 0.0 }
 0x33d   : > { %v4883_v14 = vadd.f32 %v4882_v9, %v4881_v28 }
 0x33e   : > { %4820 = vst.msk [vmem:[%s6890_s18 + $0x7c] sm:$0xf] %vm216_vm5, %v4788_v61 }
 0x33f   : > { %v4884_v30 = vrot.slane %v4883_v14, 4 }
 0x341   : > { %v4885_v26 = vadd.f32 %v4884_v30, %v4883_v14 }
 0x343   : > { %v4886_v59 = vrot.slane %v4885_v26, 2 }
 0x345   : > { %v4887_v8 = vadd.f32 %v4886_v59, %v4885_v26 }
 0x347   : > { %v4888_v48 = vrot.slane %v4887_v8, 1 }
 0x349   : > { %v4889_v4 = vadd.f32 %v4888_v48, %v4887_v8 }
 0x34b   : > { %4923 = vst.msk [vmem:[%s211_s21] sm:$0x1] %vm219_vm0, %v4889_v4  ;;  %v7358_v47 = vmul.f32 0.00390625, %v4889_v4 }
 0x34d   : > { %v7362_v20 = vsub.f32 %v7322_v0, %v7358_v47  ;;  %v7365_v56 = vsub.f32 %v4752_v51, %v7358_v47  ;;  %v7368_v3 = vsub.f32 %v4753_v7, %v7358_v47  ;;  %v7371_v46 = vsub.f32 %v4754_v23, %v7358_v47 }
 0x34e   : > { %v7374_v63 = vsub.f32 %v4755_v22, %v7358_v47  ;;  %v7377_v54 = vsub.f32 %v4756_v16, %v7358_v47  ;;  %v4891_v49 = vsub.f32 %v6885_v41, %v7358_v47  ;;  %v4892_v0 = vsub.f32 %v6910_v40, %v7358_v47 }
 0x34f   : > { %v4893_v51 = vsub.f32 %v6937_v13, %v7358_v47  ;;  %v4894_v7 = vsub.f32 %v6961_v50, %v7358_v47  ;;  %v4895_v36 = vsub.f32 %v6988_v10, %v7358_v47  ;;  %v4896_v18 = vsub.f32 %v7008_v31, %v7358_v47 }
 0x350   : > { %v4924_v23 = vmul.f32 %v4891_v49, %v4891_v49  ;;  %v4925_v25 = vmul.f32 %v4892_v0, %v4892_v0  ;;  %v4897_v13 = vsub.f32 %v7034_v5, %v7358_v47  ;;  %v4898_v10 = vsub.f32 %v7059_v12, %v7358_v47 }
 0x351   : > { %v4926_v19 = vmul.f32 %v4893_v51, %v4893_v51  ;;  %v4927_v6 = vmul.f32 %v4894_v7, %v4894_v7  ;;  %v4928_v38 = vmul.f32 %v4895_v36, %v4895_v36  ;;  %v4929_v22 = vmul.f32 %v4896_v18, %v4896_v18 }
 0x352   : > { %v4956_v41 = vsel %vm1328_vm12, %v4924_v23, 0.0  ;;  %v4957_v40 = vsel %vm1328_vm12, %v4925_v25, 0.0  ;;  %v4899_v43 = vsub.f32 %v7090_v32, %v7358_v47  ;;  %v4930_v27 = vmul.f32 %v4897_v13, %v4897_v13 }
 0x353   : > { %v4958_v53 = vadd.f32 %v4957_v40, %v4956_v41  ;;  %v4959_v50 = vsel %vm1328_vm12, %v4926_v19, 0.0  ;;  %v4961_v55 = vsel %vm1328_vm12, %v4927_v6, 0.0  ;;  %v4963_v28 = vsel %vm1328_vm12, %v4928_v38, 0.0 }
 0x354   : > { %v4900_v5 = vsub.f32 %v7112_v44, %v7358_v47  ;;  %v4931_v15 = vmul.f32 %v4898_v10, %v4898_v10  ;;  %v4965_v11 = vsel %vm1328_vm12, %v4929_v22, 0.0  ;;  %v4901_v12 = vsub.f32 %v7135_v24, %v7358_v47 }
 0x355   : > { %v4960_v21 = vadd.f32 %v4959_v50, %v4958_v53  ;;  %v4932_v61 = vmul.f32 %v4899_v43, %v4899_v43  ;;  %v4967_v9 = vsel %vm1328_vm12, %v4930_v27, 0.0  ;;  %v4902_v32 = vsub.f32 %v7154_v39, %v7358_v47 }
 0x356   : > { %v4933_v30 = vmul.f32 %v4900_v5, %v4900_v5  ;;  %v4969_v26 = vsel %vm1328_vm12, %v4931_v15, 0.0  ;;  %v4903_v44 = vsub.f32 %v7168_v42, %v7358_v47  ;;  %v4934_v8 = vmul.f32 %v4901_v12, %v4901_v12 }
 0x357   : > { %v4962_v31 = vadd.f32 %v4961_v55, %v4960_v21  ;;  %v4971_v48 = vsel %vm1328_vm12, %v4932_v61, 0.0  ;;  %v4904_v24 = vsub.f32 %v7182_v58, %v7358_v47  ;;  %v4935_v49 = vmul.f32 %v4902_v32, %v4902_v32 }
 0x358   : > { %v4973_v0 = vsel %vm1328_vm12, %v4933_v30, 0.0  ;;  %v4905_v39 = vsub.f32 %v7189_v37, %v7358_v47  ;;  %v4936_v7 = vmul.f32 %v4903_v44, %v4903_v44  ;;  %v4975_v23 = vsel %vm1328_vm12, %v4934_v8, 0.0 }
 0x359   : > { %v4964_v2 = vadd.f32 %v4963_v28, %v4962_v31  ;;  %v4906_v42 = vsub.f32 %v7197_v33, %v7358_v47  ;;  %v4937_v36 = vmul.f32 %v4904_v24, %v4904_v24  ;;  %v4977_v19 = vsel %vm1328_vm12, %v4935_v49, 0.0 }
 0x35a   : > { %v4907_v58 = vsub.f32 %v7204_v29, %v7358_v47  ;;  %v4938_v6 = vmul.f32 %v4905_v39, %v4905_v39  ;;  %v4979_v41 = vsel %vm1328_vm12, %v4936_v7, 0.0  ;;  %v4908_v37 = vsub.f32 %v7211_v34, %v7358_v47 }
 0x35b   : > { %v4966_v16 = vadd.f32 %v4965_v11, %v4964_v2  ;;  %v4939_v53 = vmul.f32 %v4906_v42, %v4906_v42  ;;  %v4981_v13 = vsel %vm1328_vm12, %v4937_v36, 0.0  ;;  %v4909_v33 = vsub.f32 %v7218_v17, %v7358_v47 }
 0x35c   : > { %v4940_v50 = vmul.f32 %v4907_v58, %v4907_v58  ;;  %v4983_v21 = vsel %vm1328_vm12, %v4938_v6, 0.0  ;;  %v4910_v29 = vsub.f32 %v7225_v57, %v7358_v47  ;;  %v4941_v22 = vmul.f32 %v4908_v37, %v4908_v37 }
 0x35d   : > { %v4968_v14 = vadd.f32 %v4967_v9, %v4966_v16  ;;  %v4985_v55 = vsel %vm1328_vm12, %v4939_v53, 0.0  ;;  %v4911_v34 = vsub.f32 %v7232_v52, %v7358_v47  ;;  %v4942_v43 = vmul.f32 %v4909_v33, %v4909_v33 }
 0x35e   : > { %v4987_v27 = vsel %vm1328_vm12, %v4940_v50, 0.0  ;;  %v4912_v17 = vsub.f32 %v7247_v62, %v7358_v47  ;;  %v4943_v2 = vmul.f32 %v4910_v29, %v4910_v29  ;;  %v4989_v5 = vsel %vm1328_vm12, %v4941_v22, 0.0 }
 0x35f   : > { %v4970_v59 = vadd.f32 %v4969_v26, %v4968_v14  ;;  %v4913_v57 = vsub.f32 %v7262_v35, %v7358_v47  ;;  %v4944_v11 = vmul.f32 %v4911_v34, %v4911_v34  ;;  %v4991_v16 = vsel %vm1328_vm12, %v4942_v43, 0.0 }
 0x360   : > { %v4914_v52 = vsub.f32 %v7277_v60, %v7358_v47  ;;  %v4945_v61 = vmul.f32 %v4912_v17, %v4912_v17  ;;  %v4993_v9 = vsel %vm1328_vm12, %v4943_v2, 0.0  ;;  %v4915_v62 = vsub.f32 %v7292_v1, %v7358_v47 }
 0x361   : > { %v4972_v4 = vadd.f32 %v4971_v48, %v4970_v59  ;;  %v4946_v32 = vmul.f32 %v4913_v57, %v4913_v57  ;;  %v4995_v30 = vsel %vm1328_vm12, %v4944_v11, 0.0  ;;  %v4916_v35 = vsub.f32 %v7307_v45, %v7358_v47 }
 0x362   : > { %v4947_v59 = vmul.f32 %v4914_v52, %v4914_v52  ;;  %v4997_v44 = vsel %vm1328_vm12, %v4945_v61, 0.0  ;;  %v4948_v48 = vmul.f32 %v4915_v62, %v4915_v62  ;;  %v4950_v1 = vmul.f32 %v7362_v20, %v7362_v20 }
 0x363   : > { %v4974_v51 = vadd.f32 %v4973_v0, %v4972_v4  ;;  %v4999_v60 = vsel %vm1328_vm12, %v4946_v32, 0.0  ;;  %v4949_v24 = vmul.f32 %v4916_v35, %v4916_v35  ;;  %v4951_v45 = vmul.f32 %v7365_v56, %v7365_v56 }
 0x364   : > { %v5001_v49 = vsel %vm1328_vm12, %v4947_v59, 0.0  ;;  %v4953_v36 = vmul.f32 %v7371_v46, %v7371_v46  ;;  %v4955_v6 = vmul.f32 %v7377_v54, %v7377_v54 }
 0x365   : > { %v4976_v25 = vadd.f32 %v4975_v23, %v4974_v51  ;;  %v5003_v51 = vsel %vm1328_vm12, %v4948_v48, 0.0  ;;  %v5005_v47 = vsel %vm1328_vm12, %v4949_v24, 0.0  ;;  %v4952_v23 = vmul.f32 %v7368_v3, %v7368_v3 }
 0x366   : > { %v5009_v20 = vsel %vm1328_vm12, %v4951_v45, 0.0  ;;  %v5013_v3 = vsel %vm1328_vm12, %v4953_v36, 0.0  ;;  %v5017_v46 = vsel %vm1328_vm12, %v4955_v6, 0.0 }
 0x367   : > { %v4978_v18 = vadd.f32 %v4977_v19, %v4976_v25  ;;  %v5007_v25 = vsel %vm1328_vm12, %v4950_v1, 0.0  ;;  %v5011_v56 = vsel %vm1328_vm12, %v4952_v23, 0.0 }
 0x369   : > { %v4980_v40 = vadd.f32 %v4979_v41, %v4978_v18  ;;  %v4954_v18 = vmul.f32 %v7374_v63, %v7374_v63 }
 0x36b   : > { %v4982_v38 = vadd.f32 %v4981_v13, %v4980_v40  ;;  %v5015_v40 = vsel %vm1328_vm12, %v4954_v18, 0.0 }
 0x36d   : > { %v4984_v10 = vadd.f32 %v4983_v21, %v4982_v38 }
 0x36f   : > { %v4986_v31 = vadd.f32 %v4985_v55, %v4984_v10 }
 0x371   : > { %v4988_v28 = vadd.f32 %v4987_v27, %v4986_v31 }
 0x373   : > { %v4990_v15 = vadd.f32 %v4989_v5, %v4988_v28 }
 0x375   : > { %v4992_v12 = vadd.f32 %v4991_v16, %v4990_v15 }
 0x377   : > { %v4994_v14 = vadd.f32 %v4993_v9, %v4992_v12 }
 0x379   : > { %v4996_v26 = vadd.f32 %v4995_v30, %v4994_v14 }
 0x37b   : > { %v4998_v8 = vadd.f32 %v4997_v44, %v4996_v26 }
 0x37d   : > { %v5000_v4 = vadd.f32 %v4999_v60, %v4998_v8 }
 0x37f   : > { %v5002_v0 = vadd.f32 %v5001_v49, %v5000_v4 }
 0x381   : > { %v5004_v39 = vadd.f32 %v5003_v51, %v5002_v0 }
 0x383   : > { %v5006_v7 = vadd.f32 %v5005_v47, %v5004_v39 }
 0x385   : > { %v5008_v42 = vadd.f32 %v5007_v25, %v5006_v7 }
 0x387   : > { %v5010_v19 = vadd.f32 %v5009_v20, %v5008_v42 }
 0x389   : > { %v5012_v58 = vadd.f32 %v5011_v56, %v5010_v19 }
 0x38b   : > { %v5014_v41 = vadd.f32 %v5013_v3, %v5012_v58 }
 0x38d   : > { %v5016_v37 = vadd.f32 %v5015_v40, %v5014_v41 }
 0x38f   : > { %v5018_v53 = vadd.f32 %v5017_v46, %v5016_v37 }
 0x391   : > { %v5019_v13 = vrot.slane %v5018_v53, 4 }
 0x393   : > { %v5020_v38 = vadd.f32 %v5019_v13, %v5018_v53 }
 0x395   : > { %v5021_v33 = vrot.slane %v5020_v38, 2 }
 0x397   : > { %v5022_v50 = vadd.f32 %v5021_v33, %v5020_v38 }
 0x399   : > { %v5023_v63 = vrot.slane %v5022_v50, 1 }
 0x39b   : > { %v5024_v21 = vadd.f32 %v5023_v63, %v5022_v50 }
 0x39d   : > { %5025 = vst.msk [vmem:[%s214_s24] sm:$0x1] %vm219_vm0, %v5024_v21 }
 0x39e PF: > { %s15_s15 = sadd.s32 1, %s5650_s15  }
 0x39f   : > { %p12_p4 = scmp.ge.s32.totalorder %s15_s15, 4  }
 0x3a1   :  { %14 = sbr.rel (!%p12_p4) target bundleno = 1 (0x1), region = 85 }

// kernel: basic_block_forward.4
= control target key start
LH: loop header
LB: loop body
LE: loop exit
PB: predicated region body
PF: predicated region fallthrough
CT: control target
= control target key end

     0   :  { %s5931_s21 = smov 0   ;;  %s7662_s0 = inlined_call_operand.vmem [shape: bf16[2,16,16,4], index: 0, kind: input, shape index: {}]   ;;  %s7663_s1 = inlined_call_operand.vmem [shape: bf16[36,4], index: 1, kind: input, shape index: {}]   ;;  %s7664_s2 = inlined_call_operand.vmem [shape: f32[1,4], index: 2, kind: input, shape index: {}]   ;;  %s7665_s3 = inlined_call_operand.vmem [shape: f32[1,4], index: 3, kind: input, shape index: {}]   ;;  %s7666_s4 = inlined_call_operand.vmem [shape: f32[2,256,4], index: 4, kind: output, shape index: {0}]   ;;  %s7667_s5 = inlined_call_operand.vmem [shape: f32[2,1,4], index: 5, kind: output, shape index: {1}]   ;;  %s7668_s6 = inlined_call_operand.vmem [shape: f32[2,1,4], index: 6, kind: output, shape index: {2}]  }
   0x1 LB: > { %s5289_s22 = sadd.s32 4294967295, %s5893_s21   ;;  %p5293_p0 = scmp.ge.s32.totalorder %s5893_s21, 1  ;;  %s5893_s21 = sphi %s5931_s21, %s17_s21  }
   0x2   : > { %p217_p1 = scmp.lt.s32.totalorder %s5893_s21, 3 }
   0x4   : > { %p218_p2 = pnand %p5293_p0, %p217_p1 }
   0x6   : > { %221 = sbr.rel (%p218_p2) target bundleno = 953 (0x3b9), region = 36 }
   0xb   : > { %v1465_v0 = vld [vmem:[%s7663_s1] sm:$0xc]  ;;  %p253_p3 = scmp.lt.s32.totalorder %s5289_s22, 1  ;;  %vm273_vm0 = vcmask 24576   ;;  %vm280_vm1 = vsmask.f32 256 }
   0xc   : > { %v1515_v1 = vunpack.c.l.b16 %v1465_v0  ;;  %v294_v2 = vld [vmem:[#allocation2 + $0x30] sm:$0x1]  ;;  %vm336_vm2 = vsmask.f32 7938  ;;  %vm5946_vm3 = vmand %vm273_vm0, %vm280_vm1  ;;  %v350_v4 = vld [vmem:[#allocation2 + $0x38] sm:$0x1] }
   0xd   : > { %s7708_s22 = smov (!%p253_p3, %s5289_s22), 1  ;;  %v295_v6 = vsel %vm5946_vm3, 0, %v294_v2  ;;  %vm5954_vm4 = vmand %vm273_vm0, %vm336_vm2  ;;  %vm1567_vm5 = vcmask 1041408   ;;  %v5969_v10 = vld [vmem:[%s7664_s2] ss:$0 sm:$0xff]  ;;  %vm270_vm6 = vcmask 27648  }
   0xe   : > { %v1516_v5 = vpack.c.b16 %v1515_v1, %v1515_v1  ;;  %s5684_s25 = sshll.u32 %s7708_s22, 7  ;;  %296 = vst [vmem:[#allocation2 + $0x30] sm:$0x1] %v295_v6  ;;  %v351_v8 = vsel %vm5954_vm4, 0, %v350_v4  ;;  %v5975_v12 = vld [vmem:[%s7665_s3] ss:$0 sm:$0xff]  ;;  %vm6011_vm8 = vmand %vm270_vm6, %vm336_vm2  ;;  %s265_s17 = scalar_lea.vmem %s7667_s5, %s7708_s22 }
   0xf   : > { %s5964_s28 = scalar_lea.vmem %s7662_s0, %s5684_s25  ;;  %352 = vst [vmem:[#allocation2 + $0x38] sm:$0x1] %v351_v8  ;;  %v306_v17 = vld [vmem:[#allocation2 + $0x60] sm:$0x1]  ;;  %v362_v18 = vld [vmem:[#allocation2 + $0x68] sm:$0x1]  ;;  %s268_s20 = scalar_lea.vmem %s7668_s6, %s7708_s22 }
  0x10   : > { %v1517_v9 = vrot.slane %v1516_v5, 2  ;;  %v5800_v11 = vld [vmem:[%s5964_s28 + $0x18] sm:$0xff]   ;;  %v307_v20 = vsel %vm5946_vm3, 0, %v306_v17  ;;  %v363_v21 = vsel %vm5954_vm4, 0, %v362_v18  ;;  %v318_v23 = vld [vmem:[#allocation2 + $0x90] sm:$0x1] }
  0x11   : > { %v5804_v13 = vld [vmem:[%s5964_s28 + $0x38] sm:$0xff]   ;;  %v5748_v15 = vunpack.c.l.bf16 %v5800_v11  ;;  %v5749_v16 = vunpack.c.h.bf16 %v5800_v11  ;;  %308 = vst [vmem:[#allocation2 + $0x60] sm:$0x1] %v307_v20  ;;  %v319_v30 = vsel %vm5946_vm3, 0, %v318_v23  ;;  %v5801_v38 = vld [vmem:[%s5964_s28 + $0x20] sm:$0xff]   ;;  %v5895_v45 = vmov 0  }
  0x12   : > { %v1569_v14 = vsel %vm1567_vm5, %v1517_v9, 0  ;;  %v5764_v19 = vunpack.c.l.bf16 %v5804_v13  ;;  %v5765_v22 = vunpack.c.h.bf16 %v5804_v13  ;;  %v374_v24 = vld [vmem:[#allocation2 + $0x98] sm:$0x1]  ;;  %364 = vst [vmem:[#allocation2 + $0x68] sm:$0x1] %v363_v21  ;;  %v5752_v50 = vunpack.c.l.bf16 %v5801_v38  ;;  %s5685_s11 = sshll.u32 %s7708_s22, 8 }
  0x13   : > { %5813 = vmatpush.bf16.msra.mxu1 %v1569_v14  ;;  %5814 = vmatpush.bf16.msra.mxu2 %v1569_v14  ;;  %v466_v25 = vmul.f32 %v5969_v10, %v5748_v15  ;;  %v467_v26 = vmul.f32 %v5969_v10, %v5749_v16  ;;  %v5808_v28 = vld [vmem:[%s5964_s28 + $0x58] sm:$0xff]   ;;  %v375_v31 = vsel %vm5954_vm4, 0, %v374_v24  ;;  %320 = vst [vmem:[#allocation2 + $0x90] sm:$0x1] %v319_v30  ;;  %vm592_vm7 = vsmask.f32 4368  ;;  %s7109_s14 = scalar_lea.vmem %s7666_s4, %s5685_s11 }
  0x14   : > { %5815 = vmatpush.bf16.msra.mxu3 %v1569_v14  ;;  %1578 = vmatpush.bf16.msra.mxu0 %v1569_v14  ;;  %v474_v27 = vmul.f32 %v5969_v10, %v5764_v19  ;;  %v475_v29 = vmul.f32 %v5969_v10, %v5765_v22  ;;  %v5780_v32 = vunpack.c.l.bf16 %v5808_v28  ;;  %v5781_v36 = vunpack.c.h.bf16 %v5808_v28  ;;  %v297_v37 = vld [vmem:[#allocation2 + $0x3c] sm:$0x1]  ;;  %376 = vst [vmem:[#allocation2 + $0x98] sm:$0x1] %v375_v31  ;;  %v353_v49 = vld [vmem:[#allocation2 + $0x44] sm:$0x1]  ;;  %vm6018_vm9 = vmor %vm280_vm1, %vm592_vm7 }
  0x15   : > { %v502_v33 = vadd.f32 %v5975_v12, %v466_v25  ;;  %v503_v34 = vadd.f32 %v5975_v12, %v467_v26  ;;  %271 = vst.msk [vmem:[#allocation2] sm:$0xf] %vm270_vm6, %v5895_v45  ;;  %v298_v48 = vsel %vm5946_vm3, 0, %v297_v37  ;;  %v354_v57 = vsel %vm5954_vm4, 0, %v353_v49  ;;  %v938_v8 = vld [vmem:[#allocation2 + $0x30] sm:$0xf] }
  0x16   : > { %v510_v35 = vadd.f32 %v5975_v12, %v474_v27  ;;  %v511_v39 = vadd.f32 %v5975_v12, %v475_v29  ;;  %v482_v40 = vmul.f32 %v5969_v10, %v5780_v32  ;;  %v483_v44 = vmul.f32 %v5969_v10, %v5781_v36  ;;  %272 = vst.msk [vmem:[#allocation2 + $0x4] sm:$0xf] %vm270_vm6, %v5895_v45  ;;  %v942_v14 = vld [vmem:[#allocation2 + $0x38] sm:$0x1] }
  0x17   : > { %v534_v41 = vmax.f32 %v502_v33, 0.0  ;;  %v535_v42 = vmax.f32 %v503_v34, 0.0  ;;  %274 = vst.msk [vmem:[#allocation2 + $0x8] sm:$0x1] %vm273_vm0, %v5895_v45  ;;  %v5753_v58 = vunpack.c.h.bf16 %v5801_v38  ;;  %v468_v11 = vmul.f32 %v5969_v10, %v5752_v50  ;;  %v2043_v38 = vld [vmem:[%s7663_s1 + $0x4] sm:$0x3] }
  0x18   : > { %v542_v43 = vmax.f32 %v510_v35, 0.0  ;;  %v543_v46 = vmax.f32 %v511_v39, 0.0  ;;  %v518_v47 = vadd.f32 %v5975_v12, %v482_v40  ;;  %v519_v54 = vadd.f32 %v5975_v12, %v483_v44  ;;  %276 = vst.msk [vmem:[#allocation2 + $0xcc] sm:$0xf] %vm270_vm6, %v5895_v45  ;;  %v966_v23 = vld [vmem:[#allocation2 + $0x60] sm:$0xf] }
  0x19   : > { %v566_v51 = vpack.c.bf16 %v534_v41, %v534_v41  ;;  %v567_v52 = vpack.c.bf16 %v535_v42, %v535_v42  ;;  %277 = vst.msk [vmem:[#allocation2 + $0xd0] sm:$0xf] %vm270_vm6, %v5895_v45  ;;  %v469_v18 = vmul.f32 %v5969_v10, %v5753_v58  ;;  %v970_v28 = vld [vmem:[#allocation2 + $0x68] sm:$0x1]  ;;  %v504_v39 = vadd.f32 %v5975_v12, %v468_v11 }
  0x1a   : > { %v574_v53 = vpack.c.bf16 %v542_v43, %v542_v43  ;;  %v575_v55 = vpack.c.bf16 %v543_v46, %v543_v46  ;;  %v550_v56 = vmax.f32 %v518_v47, 0.0  ;;  %v551_v9 = vmax.f32 %v519_v54, 0.0  ;;  %278 = vst.msk [vmem:[#allocation2 + $0xd4] sm:$0x1] %vm273_vm0, %v5895_v45  ;;  %v994_v43 = vld [vmem:[#allocation2 + $0x90] sm:$0xf] }
  0x1b   : > { %v646_v59 = vshrl.u32 %v566_v51, 16  ;;  %v649_v60 = vshll.u32 %v566_v51, 16  ;;  %v654_v61 = vshrl.u32 %v567_v52, 16  ;;  %v657_v62 = vshll.u32 %v567_v52, 16  ;;  %299 = vst [vmem:[#allocation2 + $0x3c] sm:$0x1] %v298_v48 }
  0x1c   : > { %v714_v63 = vshrl.u32 %v574_v53, 16  ;;  %v717_v0 = vshll.u32 %v574_v53, 16  ;;  %v722_v1 = vshrl.u32 %v575_v55, 16  ;;  %v725_v2 = vshll.u32 %v575_v55, 16  ;;  %v282_v33 = vld [vmem:[#allocation2] sm:$0x1] }
  0x1d   : > { %v648_v4 = vrot.slane %v646_v59, 7  ;;  %v656_v5 = vrot.slane %v654_v61, 7  ;;  %v582_v17 = vpack.c.bf16 %v550_v56, %v550_v56  ;;  %v583_v32 = vpack.c.bf16 %v551_v9, %v551_v9  ;;  %v1030_v34 = vld [vmem:[#allocation2 + $0x4] sm:$0xf]  ;;  %355 = vst [vmem:[#allocation2 + $0x44] sm:$0x1] %v354_v57 }
  0x1e   : > { %v716_v15 = vrot.slane %v714_v63, 7  ;;  %v724_v16 = vrot.slane %v722_v1, 7  ;;  %v2141_v44 = vsel %vm1567_vm5, %v2043_v38, 0  ;;  %vm1078_vm10 = vsmask.f32 3328 }
  0x1f   : > { %v651_v19 = vor.u32 %v649_v60, %v648_v4  ;;  %v652_v20 = vrot.slane %v648_v4, 4  ;;  %v659_v21 = vor.u32 %v657_v62, %v656_v5  ;;  %v661_v22 = vrot.slane %v656_v5, 4  ;;  %v998_v47 = vld [vmem:[#allocation2 + $0x98] sm:$0x1]  ;;  %2150 = vmatpush.bf16.msrb.mxu2 %v2141_v44  ;;  %v6045_v49 = vld [vmem:[#allocation2 + $0x8] sm:$0x1] }
  0x20   : > { %v719_v24 = vor.u32 %v717_v0, %v716_v15  ;;  %v720_v25 = vrot.slane %v716_v15, 4  ;;  %v727_v26 = vor.u32 %v725_v2, %v724_v16  ;;  %v729_v27 = vrot.slane %v724_v16, 4  ;;  %v2296_v53 = vld [vmem:[%s7663_s1 + $0x4] sm:$0xc]  ;;  %v1061_v59 = vld [vmem:[%s7663_s1] sm:$0x3] }
  0x21   : > { %v660_v29 = vsel %vm6018_vm9, %v652_v20, %v659_v21  ;;  %v939_v30 = vsel %vm6011_vm8, %v651_v19, %v938_v8  ;;  %v943_v31 = vsel %vm5946_vm3, %v661_v22, %v942_v14  ;;  %v782_v37 = vshrl.u32 %v582_v17, 16  ;;  %v6061_v0 = vld [vmem:[%s5964_s28 + $0x40] sm:$0xff]   ;;  %v2985_v2 = vld [vmem:[%s7663_s1 + $0x8] sm:$0x3] }
  0x22   : > { %940 = vst [vmem:[#allocation2 + $0x30] sm:$0xf] %v939_v30  ;;  %v728_v35 = vsel %vm6018_vm9, %v720_v25, %v727_v26  ;;  %v967_v36 = vsel %vm6011_vm8, %v719_v24, %v966_v23  ;;  %v785_v40 = vshll.u32 %v582_v17, 16  ;;  %v790_v41 = vshrl.u32 %v583_v32, 16 }
  0x23   : > { %941 = vst.msk [vmem:[#allocation2 + $0x34] sm:$0xf] %vm270_vm6, %v660_v29  ;;  %v793_v42 = vshll.u32 %v583_v32, 16  ;;  %vm1079_vm11 = vsmask.f32 7440  ;;  %v971_v45 = vsel %vm5946_vm3, %v729_v27, %v970_v28  ;;  %v784_v46 = vrot.slane %v782_v37, 7 }
  0x24   : > { %944 = vst [vmem:[#allocation2 + $0x38] sm:$0x1] %v943_v31  ;;  %v283_v48 = vsel %vm5946_vm3, 0, %v282_v33  ;;  %v1091_v50 = vshll.u32 %v1030_v34, 16  ;;  %v792_v51 = vrot.slane %v790_v41, 7  ;;  %v1095_v52 = vshrl.u32 %v1030_v34, 16  ;;  %vm6088_vm13 = vmor %vm1078_vm10, %vm1079_vm11 }
  0x25   : > { %968 = vst [vmem:[#allocation2 + $0x60] sm:$0xf] %v967_v36  ;;  %v505_v54 = vadd.f32 %v5975_v12, %v469_v18  ;;  %v787_v55 = vor.u32 %v785_v40, %v784_v46  ;;  %v788_v56 = vrot.slane %v784_v46, 4  ;;  %v2378_v58 = vunpack.c.l.b16 %v2296_v53 }
  0x26   : > { %969 = vst.msk [vmem:[#allocation2 + $0x64] sm:$0xf] %vm270_vm6, %v728_v35  ;;  %v6052_v57 = vrot.slane %v1091_v50, 5  ;;  %v795_v60 = vor.u32 %v793_v42, %v792_v51  ;;  %v797_v61 = vrot.slane %v792_v51, 4  ;;  %v6057_v62 = vrot.slane %v1095_v52, 4 }
  0x27   : > { %972 = vst [vmem:[#allocation2 + $0x68] sm:$0x1] %v971_v45  ;;  %v1789_v63 = vsel %vm1567_vm5, %v1061_v59, 0  ;;  %v995_v1 = vsel %vm6011_vm8, %v787_v55, %v994_v43  ;;  %v536_v4 = vmax.f32 %v504_v39, 0.0  ;;  %v537_v5 = vmax.f32 %v505_v54, 0.0 }
  0x28   : > { %284 = vst [vmem:[#allocation2] sm:$0x1] %v283_v48  ;;  %1798 = vmatpush.bf16.msrb.mxu1 %v1789_v63  ;;  %v796_v9 = vsel %vm6018_vm9, %v788_v56, %v795_v60  ;;  %v999_v11 = vsel %vm5946_vm3, %v797_v61, %v998_v47  ;;  %v339_v14 = vsel %vm5954_vm4, 0, %v6045_v49  ;;  %v3083_v15 = vsel %vm1567_vm5, %v2985_v2, 0 }
  0x29   : > { %v1037_v8 = vld [vmem:[#allocation2 + $0x30] sm:$0xf]  ;;  %996 = vst [vmem:[#allocation2 + $0x90] sm:$0xf] %v995_v1  ;;  %v6077_v19 = vpack.c.b16 %v2378_v58, %v2378_v58  ;;  %3092 = vmatpush.bf16.msrb.mxu0 %v3083_v15  ;;  %v5768_v20 = vunpack.c.l.bf16 %v6061_v0  ;;  %v1098_v24 = vor.u32 %v6057_v62, %v6052_v57  ;;  %v6082_v25 = vpack.c.bf16 %v536_v4, %v536_v4 }
  0x2a   : > { %v1038_v16 = vld [vmem:[#allocation2 + $0x34] sm:$0xf]  ;;  %v1178_v17 = vshrl.u32 %v1037_v8, 16  ;;  %v1181_v18 = vshll.u32 %v1037_v8, 16  ;;  %997 = vst.msk [vmem:[#allocation2 + $0x94] sm:$0xf] %vm270_vm6, %v796_v9  ;;  %v6084_v30 = vpack.c.bf16 %v537_v5, %v537_v5  ;;  %v5769_v50 = vunpack.c.h.bf16 %v6061_v0 }
  0x2b   : > { %v1066_v21 = vld [vmem:[#allocation2 + $0x38] sm:$0x1]  ;;  %v1187_v22 = vshll.u32 %v1038_v16, 16  ;;  %v1191_v23 = vshrl.u32 %v1038_v16, 16  ;;  %1000 = vst [vmem:[#allocation2 + $0x98] sm:$0x1] %v999_v11  ;;  %v476_v11 = vmul.f32 %v5969_v10, %v5768_v20 }
  0x2c   : > { %v1180_v26 = vrot.slane %v1178_v17, 4  ;;  %v1183_v27 = vrot.slane %v1181_v18, 5  ;;  %v1197_v28 = vshll.u32 %v1066_v21, 16  ;;  %v1045_v29 = vld [vmem:[#allocation2 + $0x60] sm:$0xf]  ;;  %vm1518_vm12 = vcmask 31744  }
  0x2d   : > { %v1189_v31 = vrot.slane %v1187_v22, 5  ;;  %v1193_v32 = vrot.slane %v1191_v23, 4  ;;  %v1046_v33 = vld [vmem:[#allocation2 + $0x64] sm:$0xf]  ;;  %v1274_v34 = vshrl.u32 %v1045_v29, 16  ;;  %v1277_v35 = vshll.u32 %v1045_v29, 16 }
  0x2e   : > { %v1184_v36 = vor.u32 %v1183_v27, %v1180_v26  ;;  %v1199_v37 = vrot.slane %v1197_v28, 5  ;;  %v1070_v38 = vld [vmem:[#allocation2 + $0x68] sm:$0x1]  ;;  %v1283_v39 = vshll.u32 %v1046_v33, 16  ;;  %v1287_v40 = vshrl.u32 %v1046_v33, 16 }
  0x2f   : > { %v1194_v42 = vor.u32 %v1193_v32, %v1189_v31  ;;  %v1276_v43 = vrot.slane %v1274_v34, 4  ;;  %v1279_v44 = vrot.slane %v1277_v35, 5  ;;  %v1293_v45 = vshll.u32 %v1070_v38, 16  ;;  %340 = vst [vmem:[#allocation2 + $0x8] sm:$0x1] %v339_v14 }
  0x30   : > { %v1185_v46 = vrot.slane %v1184_v36, 4  ;;  %v1285_v47 = vrot.slane %v1283_v39, 5  ;;  %v1289_v48 = vrot.slane %v1287_v40, 4  ;;  %v1053_v49 = vld [vmem:[#allocation2 + $0x90] sm:$0xf]  ;;  %v2380_v38 = vrot.slane %v6077_v19, 2 }
  0x31   : > { %v1195_v51 = vrot.slane %v1194_v42, 4  ;;  %v1280_v52 = vor.u32 %v1279_v44, %v1276_v43  ;;  %v1295_v53 = vrot.slane %v1293_v45, 5  ;;  %v1054_v54 = vld [vmem:[#allocation2 + $0x94] sm:$0xf]  ;;  %v1370_v55 = vshrl.u32 %v1053_v49, 16 }
  0x32   : > { %v1190_v56 = vsel %vm6088_vm13, %v1185_v46, %v1189_v31  ;;  %v1290_v58 = vor.u32 %v1289_v48, %v1285_v47  ;;  %v1074_v59 = vld [vmem:[#allocation2 + $0x98] sm:$0x1]  ;;  %v1373_v60 = vshll.u32 %v1053_v49, 16  ;;  %v1379_v61 = vshll.u32 %v1054_v54, 16  ;;  %v1029_v9 = vld [vmem:[#allocation2] sm:$0xf] }
  0x33   : > { %v1200_v62 = vsel %vm6088_vm13, %v1195_v51, %v1199_v37  ;;  %v1474_v63 = vunpack.c.l.b16 %v1190_v56  ;;  %v1281_v1 = vrot.slane %v1280_v52, 4  ;;  %v1372_v2 = vrot.slane %v1370_v55, 4  ;;  %v309_v44 = vld [vmem:[#allocation2 + $0x6c] sm:$0x1]  ;;  %v365_v52 = vld [vmem:[#allocation2 + $0x74] sm:$0x1] }
  0x34   : > { %v1475_v4 = vunpack.c.l.b16 %v1200_v62  ;;  %v1291_v5 = vrot.slane %v1290_v58, 4  ;;  %v1375_v8 = vrot.slane %v1373_v60, 5  ;;  %v1381_v15 = vrot.slane %v1379_v61, 5  ;;  %v945_v56 = vld [vmem:[#allocation2 + $0x3c] sm:$0xf] }
  0x35   : > { %v1286_v14 = vsel %vm6088_vm13, %v1281_v1, %v1285_v47  ;;  %v1383_v16 = vshrl.u32 %v1054_v54, 16  ;;  %v1389_v17 = vshll.u32 %v1074_v59, 16  ;;  %v1082_v29 = vshrl.u32 %v1029_v9, 16  ;;  %v321_v58 = vld [vmem:[#allocation2 + $0x9c] sm:$0x1] }
  0x36   : > { %v1502_v18 = vpack.c.b16 %v1475_v4, %v1474_v63  ;;  %v1296_v21 = vsel %vm6088_vm13, %v1291_v5, %v1295_v53  ;;  %v1482_v22 = vunpack.c.l.b16 %v1286_v14  ;;  %v1376_v23 = vor.u32 %v1375_v8, %v1372_v2  ;;  %v1062_v26 = vld [vmem:[#allocation2 + $0x8] sm:$0x1]  ;;  %v377_v4 = vld [vmem:[#allocation2 + $0xa4] sm:$0x1] }
  0x37   : > { %v1483_v27 = vunpack.c.l.b16 %v1296_v21  ;;  %v1385_v28 = vrot.slane %v1383_v16, 4  ;;  %v1099_v31 = vrot.slane %v1098_v24, 4  ;;  %v1391_v32 = vrot.slane %v1389_v17, 5  ;;  %v5809_v5 = vld [vmem:[%s5964_s28 + $0x60] sm:$0xff]  }
  0x38   : > { %5302 = vmatmul.msk.bf16.vlgmr.msra.gmra.mxu1 %vm1518_vm12, %v1502_v18  ;;  %v1377_v20 = vrot.slane %v1376_v23, 4  ;;  %v1085_v33 = vshll.u32 %v1029_v9, 16  ;;  %v1101_v34 = vshll.u32 %v1062_v26, 16  ;;  %v1084_v37 = vrot.slane %v1082_v29, 4  ;;  %v285_v18 = vld [vmem:[#allocation2 + $0xc] sm:$0x1] }
  0x39   : > { %v1506_v35 = vpack.c.b16 %v1483_v27, %v1482_v22  ;;  %v1386_v36 = vor.u32 %v1385_v28, %v1381_v15  ;;  %v663_v43 = vshrl.u32 %v6082_v25, 16  ;;  %v2430_v46 = vsel %vm1567_vm5, %v2380_v38, 0  ;;  %v5735_v21 = vld [vmem:[%s5964_s28] sm:$0xff]   ;;  %v341_v27 = vld [vmem:[#allocation2 + $0x14] sm:$0x1] }
  0x3a   : > { %v1382_v39 = vsel %vm6088_vm13, %v1377_v20, %v1381_v15  ;;  %v1087_v40 = vrot.slane %v1085_v33, 5  ;;  %v1103_v42 = vrot.slane %v1101_v34, 5  ;;  %v666_v47 = vshll.u32 %v6082_v25, 16  ;;  %2439 = vmatpush.bf16.msrb.mxu3 %v2430_v46  ;;  %v949_v15 = vld [vmem:[#allocation2 + $0x44] sm:$0x1] }
  0x3b   : > { %5306 = vmatmul.msk.bf16.vlgmr.msra.gmra.mxu2 %vm1518_vm12, %v1506_v35  ;;  %v1387_v24 = vrot.slane %v1386_v36, 4  ;;  %v1490_v45 = vunpack.c.l.b16 %v1382_v39  ;;  %v665_v49 = vrot.slane %v663_v43, 7  ;;  %v671_v51 = vshrl.u32 %v6084_v30, 16 }
  0x3c   : > { %v1088_v48 = vor.u32 %v1087_v40, %v1084_v37  ;;  %v1104_v19 = vsel %vm6088_vm13, %v1099_v31, %v1103_v42  ;;  %v674_v55 = vshll.u32 %v6084_v30, 16  ;;  %v310_v25 = vsel %vm5946_vm3, 0, %v309_v44 }
  0x3d   : > { %v1392_v53 = vsel %vm6088_vm13, %v1387_v24, %v1391_v32  ;;  %v1467_v54 = vunpack.c.l.b16 %v1104_v19  ;;  %v668_v61 = vor.u32 %v666_v47, %v665_v49  ;;  %v669_v62 = vrot.slane %v665_v49, 4  ;;  %311 = vst [vmem:[#allocation2 + $0x6c] sm:$0x1] %v310_v25  ;;  %v300_v24 = vld [vmem:[#allocation2 + $0x48] sm:$0x1] }
  0x3e   : > { %v1491_v59 = vunpack.c.l.b16 %v1392_v53  ;;  %v1089_v60 = vrot.slane %v1088_v48, 4  ;;  %v673_v63 = vrot.slane %v671_v51, 7  ;;  %v366_v1 = vsel %vm5954_vm4, 0, %v365_v52 }
  0x3f   : > { %v477_v2 = vmul.f32 %v5969_v10, %v5769_v50  ;;  %v512_v30 = vadd.f32 %v5975_v12, %v476_v11  ;;  %v946_v14 = vsel %vm6011_vm8, %v668_v61, %v945_v56  ;;  %367 = vst [vmem:[#allocation2 + $0x74] sm:$0x1] %v366_v1  ;;  %v322_v0 = vsel %vm5946_vm3, 0, %v321_v58 }
  0x40   : > { %v1510_v8 = vpack.c.b16 %v1491_v59, %v1490_v45  ;;  %v1094_v9 = vsel %vm6088_vm13, %v1089_v60, %v6052_v57  ;;  %v676_v50 = vor.u32 %v674_v55, %v673_v63  ;;  %v678_v17 = vrot.slane %v673_v63, 4  ;;  %947 = vst [vmem:[#allocation2 + $0x3c] sm:$0xf] %v946_v14 }
  0x41   : > { %v1466_v16 = vunpack.c.l.b16 %v1094_v9  ;;  %v513_v11 = vadd.f32 %v5975_v12, %v477_v2  ;;  %v544_v22 = vmax.f32 %v512_v30, 0.0  ;;  %323 = vst [vmem:[#allocation2 + $0x9c] sm:$0x1] %v322_v0  ;;  %v378_v57 = vsel %vm5954_vm4, 0, %v377_v4 }
  0x42   : > { %5310 = vmatmul.msk.bf16.vlgmr.msra.gmra.mxu3 %vm1518_vm12, %v1510_v8  ;;  %v5784_v23 = vunpack.c.l.bf16 %v5809_v5  ;;  %v5785_v26 = vunpack.c.h.bf16 %v5809_v5  ;;  %v677_v29 = vsel %vm6018_vm9, %v669_v62, %v676_v50  ;;  %v950_v31 = vsel %vm5946_vm3, %v678_v17, %v949_v15  ;;  %379 = vst [vmem:[#allocation2 + $0xa4] sm:$0x1] %v378_v57 }
  0x43   : > { %v1498_v28 = vpack.c.b16 %v1467_v54, %v1466_v16  ;;  %v545_v20 = vmax.f32 %v513_v11, 0.0  ;;  %948 = vst.msk [vmem:[#allocation2 + $0x40] sm:$0xf] %vm270_vm6, %v677_v29  ;;  %v576_v32 = vpack.c.bf16 %v544_v22, %v544_v22  ;;  %v286_v35 = vsel %vm5946_vm3, 0, %v285_v18 }
  0x44   : > { %v484_v33 = vmul.f32 %v5969_v10, %v5784_v23  ;;  %v485_v34 = vmul.f32 %v5969_v10, %v5785_v26  ;;  %951 = vst [vmem:[#allocation2 + $0x44] sm:$0x1] %v950_v31  ;;  %v342_v37 = vsel %vm5954_vm4, 0, %v341_v27  ;;  %v5736_v38 = vunpack.c.l.bf16 %v5735_v21  ;;  %v973_v25 = vld [vmem:[#allocation2 + $0x6c] sm:$0xf] }
  0x45   : > { %5298 = vmatmul.msk.bf16.vlgmr.msra.gmra.mxu0 %vm1518_vm12, %v1498_v28  ;;  %v577_v36 = vpack.c.bf16 %v545_v20, %v545_v20  ;;  %v5737_v39 = vunpack.c.h.bf16 %v5735_v21  ;;  %v731_v40 = vshrl.u32 %v576_v32, 16  ;;  %v734_v42 = vshll.u32 %v576_v32, 16  ;;  %287 = vst [vmem:[#allocation2 + $0xc] sm:$0x1] %v286_v35 }
  0x46   : > { %v520_v43 = vadd.f32 %v5975_v12, %v484_v33  ;;  %v521_v44 = vadd.f32 %v5975_v12, %v485_v34  ;;  %343 = vst [vmem:[#allocation2 + $0x14] sm:$0x1] %v342_v37  ;;  %v460_v47 = vmul.f32 %v5969_v10, %v5736_v38  ;;  %v301_v53 = vsel %vm5946_vm3, 0, %v300_v24  ;;  %v977_v61 = vld [vmem:[#allocation2 + $0x74] sm:$0x1] }
  0x47   : > { %v739_v45 = vshrl.u32 %v577_v36, 16  ;;  %v742_v46 = vshll.u32 %v577_v36, 16  ;;  %v461_v48 = vmul.f32 %v5969_v10, %v5737_v39  ;;  %v1039_v19 = vld [vmem:[#allocation2 + $0x3c] sm:$0xf]  ;;  %v733_v49 = vrot.slane %v731_v40, 7  ;;  %v5802_v39 = vld [vmem:[%s5964_s28 + $0x28] sm:$0xff]  }
  0x48   : > { %v552_v51 = vmax.f32 %v520_v43, 0.0  ;;  %v553_v52 = vmax.f32 %v521_v44, 0.0  ;;  %v1202_v54 = vshrl.u32 %v1039_v19, 16  ;;  %v1205_v55 = vshll.u32 %v1039_v19, 16  ;;  %302 = vst [vmem:[#allocation2 + $0x48] sm:$0x1] %v301_v53 }
  0x49   : > { %v741_v56 = vrot.slane %v739_v45, 7  ;;  %v496_v58 = vadd.f32 %v5975_v12, %v460_v47  ;;  %v736_v59 = vor.u32 %v734_v42, %v733_v49  ;;  %v737_v60 = vrot.slane %v733_v49, 4  ;;  %v1001_v18 = vld [vmem:[#allocation2 + $0x9c] sm:$0xf]  ;;  %v356_v34 = vld [vmem:[#allocation2 + $0x50] sm:$0x1] }
  0x4a   : > { %v584_v62 = vpack.c.bf16 %v552_v51, %v552_v51  ;;  %v585_v63 = vpack.c.bf16 %v553_v52, %v553_v52  ;;  %v1040_v1 = vld [vmem:[#allocation2 + $0x40] sm:$0xf]  ;;  %v1204_v2 = vrot.slane %v1202_v54, 4  ;;  %v1207_v30 = vrot.slane %v1205_v55, 5  ;;  %v312_v44 = vld [vmem:[#allocation2 + $0x78] sm:$0x1] }
  0x4b   : > { %v744_v4 = vor.u32 %v742_v46, %v741_v56  ;;  %v746_v5 = vrot.slane %v741_v56, 4  ;;  %v1067_v8 = vld [vmem:[#allocation2 + $0x44] sm:$0x1]  ;;  %v1211_v9 = vshll.u32 %v1040_v1, 16  ;;  %v1215_v14 = vshrl.u32 %v1040_v1, 16 }
  0x4c   : > { %v974_v15 = vsel %vm6011_vm8, %v736_v59, %v973_v25  ;;  %v799_v0 = vshrl.u32 %v584_v62, 16  ;;  %v1208_v16 = vor.u32 %v1207_v30, %v1204_v2  ;;  %v1221_v50 = vshll.u32 %v1067_v8, 16  ;;  %v1005_v47 = vld [vmem:[#allocation2 + $0xa4] sm:$0x1] }
  0x4d   : > { %v745_v17 = vsel %vm6018_vm9, %v737_v60, %v744_v4  ;;  %975 = vst [vmem:[#allocation2 + $0x6c] sm:$0xf] %v974_v15  ;;  %v978_v11 = vsel %vm5946_vm3, %v746_v5, %v977_v61  ;;  %v1213_v21 = vrot.slane %v1211_v9, 5  ;;  %v1217_v22 = vrot.slane %v1215_v14, 4 }
  0x4e   : > { %976 = vst.msk [vmem:[#allocation2 + $0x70] sm:$0xf] %vm270_vm6, %v745_v17  ;;  %v801_v57 = vrot.slane %v799_v0, 7  ;;  %v802_v23 = vshll.u32 %v584_v62, 16  ;;  %v1209_v26 = vrot.slane %v1208_v16, 4  ;;  %v1223_v27 = vrot.slane %v1221_v50, 5 }
  0x4f   : > { %979 = vst [vmem:[#allocation2 + $0x74] sm:$0x1] %v978_v11  ;;  %v807_v28 = vshrl.u32 %v585_v63, 16  ;;  %v810_v29 = vshll.u32 %v585_v63, 16  ;;  %v1218_v31 = vor.u32 %v1217_v22, %v1213_v21  ;;  %v497_v33 = vadd.f32 %v5975_v12, %v461_v48 }
  0x50   : > { %v804_v20 = vor.u32 %v802_v23, %v801_v57  ;;  %v805_v32 = vrot.slane %v801_v57, 4  ;;  %v1214_v35 = vsel %vm6088_vm13, %v1209_v26, %v1213_v21  ;;  %v528_v37 = vmax.f32 %v496_v58, 0.0 }
  0x51   : > { %v809_v36 = vrot.slane %v807_v28, 7  ;;  %v357_v38 = vsel %vm5954_vm4, 0, %v356_v34  ;;  %v1219_v40 = vrot.slane %v1218_v31, 4  ;;  %v529_v43 = vmax.f32 %v497_v33, 0.0 }
  0x52   : > { %v1002_v42 = vsel %vm6011_vm8, %v804_v20, %v1001_v18  ;;  %358 = vst [vmem:[#allocation2 + $0x50] sm:$0x1] %v357_v38  ;;  %v1476_v24 = vunpack.c.l.b16 %v1214_v35  ;;  %v560_v48 = vpack.c.bf16 %v528_v37, %v528_v37  ;;  %v5756_v52 = vunpack.c.l.bf16 %v5802_v39 }
  0x53   : > { %v812_v45 = vor.u32 %v810_v29, %v809_v36  ;;  %v814_v46 = vrot.slane %v809_v36, 4  ;;  %1003 = vst [vmem:[#allocation2 + $0x9c] sm:$0xf] %v1002_v42  ;;  %v1224_v19 = vsel %vm6088_vm13, %v1219_v40, %v1223_v27  ;;  %v561_v51 = vpack.c.bf16 %v529_v43, %v529_v43  ;;  %v917_v43 = vld [vmem:[#allocation2 + $0xc] sm:$0xf] }
  0x54   : > { %v1047_v49 = vld [vmem:[#allocation2 + $0x6c] sm:$0xf]  ;;  %v313_v53 = vsel %vm5946_vm3, 0, %v312_v44  ;;  %v1477_v54 = vunpack.c.l.b16 %v1224_v19  ;;  %v5757_v63 = vunpack.c.h.bf16 %v5802_v39  ;;  %v595_v9 = vshrl.u32 %v560_v48, 16 }
  0x55   : > { %v1048_v55 = vld [vmem:[#allocation2 + $0x70] sm:$0xf]  ;;  %v1298_v56 = vshrl.u32 %v1047_v49, 16  ;;  %v1301_v25 = vshll.u32 %v1047_v49, 16  ;;  %v813_v58 = vsel %vm6018_vm9, %v805_v32, %v812_v45  ;;  %314 = vst [vmem:[#allocation2 + $0x78] sm:$0x1] %v313_v53  ;;  %v1006_v62 = vsel %vm5946_vm3, %v814_v46, %v1005_v47 }
  0x56   : > { %v1071_v59 = vld [vmem:[#allocation2 + $0x74] sm:$0x1]  ;;  %v1307_v60 = vshll.u32 %v1048_v55, 16  ;;  %v1311_v61 = vshrl.u32 %v1048_v55, 16  ;;  %1004 = vst.msk [vmem:[#allocation2 + $0xa0] sm:$0xf] %vm270_vm6, %v813_v58  ;;  %v1503_v1 = vpack.c.b16 %v1477_v54, %v1476_v24  ;;  %v470_v14 = vmul.f32 %v5969_v10, %v5756_v52 }
  0x57   : > { %v1300_v2 = vrot.slane %v1298_v56, 4  ;;  %v1303_v30 = vrot.slane %v1301_v25, 5  ;;  %v1317_v4 = vshll.u32 %v1071_v59, 16  ;;  %1007 = vst [vmem:[#allocation2 + $0xa4] sm:$0x1] %v1006_v62  ;;  %v598_v16 = vshll.u32 %v560_v48, 16 }
  0x58   : > { %v1309_v5 = vrot.slane %v1307_v60, 5  ;;  %v1313_v8 = vrot.slane %v1311_v61, 4  ;;  %5303 = vmatmul.msk.bf16.gmra.mxu1 %vm1518_vm12, %v1503_v1  ;;  %v603_v50 = vshrl.u32 %v561_v51, 16  ;;  %v597_v18 = vrot.slane %v595_v9, 7  ;;  %v921_v46 = vld [vmem:[#allocation2 + $0x14] sm:$0x1] }
  0x59   : > { %v1304_v15 = vor.u32 %v1303_v30, %v1300_v2  ;;  %v1319_v0 = vrot.slane %v1317_v4, 5  ;;  %v606_v21 = vshll.u32 %v561_v51, 16  ;;  %v471_v22 = vmul.f32 %v5969_v10, %v5757_v63  ;;  %v368_v51 = vld [vmem:[#allocation2 + $0x80] sm:$0x1]  ;;  %v5806_v52 = vld [vmem:[%s5964_s28 + $0x48] sm:$0xff]  }
  0x5a   : > { %v1314_v17 = vor.u32 %v1313_v8, %v1309_v5  ;;  %v1055_v11 = vld [vmem:[#allocation2 + $0x9c] sm:$0xf]  ;;  %v605_v27 = vrot.slane %v603_v50, 7  ;;  %v600_v29 = vor.u32 %v598_v16, %v597_v18  ;;  %v601_v31 = vrot.slane %v597_v18, 4  ;;  %v324_v25 = vld [vmem:[#allocation2 + $0xa8] sm:$0x1] }
  0x5b   : > { %v1305_v57 = vrot.slane %v1304_v15, 4  ;;  %v1394_v23 = vshrl.u32 %v1055_v11, 16  ;;  %v1397_v26 = vshll.u32 %v1055_v11, 16  ;;  %v506_v20 = vadd.f32 %v5975_v12, %v470_v14  ;;  %v380_v62 = vld [vmem:[#allocation2 + $0xb0] sm:$0x1]  ;;  %v5810_v14 = vld [vmem:[%s5964_s28 + $0x68] sm:$0xff]  }
  0x5c   : > { %v1315_v28 = vrot.slane %v1314_v17, 4  ;;  %v608_v36 = vor.u32 %v606_v21, %v605_v27  ;;  %v610_v49 = vrot.slane %v605_v27, 4  ;;  %v918_v56 = vsel %vm6011_vm8, %v600_v29, %v917_v43 }
  0x5d   : > { %v1310_v32 = vsel %vm6088_vm13, %v1305_v57, %v1309_v5  ;;  %v1056_v33 = vld [vmem:[#allocation2 + $0xa0] sm:$0xf]  ;;  %v1396_v34 = vrot.slane %v1394_v23, 4  ;;  %v1399_v35 = vrot.slane %v1397_v26, 5  ;;  %919 = vst [vmem:[#allocation2 + $0xc] sm:$0xf] %v918_v56  ;;  %v507_v60 = vadd.f32 %v5975_v12, %v471_v22 }
  0x5e   : > { %v1320_v37 = vsel %vm6088_vm13, %v1315_v28, %v1319_v0  ;;  %v1484_v38 = vunpack.c.l.b16 %v1310_v32  ;;  %v1075_v39 = vld [vmem:[#allocation2 + $0xa4] sm:$0x1]  ;;  %v1403_v40 = vshll.u32 %v1056_v33, 16  ;;  %v1407_v42 = vshrl.u32 %v1056_v33, 16  ;;  %v952_v57 = vld [vmem:[#allocation2 + $0x48] sm:$0xf] }
  0x5f   : > { %v1485_v44 = vunpack.c.l.b16 %v1320_v37  ;;  %v1400_v24 = vor.u32 %v1399_v35, %v1396_v34  ;;  %v1413_v45 = vshll.u32 %v1075_v39, 16  ;;  %v609_v19 = vsel %vm6018_vm9, %v601_v31, %v608_v36 }
  0x60   : > { %v1405_v47 = vrot.slane %v1403_v40, 5  ;;  %v1409_v48 = vrot.slane %v1407_v42, 4  ;;  %920 = vst.msk [vmem:[#allocation2 + $0x10] sm:$0xf] %vm270_vm6, %v609_v19  ;;  %v922_v59 = vsel %vm5946_vm3, %v610_v49, %v921_v46  ;;  %v538_v61 = vmax.f32 %v506_v20, 0.0 }
  0x61   : > { %v1507_v53 = vpack.c.b16 %v1485_v44, %v1484_v38  ;;  %v1401_v54 = vrot.slane %v1400_v24, 4  ;;  %v1415_v55 = vrot.slane %v1413_v45, 5  ;;  %923 = vst [vmem:[#allocation2 + $0x14] sm:$0x1] %v922_v59  ;;  %v369_v1 = vsel %vm5954_vm4, 0, %v368_v51 }
  0x62   : > { %v1410_v58 = vor.u32 %v1409_v48, %v1405_v47  ;;  %v5772_v2 = vunpack.c.l.bf16 %v5806_v52  ;;  %v5773_v30 = vunpack.c.h.bf16 %v5806_v52  ;;  %v539_v8 = vmax.f32 %v507_v60, 0.0  ;;  %370 = vst [vmem:[#allocation2 + $0x80] sm:$0x1] %v369_v1  ;;  %v956_v48 = vld [vmem:[#allocation2 + $0x50] sm:$0x1] }
  0x63   : > { %5307 = vmatmul.msk.bf16.gmra.mxu2 %vm1518_vm12, %v1507_v53  ;;  %v1406_v63 = vsel %vm6088_vm13, %v1401_v54, %v1405_v47  ;;  %v570_v9 = vpack.c.bf16 %v538_v61, %v538_v61  ;;  %v325_v16 = vsel %vm5946_vm3, 0, %v324_v25  ;;  %v381_v50 = vsel %vm5954_vm4, 0, %v380_v62  ;;  %v6226_v25 = vld [vmem:[%s7664_s2] ss:$0 sm:$0xff] }
  0x64   : > { %v1411_v4 = vrot.slane %v1410_v58, 4  ;;  %v1492_v5 = vunpack.c.l.b16 %v1406_v63  ;;  %v478_v15 = vmul.f32 %v5969_v10, %v5772_v2  ;;  %v479_v0 = vmul.f32 %v5969_v10, %v5773_v30  ;;  %326 = vst [vmem:[#allocation2 + $0xa8] sm:$0x1] %v325_v16  ;;  %v1031_v33 = vld [vmem:[#allocation2 + $0xc] sm:$0xf] }
  0x65   : > { %v571_v11 = vpack.c.bf16 %v539_v8, %v539_v8  ;;  %v680_v18 = vshrl.u32 %v570_v9, 16  ;;  %v683_v21 = vshll.u32 %v570_v9, 16  ;;  %382 = vst [vmem:[#allocation2 + $0xb0] sm:$0x1] %v381_v50  ;;  %v5788_v10 = vunpack.c.l.bf16 %v5810_v14  ;;  %v288_v63 = vld [vmem:[#allocation2 + $0x18] sm:$0x1] }
  0x66   : > { %v1416_v17 = vsel %vm6088_vm13, %v1411_v4, %v1415_v55  ;;  %v514_v23 = vadd.f32 %v5975_v12, %v478_v15  ;;  %v515_v26 = vadd.f32 %v5975_v12, %v479_v0  ;;  %v5789_v20 = vunpack.c.h.bf16 %v5810_v14  ;;  %v6240_v9 = vld [vmem:[%s7665_s3] ss:$0 sm:$0xff] }
  0x67   : > { %v1493_v22 = vunpack.c.l.b16 %v1416_v17  ;;  %v6213_v27 = vld [vmem:[#allocation2 + $0x10] sm:$0xf]  ;;  %v682_v28 = vrot.slane %v680_v18, 7  ;;  %v688_v29 = vshrl.u32 %v571_v11, 16  ;;  %v691_v31 = vshll.u32 %v571_v11, 16 }
  0x68   : > { %v1115_v34 = vshll.u32 %v6213_v27, 16  ;;  %v1119_v35 = vshrl.u32 %v6213_v27, 16  ;;  %v546_v36 = vmax.f32 %v514_v23, 0.0  ;;  %v6217_v37 = vld [vmem:[#allocation2 + $0x14] sm:$0x1]  ;;  %v1106_v38 = vshrl.u32 %v1031_v33, 16 }
  0x69   : > { %v1511_v32 = vpack.c.b16 %v1493_v22, %v1492_v5  ;;  %v1109_v39 = vshll.u32 %v1031_v33, 16  ;;  %v685_v12 = vor.u32 %v683_v21, %v682_v28  ;;  %v686_v40 = vrot.slane %v682_v28, 4  ;;  %v980_v11 = vld [vmem:[#allocation2 + $0x78] sm:$0xf]  ;;  %v984_v21 = vld [vmem:[#allocation2 + $0x80] sm:$0x1] }
  0x6a   : > { %v1117_v42 = vrot.slane %v1115_v34, 5  ;;  %v1121_v43 = vrot.slane %v1119_v35, 4  ;;  %v1125_v44 = vshll.u32 %v6217_v37, 16  ;;  %v690_v24 = vrot.slane %v688_v29, 7 }
  0x6b   : > { %5311 = vmatmul.msk.bf16.gmra.mxu3 %vm1518_vm12, %v1511_v32  ;;  %v1108_v45 = vrot.slane %v1106_v38, 4  ;;  %v1111_v46 = vrot.slane %v1109_v39, 5  ;;  %v953_v47 = vsel %vm6011_vm8, %v685_v12, %v952_v57  ;;  %v547_v19 = vmax.f32 %v515_v26, 0.0  ;;  %v5798_v26 = vld [vmem:[%s5964_s28 + $0x8] sm:$0xff]  }
  0x6c   : > { %v1122_v49 = vor.u32 %v1121_v43, %v1117_v42  ;;  %v1127_v51 = vrot.slane %v1125_v44, 5  ;;  %v693_v52 = vor.u32 %v691_v31, %v690_v24  ;;  %v695_v53 = vrot.slane %v690_v24, 4  ;;  %954 = vst [vmem:[#allocation2 + $0x48] sm:$0xf] %v953_v47 }
  0x6d   : > { %v1112_v54 = vor.u32 %v1111_v46, %v1108_v45  ;;  %v578_v55 = vpack.c.bf16 %v546_v36, %v546_v36  ;;  %v579_v56 = vpack.c.bf16 %v547_v19, %v547_v19  ;;  %v486_v58 = vmul.f32 %v6226_v25, %v5788_v10  ;;  %v6250_v36 = vld [vmem:[%s5964_s28 + $0x30] sm:$0xff]  }
  0x6e   : > { %v1123_v59 = vrot.slane %v1122_v49, 4  ;;  %v694_v60 = vsel %vm6018_vm9, %v686_v40, %v693_v52  ;;  %v957_v61 = vsel %vm5946_vm3, %v695_v53, %v956_v48  ;;  %v487_v62 = vmul.f32 %v6226_v25, %v5789_v20 }
  0x6f   : > { %v1113_v1 = vrot.slane %v1112_v54, 4  ;;  %955 = vst.msk [vmem:[#allocation2 + $0x4c] sm:$0xf] %vm270_vm6, %v694_v60  ;;  %v748_v2 = vshrl.u32 %v578_v55, 16  ;;  %v751_v30 = vshll.u32 %v578_v55, 16  ;;  %v756_v4 = vshrl.u32 %v579_v56, 16 }
  0x70   : > { %v1128_v5 = vsel %vm6088_vm13, %v1123_v59, %v1127_v51  ;;  %958 = vst [vmem:[#allocation2 + $0x50] sm:$0x1] %v957_v61  ;;  %v759_v8 = vshll.u32 %v579_v56, 16  ;;  %v522_v14 = vadd.f32 %v6240_v9, %v486_v58  ;;  %v523_v15 = vadd.f32 %v6240_v9, %v487_v62  ;;  %v303_v61 = vld [vmem:[#allocation2 + $0x54] sm:$0x1] }
  0x71   : > { %v1118_v0 = vsel %vm6088_vm13, %v1113_v1, %v1117_v42  ;;  %v1469_v16 = vunpack.c.l.b16 %v1128_v5  ;;  %v750_v50 = vrot.slane %v748_v2, 7  ;;  %v758_v17 = vrot.slane %v756_v4, 7  ;;  %v344_v42 = vld [vmem:[#allocation2 + $0x20] sm:$0x1]  ;;  %v1008_v5 = vld [vmem:[#allocation2 + $0xa8] sm:$0xf] }
  0x72   : > { %v1468_v18 = vunpack.c.l.b16 %v1118_v0  ;;  %v554_v22 = vmax.f32 %v522_v14, 0.0  ;;  %v555_v57 = vmax.f32 %v523_v15, 0.0  ;;  %v289_v23 = vsel %vm5946_vm3, 0, %v288_v63 }
  0x73   : > { %v1041_v10 = vld [vmem:[#allocation2 + $0x48] sm:$0xf]  ;;  %v753_v28 = vor.u32 %v751_v30, %v750_v50  ;;  %v754_v29 = vrot.slane %v750_v50, 4  ;;  %v761_v31 = vor.u32 %v759_v8, %v758_v17  ;;  %v763_v20 = vrot.slane %v758_v17, 4  ;;  %290 = vst [vmem:[#allocation2 + $0x18] sm:$0x1] %v289_v23 }
  0x74   : > { %v1499_v32 = vpack.c.b16 %v1469_v16, %v1468_v18  ;;  %v1226_v33 = vshrl.u32 %v1041_v10, 16  ;;  %v1229_v34 = vshll.u32 %v1041_v10, 16  ;;  %v586_v35 = vpack.c.bf16 %v554_v22, %v554_v22  ;;  %v1012_v50 = vld [vmem:[#allocation2 + $0xb0] sm:$0x1] }
  0x75   : > { %v762_v38 = vsel %vm6018_vm9, %v754_v29, %v761_v31  ;;  %v981_v39 = vsel %vm6011_vm8, %v753_v28, %v980_v11  ;;  %v985_v12 = vsel %vm5946_vm3, %v763_v20, %v984_v21  ;;  %v587_v40 = vpack.c.bf16 %v555_v57, %v555_v57  ;;  %v359_v31 = vld [vmem:[#allocation2 + $0x5c] sm:$0x1] }
  0x76   : > { %5299 = vmatmul.msk.bf16.gmra.mxu0 %vm1518_vm12, %v1499_v32  ;;  %v1042_v43 = vld [vmem:[#allocation2 + $0x4c] sm:$0xf]  ;;  %v1228_v44 = vrot.slane %v1226_v33, 4  ;;  %v1231_v24 = vrot.slane %v1229_v34, 5  ;;  %982 = vst [vmem:[#allocation2 + $0x78] sm:$0xf] %v981_v39  ;;  %v5740_v45 = vunpack.c.l.bf16 %v5798_v26  ;;  %v5741_v46 = vunpack.c.h.bf16 %v5798_v26 }
  0x77   : > { %v1068_v47 = vld [vmem:[#allocation2 + $0x50] sm:$0x1]  ;;  %v1235_v48 = vshll.u32 %v1042_v43, 16  ;;  %v1239_v19 = vshrl.u32 %v1042_v43, 16  ;;  %983 = vst.msk [vmem:[#allocation2 + $0x7c] sm:$0xf] %vm270_vm6, %v762_v38  ;;  %v5760_v49 = vunpack.c.l.bf16 %v6250_v36  ;;  %v5761_v51 = vunpack.c.h.bf16 %v6250_v36 }
  0x78   : > { %v1232_v52 = vor.u32 %v1231_v24, %v1228_v44  ;;  %v1245_v53 = vshll.u32 %v1068_v47, 16  ;;  %986 = vst [vmem:[#allocation2 + $0x80] sm:$0x1] %v985_v12  ;;  %v816_v54 = vshrl.u32 %v586_v35, 16  ;;  %v819_v55 = vshll.u32 %v586_v35, 16 }
  0x79   : > { %v1237_v56 = vrot.slane %v1235_v48, 5  ;;  %v1241_v58 = vrot.slane %v1239_v19, 4  ;;  %v824_v59 = vshrl.u32 %v587_v40, 16  ;;  %v827_v60 = vshll.u32 %v587_v40, 16  ;;  %v315_v48 = vld [vmem:[#allocation2 + $0x84] sm:$0x1] }
  0x7a   : > { %v1233_v62 = vrot.slane %v1232_v52, 4  ;;  %v1247_v63 = vrot.slane %v1245_v53, 5  ;;  %v818_v1 = vrot.slane %v816_v54, 7  ;;  %v345_v2 = vsel %vm5954_vm4, 0, %v344_v42 }
  0x7b   : > { %v1242_v30 = vor.u32 %v1241_v58, %v1237_v56  ;;  %v826_v4 = vrot.slane %v824_v59, 7  ;;  %346 = vst [vmem:[#allocation2 + $0x20] sm:$0x1] %v345_v2  ;;  %v462_v8 = vmul.f32 %v6226_v25, %v5740_v45  ;;  %v463_v14 = vmul.f32 %v6226_v25, %v5741_v46 }
  0x7c   : > { %v1238_v15 = vsel %vm6088_vm13, %v1233_v62, %v1237_v56  ;;  %v821_v0 = vor.u32 %v819_v55, %v818_v1  ;;  %v822_v16 = vrot.slane %v818_v1, 4  ;;  %v304_v17 = vsel %vm5946_vm3, 0, %v303_v61  ;;  %v371_v55 = vld [vmem:[#allocation2 + $0x8c] sm:$0x1] }
  0x7d   : > { %v1243_v11 = vrot.slane %v1242_v30, 4  ;;  %v1478_v18 = vunpack.c.l.b16 %v1238_v15  ;;  %v1049_v21 = vld [vmem:[#allocation2 + $0x78] sm:$0xf]  ;;  %v829_v22 = vor.u32 %v827_v60, %v826_v4  ;;  %v831_v57 = vrot.slane %v826_v4, 4  ;;  %305 = vst [vmem:[#allocation2 + $0x54] sm:$0x1] %v304_v17 }
  0x7e   : > { %v1050_v23 = vld [vmem:[#allocation2 + $0x7c] sm:$0xf]  ;;  %v1322_v26 = vshrl.u32 %v1049_v21, 16  ;;  %v1325_v10 = vshll.u32 %v1049_v21, 16  ;;  %v1009_v28 = vsel %vm6011_vm8, %v821_v0, %v1008_v5  ;;  %v498_v29 = vadd.f32 %v6240_v9, %v462_v8  ;;  %v5807_v17 = vld [vmem:[%s5964_s28 + $0x50] sm:$0xff]  }
  0x7f   : > { %v1248_v20 = vsel %vm6088_vm13, %v1243_v11, %v1247_v63  ;;  %v1072_v32 = vld [vmem:[#allocation2 + $0x80] sm:$0x1]  ;;  %v1331_v33 = vshll.u32 %v1050_v23, 16  ;;  %v1335_v34 = vshrl.u32 %v1050_v23, 16  ;;  %v830_v35 = vsel %vm6018_vm9, %v822_v16, %v829_v22  ;;  %1010 = vst [vmem:[#allocation2 + $0xa8] sm:$0xf] %v1009_v28 }
  0x80   : > { %v1479_v38 = vunpack.c.l.b16 %v1248_v20  ;;  %v1324_v39 = vrot.slane %v1322_v26, 4  ;;  %v1327_v12 = vrot.slane %v1325_v10, 5  ;;  %v1341_v40 = vshll.u32 %v1072_v32, 16  ;;  %1011 = vst.msk [vmem:[#allocation2 + $0xac] sm:$0xf] %vm270_vm6, %v830_v35 }
  0x81   : > { %v1333_v42 = vrot.slane %v1331_v33, 5  ;;  %v1337_v43 = vrot.slane %v1335_v34, 4  ;;  %v1013_v44 = vsel %vm5946_vm3, %v831_v57, %v1012_v50  ;;  %v499_v47 = vadd.f32 %v6240_v9, %v463_v14  ;;  %v924_v32 = vld [vmem:[#allocation2 + $0x18] sm:$0xf] }
  0x82   : > { %v1504_v24 = vpack.c.b16 %v1479_v38, %v1478_v18  ;;  %v1328_v45 = vor.u32 %v1327_v12, %v1324_v39  ;;  %v1343_v46 = vrot.slane %v1341_v40, 5  ;;  %1014 = vst [vmem:[#allocation2 + $0xb0] sm:$0x1] %v1013_v44  ;;  %v530_v52 = vmax.f32 %v498_v29, 0.0  ;;  %v928_v39 = vld [vmem:[#allocation2 + $0x20] sm:$0x1] }
  0x83   : > { %v1338_v19 = vor.u32 %v1337_v43, %v1333_v42  ;;  %v360_v53 = vsel %vm5954_vm4, 0, %v359_v31  ;;  %v472_v54 = vmul.f32 %v6226_v25, %v5760_v49  ;;  %v531_v58 = vmax.f32 %v499_v47, 0.0 }
  0x84   : > { %5304 = vmatmul.msk.bf16.gmra.mxu1 %vm1518_vm12, %v1504_v24  ;;  %v1329_v56 = vrot.slane %v1328_v45, 4  ;;  %361 = vst [vmem:[#allocation2 + $0x5c] sm:$0x1] %v360_v53  ;;  %v473_v59 = vmul.f32 %v6226_v25, %v5761_v51  ;;  %v562_v61 = vpack.c.bf16 %v530_v52, %v530_v52  ;;  %v316_v63 = vsel %vm5946_vm3, 0, %v315_v48 }
  0x85   : > { %v1339_v60 = vrot.slane %v1338_v19, 4  ;;  %v508_v62 = vadd.f32 %v6240_v9, %v472_v54  ;;  %v563_v2 = vpack.c.bf16 %v531_v58, %v531_v58  ;;  %317 = vst [vmem:[#allocation2 + $0x84] sm:$0x1] %v316_v63  ;;  %v372_v36 = vsel %vm5954_vm4, 0, %v371_v55  ;;  %v327_v54 = vld [vmem:[#allocation2 + $0xb4] sm:$0x1] }
  0x86   : > { %v1334_v49 = vsel %vm6088_vm13, %v1329_v56, %v1333_v42  ;;  %v1057_v1 = vld [vmem:[#allocation2 + $0xa8] sm:$0xf]  ;;  %v509_v30 = vadd.f32 %v6240_v9, %v473_v59  ;;  %373 = vst [vmem:[#allocation2 + $0x8c] sm:$0x1] %v372_v36  ;;  %v612_v50 = vshrl.u32 %v562_v61, 16  ;;  %v615_v22 = vshll.u32 %v562_v61, 16 }
  0x87   : > { %v1344_v51 = vsel %vm6088_vm13, %v1339_v60, %v1343_v46  ;;  %v1486_v4 = vunpack.c.l.b16 %v1334_v49  ;;  %v1058_v5 = vld [vmem:[#allocation2 + $0xac] sm:$0xf]  ;;  %v1418_v8 = vshrl.u32 %v1057_v1, 16  ;;  %v1421_v14 = vshll.u32 %v1057_v1, 16  ;;  %v383_v60 = vld [vmem:[#allocation2 + $0xbc] sm:$0x1] }
  0x88   : > { %v1487_v15 = vunpack.c.l.b16 %v1344_v51  ;;  %v1427_v0 = vshll.u32 %v1058_v5, 16  ;;  %v1431_v16 = vshrl.u32 %v1058_v5, 16  ;;  %v620_v57 = vshrl.u32 %v563_v2, 16  ;;  %v5811_v61 = vld [vmem:[%s5964_s28 + $0x70] sm:$0xff]  }
  0x89   : > { %v1076_v11 = vld [vmem:[#allocation2 + $0xb0] sm:$0x1]  ;;  %v1420_v18 = vrot.slane %v1418_v8, 4  ;;  %v1423_v21 = vrot.slane %v1421_v14, 5  ;;  %v614_v31 = vrot.slane %v612_v50, 7  ;;  %v5776_v33 = vunpack.c.l.bf16 %v5807_v17 }
  0x8a   : > { %v1508_v23 = vpack.c.b16 %v1487_v15, %v1486_v4  ;;  %v1429_v26 = vrot.slane %v1427_v0, 5  ;;  %v1433_v10 = vrot.slane %v1431_v16, 4  ;;  %v1437_v28 = vshll.u32 %v1076_v11, 16  ;;  %v959_v14 = vld [vmem:[#allocation2 + $0x54] sm:$0xf] }
  0x8b   : > { %v1424_v29 = vor.u32 %v1423_v21, %v1420_v18  ;;  %v622_v20 = vrot.slane %v620_v57, 7  ;;  %v623_v38 = vshll.u32 %v563_v2, 16  ;;  %v540_v12 = vmax.f32 %v508_v62, 0.0  ;;  %v291_v2 = vld [vmem:[#allocation2 + $0x24] sm:$0x1] }
  0x8c   : > { %5308 = vmatmul.msk.bf16.gmra.mxu2 %vm1518_vm12, %v1508_v23  ;;  %v1434_v34 = vor.u32 %v1433_v10, %v1429_v26  ;;  %v1439_v35 = vrot.slane %v1437_v28, 5  ;;  %v617_v42 = vor.u32 %v615_v22, %v614_v31  ;;  %v618_v43 = vrot.slane %v614_v31, 4  ;;  %v347_v18 = vld [vmem:[#allocation2 + $0x2c] sm:$0x1]  ;;  %v963_v57 = vld [vmem:[#allocation2 + $0x5c] sm:$0x1] }
  0x8d   : > { %v1425_v40 = vrot.slane %v1424_v29, 4  ;;  %v627_v44 = vrot.slane %v622_v20, 4  ;;  %v625_v45 = vor.u32 %v623_v38, %v622_v20  ;;  %v541_v46 = vmax.f32 %v509_v30, 0.0 }
  0x8e   : > { %v1435_v24 = vrot.slane %v1434_v34, 4  ;;  %v572_v47 = vpack.c.bf16 %v540_v12, %v540_v12  ;;  %v925_v19 = vsel %vm6011_vm8, %v617_v42, %v924_v32  ;;  %v5777_v53 = vunpack.c.h.bf16 %v5807_v17 }
  0x8f   : > { %v1430_v48 = vsel %vm6088_vm13, %v1425_v40, %v1429_v26  ;;  %v929_v52 = vsel %vm5946_vm3, %v627_v44, %v928_v39  ;;  %v626_v58 = vsel %vm6018_vm9, %v618_v43, %v625_v45  ;;  %926 = vst [vmem:[#allocation2 + $0x18] sm:$0xf] %v925_v19  ;;  %v573_v59 = vpack.c.bf16 %v541_v46, %v541_v46 }
  0x90   : > { %v1440_v55 = vsel %vm6088_vm13, %v1435_v24, %v1439_v35  ;;  %v1494_v56 = vunpack.c.l.b16 %v1430_v48  ;;  %927 = vst.msk [vmem:[#allocation2 + $0x1c] sm:$0xf] %vm270_vm6, %v626_v58  ;;  %v697_v63 = vshrl.u32 %v572_v47, 16  ;;  %v700_v49 = vshll.u32 %v572_v47, 16  ;;  %v5799_v58 = vld [vmem:[%s5964_s28 + $0x10] sm:$0xff]  }
  0x91   : > { %v1495_v62 = vunpack.c.l.b16 %v1440_v55  ;;  %v480_v1 = vmul.f32 %v6226_v25, %v5776_v33  ;;  %930 = vst [vmem:[#allocation2 + $0x20] sm:$0x1] %v929_v52  ;;  %v705_v30 = vshrl.u32 %v573_v59, 16  ;;  %v708_v36 = vshll.u32 %v573_v59, 16 }
  0x92   : > { %v481_v51 = vmul.f32 %v6226_v25, %v5777_v53  ;;  %v328_v4 = vsel %vm5946_vm3, 0, %v327_v54  ;;  %v699_v8 = vrot.slane %v697_v63, 7  ;;  %v384_v0 = vsel %vm5954_vm4, 0, %v383_v60 }
  0x93   : > { %v1512_v5 = vpack.c.b16 %v1495_v62, %v1494_v56  ;;  %v516_v15 = vadd.f32 %v6240_v9, %v480_v1  ;;  %329 = vst [vmem:[#allocation2 + $0xb4] sm:$0x1] %v328_v4  ;;  %v707_v16 = vrot.slane %v705_v30, 7  ;;  %v5792_v17 = vunpack.c.l.bf16 %v5811_v61  ;;  %v987_v1 = vld [vmem:[#allocation2 + $0x84] sm:$0xf] }
  0x94   : > { %v517_v50 = vadd.f32 %v6240_v9, %v481_v51  ;;  %385 = vst [vmem:[#allocation2 + $0xbc] sm:$0x1] %v384_v0  ;;  %v5793_v11 = vunpack.c.h.bf16 %v5811_v61  ;;  %v702_v21 = vor.u32 %v700_v49, %v699_v8  ;;  %v703_v22 = vrot.slane %v699_v8, 4 }
  0x95   : > { %5312 = vmatmul.msk.bf16.gmra.mxu3 %vm1518_vm12, %v1512_v5  ;;  %v548_v23 = vmax.f32 %v516_v15, 0.0  ;;  %v292_v26 = vsel %vm5946_vm3, 0, %v291_v2  ;;  %v710_v10 = vor.u32 %v708_v36, %v707_v16  ;;  %v712_v28 = vrot.slane %v707_v16, 4 }
  0x96   : > { %v549_v29 = vmax.f32 %v517_v50, 0.0  ;;  %v488_v31 = vmul.f32 %v6226_v25, %v5792_v17  ;;  %293 = vst [vmem:[#allocation2 + $0x24] sm:$0x1] %v292_v26  ;;  %v1033_v20 = vld [vmem:[#allocation2 + $0x18] sm:$0xf]  ;;  %v960_v32 = vsel %vm6011_vm8, %v702_v21, %v959_v14  ;;  %v489_v34 = vmul.f32 %v6226_v25, %v5793_v11 }
  0x97   : > { %v580_v33 = vpack.c.bf16 %v548_v23, %v548_v23  ;;  %v348_v35 = vsel %vm5954_vm4, 0, %v347_v18  ;;  %v6329_v38 = vld [vmem:[#allocation2 + $0x1c] sm:$0xf]  ;;  %v1130_v39 = vshrl.u32 %v1033_v20, 16  ;;  %v1133_v12 = vshll.u32 %v1033_v20, 16 }
  0x98   : > { %v711_v40 = vsel %vm6018_vm9, %v703_v22, %v710_v10  ;;  %961 = vst [vmem:[#allocation2 + $0x54] sm:$0xf] %v960_v32  ;;  %v964_v42 = vsel %vm5946_vm3, %v712_v28, %v963_v57  ;;  %v6335_v43 = vld [vmem:[#allocation2 + $0x20] sm:$0x1]  ;;  %v1139_v44 = vshll.u32 %v6329_v38, 16  ;;  %v1143_v24 = vshrl.u32 %v6329_v38, 16 }
  0x99   : > { %962 = vst.msk [vmem:[#allocation2 + $0x58] sm:$0xf] %vm270_vm6, %v711_v40  ;;  %v581_v45 = vpack.c.bf16 %v549_v29, %v549_v29  ;;  %v524_v46 = vadd.f32 %v6240_v9, %v488_v31  ;;  %v1132_v47 = vrot.slane %v1130_v39, 4  ;;  %v1135_v48 = vrot.slane %v1133_v12, 5  ;;  %v991_v22 = vld [vmem:[#allocation2 + $0x8c] sm:$0x1] }
  0x9a   : > { %v1149_v19 = vshll.u32 %v6335_v43, 16  ;;  %965 = vst [vmem:[#allocation2 + $0x5c] sm:$0x1] %v964_v42  ;;  %v765_v52 = vshrl.u32 %v580_v33, 16  ;;  %v1141_v53 = vrot.slane %v1139_v44, 5  ;;  %v1145_v54 = vrot.slane %v1143_v24, 4 }
  0x9b   : > { %v768_v55 = vshll.u32 %v580_v33, 16  ;;  %v773_v56 = vshrl.u32 %v581_v45, 16  ;;  %v1136_v59 = vor.u32 %v1135_v48, %v1132_v47  ;;  %v776_v62 = vshll.u32 %v581_v45, 16  ;;  %349 = vst [vmem:[#allocation2 + $0x2c] sm:$0x1] %v348_v35 }
  0x9c   : > { %v1151_v60 = vrot.slane %v1149_v19, 5  ;;  %v767_v61 = vrot.slane %v765_v52, 7  ;;  %v1146_v63 = vor.u32 %v1145_v54, %v1141_v53  ;;  %v525_v2 = vadd.f32 %v6240_v9, %v489_v34 }
  0x9d   : > { %v775_v49 = vrot.slane %v773_v56, 7  ;;  %v556_v30 = vmax.f32 %v524_v46, 0.0  ;;  %v1137_v36 = vrot.slane %v1136_v59, 4  ;;  %v5744_v5 = vunpack.c.l.bf16 %v5799_v58 }
  0x9e   : > { %v770_v51 = vor.u32 %v768_v55, %v767_v61  ;;  %v771_v4 = vrot.slane %v767_v61, 4  ;;  %v1147_v8 = vrot.slane %v1146_v63, 4  ;;  %v557_v16 = vmax.f32 %v525_v2, 0.0 }
  0x9f   : > { %v1043_v14 = vld [vmem:[#allocation2 + $0x54] sm:$0xf]  ;;  %v778_v15 = vor.u32 %v776_v62, %v775_v49  ;;  %v780_v0 = vrot.slane %v775_v49, 4  ;;  %v1142_v50 = vsel %vm6088_vm13, %v1137_v36, %v1141_v53  ;;  %v588_v44 = vpack.c.bf16 %v556_v30, %v556_v30 }
  0xa0   : > { %v6346_v17 = vld [vmem:[#allocation2 + $0x58] sm:$0xf]  ;;  %v1250_v11 = vshrl.u32 %v1043_v14, 16  ;;  %v1253_v18 = vshll.u32 %v1043_v14, 16  ;;  %v988_v21 = vsel %vm6011_vm8, %v770_v51, %v987_v1  ;;  %v1152_v57 = vsel %vm6088_vm13, %v1147_v8, %v1151_v60 }
  0xa1   : > { %v1470_v23 = vunpack.c.l.b16 %v1142_v50  ;;  %v6352_v26 = vld [vmem:[#allocation2 + $0x5c] sm:$0x1]  ;;  %v1259_v10 = vshll.u32 %v6346_v17, 16  ;;  %v1263_v28 = vshrl.u32 %v6346_v17, 16  ;;  %989 = vst [vmem:[#allocation2 + $0x84] sm:$0xf] %v988_v21  ;;  %v1471_v29 = vunpack.c.l.b16 %v1152_v57 }
  0xa2   : > { %v1252_v31 = vrot.slane %v1250_v11, 4  ;;  %v1255_v20 = vrot.slane %v1253_v18, 5  ;;  %v1269_v32 = vshll.u32 %v6352_v26, 16  ;;  %v779_v35 = vsel %vm6018_vm9, %v771_v4, %v778_v15  ;;  %v1015_v4 = vld [vmem:[#allocation2 + $0xb4] sm:$0xf] }
  0xa3   : > { %v1261_v33 = vrot.slane %v1259_v10, 5  ;;  %v1265_v34 = vrot.slane %v1263_v28, 4  ;;  %v992_v39 = vsel %vm5946_vm3, %v780_v0, %v991_v22  ;;  %v1500_v12 = vpack.c.b16 %v1471_v29, %v1470_v23  ;;  %990 = vst.msk [vmem:[#allocation2 + $0x88] sm:$0xf] %vm270_vm6, %v779_v35  ;;  %v1019_v21 = vld [vmem:[#allocation2 + $0xbc] sm:$0x1] }
  0xa4   : > { %v1256_v40 = vor.u32 %v1255_v20, %v1252_v31  ;;  %v1271_v42 = vrot.slane %v1269_v32, 5  ;;  %993 = vst [vmem:[#allocation2 + $0x8c] sm:$0x1] %v992_v39  ;;  %v589_v45 = vpack.c.bf16 %v557_v16, %v557_v16  ;;  %v5745_v46 = vunpack.c.h.bf16 %v5799_v58 }
  0xa5   : > { %v1266_v24 = vor.u32 %v1265_v34, %v1261_v33  ;;  %v464_v47 = vmul.f32 %v6226_v25, %v5744_v5  ;;  %5300 = vmatmul.msk.bf16.gmra.mxu0 %vm1518_vm12, %v1500_v12  ;;  %v833_v19 = vshrl.u32 %v588_v44, 16  ;;  %v836_v52 = vshll.u32 %v588_v44, 16 }
  0xa6   : > { %v1257_v48 = vrot.slane %v1256_v40, 4  ;;  %v841_v54 = vshrl.u32 %v589_v45, 16  ;;  %v465_v55 = vmul.f32 %v6226_v25, %v5745_v46  ;;  %v844_v61 = vshll.u32 %v589_v45, 16 }
  0xa7   : > { %v1267_v53 = vrot.slane %v1266_v24, 4  ;;  %v835_v60 = vrot.slane %v833_v19, 7  ;;  %v500_v62 = vadd.f32 %v6240_v9, %v464_v47  ;;  %v1880_v47 = vld [vmem:[#allocation2] sm:$0xe]  ;;  %vm1928_vm14 = vcmask 1042432  }
  0xa8   : > { %v1262_v56 = vsel %vm6088_vm13, %v1257_v48, %v1261_v33  ;;  %v1051_v59 = vld [vmem:[#allocation2 + $0x84] sm:$0xf]  ;;  %v843_v51 = vrot.slane %v841_v54, 7  ;;  %v501_v14 = vadd.f32 %v6240_v9, %v465_v55  ;;  %v5829_v48 = vld [vmem:[#allocation2 + $0x8] sm:$0x1]  ;;  %vm1929_vm15 = vcmask 1046532  }
  0xa9   : > { %v1272_v58 = vsel %vm6088_vm13, %v1267_v53, %v1271_v42  ;;  %v1480_v63 = vunpack.c.l.b16 %v1262_v56  ;;  %v1346_v49 = vshrl.u32 %v1051_v59, 16  ;;  %v1349_v1 = vshll.u32 %v1051_v59, 16  ;;  %v931_v54 = vld [vmem:[#allocation2 + $0x24] sm:$0xf]  ;;  %v935_v59 = vld [vmem:[#allocation2 + $0x2c] sm:$0x1]  ;;  %vm6395_vm1 = vmor %vm1928_vm14, %vm1929_vm15 }
  0xaa   : > { %v1481_v2 = vunpack.c.l.b16 %v1272_v58  ;;  %v838_v30 = vor.u32 %v836_v52, %v835_v60  ;;  %v839_v36 = vrot.slane %v835_v60, 4  ;;  %v1052_v25 = vld [vmem:[#allocation2 + $0x88] sm:$0xf]  ;;  %v532_v15 = vmax.f32 %v500_v62, 0.0  ;;  %v5830_v60 = vld [vmem:[#allocation2 + $0x4] sm:$0xf] }
  0xab   : > { %v1348_v5 = vrot.slane %v1346_v49, 4  ;;  %v1351_v8 = vrot.slane %v1349_v1, 5  ;;  %v1073_v16 = vld [vmem:[#allocation2 + $0x8c] sm:$0x1]  ;;  %v1355_v50 = vshll.u32 %v1052_v25, 16  ;;  %v1359_v11 = vshrl.u32 %v1052_v25, 16 }
  0xac   : > { %v1505_v0 = vpack.c.b16 %v1481_v2, %v1480_v63  ;;  %v846_v18 = vor.u32 %v844_v61, %v843_v51  ;;  %v1365_v57 = vshll.u32 %v1073_v16, 16  ;;  %v848_v23 = vrot.slane %v843_v51, 4 }
  0xad   : > { %v1352_v22 = vor.u32 %v1351_v8, %v1348_v5  ;;  %v1357_v10 = vrot.slane %v1355_v50, 5  ;;  %v1361_v28 = vrot.slane %v1359_v11, 4  ;;  %v1016_v9 = vsel %vm6011_vm8, %v838_v30, %v1015_v4  ;;  %v3640_v4 = vld [vmem:[%s7663_s1 + $0xc] sm:$0x3] }
  0xae   : > { %5305 = vmatmul.msk.bf16.gmra.mxu1 %vm1518_vm12, %v1505_v0  ;;  %v847_v29 = vsel %vm6018_vm9, %v839_v36, %v846_v18  ;;  %1017 = vst [vmem:[#allocation2 + $0xb4] sm:$0xf] %v1016_v9  ;;  %v1020_v20 = vsel %vm5946_vm3, %v848_v23, %v1019_v21  ;;  %v533_v32 = vmax.f32 %v501_v14, 0.0  ;;  %v1367_v34 = vrot.slane %v1365_v57, 5  ;;  %v5686_v23 = vld [vmem:[#allocation2] sm:$0xff] }
  0xaf   : > { %v1353_v31 = vrot.slane %v1352_v22, 4  ;;  %v1362_v33 = vor.u32 %v1361_v28, %v1357_v10  ;;  %1018 = vst.msk [vmem:[#allocation2 + $0xb8] sm:$0xf] %vm270_vm6, %v847_v29  ;;  %v564_v35 = vpack.c.bf16 %v532_v15, %v532_v15  ;;  %v1936_v19 = vrot.slane %v5829_v48, 5 }
  0xb0   : > { %1021 = vst [vmem:[#allocation2 + $0xbc] sm:$0x1] %v1020_v20  ;;  %v565_v12 = vpack.c.bf16 %v533_v32, %v533_v32  ;;  %v1933_v61 = vrot.slane %v5830_v60, 5  ;;  %v5394_v49 = vrot.slane %v1880_v47, 9 }
  0xb1   : > { %v1358_v39 = vsel %vm6088_vm13, %v1353_v31, %v1357_v10  ;;  %v1363_v40 = vrot.slane %v1362_v33, 4  ;;  %v629_v42 = vshrl.u32 %v564_v35, 16  ;;  %v632_v44 = vshll.u32 %v564_v35, 16 }
  0xb2   : > { %v1488_v24 = vunpack.c.l.b16 %v1358_v39  ;;  %v637_v45 = vshrl.u32 %v565_v12, 16  ;;  %v640_v46 = vshll.u32 %v565_v12, 16  ;;  %v1935_v11 = vrot.slane %v1933_v61, 4  ;;  %v2553_v39 = vld [vmem:[#allocation2 + $0xc] sm:$0xf] }
  0xb3   : > { %v1368_v52 = vsel %vm6088_vm13, %v1363_v40, %v1367_v34  ;;  %v631_v53 = vrot.slane %v629_v42, 7  ;;  %v3770_v31 = vsel %vm1567_vm5, %v3640_v4, 0  ;;  %v1934_v32 = vsel %vm6395_vm1, %v5394_v49, %v1933_v61  ;;  %v2554_v12 = vld [vmem:[#allocation2 + $0x10] sm:$0xf] }
  0xb4   : > { %v1489_v55 = vunpack.c.l.b16 %v1368_v52  ;;  %v639_v56 = vrot.slane %v637_v45, 7  ;;  %3779 = vmatpush.bf16.msra.mxu2 %v3770_v31  ;;  %v1937_v34 = vsel %vm6395_vm1, %v1935_v11, %v1936_v19  ;;  %v4325_v52 = vld [vmem:[%s7663_s1 + $0xc] sm:$0xc]  ;;  %v2615_v4 = vshrl.u32 %v2554_v12, 16 }
  0xb5   : > { %v1059_v62 = vld [vmem:[#allocation2 + $0xb4] sm:$0xf]  ;;  %v634_v58 = vor.u32 %v632_v44, %v631_v53  ;;  %v635_v63 = vrot.slane %v631_v53, 4  ;;  %v2045_v48 = vunpack.c.l.b16 %v1937_v34  ;;  %v2602_v53 = vshrl.u32 %v2553_v39, 16 }
  0xb6   : > { %v1509_v1 = vpack.c.b16 %v1489_v55, %v1488_v24  ;;  %v1060_v2 = vld [vmem:[#allocation2 + $0xb8] sm:$0xf]  ;;  %v1442_v30 = vshrl.u32 %v1059_v62, 16  ;;  %v1445_v36 = vshll.u32 %v1059_v62, 16  ;;  %v642_v51 = vor.u32 %v640_v46, %v639_v56  ;;  %v2555_v34 = vld [vmem:[#allocation2 + $0x14] sm:$0x1] }
  0xb7   : > { %v1077_v25 = vld [vmem:[#allocation2 + $0xbc] sm:$0x1]  ;;  %v1451_v5 = vshll.u32 %v1060_v2, 16  ;;  %v1455_v8 = vshrl.u32 %v1060_v2, 16  ;;  %v644_v14 = vrot.slane %v639_v56, 4  ;;  %v932_v15 = vsel %vm6011_vm8, %v634_v58, %v931_v54 }
  0xb8   : > { %5309 = vmatmul.msk.bf16.gmra.mxu2 %vm1518_vm12, %v1509_v1  ;;  %v1444_v0 = vrot.slane %v1442_v30, 4  ;;  %v1447_v16 = vrot.slane %v1445_v36, 5  ;;  %v1461_v50 = vshll.u32 %v1077_v25, 16  ;;  %933 = vst [vmem:[#allocation2 + $0x24] sm:$0xf] %v932_v15  ;;  %v643_v22 = vsel %vm6018_vm9, %v635_v63, %v642_v51 }
  0xb9   : > { %v1453_v18 = vrot.slane %v1451_v5, 5  ;;  %v1457_v21 = vrot.slane %v1455_v8, 4  ;;  %v936_v57 = vsel %vm5946_vm3, %v644_v14, %v935_v59  ;;  %934 = vst.msk [vmem:[#allocation2 + $0x28] sm:$0xf] %vm270_vm6, %v643_v22  ;;  %v2044_v24 = vunpack.c.l.b16 %v1934_v32  ;;  %v3382_v1 = vld [vmem:[%s7663_s1 + $0x8] sm:$0xc] }
  0xba   : > { %v1448_v28 = vor.u32 %v1447_v16, %v1444_v0  ;;  %v1463_v9 = vrot.slane %v1461_v50, 5  ;;  %937 = vst [vmem:[#allocation2 + $0x2c] sm:$0x1] %v936_v57  ;;  %v2605_v54 = vshll.u32 %v2553_v39, 16  ;;  %v2611_v55 = vshll.u32 %v2554_v12, 16  ;;  %v5687_v39 = vld [vmem:[#allocation2 + $0xc] sm:$0xff] }
  0xbb   : > { %v1458_v29 = vor.u32 %v1457_v21, %v1453_v18  ;;  %v4375_v56 = vunpack.c.l.b16 %v4325_v52  ;;  %v4726_v2 = vld [vmem:[%s7663_s1 + $0x10] sm:$0x3]  ;;  %v2076_v51 = vpack.c.b16 %v2045_v48, %v2044_v24  ;;  %v2604_v5 = vrot.slane %v2602_v53, 4  ;;  %v1881_v50 = vld [vmem:[#allocation2 + $0xc] sm:$0xe] }
  0xbc   : > { %v1449_v20 = vrot.slane %v1448_v28, 4  ;;  %v2607_v15 = vrot.slane %v2605_v54, 5  ;;  %v3432_v0 = vunpack.c.l.b16 %v3382_v1  ;;  %v4824_v16 = vsel %vm1567_vm5, %v4726_v2, 0  ;;  %v5702_v52 = vld [vmem:[#allocation2 + $0xc] sm:$0xff]  ;;  %v2595_v6 = vld [vmem:[#allocation2 + $0xb4] sm:$0xf] }
  0xbd   : > { %v1459_v33 = vrot.slane %v1458_v29, 4  ;;  %v4376_v8 = vpack.c.b16 %v4375_v56, %v4375_v56  ;;  %4833 = vmatpush.bf16.msra.mxu0 %v4824_v16  ;;  %v1940_v22 = vrot.slane %v6213_v27, 5  ;;  %v2617_v28 = vrot.slane %v2615_v4, 4  ;;  %v1882_v56 = vld [vmem:[#allocation2 + $0x18] sm:$0xe] }
  0xbe   : > { %5378 = vmatmul.msk.bf16.vlgmr.msrb.gmra.mxu1 %vm1518_vm12, %v5686_v23  ;;  %v1454_v35 = vsel %vm6088_vm13, %v1449_v20, %v1453_v18  ;;  %v2613_v23 = vrot.slane %v2611_v55, 5  ;;  %v3433_v29 = vpack.c.b16 %v3432_v0, %v3432_v0  ;;  %v5395_v20 = vrot.slane %v1881_v50, 9  ;;  %v2556_v55 = vld [vmem:[#allocation2 + $0x18] sm:$0xf] }
  0xbf   : > { %v1464_v40 = vsel %vm6088_vm13, %v1459_v33, %v1463_v9  ;;  %v1496_v42 = vunpack.c.l.b16 %v1454_v35  ;;  %v1035_v44 = vld [vmem:[#allocation2 + $0x24] sm:$0xf]  ;;  %v4377_v21 = vrot.slane %v4376_v8, 2  ;;  %v1943_v32 = vrot.slane %v6217_v37, 5 }
  0xc0   : > { %v1497_v45 = vunpack.c.l.b16 %v1464_v40  ;;  %v1154_v46 = vshrl.u32 %v1035_v44, 16  ;;  %v1157_v47 = vshll.u32 %v1035_v44, 16  ;;  %v6413_v19 = vld [vmem:[#allocation2 + $0x28] sm:$0xf]  ;;  %v3434_v35 = vrot.slane %v3433_v29, 2 }
  0xc1   : > { %v6415_v60 = vld [vmem:[#allocation2 + $0x2c] sm:$0x1]  ;;  %v1163_v58 = vshll.u32 %v6413_v19, 16  ;;  %v1167_v63 = vshrl.u32 %v6413_v19, 16  ;;  %v4427_v31 = vsel %vm1567_vm5, %v4377_v21, 0  ;;  %v1942_v27 = vrot.slane %v1940_v22, 4 }
  0xc2   : > { %v1513_v59 = vpack.c.b16 %v1497_v45, %v1496_v42  ;;  %v1156_v61 = vrot.slane %v1154_v46, 4  ;;  %v1159_v62 = vrot.slane %v1157_v47, 5  ;;  %v1173_v49 = vshll.u32 %v6415_v60, 16  ;;  %4436 = vmatpush.bf16.msra.mxu3 %v4427_v31  ;;  %v5703_v31 = vld [vmem:[#allocation2 + $0x18] sm:$0xff] }
  0xc3   : > { %v1165_v36 = vrot.slane %v1163_v58, 5  ;;  %v1169_v25 = vrot.slane %v1167_v63, 4  ;;  %v2608_v40 = vor.u32 %v2607_v15, %v2604_v5  ;;  %v3484_v44 = vsel %vm1567_vm5, %v3434_v35, 0  ;;  %v2560_v35 = vld [vmem:[#allocation2 + $0x28] sm:$0xf] }
  0xc4   : > { %5313 = vmatmul.msk.bf16.gmra.mxu3 %vm1518_vm12, %v1513_v59  ;;  %v1160_v30 = vor.u32 %v1159_v62, %v1156_v61  ;;  %v1175_v18 = vrot.slane %v1173_v49, 5  ;;  %v2618_v24 = vor.u32 %v2617_v28, %v2613_v23  ;;  %v2621_v45 = vshll.u32 %v2555_v34, 16  ;;  %3493 = vmatpush.bf16.msra.mxu1 %v3484_v44  ;;  %v2557_v49 = vld [vmem:[#allocation2 + $0x1c] sm:$0xf]  ;;  %v2559_v34 = vld [vmem:[#allocation2 + $0x24] sm:$0xf] }
  0xc5   : > { %v1170_v11 = vor.u32 %v1169_v25, %v1165_v36  ;;  %v1941_v46 = vsel %vm6395_vm1, %v5395_v20, %v1940_v22  ;;  %v1944_v37 = vsel %vm6395_vm1, %v1942_v27, %v1943_v32  ;;  %v2609_v48 = vrot.slane %v2608_v40, 4  ;;  %v2558_v22 = vld [vmem:[#allocation2 + $0x20] sm:$0x1] }
  0xc6   : > { %v1161_v14 = vrot.slane %v1160_v30, 4  ;;  %v2046_v53 = vunpack.c.l.b16 %v1941_v46  ;;  %v2047_v54 = vunpack.c.l.b16 %v1944_v37  ;;  %v1947_v59 = vrot.slane %v6329_v38, 5 }
  0xc7   : > { %v1171_v9 = vrot.slane %v1170_v11, 4  ;;  %v2619_v61 = vrot.slane %v2618_v24, 4  ;;  %v2623_v62 = vrot.slane %v2621_v45, 5  ;;  %v5396_v58 = vrot.slane %v1882_v56, 9  ;;  %v1883_v45 = vld [vmem:[#allocation2 + $0x24] sm:$0xe] }
  0xc8   : > { %v1166_v57 = vsel %vm6088_vm13, %v1161_v14, %v1165_v36  ;;  %5410 = vmatmul.msk.bf16.vlgmr.msrb.gmra.mxu2 %vm1518_vm12, %v2076_v51  ;;  %v1950_v63 = vrot.slane %v6335_v43, 5  ;;  %v1949_v1 = vrot.slane %v1947_v59, 4  ;;  %v2614_v2 = vsel %vm6088_vm13, %v2609_v48, %v2613_v23 }
  0xc9   : > { %v1472_v33 = vunpack.c.l.b16 %v1166_v57  ;;  %v1176_v12 = vsel %vm6088_vm13, %v1171_v9, %v1175_v18  ;;  %v2626_v30 = vshrl.u32 %v2556_v55, 16  ;;  %v1948_v36 = vsel %vm6395_vm1, %v5396_v58, %v1947_v59  ;;  %v5688_v57 = vld [vmem:[#allocation2 + $0x18] sm:$0xff] }
  0xca   : > { %v1473_v42 = vunpack.c.l.b16 %v1176_v12  ;;  %v2077_v51 = vpack.c.b16 %v2047_v54, %v2046_v53  ;;  %v2629_v4 = vshll.u32 %v2556_v55, 16  ;;  %v1951_v38 = vsel %vm6395_vm1, %v1949_v1, %v1950_v63  ;;  %v2561_v53 = vld [vmem:[#allocation2 + $0x2c] sm:$0x1] }
  0xcb   : > { %v2048_v25 = vunpack.c.l.b16 %v1948_v36  ;;  %v2624_v43 = vsel %vm6088_vm13, %v2619_v61, %v2623_v62  ;;  %v2635_v5 = vshll.u32 %v2557_v49, 16  ;;  %v2639_v8 = vshrl.u32 %v2557_v49, 16  ;;  %v5689_v61 = vld [vmem:[#allocation2 + $0x24] sm:$0xff] }
  0xcc   : > { %v1501_v47 = vpack.c.b16 %v1473_v42, %v1472_v33  ;;  %v2049_v14 = vunpack.c.l.b16 %v1951_v38  ;;  %v2986_v0 = vunpack.c.l.b16 %v2614_v2  ;;  %v2987_v16 = vunpack.c.l.b16 %v2624_v43  ;;  %v5704_v2 = vld [vmem:[#allocation2 + $0x24] sm:$0xff] }
  0xcd   : > { %v2628_v50 = vrot.slane %v2626_v30, 4  ;;  %v2631_v11 = vrot.slane %v2629_v4, 5  ;;  %v2637_v18 = vrot.slane %v2635_v5, 5  ;;  %v2641_v21 = vrot.slane %v2639_v8, 4 }
  0xce   : > { %5379 = vmatmul.msk.bf16.gmra.mxu1 %vm1518_vm12, %v5687_v39  ;;  %5301 = vmatmul.msk.bf16.gmra.mxu0 %vm1518_vm12, %v1501_v47  ;;  %v2078_v15 = vpack.c.b16 %v2049_v14, %v2048_v25  ;;  %v3018_v23 = vpack.c.b16 %v2987_v16, %v2986_v0  ;;  %v2645_v9 = vshll.u32 %v2558_v22, 16  ;;  %v2650_v27 = vshrl.u32 %v2559_v34, 16  ;;  %v2563_v25 = vld [vmem:[#allocation2 + $0x34] sm:$0xf] }
  0xcf   : > { %v2632_v28 = vor.u32 %v2631_v11, %v2628_v50  ;;  %v2642_v29 = vor.u32 %v2641_v21, %v2637_v18  ;;  %v2653_v12 = vshll.u32 %v2559_v34, 16  ;;  %v2659_v40 = vshll.u32 %v2560_v35, 16  ;;  %v5831_v50 = vld [vmem:[#allocation2 + $0x34] sm:$0xf]  ;;  %v2564_v34 = vld [vmem:[#allocation2 + $0x38] sm:$0x1] }
  0xd0   : > { %v2647_v33 = vrot.slane %v2645_v9, 5  ;;  %v2663_v44 = vshrl.u32 %v2560_v35, 16  ;;  %v1954_v24 = vrot.slane %v6413_v19, 5  ;;  %v2652_v47 = vrot.slane %v2650_v27, 4  ;;  %v5690_v35 = vld [vmem:[#allocation2 + $0x30] sm:$0xff] }
  0xd1   : > { %v2633_v20 = vrot.slane %v2632_v28, 4  ;;  %v2643_v32 = vrot.slane %v2642_v29, 4  ;;  %v2655_v48 = vrot.slane %v2653_v12, 5  ;;  %v5397_v55 = vrot.slane %v1883_v45, 9  ;;  %v5705_v45 = vld [vmem:[#allocation2 + $0x30] sm:$0xff] }
  0xd2   : > { %v2665_v54 = vrot.slane %v2663_v44, 4  ;;  %v1956_v56 = vrot.slane %v1954_v24, 4  ;;  %v1957_v59 = vrot.slane %v6415_v60, 5  ;;  %v2669_v58 = vshll.u32 %v2561_v53, 16  ;;  %v2565_v53 = vld [vmem:[#allocation2 + $0x3c] sm:$0xf] }
  0xd3   : > { %v2638_v39 = vsel %vm6088_vm13, %v2633_v20, %v2637_v18  ;;  %v2648_v42 = vsel %vm6088_vm13, %v2643_v32, %v2647_v33  ;;  %v2656_v63 = vor.u32 %v2655_v48, %v2652_v47  ;;  %v1955_v19 = vsel %vm6395_vm1, %v5397_v55, %v1954_v24  ;;  %v1884_v18 = vld [vmem:[#allocation2 + $0x30] sm:$0xe]  ;;  %v5832_v32 = vld [vmem:[#allocation2 + $0x38] sm:$0x1]  ;;  %v6485_v47 = vpop.f32.mrf.mxu2 }
  0xd4   : > { %5490 = vmatmul.msk.bf16.vlgmr.msrb.gmra.mxu3 %vm1518_vm12, %v5702_v52  ;;  %v2988_v46 = vunpack.c.l.b16 %v2638_v39  ;;  %v2989_v37 = vunpack.c.l.b16 %v2648_v42  ;;  %v2661_v52 = vrot.slane %v2659_v40, 5  ;;  %v1958_v1 = vsel %vm6395_vm1, %v1956_v56, %v1957_v59 }
  0xd5   : > { %v2050_v30 = vunpack.c.l.b16 %v1955_v19  ;;  %v2051_v36 = vunpack.c.l.b16 %v1958_v1  ;;  %v2657_v60 = vrot.slane %v2656_v63, 4  ;;  %v2671_v38 = vrot.slane %v2669_v58, 5  ;;  %v5833_v19 = vld [vmem:[#allocation2 + $0x40] sm:$0xf] }
  0xd6   : > { %v3019_v62 = vpack.c.b16 %v2989_v37, %v2988_v46  ;;  %v2666_v49 = vor.u32 %v2665_v54, %v2661_v52  ;;  %v2683_v14 = vshll.u32 %v2563_v25, 16  ;;  %v2687_v16 = vshrl.u32 %v2563_v25, 16  ;;  %v2566_v54 = vld [vmem:[#allocation2 + $0x40] sm:$0xf] }
  0xd7   : > { %v2079_v8 = vpack.c.b16 %v2051_v36, %v2050_v30  ;;  %v1961_v11 = vrot.slane %v5831_v50, 5  ;;  %v1964_v33 = vrot.slane %v5832_v32, 5  ;;  %v2693_v40 = vshll.u32 %v2564_v34, 16  ;;  %v6499_v50 = vpop.f32.mrf.mxu3  ;;  %v6507_v32 = vpop.f32.mrf.mxu0 }
  0xd8   : > { %5411 = vmatmul.msk.bf16.gmra.mxu2 %vm1518_vm12, %v2077_v51  ;;  %v2562_v51 = vld [vmem:[#allocation2 + $0x30] sm:$0xf]  ;;  %v2667_v4 = vrot.slane %v2666_v49, 4  ;;  %v2685_v29 = vrot.slane %v2683_v14, 5  ;;  %v2689_v9 = vrot.slane %v2687_v16, 4  ;;  %v2707_v58 = vshll.u32 %v2566_v54, 16 }
  0xd9   : > { %v2674_v43 = vshrl.u32 %v2562_v51, 16  ;;  %v2677_v5 = vshll.u32 %v2562_v51, 16  ;;  %v1963_v20 = vrot.slane %v1961_v11, 4  ;;  %v2711_v49 = vshrl.u32 %v2566_v54, 16  ;;  %v5691_v16 = vld [vmem:[#allocation2 + $0x3c] sm:$0xff] }
  0xda   : > { %v2672_v0 = vsel %vm6088_vm13, %v2667_v4, %v2671_v38  ;;  %v2690_v12 = vor.u32 %v2689_v9, %v2685_v29  ;;  %v1968_v1 = vrot.slane %v5833_v19, 5  ;;  %v2709_v4 = vrot.slane %v2707_v58, 5  ;;  %v2567_v38 = vld [vmem:[#allocation2 + $0x44] sm:$0x1]  ;;  %v1886_v54 = vld [vmem:[#allocation2 + $0x48] sm:$0xe] }
  0xdb   : > { %v2676_v21 = vrot.slane %v2674_v43, 4  ;;  %v2679_v22 = vrot.slane %v2677_v5, 5  ;;  %v2991_v28 = vunpack.c.l.b16 %v2672_v0  ;;  %v1965_v44 = vsel %vm6395_vm1, %v1963_v20, %v1964_v33  ;;  %v6495_v43 = vpop.f32.mrf.mxu2  ;;  %v2568_v20 = vld [vmem:[#allocation2 + $0x48] sm:$0xf] }
  0xdc   : > { %v2053_v37 = vunpack.c.l.b16 %v1965_v44  ;;  %v2691_v48 = vrot.slane %v2690_v12, 4  ;;  %v2713_v25 = vrot.slane %v2711_v49, 4  ;;  %v1970_v14 = vrot.slane %v1968_v1, 4 }
  0xdd   : > { %v2680_v39 = vor.u32 %v2679_v22, %v2676_v21  ;;  %v2722_v12 = vshrl.u32 %v2568_v20, 16  ;;  %v5400_v19 = vrot.slane %v1886_v54, 9 }
  0xde   : > { %5380 = vmatmul.msk.bf16.gmra.mxu1 %vm1518_vm12, %v5688_v57  ;;  %5506 = vmatmul.msk.bf16.vlgmr.msrb.gmra.mxu0 %vm1518_vm12, %v3018_v23  ;;  %v6476_v57 = vpop.f32.mrf.mxu1  ;;  %v2714_v22 = vor.u32 %v2713_v25, %v2709_v4 }
  0xdf   : > { %v2681_v24 = vrot.slane %v2680_v39, 4  ;;  %v2569_v39 = vld [vmem:[#allocation2 + $0x4c] sm:$0xf] }
  0xe0   : > { %v2715_v34 = vrot.slane %v2714_v22, 4 }
  0xe1   : > { %v2686_v56 = vsel %vm6088_vm13, %v2681_v24, %v2685_v29  ;;  %v5706_v29 = vld [vmem:[#allocation2 + $0x3c] sm:$0xff]  ;;  %v2731_v24 = vshll.u32 %v2569_v39, 16 }
  0xe2   : > { %v2992_v30 = vunpack.c.l.b16 %v2686_v56  ;;  %v2724_v56 = vrot.slane %v2722_v12, 4 }
  0xe3   : > { %v2733_v58 = vrot.slane %v2731_v24, 5  ;;  %v1982_v24 = vrot.slane %v6346_v17, 5 }
  0xe4   : > { %5491 = vmatmul.msk.bf16.gmra.mxu3 %vm1518_vm12, %v5703_v31  ;;  %v5398_v31 = vrot.slane %v1884_v18, 9  ;;  %v2717_v18 = vshll.u32 %v2567_v38, 16 }
  0xe6   : > { %v1962_v42 = vsel %vm6395_vm1, %v5398_v31, %v1961_v11  ;;  %v6487_v55 = vpop.f32.mrf.mxu1 }
  0xe7   : > { %v2052_v46 = vunpack.c.l.b16 %v1962_v42  ;;  %v6511_v42 = vpop.f32.mrf.mxu2 }
  0xe8   : > { %5412 = vmatmul.msk.bf16.gmra.mxu2 %vm1518_vm12, %v2078_v15  ;;  %v2662_v15 = vsel %vm6088_vm13, %v2657_v60, %v2661_v52  ;;  %v2695_v52 = vrot.slane %v2693_v40, 5  ;;  %v2725_v40 = vshll.u32 %v2568_v20, 16 }
  0xe9   : > { %v2990_v23 = vunpack.c.l.b16 %v2662_v15  ;;  %v2080_v59 = vpack.c.b16 %v2053_v37, %v2052_v46  ;;  %v5834_v15 = vld [vmem:[#allocation2 + $0x44] sm:$0x1]  ;;  %v6518_v37 = vpop.f32.mrf.mxu3 }
  0xea   : > { %v2696_v63 = vsel %vm6088_vm13, %v2691_v48, %v2695_v52  ;;  %v1971_v0 = vrot.slane %v5834_v15, 5  ;;  %v2735_v48 = vshrl.u32 %v2569_v39, 16  ;;  %v5835_v52 = vld [vmem:[#allocation2 + $0x4c] sm:$0xf] }
  0xeb   : > { %v3020_v27 = vpack.c.b16 %v2991_v28, %v2990_v23  ;;  %v2993_v36 = vunpack.c.l.b16 %v2696_v63 }
  0xec   : > { %v1972_v28 = vsel %vm6395_vm1, %v1970_v14, %v1971_v0  ;;  %v2737_v63 = vrot.slane %v2735_v48, 4 }
  0xed   : > { %v3021_v11 = vpack.c.b16 %v2993_v36, %v2992_v30  ;;  %v2055_v31 = vunpack.c.l.b16 %v1972_v28  ;;  %v2570_v36 = vld [vmem:[#allocation2 + $0x50] sm:$0x1] }
  0xee   : > { %5381 = vmatmul.msk.bf16.gmra.mxu1 %vm1518_vm12, %v5689_v61  ;;  %5507 = vmatmul.msk.bf16.gmra.mxu0 %vm1518_vm12, %v3019_v62  ;;  %v2698_v61 = vshrl.u32 %v2565_v53, 16  ;;  %v2701_v62 = vshll.u32 %v2565_v53, 16  ;;  %v6497_v5 = vpop.f32.mrf.mxu1  ;;  %v1975_v53 = vrot.slane %v5835_v52, 5  ;;  %v2738_v25 = vor.u32 %v2737_v63, %v2733_v58 }
  0xef   : > { %v6525_v14 = vpop.f32.mrf.mxu2  ;;  %v1985_v63 = vrot.slane %v6352_v26, 5  ;;  %v5708_v26 = vld [vmem:[#allocation2 + $0x54] sm:$0xff] }
  0xf0   : > { %v2700_v51 = vrot.slane %v2698_v61, 4  ;;  %v2703_v60 = vrot.slane %v2701_v62, 5  ;;  %v1976_v15 = vsel %vm6395_vm1, %v5400_v19, %v1975_v53  ;;  %v2573_v19 = vld [vmem:[#allocation2 + $0x5c] sm:$0x1] }
  0xf2   : > { %v2704_v21 = vor.u32 %v2703_v60, %v2700_v51  ;;  %v5692_v51 = vld [vmem:[#allocation2 + $0x48] sm:$0xff]  ;;  %v6523_v60 = vpop.f32.mrf.mxu0 }
  0xf4   : > { %5492 = vmatmul.msk.bf16.gmra.mxu3 %vm1518_vm12, %v5704_v2  ;;  %v1885_v2 = vld [vmem:[#allocation2 + $0x3c] sm:$0xe]  ;;  %v2705_v33 = vrot.slane %v2704_v21, 4  ;;  %v2056_v21 = vunpack.c.l.b16 %v1976_v15 }
  0xf8   : > { %5413 = vmatmul.msk.bf16.gmra.mxu2 %vm1518_vm12, %v2079_v8  ;;  %v5399_v8 = vrot.slane %v1885_v2, 9  ;;  %v5836_v2 = vld [vmem:[#allocation2 + $0x50] sm:$0x1] }
  0xf9   : > { %v1978_v30 = vrot.slane %v5836_v2, 5 }
  0xfa   : > { %v1969_v23 = vsel %vm6395_vm1, %v5399_v8, %v1968_v1  ;;  %v1977_v1 = vrot.slane %v1975_v53, 4  ;;  %v2741_v8 = vshll.u32 %v2570_v36, 16  ;;  %v6540_v12 = vpop.f32.mrf.mxu0 }
  0xfb   : > { %v2054_v9 = vunpack.c.l.b16 %v1969_v23  ;;  %v2739_v23 = vrot.slane %v2738_v25, 4 }
  0xfc   : > { %v1979_v0 = vsel %vm6395_vm1, %v1977_v1, %v1978_v30  ;;  %v2743_v28 = vrot.slane %v2741_v8, 5  ;;  %v5693_v30 = vld [vmem:[#allocation2 + $0x54] sm:$0xff] }
  0xfd   : > { %v2081_v44 = vpack.c.b16 %v2055_v31, %v2054_v9  ;;  %v2057_v22 = vunpack.c.l.b16 %v1979_v0  ;;  %v2572_v9 = vld [vmem:[#allocation2 + $0x58] sm:$0xf] }
  0xfe   : > { %5382 = vmatmul.msk.bf16.gmra.mxu1 %vm1518_vm12, %v5690_v35  ;;  %5508 = vmatmul.msk.bf16.gmra.mxu0 %vm1518_vm12, %v3020_v27  ;;  %v2719_v35 = vrot.slane %v2717_v18, 5  ;;  %v6509_v27 = vpop.f32.mrf.mxu1  ;;  %v5707_v18 = vld [vmem:[#allocation2 + $0x48] sm:$0xff]  ;;  %v2755_v39 = vshll.u32 %v2572_v9, 16 }
 0x100   : > { %v2720_v46 = vsel %vm6088_vm13, %v2715_v34, %v2719_v35 }
 0x101   : > { %v2995_v62 = vunpack.c.l.b16 %v2720_v46 }
 0x102   : > { %v6558_v25 = vpop.f32.mrf.mxu0 }
 0x104   : > { %5493 = vmatmul.msk.bf16.gmra.mxu3 %vm1518_vm12, %v5705_v45  ;;  %v2710_v45 = vsel %vm6088_vm13, %v2705_v33, %v2709_v4  ;;  %v2082_v33 = vpack.c.b16 %v2057_v22, %v2056_v21  ;;  %v2574_v22 = vld [vmem:[#allocation2 + $0x60] sm:$0xf] }
 0x105   : > { %v2994_v61 = vunpack.c.l.b16 %v2710_v45  ;;  %v1887_v45 = vld [vmem:[#allocation2 + $0x54] sm:$0xe] }
 0x106   : > { %v6521_v49 = vpop.f32.mrf.mxu1 }
 0x107   : > { %v3022_v38 = vpack.c.b16 %v2995_v62, %v2994_v61  ;;  %v5401_v62 = vrot.slane %v1887_v45, 9  ;;  %v1888_v45 = vld [vmem:[#allocation2 + $0x60] sm:$0xe] }
 0x108   : > { %5414 = vmatmul.msk.bf16.gmra.mxu2 %vm1518_vm12, %v2080_v59  ;;  %v2727_v59 = vrot.slane %v2725_v40, 5  ;;  %v2744_v40 = vsel %vm6088_vm13, %v2739_v23, %v2743_v28  ;;  %v2575_v23 = vld [vmem:[#allocation2 + $0x64] sm:$0xf] }
 0x109   : > { %v2997_v52 = vunpack.c.l.b16 %v2744_v40  ;;  %v2783_v40 = vshrl.u32 %v2575_v23, 16 }
 0x10a   : > { %v2728_v4 = vor.u32 %v2727_v59, %v2724_v56  ;;  %v2757_v56 = vrot.slane %v2755_v39, 5  ;;  %v2779_v39 = vshll.u32 %v2575_v23, 16 }
 0x10e   : > { %5383 = vmatmul.msk.bf16.gmra.mxu1 %vm1518_vm12, %v5691_v16  ;;  %5509 = vmatmul.msk.bf16.gmra.mxu0 %vm1518_vm12, %v3021_v11  ;;  %v2729_v16 = vrot.slane %v2728_v4, 4  ;;  %v6532_v11 = vpop.f32.mrf.mxu3  ;;  %v6535_v31 = vpop.f32.mrf.mxu1  ;;  %v1983_v4 = vsel %vm6395_vm1, %v5401_v62, %v1982_v24 }
 0x10f   : > { %v6545_v48 = vpop.f32.mrf.mxu2  ;;  %v2058_v15 = vunpack.c.l.b16 %v1983_v4 }
 0x110   : > { %v2734_v20 = vsel %vm6088_vm13, %v2729_v16, %v2733_v58  ;;  %v1984_v58 = vrot.slane %v1982_v24, 4 }
 0x111   : > { %v2996_v46 = vunpack.c.l.b16 %v2734_v20 }
 0x113   : > { %v3023_v17 = vpack.c.b16 %v2997_v52, %v2996_v46  ;;  %v5838_v46 = vld [vmem:[#allocation2 + $0x68] sm:$0x1] }
 0x114   : > { %5494 = vmatmul.msk.bf16.gmra.mxu3 %vm1518_vm12, %v5706_v29  ;;  %v2571_v29 = vld [vmem:[#allocation2 + $0x54] sm:$0xf]  ;;  %v1992_v52 = vrot.slane %v5838_v46, 5 }
 0x115   : > { %v2746_v34 = vshrl.u32 %v2571_v29, 16  ;;  %v2749_v35 = vshll.u32 %v2571_v29, 16 }
 0x116   : > { %v6548_v59 = vpop.f32.mrf.mxu3 }
 0x117   : > { %v2748_v53 = vrot.slane %v2746_v34, 4  ;;  %v2751_v54 = vrot.slane %v2749_v35, 5  ;;  %v6561_v21 = vpop.f32.mrf.mxu2  ;;  %v2773_v34 = vshll.u32 %v2574_v22, 16 }
 0x118   : > { %5415 = vmatmul.msk.bf16.gmra.mxu2 %vm1518_vm12, %v2081_v44  ;;  %v2759_v44 = vshrl.u32 %v2572_v9, 16 }
 0x119   : > { %v2752_v2 = vor.u32 %v2751_v54, %v2748_v53  ;;  %v2775_v62 = vrot.slane %v2773_v34, 5 }
 0x11a   : > { %v2761_v61 = vrot.slane %v2759_v44, 4  ;;  %v5837_v44 = vld [vmem:[#allocation2 + $0x64] sm:$0xf] }
 0x11b   : > { %v2753_v8 = vrot.slane %v2752_v2, 4  ;;  %v1989_v24 = vrot.slane %v5837_v44, 5  ;;  %v2576_v2 = vld [vmem:[#allocation2 + $0x68] sm:$0x1] }
 0x11c   : > { %v2762_v36 = vor.u32 %v2761_v61, %v2757_v56 }
 0x11d   : > { %v2758_v9 = vsel %vm6088_vm13, %v2753_v8, %v2757_v56 }
 0x11e   : > { %5384 = vmatmul.msk.bf16.gmra.mxu1 %vm1518_vm12, %v5692_v51  ;;  %5510 = vmatmul.msk.bf16.gmra.mxu0 %vm1518_vm12, %v3022_v38  ;;  %v2765_v51 = vshll.u32 %v2573_v19, 16  ;;  %v1986_v38 = vsel %vm6395_vm1, %v1984_v58, %v1985_v63  ;;  %v2763_v16 = vrot.slane %v2762_v36, 4  ;;  %v6565_v29 = vpop.f32.mrf.mxu3  ;;  %v2998_v53 = vunpack.c.l.b16 %v2758_v9 }
 0x11f   : > { %v2059_v0 = vunpack.c.l.b16 %v1986_v38  ;;  %v2781_v58 = vrot.slane %v2779_v39, 5  ;;  %v2785_v63 = vrot.slane %v2783_v40, 4  ;;  %v5402_v19 = vrot.slane %v1888_v45, 9 }
 0x121   : > { %v2083_v20 = vpack.c.b16 %v2059_v0, %v2058_v15  ;;  %v2786_v15 = vor.u32 %v2785_v63, %v2781_v58  ;;  %v2789_v0 = vshll.u32 %v2576_v2, 16 }
 0x122   : > { %v6573_v56 = vpop.f32.mrf.mxu0 }
 0x123   : > { %v2791_v34 = vrot.slane %v2789_v0, 5 }
 0x124   : > { %5495 = vmatmul.msk.bf16.gmra.mxu3 %vm1518_vm12, %v5707_v18  ;;  %v2767_v18 = vrot.slane %v2765_v51, 5 }
 0x126   : > { %v2768_v35 = vsel %vm6088_vm13, %v2763_v16, %v2767_v18  ;;  %v6578_v8 = vpop.f32.mrf.mxu3  ;;  %v1990_v16 = vsel %vm6395_vm1, %v5402_v19, %v1989_v24  ;;  %v1889_v19 = vld [vmem:[#allocation2 + $0x6c] sm:$0xe] }
 0x127   : > { %v2999_v54 = vunpack.c.l.b16 %v2768_v35  ;;  %7681 = vst [vmem:[#allocation3_spill] sm:$0xff] %v6578_v8  ;;  %v2578_v35 = vld [vmem:[#allocation2 + $0x70] sm:$0xf] }
 0x128   : > { %5416 = vmatmul.msk.bf16.gmra.mxu2 %vm1518_vm12, %v2082_v33  ;;  %v2770_v33 = vshrl.u32 %v2574_v22, 16  ;;  %v5709_v22 = vld [vmem:[#allocation2 + $0x60] sm:$0xff] }
 0x129   : > { %v3024_v4 = vpack.c.b16 %v2999_v54, %v2998_v53  ;;  %v2803_v54 = vshll.u32 %v2578_v35, 16 }
 0x12a   : > { %v2772_v61 = vrot.slane %v2770_v33, 4  ;;  %v2787_v33 = vrot.slane %v2786_v15, 4  ;;  %v6586_v40 = vpop.f32.mrf.mxu0 }
 0x12b   : > { %v6551_v1 = vpop.f32.mrf.mxu1 }
 0x12c   : > { %v2776_v38 = vor.u32 %v2775_v62, %v2772_v61  ;;  %v2792_v53 = vsel %vm6088_vm13, %v2787_v33, %v2791_v34  ;;  %v2807_v61 = vshrl.u32 %v2578_v35, 16  ;;  %v5839_v62 = vld [vmem:[#allocation2 + $0x70] sm:$0xf] }
 0x12d   : > { %v1996_v63 = vrot.slane %v5839_v62, 5  ;;  %v3001_v15 = vunpack.c.l.b16 %v2792_v53  ;;  %v5695_v35 = vld [vmem:[#allocation2 + $0x6c] sm:$0xff] }
 0x12e   : > { %5385 = vmatmul.msk.bf16.gmra.mxu1 %vm1518_vm12, %v5693_v30  ;;  %5511 = vmatmul.msk.bf16.gmra.mxu0 %vm1518_vm12, %v3023_v17  ;;  %v1991_v17 = vrot.slane %v1989_v24, 4  ;;  %v2777_v23 = vrot.slane %v2776_v38, 4  ;;  %v2809_v0 = vrot.slane %v2807_v61, 4 }
 0x130   : > { %v1993_v18 = vsel %vm6395_vm1, %v1991_v17, %v1992_v52  ;;  %v2782_v46 = vsel %vm6088_vm13, %v2777_v23, %v2781_v58  ;;  %v2805_v58 = vrot.slane %v2803_v54, 5 }
 0x131   : > { %v2061_v9 = vunpack.c.l.b16 %v1993_v18  ;;  %v1998_v18 = vrot.slane %v1996_v63, 4 }
 0x133   : > { %v6563_v28 = vpop.f32.mrf.mxu1 }
 0x134   : > { %5496 = vmatmul.msk.bf16.gmra.mxu3 %vm1518_vm12, %v5708_v26  ;;  %v5694_v26 = vld [vmem:[#allocation2 + $0x60] sm:$0xff] }
 0x138   : > { %5417 = vmatmul.msk.bf16.gmra.mxu2 %vm1518_vm12, %v2083_v20  ;;  %v2577_v20 = vld [vmem:[#allocation2 + $0x6c] sm:$0xf] }
 0x139   : > { %v2794_v24 = vshrl.u32 %v2577_v20, 16  ;;  %v2797_v45 = vshll.u32 %v2577_v20, 16 }
 0x13b   : > { %v1800_v30 = vpop.f32.mrf.mxu1  ;;  %v6575_v36 = vpop.f32.mrf.mxu2  ;;  %v2796_v2 = vrot.slane %v2794_v24, 4 }
 0x13c   : > { %v1801_v51 = vadd.f32 %v1800_v30, %v6507_v32  ;;  %v2060_v32 = vunpack.c.l.b16 %v1990_v16  ;;  %v2799_v30 = vrot.slane %v2797_v45, 5  ;;  %v5403_v16 = vrot.slane %v1889_v19, 9 }
 0x13d   : > { %v2810_v45 = vor.u32 %v2809_v0, %v2805_v58 }
 0x13e   : > { %5386 = vmatmul.msk.bf16.gmra.mxu1 %vm1518_vm12, %v5694_v26  ;;  %5512 = vmatmul.msk.bf16.gmra.mxu0 %vm1518_vm12, %v3024_v4  ;;  %v2084_v52 = vpack.c.b16 %v2061_v9, %v2060_v32  ;;  %v5840_v4 = vld [vmem:[#allocation2 + $0x74] sm:$0x1]  ;;  %v3000_v26 = vunpack.c.l.b16 %v2782_v46  ;;  %v2800_v23 = vor.u32 %v2799_v30, %v2796_v2  ;;  %v2580_v30 = vld [vmem:[#allocation2 + $0x78] sm:$0xf] }
 0x13f   : > { %v1999_v38 = vrot.slane %v5840_v4, 5  ;;  %v2811_v19 = vrot.slane %v2810_v45, 4  ;;  %v5842_v45 = vld [vmem:[#allocation2 + $0x80] sm:$0x1] }
 0x140   : > { %v3025_v20 = vpack.c.b16 %v3001_v15, %v3000_v26  ;;  %v2801_v61 = vrot.slane %v2800_v23, 4  ;;  %v2581_v26 = vld [vmem:[#allocation2 + $0x7c] sm:$0xf] }
 0x141   : > { %v2000_v53 = vsel %vm6395_vm1, %v1998_v18, %v1999_v38  ;;  %v2818_v18 = vshrl.u32 %v2580_v30, 16 }
 0x142   : > { %v2063_v62 = vunpack.c.l.b16 %v2000_v53 }
 0x143   : > { %v1802_v39 = vpop.f32.mrf.mxu1  ;;  %v6588_v44 = vpop.f32.mrf.mxu2 }
 0x144   : > { %5497 = vmatmul.msk.bf16.gmra.mxu3 %vm1518_vm12, %v5709_v22  ;;  %v2579_v22 = vld [vmem:[#allocation2 + $0x74] sm:$0x1]  ;;  %v1803_v4 = vadd.f32 %v1802_v39, %v6523_v60  ;;  %v5841_v60 = vld [vmem:[#allocation2 + $0x7c] sm:$0xf] }
 0x145   : > { %v2813_v46 = vshll.u32 %v2579_v22, 16  ;;  %v2821_v22 = vshll.u32 %v2580_v30, 16  ;;  %v2003_v39 = vrot.slane %v5841_v60, 5 }
 0x147   : > { %v6595_v17 = vpop.f32.mrf.mxu3  ;;  %v2815_v2 = vrot.slane %v2813_v46, 5 }
 0x148   : > { %7682 = vst [vmem:[#allocation4_spill] sm:$0xff] %v6595_v17  ;;  %5418 = vmatmul.msk.bf16.gmra.mxu2 %vm1518_vm12, %v2084_v52  ;;  %v1997_v52 = vsel %vm6395_vm1, %v5403_v16, %v1996_v63  ;;  %v2806_v63 = vsel %vm6088_vm13, %v2801_v61, %v2805_v58  ;;  %v2006_v58 = vrot.slane %v5842_v45, 5 }
 0x149   : > { %v3002_v46 = vunpack.c.l.b16 %v2806_v63  ;;  %v5696_v63 = vld [vmem:[#allocation2 + $0x78] sm:$0xff] }
 0x14b   : > { %v2152_v32 = vpop.f32.mrf.mxu2  ;;  %v1805_v9 = vpop.f32.mrf.mxu1 }
 0x14c   : > { %v2232_v33 = vadd.f32 %v2152_v32, %v1801_v51  ;;  %v1806_v34 = vadd.f32 %v1805_v9, %v6540_v12  ;;  %v6599_v24 = vpop.f32.mrf.mxu0  ;;  %v5710_v51 = vld [vmem:[#allocation2 + $0x6c] sm:$0xff]  ;;  %v2062_v12 = vunpack.c.l.b16 %v1997_v52  ;;  %v2816_v32 = vsel %vm6088_vm13, %v2811_v19, %v2815_v2  ;;  %v2582_v19 = vld [vmem:[#allocation2 + $0x80] sm:$0x1] }
 0x14d   : > { %v2827_v9 = vshll.u32 %v2581_v26, 16  ;;  %v3003_v53 = vunpack.c.l.b16 %v2816_v32 }
 0x14e   : > { %5387 = vmatmul.msk.bf16.gmra.mxu1 %vm1518_vm12, %v5695_v35  ;;  %5513 = vmatmul.msk.bf16.gmra.mxu0 %vm1518_vm12, %v3025_v20  ;;  %v2085_v16 = vpack.c.b16 %v2063_v62, %v2062_v12  ;;  %v2831_v20 = vshrl.u32 %v2581_v26, 16  ;;  %v1890_v35 = vld [vmem:[#allocation2 + $0x78] sm:$0xe]  ;;  %v2823_v12 = vrot.slane %v2821_v22, 5 }
 0x14f   : > { %v6606_v54 = vpop.f32.mrf.mxu3  ;;  %v2829_v62 = vrot.slane %v2827_v9, 5 }
 0x150   : > { %7683 = vst [vmem:[#allocation5_spill] sm:$0xff] %v6606_v54  ;;  %v2833_v30 = vrot.slane %v2831_v20, 4  ;;  %v3026_v54 = vpack.c.b16 %v3003_v53, %v3002_v46  ;;  %v5711_v20 = vld [vmem:[#allocation2 + $0x78] sm:$0xff] }
 0x152   : > { %v2834_v32 = vor.u32 %v2833_v30, %v2829_v62 }
 0x153   : > { %v2154_v38 = vpop.f32.mrf.mxu2  ;;  %v1807_v15 = vpop.f32.mrf.mxu1 }
 0x154   : > { %5498 = vmatmul.msk.bf16.gmra.mxu3 %vm1518_vm12, %v5710_v51  ;;  %v2233_v0 = vadd.f32 %v2154_v38, %v1803_v4  ;;  %v6613_v23 = vpop.f32.mrf.mxu0  ;;  %v2820_v51 = vrot.slane %v2818_v18, 4  ;;  %v5404_v4 = vrot.slane %v1890_v35, 9  ;;  %v2005_v38 = vrot.slane %v2003_v39, 4 }
 0x155   : > { %v2835_v53 = vrot.slane %v2834_v32, 4 }
 0x156   : > { %v2824_v60 = vor.u32 %v2823_v12, %v2820_v51  ;;  %v2007_v18 = vsel %vm6395_vm1, %v2005_v38, %v2006_v58  ;;  %v2584_v12 = vld [vmem:[#allocation2 + $0x88] sm:$0xf] }
 0x157   : > { %v2441_v52 = vpop.f32.mrf.mxu3  ;;  %v2065_v46 = vunpack.c.l.b16 %v2007_v18 }
 0x158   : > { %v2521_v61 = vadd.f32 %v2441_v52, %v2232_v33  ;;  %5419 = vmatmul.msk.bf16.gmra.mxu2 %vm1518_vm12, %v2085_v16  ;;  %v2837_v33 = vshll.u32 %v2582_v19, 16  ;;  %v2004_v16 = vsel %vm6395_vm1, %v5404_v4, %v2003_v39  ;;  %v2583_v52 = vld [vmem:[#allocation2 + $0x84] sm:$0xf]  ;;  %v1808_v39 = vadd.f32 %v1807_v15, %v6558_v25  ;;  %v5843_v15 = vld [vmem:[#allocation2 + $0x88] sm:$0xf] }
 0x159   : > { %v2064_v35 = vunpack.c.l.b16 %v2004_v16  ;;  %v2842_v58 = vshrl.u32 %v2583_v52, 16  ;;  %v2845_v4 = vshll.u32 %v2583_v52, 16  ;;  %v2855_v25 = vshrl.u32 %v2584_v12, 16 }
 0x15a   : > { %v2839_v51 = vrot.slane %v2837_v33, 5 }
 0x15b   : > { %v2157_v2 = vpop.f32.mrf.mxu2  ;;  %v1810_v26 = vpop.f32.mrf.mxu1  ;;  %v2844_v16 = vrot.slane %v2842_v58, 4  ;;  %v2847_v18 = vrot.slane %v2845_v4, 5  ;;  %v5697_v4 = vld [vmem:[#allocation2 + $0x84] sm:$0xff] }
 0x15c   : > { %v2234_v17 = vadd.f32 %v2157_v2, %v1806_v34  ;;  %v1811_v45 = vadd.f32 %v1810_v26, %v6573_v56  ;;  %v3094_v8 = vpop.f32.mrf.mxu0  ;;  %v2825_v56 = vrot.slane %v2824_v60, 4  ;;  %v2840_v2 = vsel %vm6088_vm13, %v2835_v53, %v2839_v51  ;;  %v2585_v51 = vld [vmem:[#allocation2 + $0x8c] sm:$0x1] }
 0x15d   : > { %v6624_v22 = vadd.f32 %v3094_v8, %v2521_v61  ;;  %v2851_v26 = vshll.u32 %v2584_v12, 16  ;;  %v2010_v60 = vrot.slane %v5843_v15, 5 }
 0x15e   : > { %5388 = vmatmul.msk.bf16.gmra.mxu1 %vm1518_vm12, %v5696_v63  ;;  %5514 = vmatmul.msk.bf16.gmra.mxu0 %vm1518_vm12, %v3026_v54  ;;  %v2830_v8 = vsel %vm6088_vm13, %v2825_v56, %v2829_v62  ;;  %v1891_v63 = vld [vmem:[#allocation2 + $0x84] sm:$0xe]  ;;  %v3005_v56 = vunpack.c.l.b16 %v2840_v2 }
 0x15f   : > { %v2443_v9 = vpop.f32.mrf.mxu3  ;;  %v5405_v52 = vrot.slane %v1891_v63, 9  ;;  %v2012_v53 = vrot.slane %v2010_v60, 4 }
 0x160   : > { %v2522_v34 = vadd.f32 %v2443_v9, %v2233_v0  ;;  %v2086_v0 = vpack.c.b16 %v2065_v46, %v2064_v35  ;;  %v5844_v9 = vld [vmem:[#allocation2 + $0x8c] sm:$0x1]  ;;  %v2857_v46 = vrot.slane %v2855_v25, 4 }
 0x161   : > { %v2013_v62 = vrot.slane %v5844_v9, 5 }
 0x163   : > { %v2159_v30 = vpop.f32.mrf.mxu2  ;;  %v1812_v38 = vpop.f32.mrf.mxu1 }
 0x164   : > { %5499 = vmatmul.msk.bf16.gmra.mxu3 %vm1518_vm12, %v5711_v20  ;;  %v2235_v54 = vadd.f32 %v2159_v30, %v1808_v39  ;;  %v1813_v61 = vadd.f32 %v1812_v38, %v6586_v40  ;;  %v3096_v19 = vpop.f32.mrf.mxu0  ;;  %v3004_v20 = vunpack.c.l.b16 %v2830_v8  ;;  %v2853_v40 = vrot.slane %v2851_v26, 5 }
 0x165   : > { %v6634_v32 = vadd.f32 %v3096_v19, %v2522_v34  ;;  %v2848_v39 = vor.u32 %v2847_v18, %v2844_v16  ;;  %v2861_v8 = vshll.u32 %v2585_v51, 16  ;;  %v2586_v16 = vld [vmem:[#allocation2 + $0x90] sm:$0xf] }
 0x166   : > { %v3027_v34 = vpack.c.b16 %v3005_v56, %v3004_v20  ;;  %v2858_v15 = vor.u32 %v2857_v46, %v2853_v40  ;;  %v2587_v20 = vld [vmem:[#allocation2 + $0x94] sm:$0xf]  ;;  %v2866_v56 = vshrl.u32 %v2586_v16, 16 }
 0x167   : > { %v2446_v33 = vpop.f32.mrf.mxu3  ;;  %v2849_v25 = vrot.slane %v2848_v39, 4  ;;  %v2863_v9 = vrot.slane %v2861_v8, 5 }
 0x168   : > { %v2523_v35 = vadd.f32 %v2446_v33, %v2234_v17  ;;  %5420 = vmatmul.msk.bf16.gmra.mxu2 %vm1518_vm12, %v2086_v0  ;;  %v2011_v17 = vsel %vm6395_vm1, %v5405_v52, %v2010_v60  ;;  %v2014_v0 = vsel %vm6395_vm1, %v2012_v53, %v2013_v62  ;;  %v2859_v18 = vrot.slane %v2858_v15, 4  ;;  %v5846_v15 = vld [vmem:[#allocation2 + $0x98] sm:$0x1] }
 0x169   : > { %v2066_v63 = vunpack.c.l.b16 %v2011_v17  ;;  %v2067_v33 = vunpack.c.l.b16 %v2014_v0  ;;  %v2854_v60 = vsel %vm6088_vm13, %v2849_v25, %v2853_v40  ;;  %v2869_v53 = vshll.u32 %v2586_v16, 16 }
 0x16a   : > { %v2864_v39 = vsel %vm6088_vm13, %v2859_v18, %v2863_v9  ;;  %v2020_v8 = vrot.slane %v5846_v15, 5  ;;  %v3006_v17 = vunpack.c.l.b16 %v2854_v60  ;;  %v2588_v18 = vld [vmem:[#allocation2 + $0x98] sm:$0x1] }
 0x16b   : > { %v2162_v12 = vpop.f32.mrf.mxu2  ;;  %v1815_v30 = vpop.f32.mrf.mxu1  ;;  %v2087_v52 = vpack.c.b16 %v2067_v33, %v2066_v63  ;;  %v2871_v25 = vrot.slane %v2869_v53, 5  ;;  %v2885_v15 = vshll.u32 %v2588_v18, 16 }
 0x16c   : > { %v2236_v38 = vadd.f32 %v2162_v12, %v1811_v45  ;;  %v1816_v58 = vadd.f32 %v1815_v30, %v6599_v24  ;;  %v3099_v19 = vpop.f32.mrf.mxu0  ;;  %v5712_v24 = vld [vmem:[#allocation2 + $0x84] sm:$0xff]  ;;  %v2875_v12 = vshll.u32 %v2587_v20, 16  ;;  %v2879_v30 = vshrl.u32 %v2587_v20, 16 }
 0x16d   : > { %v6643_v2 = vadd.f32 %v3099_v19, %v2523_v35  ;;  %v1892_v19 = vld [vmem:[#allocation2 + $0x90] sm:$0xe] }
 0x16e   : > { %5389 = vmatmul.msk.bf16.gmra.mxu1 %vm1518_vm12, %v5697_v4  ;;  %5515 = vmatmul.msk.bf16.gmra.mxu0 %vm1518_vm12, %v3027_v34  ;;  %v5845_v34 = vld [vmem:[#allocation2 + $0x94] sm:$0xf]  ;;  %v2881_v63 = vrot.slane %v2879_v30, 4  ;;  %v5406_v33 = vrot.slane %v1892_v19, 9 }
 0x16f   : > { %v2448_v26 = vpop.f32.mrf.mxu3  ;;  %v2017_v4 = vrot.slane %v5845_v34, 5  ;;  %v5713_v30 = vld [vmem:[#allocation2 + $0x90] sm:$0xff] }
 0x170   : > { %v2524_v45 = vadd.f32 %v2448_v26, %v2235_v54 }
 0x171   : > { %v2019_v16 = vrot.slane %v2017_v4, 4 }
 0x173   : > { %v2164_v62 = vpop.f32.mrf.mxu2  ;;  %v1817_v46 = vpop.f32.mrf.mxu1 }
 0x174   : > { %5500 = vmatmul.msk.bf16.gmra.mxu3 %vm1518_vm12, %v5712_v24  ;;  %v2237_v35 = vadd.f32 %v2164_v62, %v1813_v61  ;;  %v1818_v54 = vadd.f32 %v1817_v46, %v6613_v23  ;;  %v3101_v51 = vpop.f32.mrf.mxu0  ;;  %v3007_v61 = vunpack.c.l.b16 %v2864_v39  ;;  %v2868_v23 = vrot.slane %v2866_v56, 4 }
 0x175   : > { %v6652_v40 = vadd.f32 %v3101_v51, %v2524_v45  ;;  %v2877_v24 = vrot.slane %v2875_v12, 5  ;;  %v5698_v51 = vld [vmem:[#allocation2 + $0x90] sm:$0xff]  ;;  %v2021_v56 = vsel %vm6395_vm1, %v2019_v16, %v2020_v8  ;;  %v2590_v12 = vld [vmem:[#allocation2 + $0xa0] sm:$0xf] }
 0x176   : > { %v3028_v62 = vpack.c.b16 %v3007_v61, %v3006_v17  ;;  %v2872_v45 = vor.u32 %v2871_v25, %v2868_v23  ;;  %v2887_v23 = vrot.slane %v2885_v15, 5  ;;  %v2903_v8 = vshrl.u32 %v2590_v12, 16 }
 0x177   : > { %v2451_v0 = vpop.f32.mrf.mxu3  ;;  %v2882_v60 = vor.u32 %v2881_v63, %v2877_v24  ;;  %v2899_v63 = vshll.u32 %v2590_v12, 16  ;;  %v2591_v12 = vld [vmem:[#allocation2 + $0xa4] sm:$0x1] }
 0x178   : > { %v2525_v26 = vadd.f32 %v2451_v0, %v2236_v38  ;;  %5421 = vmatmul.msk.bf16.gmra.mxu2 %vm1518_vm12, %v2087_v52  ;;  %v2018_v38 = vsel %vm6395_vm1, %v5406_v33, %v2017_v4  ;;  %v2589_v52 = vld [vmem:[#allocation2 + $0x9c] sm:$0xf]  ;;  %v2873_v19 = vrot.slane %v2872_v45, 4  ;;  %v2069_v0 = vunpack.c.l.b16 %v2021_v56 }
 0x179   : > { %v2068_v17 = vunpack.c.l.b16 %v2018_v38  ;;  %v2883_v61 = vrot.slane %v2882_v60, 4  ;;  %v2890_v4 = vshrl.u32 %v2589_v52, 16  ;;  %v2893_v25 = vshll.u32 %v2589_v52, 16  ;;  %v1893_v56 = vld [vmem:[#allocation2 + $0x9c] sm:$0xe] }
 0x17a   : > { %v6670_v15 = vrot.slane %v2899_v63, 5  ;;  %v2905_v38 = vrot.slane %v2903_v8, 4  ;;  %v2909_v8 = vshll.u32 %v2591_v12, 16 }
 0x17b   : > { %v2167_v9 = vpop.f32.mrf.mxu2  ;;  %v1820_v20 = vpop.f32.mrf.mxu1  ;;  %v2892_v45 = vrot.slane %v2890_v4, 4  ;;  %v5812_v4 = vld [vmem:[%s5964_s28 + $0x78] sm:$0xff]  }
 0x17c   : > { %v2238_v46 = vadd.f32 %v2167_v9, %v1816_v58  ;;  %v3104_v34 = vpop.f32.mrf.mxu0  ;;  %v2906_v63 = vor.u32 %v2905_v38, %v6670_v15  ;;  %v2911_v12 = vrot.slane %v2909_v8, 5  ;;  %v330_v8 = vld [vmem:[#allocation2 + $0xc0] sm:$0x1] }
 0x17d   : > { %v6660_v53 = vadd.f32 %v3104_v34, %v2525_v26  ;;  %v2878_v26 = vsel %vm6088_vm13, %v2873_v19, %v2877_v24  ;;  %v5847_v34 = vld [vmem:[#allocation2 + $0xa0] sm:$0xf]  ;;  %v5848_v19 = vld [vmem:[#allocation2 + $0xa4] sm:$0x1] }
 0x17e   : > { %5390 = vmatmul.msk.bf16.gmra.mxu1 %vm1518_vm12, %v5698_v51  ;;  %5516 = vmatmul.msk.bf16.gmra.mxu0 %vm1518_vm12, %v3028_v62  ;;  %v2888_v62 = vsel %vm6088_vm13, %v2883_v61, %v2887_v23  ;;  %v2895_v51 = vrot.slane %v2893_v25, 5  ;;  %v2024_v60 = vrot.slane %v5847_v34, 5  ;;  %v3008_v24 = vunpack.c.l.b16 %v2878_v26  ;;  %v5699_v34 = vld [vmem:[#allocation2 + $0x9c] sm:$0xff] }
 0x17f   : > { %v2453_v39 = vpop.f32.mrf.mxu3  ;;  %v5407_v61 = vrot.slane %v1893_v56, 9  ;;  %v1821_v25 = vadd.f32 %v1820_v20, %v6476_v57  ;;  %v5797_v26 = vunpack.c.h.bf16 %v5812_v4  ;;  %v5849_v57 = vld [vmem:[%s7664_s2] ss:$0 sm:$0xff] }
 0x180   : > { %v2526_v58 = vadd.f32 %v2453_v39, %v2237_v35  ;;  %v2088_v35 = vpack.c.b16 %v2069_v0, %v2068_v17  ;;  %v2027_v17 = vrot.slane %v5848_v19, 5  ;;  %v2896_v0 = vor.u32 %v2895_v51, %v2892_v45  ;;  %v2592_v19 = vld [vmem:[#allocation2 + $0xa8] sm:$0xf] }
 0x181   : > { %v2026_v23 = vrot.slane %v2024_v60, 4  ;;  %v2025_v45 = vsel %vm6395_vm1, %v5407_v61, %v2024_v60  ;;  %v491_v38 = vmul.f32 %v5849_v57, %v5797_v26  ;;  %v5850_v60 = vld [vmem:[%s7665_s3] ss:$0 sm:$0xff] }
 0x182   : > { %v2897_v56 = vrot.slane %v2896_v0, 4 }
 0x183   : > { %v2169_v33 = vpop.f32.mrf.mxu2  ;;  %v6663_v16 = vpop.f32.mrf.mxu1  ;;  %v2028_v51 = vsel %vm6395_vm1, %v2026_v23, %v2027_v17  ;;  %v527_v61 = vadd.f32 %v5850_v60, %v491_v38 }
 0x184   : > { %5501 = vmatmul.msk.bf16.gmra.mxu3 %vm1518_vm12, %v5713_v30  ;;  %v2239_v18 = vadd.f32 %v2169_v33, %v1818_v54  ;;  %v3106_v9 = vpop.f32.mrf.mxu0  ;;  %v3009_v54 = vunpack.c.l.b16 %v2888_v62  ;;  %v2071_v0 = vunpack.c.l.b16 %v2028_v51 }
 0x185   : > { %v6672_v52 = vadd.f32 %v3106_v9, %v2526_v58  ;;  %v5796_v58 = vunpack.c.l.bf16 %v5812_v4  ;;  %v5714_v4 = vld [vmem:[#allocation2 + $0x9c] sm:$0xff] }
 0x186   : > { %v3029_v62 = vpack.c.b16 %v3009_v54, %v3008_v24 }
 0x187   : > { %7684 = vst [vmem:[#allocation6_spill] sm:$0xff] %v6672_v52  ;;  %v2456_v39 = vpop.f32.mrf.mxu3  ;;  %v490_v20 = vmul.f32 %v5849_v57, %v5796_v58 }
 0x188   : > { %v2527_v30 = vadd.f32 %v2456_v39, %v2238_v46  ;;  %5422 = vmatmul.msk.bf16.gmra.mxu2 %vm1518_vm12, %v2088_v35  ;;  %v2907_v39 = vrot.slane %v2906_v63, 4  ;;  %v2593_v63 = vld [vmem:[#allocation2 + $0xac] sm:$0xf] }
 0x189   : > { %v526_v17 = vadd.f32 %v5850_v60, %v490_v20  ;;  %v2927_v51 = vshrl.u32 %v2593_v63, 16  ;;  %v559_v20 = vmax.f32 %v527_v61, 0.0 }
 0x18a   : > { %v2912_v26 = vsel %vm6088_vm13, %v2907_v39, %v2911_v12  ;;  %v5851_v39 = vld [vmem:[#allocation2 + $0xac] sm:$0xf] }
 0x18b   : > { %v2172_v33 = vpop.f32.mrf.mxu2  ;;  %v6678_v9 = vpop.f32.mrf.mxu1  ;;  %v558_v58 = vmax.f32 %v526_v17, 0.0  ;;  %v2031_v12 = vrot.slane %v5851_v39, 5  ;;  %v3011_v17 = vunpack.c.l.b16 %v2912_v26  ;;  %v2929_v61 = vrot.slane %v2927_v51, 4  ;;  %v2594_v26 = vld [vmem:[#allocation2 + $0xb0] sm:$0x1] }
 0x18c   : > { %v2240_v46 = vadd.f32 %v2172_v33, %v1821_v25  ;;  %v3109_v35 = vpop.f32.mrf.mxu0  ;;  %v2070_v25 = vunpack.c.l.b16 %v2025_v45  ;;  %v2902_v33 = vsel %vm6088_vm13, %v2897_v56, %v6670_v15  ;;  %v2923_v45 = vshll.u32 %v2593_v63, 16 }
 0x18d   : > { %v6688_v24 = vadd.f32 %v3109_v35, %v2527_v30  ;;  %v331_v30 = vsel %vm5946_vm3, 0, %v330_v8  ;;  %v2917_v35 = vshll.u32 %v2592_v19, 16  ;;  %v590_v15 = vpack.c.bf16 %v558_v58, %v558_v58 }
 0x18e   : > { %5391 = vmatmul.msk.bf16.gmra.mxu1 %vm1518_vm12, %v5699_v34  ;;  %5517 = vmatmul.msk.bf16.gmra.mxu0 %vm1518_vm12, %v3029_v62  ;;  %v1823_v62 = vadd.f32 %v6663_v16, %v6487_v55  ;;  %332 = vst [vmem:[#allocation2 + $0xc0] sm:$0x1] %v331_v30  ;;  %v3010_v60 = vunpack.c.l.b16 %v2902_v33  ;;  %v1894_v16 = vld [vmem:[#allocation2 + $0xa8] sm:$0xe]  ;;  %v591_v52 = vpack.c.bf16 %v559_v20, %v559_v20  ;;  %v5852_v33 = vld [vmem:[#allocation2 + $0xb0] sm:$0x1] }
 0x18f   : > { %7685 = vst [vmem:[#allocation7_spill] sm:$0xff] %v6688_v24  ;;  %v2458_v54 = vpop.f32.mrf.mxu3  ;;  %v850_v8 = vshrl.u32 %v590_v15, 16  ;;  %v2919_v63 = vrot.slane %v2917_v35, 5  ;;  %v6708_v24 = vrot.slane %v2923_v45, 5  ;;  %v853_v58 = vshll.u32 %v590_v15, 16 }
 0x190   : > { %v2528_v23 = vadd.f32 %v2458_v54, %v2239_v18  ;;  %v2914_v18 = vshrl.u32 %v2592_v19, 16  ;;  %v2089_v54 = vpack.c.b16 %v2071_v0, %v2070_v25  ;;  %v5408_v25 = vrot.slane %v1894_v16, 9 }
 0x191   : > { %v852_v0 = vrot.slane %v850_v8, 7  ;;  %v3030_v35 = vpack.c.b16 %v3011_v17, %v3010_v60  ;;  %v861_v20 = vshll.u32 %v591_v52, 16  ;;  %v2930_v16 = vor.u32 %v2929_v61, %v6708_v24 }
 0x192   : > { %v2916_v55 = vrot.slane %v2914_v18, 4  ;;  %v2033_v18 = vrot.slane %v2031_v12, 4  ;;  %v2933_v15 = vshll.u32 %v2594_v26, 16 }
 0x193   : > { %v2174_v34 = vpop.f32.mrf.mxu2  ;;  %v6703_v57 = vpop.f32.mrf.mxu1  ;;  %v2931_v26 = vrot.slane %v2930_v16, 4 }
 0x194   : > { %5502 = vmatmul.msk.bf16.gmra.mxu3 %vm1518_vm12, %v5714_v4  ;;  %v2241_v38 = vadd.f32 %v2174_v34, %v1823_v62  ;;  %v3111_v56 = vpop.f32.mrf.mxu0  ;;  %v2034_v62 = vrot.slane %v5852_v33, 5  ;;  %v855_v34 = vor.u32 %v853_v58, %v852_v0  ;;  %v2920_v45 = vor.u32 %v2919_v63, %v2916_v55 }
 0x195   : > { %v6706_v30 = vadd.f32 %v3111_v56, %v2528_v23  ;;  %v1826_v23 = vadd.f32 %v6678_v9, %v6497_v5  ;;  %v1022_v56 = vld [vmem:[#allocation2 + $0xc0] sm:$0xf]  ;;  %v2032_v33 = vsel %vm6395_vm1, %v5408_v25, %v2031_v12  ;;  %v856_v9 = vrot.slane %v852_v0, 4  ;;  %v5715_v0 = vld [vmem:[#allocation2 + $0xa8] sm:$0xff] }
 0x196   : > { %v2035_v5 = vsel %vm6395_vm1, %v2033_v18, %v2034_v62  ;;  %v1023_v17 = vsel %vm6011_vm8, %v855_v34, %v1022_v56  ;;  %v2921_v61 = vrot.slane %v2920_v45, 4  ;;  %v2072_v58 = vunpack.c.l.b16 %v2032_v33 }
 0x197   : > { %7686 = vst [vmem:[#allocation8_spill] sm:$0xff] %v6706_v30  ;;  %v2461_v19 = vpop.f32.mrf.mxu3  ;;  %v2073_v62 = vunpack.c.l.b16 %v2035_v5  ;;  %v2935_v18 = vrot.slane %v2933_v15, 5  ;;  %v2938_v56 = vshrl.u32 %v2595_v6, 16 }
 0x198   : > { %v2529_v4 = vadd.f32 %v2461_v19, %v2240_v46  ;;  %5423 = vmatmul.msk.bf16.gmra.mxu2 %vm1518_vm12, %v2089_v54  ;;  %v858_v46 = vshrl.u32 %v591_v52, 16  ;;  %v386_v54 = vld [vmem:[#allocation2 + $0xc8] sm:$0x1]  ;;  %1024 = vst [vmem:[#allocation2 + $0xc0] sm:$0xf] %v1023_v17 }
 0x199   : > { %v5700_v19 = vld [vmem:[#allocation2 + $0xa8] sm:$0xff]  ;;  %v387_v52 = vsel %vm5954_vm4, 0, %v386_v54  ;;  %v2940_v17 = vrot.slane %v2938_v56, 4 }
 0x19a   : > { %v860_v60 = vrot.slane %v858_v46, 7  ;;  %388 = vst [vmem:[#allocation2 + $0xc8] sm:$0x1] %v387_v52 }
 0x19b   : > { %v2177_v39 = vpop.f32.mrf.mxu2  ;;  %v6713_v51 = vpop.f32.mrf.mxu1 }
 0x19c   : > { %v2242_v8 = vadd.f32 %v2177_v39, %v1826_v23  ;;  %v3114_v30 = vpop.f32.mrf.mxu0  ;;  %v863_v12 = vor.u32 %v861_v20, %v860_v60  ;;  %v2596_v23 = vld [vmem:[#allocation2 + $0xb8] sm:$0xf]  ;;  %v865_v39 = vrot.slane %v860_v60, 4  ;;  %v2090_v20 = vpack.c.b16 %v2073_v62, %v2072_v58  ;;  %v5854_v62 = vld [vmem:[#allocation2 + $0xbc] sm:$0x1] }
 0x19d   : > { %v6725_v55 = vadd.f32 %v3114_v30, %v2529_v4  ;;  %v1828_v30 = vadd.f32 %v6703_v57, %v6509_v27  ;;  %v2926_v4 = vsel %vm6088_vm13, %v2921_v61, %v6708_v24  ;;  %v2947_v13 = vshll.u32 %v2596_v23, 16  ;;  %v5853_v57 = vld [vmem:[#allocation2 + $0xb8] sm:$0xf] }
 0x19e   : > { %5392 = vmatmul.msk.bf16.gmra.mxu1 %vm1518_vm12, %v5700_v19  ;;  %5518 = vmatmul.msk.bf16.gmra.mxu0 %vm1518_vm12, %v3030_v35  ;;  %v864_v34 = vsel %vm6018_vm9, %v856_v9, %v863_v12  ;;  %v2941_v35 = vshll.u32 %v2595_v6, 16  ;;  %v2951_v54 = vshrl.u32 %v2596_v23, 16  ;;  %v2936_v27 = vsel %vm6088_vm13, %v2931_v26, %v2935_v18  ;;  %v1895_v19 = vld [vmem:[#allocation2 + $0xb4] sm:$0xe]  ;;  %v2597_v12 = vld [vmem:[#allocation2 + $0xbc] sm:$0x1] }
 0x19f   : > { %v2463_v63 = vpop.f32.mrf.mxu3  ;;  %1025 = vst.msk [vmem:[#allocation2 + $0xc4] sm:$0xf] %vm270_vm6, %v864_v34  ;;  %v2038_v15 = vrot.slane %v5853_v57, 5  ;;  %v3012_v5 = vunpack.c.l.b16 %v2926_v4  ;;  %v2041_v6 = vrot.slane %v5854_v62, 5  ;;  %v5409_v26 = vrot.slane %v1895_v19, 9 }
 0x1a0   : > { %v2530_v25 = vadd.f32 %v2463_v63, %v2241_v38  ;;  %v2943_v60 = vrot.slane %v2941_v35, 5  ;;  %v3013_v63 = vunpack.c.l.b16 %v2936_v27  ;;  %v2953_v58 = vrot.slane %v2951_v54, 4  ;;  %v5701_v35 = vld [vmem:[#allocation2 + $0xb4] sm:$0xff] }
 0x1a1   : > { %v1026_v33 = vld [vmem:[#allocation2 + $0xc8] sm:$0x1]  ;;  %v1831_v18 = vadd.f32 %v6713_v51, %v6521_v49  ;;  %v2957_v34 = vshll.u32 %v2597_v12, 16 }
 0x1a2   : > { %v1027_v52 = vsel %vm5946_vm3, %v865_v39, %v1026_v33  ;;  %v2944_v23 = vor.u32 %v2943_v60, %v2940_v17  ;;  %v2598_v39 = vld [vmem:[#allocation2 + $0xc0] sm:$0xf] }
 0x1a3   : > { %v2179_v38 = vpop.f32.mrf.mxu2  ;;  %v1832_v45 = vpop.f32.mrf.mxu1  ;;  %1028 = vst [vmem:[#allocation2 + $0xc8] sm:$0x1] %v1027_v52  ;;  %v2959_v57 = vrot.slane %v2957_v34, 5  ;;  %v2962_v19 = vshrl.u32 %v2598_v39, 16  ;;  %v2965_v33 = vshll.u32 %v2598_v39, 16 }
 0x1a4   : > { %5503 = vmatmul.msk.bf16.gmra.mxu3 %vm1518_vm12, %v5715_v0  ;;  %v2243_v46 = vadd.f32 %v2179_v38, %v1828_v30  ;;  %v3116_v16 = vpop.f32.mrf.mxu0  ;;  %v2949_v0 = vrot.slane %v2947_v13, 5  ;;  %v3031_v38 = vpack.c.b16 %v3013_v63, %v3012_v5  ;;  %v2039_v13 = vsel %vm6395_vm1, %v5409_v26, %v2038_v15  ;;  %v5855_v52 = vld [vmem:[#allocation2 + $0x10] sm:$0xf] }
 0x1a5   : > { %v6739_v24 = vadd.f32 %v3116_v16, %v2530_v25  ;;  %v2040_v25 = vrot.slane %v2038_v15, 4  ;;  %v2945_v27 = vrot.slane %v2944_v23, 4  ;;  %v2074_v60 = vunpack.c.l.b16 %v2039_v13 }
 0x1a6   : > { %v2954_v56 = vor.u32 %v2953_v58, %v2949_v0  ;;  %v2599_v16 = vld [vmem:[#allocation2 + $0xc4] sm:$0xf]  ;;  %v3272_v63 = vrot.slane %v5855_v52, 5  ;;  %v1833_v62 = vadd.f32 %v1832_v45, %v6535_v31  ;;  %v2967_v26 = vrot.slane %v2965_v33, 5 }
 0x1a7   : > { %v2466_v9 = vpop.f32.mrf.mxu3  ;;  %v2042_v54 = vsel %vm6395_vm1, %v2040_v25, %v2041_v6  ;;  %v2971_v12 = vshll.u32 %v2599_v16, 16  ;;  %v2975_v58 = vshrl.u32 %v2599_v16, 16  ;;  %v2964_v6 = vrot.slane %v2962_v19, 4 }
 0x1a8   : > { %v2531_v61 = vadd.f32 %v2466_v9, %v2242_v8  ;;  %5424 = vmatmul.msk.bf16.gmra.mxu2 %vm1518_vm12, %v2090_v20  ;;  %v5716_v9 = vld [vmem:[#allocation2 + $0xb4] sm:$0xff]  ;;  %v2955_v17 = vrot.slane %v2954_v56, 4  ;;  %v2075_v15 = vunpack.c.l.b16 %v2042_v54  ;;  %v3206_v54 = vld [vmem:[#allocation2 + $0xc] sm:$0xe] }
 0x1a9   : > { %v5856_v56 = vld [vmem:[#allocation2 + $0x14] sm:$0x1]  ;;  %v2973_v31 = vrot.slane %v2971_v12, 5  ;;  %v2977_v45 = vrot.slane %v2975_v58, 4 }
 0x1aa   : > { %v2960_v23 = vsel %vm6088_vm13, %v2955_v17, %v2959_v57  ;;  %v2600_v13 = vld [vmem:[#allocation2 + $0xc8] sm:$0x1]  ;;  %v2968_v57 = vor.u32 %v2967_v26, %v2964_v6 }
 0x1ab   : > { %v2182_v30 = vpop.f32.mrf.mxu2  ;;  %v1835_v4 = vpop.f32.mrf.mxu1  ;;  %v2978_v12 = vor.u32 %v2977_v45, %v2973_v31  ;;  %v2981_v58 = vshll.u32 %v2600_v13, 16  ;;  %v6772_v13 = vld [vmem:[#allocation2 + $0x20] sm:$0x1] }
 0x1ac   : > { %v2244_v8 = vadd.f32 %v2182_v30, %v1831_v18  ;;  %v3119_v20 = vpop.f32.mrf.mxu0  ;;  %v3893_v18 = vld [vmem:[#allocation2 + $0x18] sm:$0xf]  ;;  %v2091_v30 = vpack.c.b16 %v2075_v15, %v2074_v60  ;;  %v1836_v60 = vadd.f32 %v1835_v4, %v6551_v1  ;;  %v2969_v45 = vrot.slane %v2968_v57, 4 }
 0x1ad   : > { %v6751_v49 = vadd.f32 %v3119_v20, %v2531_v61  ;;  %v6760_v20 = vld [vmem:[#allocation2 + $0x1c] sm:$0xf]  ;;  %v3942_v16 = vshrl.u32 %v3893_v18, 16 }
 0x1ae   : > { %5393 = vmatmul.msk.bf16.gmra.mxu1 %vm1518_vm12, %v5701_v35  ;;  %5519 = vmatmul.msk.bf16.gmra.mxu0 %vm1518_vm12, %v3031_v38  ;;  %v3274_v38 = vrot.slane %v3272_v63, 4  ;;  %v3275_v35 = vrot.slane %v5856_v56, 5  ;;  %v3951_v15 = vshll.u32 %v6760_v20, 16  ;;  %v3955_v52 = vshrl.u32 %v6760_v20, 16 }
 0x1af   : > { %v2468_v51 = vpop.f32.mrf.mxu3  ;;  %v3944_v26 = vrot.slane %v3942_v16, 4  ;;  %v2974_v57 = vsel %vm6088_vm13, %v2969_v45, %v2973_v31 }
 0x1b0   : > { %v2532_v5 = vadd.f32 %v2468_v51, %v2243_v46  ;;  %v2950_v46 = vsel %vm6088_vm13, %v2945_v27, %v2949_v0  ;;  %v3945_v51 = vshll.u32 %v3893_v18, 16  ;;  %v3015_v27 = vunpack.c.l.b16 %v2960_v23 }
 0x1b1   : > { %v3014_v0 = vunpack.c.l.b16 %v2950_v46  ;;  %v3957_v56 = vrot.slane %v3955_v52, 4 }
 0x1b3   : > { %v2184_v61 = vpop.f32.mrf.mxu2  ;;  %v1837_v25 = vpop.f32.mrf.mxu1  ;;  %v3032_v18 = vpack.c.b16 %v3015_v27, %v3014_v0  ;;  %v5717_v0 = vld [vmem:[#allocation2 + $0xc0] sm:$0xff] }
 0x1b4   : > { %5504 = vmatmul.msk.bf16.gmra.mxu3 %vm1518_vm12, %v5716_v9  ;;  %v2245_v34 = vadd.f32 %v2184_v61, %v1833_v62  ;;  %v3121_v39 = vpop.f32.mrf.mxu0  ;;  %v5522_v9 = vrot.slane %v3206_v54, 9  ;;  %v3276_v62 = vsel %vm6395_vm1, %v3274_v38, %v3275_v35  ;;  %v2979_v54 = vrot.slane %v2978_v12, 4 }
 0x1b5   : > { %v6762_v19 = vadd.f32 %v3121_v39, %v2532_v5  ;;  %v3384_v6 = vunpack.c.l.b16 %v3276_v62  ;;  %v3896_v62 = vld [vmem:[#allocation2 + $0x24] sm:$0xf] }
 0x1b6   : > { %v3273_v5 = vsel %vm6395_vm1, %v5522_v9, %v3272_v63  ;;  %v2983_v63 = vrot.slane %v2981_v58, 5  ;;  %v5718_v58 = vld [vmem:[#allocation2 + $0x18] sm:$0xff] }
 0x1b7   : > { %v2471_v33 = vpop.f32.mrf.mxu3  ;;  %v3383_v61 = vunpack.c.l.b16 %v3273_v5 }
 0x1b8   : > { %v2533_v17 = vadd.f32 %v2471_v33, %v2244_v8  ;;  %5425 = vmatmul.msk.bf16.gmra.mxu2 %vm1518_vm12, %v2091_v30  ;;  %v3947_v8 = vrot.slane %v3945_v51, 5  ;;  %v3953_v30 = vrot.slane %v3951_v15, 5  ;;  %v3961_v33 = vshll.u32 %v6772_v13, 16 }
 0x1b9   : > { %v3415_v23 = vpack.c.b16 %v3384_v6, %v3383_v61  ;;  %v2984_v9 = vsel %vm6088_vm13, %v2979_v54, %v2983_v63  ;;  %v5857_v61 = vld [vmem:[#allocation2 + $0x20] sm:$0x1]  ;;  %v3966_v63 = vshrl.u32 %v3896_v62, 16 }
 0x1ba   : > { %v3948_v38 = vor.u32 %v3947_v8, %v3944_v26  ;;  %v3958_v27 = vor.u32 %v3957_v56, %v3953_v30  ;;  %v3963_v5 = vrot.slane %v3961_v33, 5  ;;  %v3282_v6 = vrot.slane %v5857_v61, 5 }
 0x1bb   : > { %v2187_v1 = vpop.f32.mrf.mxu2  ;;  %v1840_v4 = vpop.f32.mrf.mxu1  ;;  %v3016_v8 = vunpack.c.l.b16 %v2974_v57  ;;  %v3017_v31 = vunpack.c.l.b16 %v2984_v9 }
 0x1bc   : > { %v2246_v46 = vadd.f32 %v2187_v1, %v1836_v60  ;;  %v3124_v39 = vpop.f32.mrf.mxu0  ;;  %v1838_v60 = vadd.f32 %v1837_v25, %v6563_v28  ;;  %v3949_v15 = vrot.slane %v3948_v38, 4  ;;  %v3207_v25 = vld [vmem:[#allocation2 + $0x18] sm:$0xe]  ;;  %v3969_v38 = vshll.u32 %v3896_v62, 16 }
 0x1bd   : > { %v6775_v35 = vadd.f32 %v3124_v39, %v2533_v17  ;;  %v5523_v45 = vrot.slane %v3207_v25, 9  ;;  %v3033_v57 = vpack.c.b16 %v3017_v31, %v3016_v8  ;;  %v1841_v9 = vadd.f32 %v1840_v4, %v6485_v47 }
 0x1be   : > { %5538 = vmatmul.msk.bf16.vlgmr.msra.gmra.mxu1 %vm1518_vm12, %v3415_v23  ;;  %5520 = vmatmul.msk.bf16.gmra.mxu0 %vm1518_vm12, %v3032_v18  ;;  %v5858_v18 = vld [vmem:[#allocation2 + $0x1c] sm:$0xf]  ;;  %v6785_v23 = vld [vmem:[#allocation2 + $0x28] sm:$0xf]  ;;  %v3954_v28 = vsel %vm6088_vm13, %v3949_v15, %v3953_v30  ;;  %v3968_v62 = vrot.slane %v3966_v63, 4  ;;  %v3971_v61 = vrot.slane %v3969_v38, 5 }
 0x1bf   : > { %v2473_v16 = vpop.f32.mrf.mxu3  ;;  %v3279_v1 = vrot.slane %v5858_v18, 5  ;;  %v3979_v33 = vshrl.u32 %v6785_v23, 16 }
 0x1c0   : > { %v2534_v51 = vadd.f32 %v2473_v16, %v2245_v34  ;;  %v3959_v34 = vrot.slane %v3958_v27, 4  ;;  %v3975_v27 = vshll.u32 %v6785_v23, 16 }
 0x1c1   : > { %v3281_v54 = vrot.slane %v3279_v1, 4  ;;  %v3280_v30 = vsel %vm6395_vm1, %v5523_v45, %v3279_v1  ;;  %v3981_v1 = vrot.slane %v3979_v33, 4  ;;  %v3972_v45 = vor.u32 %v3971_v61, %v3968_v62  ;;  %v3208_v61 = vld [vmem:[#allocation2 + $0x24] sm:$0xe] }
 0x1c2   : > { %v3977_v18 = vrot.slane %v3975_v27, 5 }
 0x1c3   : > { %v2189_v52 = vpop.f32.mrf.mxu2  ;;  %v1842_v17 = vpop.f32.mrf.mxu1 }
 0x1c4   : > { %5505 = vmatmul.msk.bf16.gmra.mxu3 %vm1518_vm12, %v5717_v0  ;;  %v2247_v12 = vadd.f32 %v2189_v52, %v1838_v60  ;;  %v3126_v26 = vpop.f32.mrf.mxu0  ;;  %v3964_v0 = vsel %vm6088_vm13, %v3959_v34, %v3963_v5  ;;  %v3385_v60 = vunpack.c.l.b16 %v3280_v30  ;;  %v4326_v52 = vunpack.c.l.b16 %v3954_v28 }
 0x1c5   : > { %v6789_v56 = vadd.f32 %v3126_v26, %v2534_v51  ;;  %v3283_v51 = vsel %vm6395_vm1, %v3281_v54, %v3282_v6  ;;  %v4550_v26 = vld [vmem:[#allocation2 + $0x18] sm:$0xe]  ;;  %v4619_v28 = vrot.slane %v6772_v13, 5  ;;  %v3982_v38 = vor.u32 %v3981_v1, %v3977_v18 }
 0x1c6   : > { %v3386_v15 = vunpack.c.l.b16 %v3283_v51  ;;  %v5650_v4 = vrot.slane %v4550_v26, 9  ;;  %v1843_v27 = vadd.f32 %v1842_v17, %v6495_v43  ;;  %v3973_v30 = vrot.slane %v3972_v45, 4  ;;  %v5860_v17 = vld [vmem:[#allocation2 + $0x28] sm:$0xf] }
 0x1c7   : > { %v2476_v39 = vpop.f32.mrf.mxu3 }
 0x1c8   : > { %v2535_v16 = vadd.f32 %v2476_v39, %v2246_v46  ;;  %5618 = vmatmul.msk.bf16.vlgmr.msra.gmra.mxu2 %vm1518_vm12, %v5718_v58  ;;  %v4616_v46 = vrot.slane %v6760_v20, 5  ;;  %v4327_v58 = vunpack.c.l.b16 %v3964_v0  ;;  %v3416_v31 = vpack.c.b16 %v3386_v15, %v3385_v60  ;;  %v6802_v39 = vld [vmem:[#allocation2 + $0x2c] sm:$0x1] }
 0x1c9   : > { %v3985_v0 = vshll.u32 %v6802_v39, 16  ;;  %v3983_v60 = vrot.slane %v3982_v38, 4 }
 0x1ca   : > { %v4618_v6 = vrot.slane %v4616_v46, 4  ;;  %v4358_v63 = vpack.c.b16 %v4327_v58, %v4326_v52  ;;  %v4617_v33 = vsel %vm6395_vm1, %v5650_v4, %v4616_v46  ;;  %v5859_v52 = vld [vmem:[#allocation2 + $0x2c] sm:$0x1]  ;;  %v6818_v46 = vld [vmem:[#allocation2 + $0x34] sm:$0xf]  ;;  %v3978_v4 = vsel %vm6088_vm13, %v3973_v30, %v3977_v18 }
 0x1cb   : > { %v2192_v34 = vpop.f32.mrf.mxu2  ;;  %v1845_v5 = vpop.f32.mrf.mxu1  ;;  %v3987_v15 = vrot.slane %v3985_v0, 5  ;;  %v3289_v58 = vrot.slane %v5859_v52, 5  ;;  %v4727_v62 = vunpack.c.l.b16 %v4617_v33  ;;  %v3999_v38 = vshll.u32 %v6818_v46, 16 }
 0x1cc   : > { %v2248_v8 = vadd.f32 %v2192_v34, %v1841_v9  ;;  %v3129_v25 = vpop.f32.mrf.mxu0  ;;  %v3899_v9 = vld [vmem:[#allocation2 + $0x30] sm:$0xf]  ;;  %v4620_v13 = vsel %vm6395_vm1, %v4618_v6, %v4619_v28  ;;  %v3286_v34 = vrot.slane %v5860_v17, 5  ;;  %v5524_v6 = vrot.slane %v3208_v61, 9 }
 0x1cd   : > { %v6805_v47 = vadd.f32 %v3129_v25, %v2535_v16  ;;  %v3990_v26 = vshrl.u32 %v3899_v9, 16  ;;  %v4728_v25 = vunpack.c.l.b16 %v4620_v13  ;;  %v4003_v0 = vshrl.u32 %v6818_v46, 16 }
 0x1ce   : > { %5539 = vmatmul.msk.bf16.gmra.mxu1 %vm1518_vm12, %v3416_v31  ;;  %5521 = vmatmul.msk.bf16.gmra.mxu0 %vm1518_vm12, %v3033_v57  ;;  %v5719_v57 = vld [vmem:[#allocation2 + $0x24] sm:$0xff]  ;;  %v3993_v31 = vshll.u32 %v3899_v9, 16  ;;  %v3288_v28 = vrot.slane %v3286_v34, 4  ;;  %v3287_v33 = vsel %vm6395_vm1, %v5524_v6, %v3286_v34  ;;  %v6835_v34 = vld [vmem:[#allocation2 + $0x38] sm:$0x1] }
 0x1cf   : > { %v2478_v20 = vpop.f32.mrf.mxu3  ;;  %v3992_v9 = vrot.slane %v3990_v26, 4 }
 0x1d0   : > { %v2536_v54 = vadd.f32 %v2478_v20, %v2247_v12  ;;  %v3290_v18 = vsel %vm6395_vm1, %v3288_v28, %v3289_v58  ;;  %v3995_v13 = vrot.slane %v3993_v31, 5  ;;  %v4626_v58 = vrot.slane %v6802_v39, 5 }
 0x1d1   : > { %v3388_v30 = vunpack.c.l.b16 %v3290_v18 }
 0x1d2   : > { %v3996_v26 = vor.u32 %v3995_v13, %v3992_v9  ;;  %v5861_v9 = vld [vmem:[#allocation2 + $0x38] sm:$0x1] }
 0x1d3   : > { %v2194_v16 = vpop.f32.mrf.mxu2  ;;  %v6813_v51 = vpop.f32.mrf.mxu1  ;;  %v3296_v13 = vrot.slane %v5861_v9, 5 }
 0x1d4   : > { %5634 = vmatmul.msk.bf16.vlgmr.msra.gmra.mxu3 %vm1518_vm12, %v4358_v63  ;;  %v2249_v12 = vadd.f32 %v2194_v16, %v1843_v27  ;;  %v3131_v43 = vpop.f32.mrf.mxu0  ;;  %v3988_v63 = vsel %vm6088_vm13, %v3983_v60, %v3987_v15  ;;  %v4623_v27 = vrot.slane %v6785_v23, 5  ;;  %v3387_v16 = vunpack.c.l.b16 %v3287_v33 }
 0x1d5   : > { %v6820_v1 = vadd.f32 %v3131_v43, %v2536_v54  ;;  %v1846_v54 = vadd.f32 %v1845_v5, %v6511_v42  ;;  %v4328_v60 = vunpack.c.l.b16 %v3978_v4  ;;  %v4329_v15 = vunpack.c.l.b16 %v3988_v63 }
 0x1d6   : > { %v3417_v42 = vpack.c.b16 %v3388_v30, %v3387_v16  ;;  %v4001_v5 = vrot.slane %v3999_v38, 5  ;;  %v4005_v23 = vrot.slane %v4003_v0, 4  ;;  %v4625_v6 = vrot.slane %v4623_v27, 4  ;;  %v3902_v30 = vld [vmem:[#allocation2 + $0x3c] sm:$0xf] }
 0x1d7   : > { %v2481_v20 = vpop.f32.mrf.mxu3  ;;  %v4359_v4 = vpack.c.b16 %v4329_v15, %v4328_v60  ;;  %v4009_v63 = vshll.u32 %v6835_v34, 16  ;;  %v1848_v39 = vadd.f32 %v6813_v51, %v6525_v14  ;;  %v5862_v15 = vld [vmem:[#allocation2 + $0x34] sm:$0xf]  ;;  %v3209_v51 = vld [vmem:[#allocation2 + $0x30] sm:$0xe] }
 0x1d8   : > { %v2537_v45 = vadd.f32 %v2481_v20, %v2248_v8  ;;  %5619 = vmatmul.msk.bf16.gmra.mxu2 %vm1518_vm12, %v5719_v57  ;;  %v4551_v8 = vld [vmem:[#allocation2 + $0x24] sm:$0xe]  ;;  %v4759_v57 = vpack.c.b16 %v4728_v25, %v4727_v62  ;;  %v4006_v28 = vor.u32 %v4005_v23, %v4001_v5  ;;  %v4627_v0 = vsel %vm6395_vm1, %v4625_v6, %v4626_v58 }
 0x1d9   : > { %v5651_v20 = vrot.slane %v4551_v8, 9  ;;  %v4011_v16 = vrot.slane %v4009_v63, 5  ;;  %v4730_v60 = vunpack.c.l.b16 %v4627_v0  ;;  %v4014_v58 = vshrl.u32 %v3902_v30, 16 }
 0x1da   : > { %v4007_v8 = vrot.slane %v4006_v28, 4 }
 0x1db   : > { %v2197_v52 = vpop.f32.mrf.mxu2  ;;  %v1850_v43 = vpop.f32.mrf.mxu1  ;;  %v4624_v38 = vsel %vm6395_vm1, %v5651_v20, %v4623_v27  ;;  %v5525_v20 = vrot.slane %v3209_v51, 9 }
 0x1dc   : > { %v2250_v17 = vadd.f32 %v2197_v52, %v1846_v54  ;;  %v3134_v61 = vpop.f32.mrf.mxu0  ;;  %v3997_v54 = vrot.slane %v3996_v26, 4  ;;  %v4729_v27 = vunpack.c.l.b16 %v4624_v38  ;;  %v3293_v52 = vrot.slane %v5862_v15, 5 }
 0x1dd   : > { %v6839_v31 = vadd.f32 %v3134_v61, %v2537_v45  ;;  %v4017_v26 = vshll.u32 %v3902_v30, 16  ;;  %v1851_v0 = vadd.f32 %v1850_v43, %v6545_v48  ;;  %v4016_v30 = vrot.slane %v4014_v58, 4 }
 0x1de   : > { %5540 = vmatmul.msk.bf16.gmra.mxu1 %vm1518_vm12, %v3417_v42  ;;  %5666 = vmatmul.msk.bf16.vlgmr.msra.gmra.mxu0 %vm1518_vm12, %v4759_v57  ;;  %v6850_v42 = vld [vmem:[#allocation2 + $0x40] sm:$0xf]  ;;  %v4002_v14 = vsel %vm6088_vm13, %v3997_v54, %v4001_v5  ;;  %v3295_v6 = vrot.slane %v3293_v52, 4  ;;  %v4760_v38 = vpack.c.b16 %v4730_v60, %v4729_v27  ;;  %v3294_v5 = vsel %vm6395_vm1, %v5525_v20, %v3293_v52 }
 0x1df   : > { %v2483_v62 = vpop.f32.mrf.mxu3  ;;  %v4023_v28 = vshll.u32 %v6850_v42, 16  ;;  %v4027_v63 = vshrl.u32 %v6850_v42, 16  ;;  %v4019_v9 = vrot.slane %v4017_v26, 5 }
 0x1e0   : > { %v2538_v25 = vadd.f32 %v2483_v62, %v2249_v12  ;;  %v5720_v12 = vld [vmem:[#allocation2 + $0x30] sm:$0xff] }
 0x1e1   : > { %v4025_v15 = vrot.slane %v4023_v28, 5  ;;  %v4029_v52 = vrot.slane %v4027_v63, 4  ;;  %v4020_v20 = vor.u32 %v4019_v9, %v4016_v30  ;;  %v3210_v9 = vld [vmem:[#allocation2 + $0x3c] sm:$0xe] }
 0x1e3   : > { %v2199_v45 = vpop.f32.mrf.mxu2  ;;  %v1852_v33 = vpop.f32.mrf.mxu1  ;;  %v4030_v26 = vor.u32 %v4029_v52, %v4025_v15 }
 0x1e4   : > { %5635 = vmatmul.msk.bf16.gmra.mxu3 %vm1518_vm12, %v4359_v4  ;;  %v2251_v18 = vadd.f32 %v2199_v45, %v1848_v39  ;;  %v3136_v57 = vpop.f32.mrf.mxu0  ;;  %v4012_v4 = vsel %vm6088_vm13, %v4007_v8, %v4011_v16  ;;  %v3389_v39 = vunpack.c.l.b16 %v3294_v5  ;;  %v4330_v45 = vunpack.c.l.b16 %v4002_v14 }
 0x1e5   : > { %v6854_v23 = vadd.f32 %v3136_v57, %v2538_v25  ;;  %v3297_v25 = vsel %vm6395_vm1, %v3295_v6, %v3296_v13  ;;  %v4552_v57 = vld [vmem:[#allocation2 + $0x30] sm:$0xe]  ;;  %v4633_v14 = vrot.slane %v6835_v34, 5  ;;  %v1853_v28 = vadd.f32 %v1852_v33, %v6561_v21  ;;  %v5864_v33 = vld [vmem:[#allocation2 + $0x40] sm:$0xf] }
 0x1e6   : > { %v3390_v54 = vunpack.c.l.b16 %v3297_v25  ;;  %v5652_v43 = vrot.slane %v4552_v57, 9  ;;  %v4021_v5 = vrot.slane %v4020_v20, 4 }
 0x1e7   : > { %v2486_v61 = vpop.f32.mrf.mxu3 }
 0x1e8   : > { %v2539_v62 = vadd.f32 %v2486_v61, %v2250_v17  ;;  %5620 = vmatmul.msk.bf16.gmra.mxu2 %vm1518_vm12, %v5720_v12  ;;  %v4630_v17 = vrot.slane %v6818_v46, 5  ;;  %v4331_v12 = vunpack.c.l.b16 %v4012_v4  ;;  %v3418_v60 = vpack.c.b16 %v3390_v54, %v3389_v39  ;;  %v6867_v61 = vld [vmem:[#allocation2 + $0x44] sm:$0x1] }
 0x1e9   : > { %v4033_v4 = vshll.u32 %v6867_v61, 16  ;;  %v4031_v39 = vrot.slane %v4030_v26, 4 }
 0x1ea   : > { %v4632_v13 = vrot.slane %v4630_v17, 4  ;;  %v4360_v58 = vpack.c.b16 %v4331_v12, %v4330_v45  ;;  %v4631_v63 = vsel %vm6395_vm1, %v5652_v43, %v4630_v17  ;;  %v5863_v45 = vld [vmem:[#allocation2 + $0x44] sm:$0x1]  ;;  %v6883_v17 = vld [vmem:[#allocation2 + $0x4c] sm:$0xf]  ;;  %v4026_v43 = vsel %vm6088_vm13, %v4021_v5, %v4025_v15 }
 0x1eb   : > { %v2202_v8 = vpop.f32.mrf.mxu2  ;;  %v1855_v16 = vpop.f32.mrf.mxu1  ;;  %v4035_v54 = vrot.slane %v4033_v4, 5  ;;  %v3303_v12 = vrot.slane %v5863_v45, 5  ;;  %v4731_v30 = vunpack.c.l.b16 %v4631_v63  ;;  %v4047_v26 = vshll.u32 %v6883_v17, 16 }
 0x1ec   : > { %v2252_v27 = vadd.f32 %v2202_v8, %v1851_v0  ;;  %v3139_v51 = vpop.f32.mrf.mxu0  ;;  %v3905_v0 = vld [vmem:[#allocation2 + $0x48] sm:$0xf]  ;;  %v4634_v34 = vsel %vm6395_vm1, %v4632_v13, %v4633_v14  ;;  %v3300_v8 = vrot.slane %v5864_v33, 5  ;;  %v5526_v13 = vrot.slane %v3210_v9, 9 }
 0x1ed   : > { %v6870_v48 = vadd.f32 %v3139_v51, %v2539_v62  ;;  %v4038_v57 = vshrl.u32 %v3905_v0, 16  ;;  %v4732_v51 = vunpack.c.l.b16 %v4634_v34  ;;  %v4051_v4 = vshrl.u32 %v6883_v17, 16 }
 0x1ee   : > { %5541 = vmatmul.msk.bf16.gmra.mxu1 %vm1518_vm12, %v3418_v60  ;;  %5667 = vmatmul.msk.bf16.gmra.mxu0 %vm1518_vm12, %v4760_v38  ;;  %v5721_v38 = vld [vmem:[#allocation2 + $0x3c] sm:$0xff]  ;;  %v4041_v60 = vshll.u32 %v3905_v0, 16  ;;  %v3302_v14 = vrot.slane %v3300_v8, 4  ;;  %v3301_v63 = vsel %vm6395_vm1, %v5526_v13, %v3300_v8  ;;  %v6900_v8 = vld [vmem:[#allocation2 + $0x50] sm:$0x1] }
 0x1ef   : > { %v2488_v46 = vpop.f32.mrf.mxu3  ;;  %v4040_v0 = vrot.slane %v4038_v57, 4 }
 0x1f0   : > { %v2540_v6 = vadd.f32 %v2488_v46, %v2251_v18  ;;  %v3304_v15 = vsel %vm6395_vm1, %v3302_v14, %v3303_v12  ;;  %v4043_v34 = vrot.slane %v4041_v60, 5  ;;  %v4640_v12 = vrot.slane %v6867_v61, 5 }
 0x1f1   : > { %v3392_v5 = vunpack.c.l.b16 %v3304_v15 }
 0x1f2   : > { %v4044_v57 = vor.u32 %v4043_v34, %v4040_v0  ;;  %v5865_v0 = vld [vmem:[#allocation2 + $0x50] sm:$0x1] }
 0x1f3   : > { %v2204_v62 = vpop.f32.mrf.mxu2  ;;  %v6878_v25 = vpop.f32.mrf.mxu1  ;;  %v3310_v34 = vrot.slane %v5865_v0, 5 }
 0x1f4   : > { %5636 = vmatmul.msk.bf16.gmra.mxu3 %vm1518_vm12, %v4360_v58  ;;  %v2253_v18 = vadd.f32 %v2204_v62, %v1853_v28  ;;  %v3141_v21 = vpop.f32.mrf.mxu0  ;;  %v4036_v58 = vsel %vm6088_vm13, %v4031_v39, %v4035_v54  ;;  %v4637_v28 = vrot.slane %v6850_v42, 5  ;;  %v3391_v62 = vunpack.c.l.b16 %v3301_v63 }
 0x1f5   : > { %v6885_v52 = vadd.f32 %v3141_v21, %v2540_v6  ;;  %v1856_v6 = vadd.f32 %v1855_v16, %v6575_v36  ;;  %v4332_v39 = vunpack.c.l.b16 %v4026_v43  ;;  %v4333_v54 = vunpack.c.l.b16 %v4036_v58 }
 0x1f6   : > { %v3419_v36 = vpack.c.b16 %v3392_v5, %v3391_v62  ;;  %v4049_v16 = vrot.slane %v4047_v26, 5  ;;  %v4053_v42 = vrot.slane %v4051_v4, 4  ;;  %v4639_v13 = vrot.slane %v4637_v28, 4  ;;  %v3908_v5 = vld [vmem:[#allocation2 + $0x54] sm:$0xf] }
 0x1f7   : > { %v2491_v46 = vpop.f32.mrf.mxu3  ;;  %v4361_v43 = vpack.c.b16 %v4333_v54, %v4332_v39  ;;  %v4057_v58 = vshll.u32 %v6900_v8, 16  ;;  %v1858_v61 = vadd.f32 %v6878_v25, %v6588_v44  ;;  %v5866_v54 = vld [vmem:[#allocation2 + $0x4c] sm:$0xf]  ;;  %v3211_v25 = vld [vmem:[#allocation2 + $0x48] sm:$0xe] }
 0x1f8   : > { %v2541_v20 = vadd.f32 %v2491_v46, %v2252_v27  ;;  %5621 = vmatmul.msk.bf16.gmra.mxu2 %vm1518_vm12, %v5721_v38  ;;  %v4553_v27 = vld [vmem:[#allocation2 + $0x3c] sm:$0xe]  ;;  %v4761_v38 = vpack.c.b16 %v4732_v51, %v4731_v30  ;;  %v4054_v14 = vor.u32 %v4053_v42, %v4049_v16  ;;  %v4641_v4 = vsel %vm6395_vm1, %v4639_v13, %v4640_v12 }
 0x1f9   : > { %v5653_v46 = vrot.slane %v4553_v27, 9  ;;  %v4059_v62 = vrot.slane %v4057_v58, 5  ;;  %v4734_v39 = vunpack.c.l.b16 %v4641_v4  ;;  %v4062_v12 = vshrl.u32 %v3908_v5, 16 }
 0x1fa   : > { %v4055_v27 = vrot.slane %v4054_v14, 4 }
 0x1fb   : > { %v2207_v45 = vpop.f32.mrf.mxu2  ;;  %v1860_v21 = vpop.f32.mrf.mxu1  ;;  %v4638_v26 = vsel %vm6395_vm1, %v5653_v46, %v4637_v28  ;;  %v5527_v46 = vrot.slane %v3211_v25, 9 }
 0x1fc   : > { %v2254_v33 = vadd.f32 %v2207_v45, %v1856_v6  ;;  %v3144_v9 = vpop.f32.mrf.mxu0  ;;  %v4045_v6 = vrot.slane %v4044_v57, 4  ;;  %v4733_v28 = vunpack.c.l.b16 %v4638_v26  ;;  %v3307_v45 = vrot.slane %v5866_v54, 5 }
 0x1fd   : > { %v6904_v60 = vadd.f32 %v3144_v9, %v2541_v20  ;;  %v4065_v57 = vshll.u32 %v3908_v5, 16  ;;  %v1861_v4 = vadd.f32 %v1860_v21, %v6499_v50  ;;  %v4064_v5 = vrot.slane %v4062_v12, 4 }
 0x1fe   : > { %5542 = vmatmul.msk.bf16.gmra.mxu1 %vm1518_vm12, %v3419_v36  ;;  %5668 = vmatmul.msk.bf16.gmra.mxu0 %vm1518_vm12, %v4761_v38  ;;  %v6915_v36 = vld [vmem:[#allocation2 + $0x58] sm:$0xf]  ;;  %v4050_v44 = vsel %vm6088_vm13, %v4045_v6, %v4049_v16  ;;  %v3309_v13 = vrot.slane %v3307_v45, 4  ;;  %v4762_v26 = vpack.c.b16 %v4734_v39, %v4733_v28  ;;  %v3308_v16 = vsel %vm6395_vm1, %v5527_v46, %v3307_v45 }
 0x1ff   : > { %v2493_v30 = vpop.f32.mrf.mxu3  ;;  %v4071_v14 = vshll.u32 %v6915_v36, 16  ;;  %v4075_v58 = vshrl.u32 %v6915_v36, 16  ;;  %v4067_v0 = vrot.slane %v4065_v57, 5 }
 0x200   : > { %v2542_v51 = vadd.f32 %v2493_v30, %v2253_v18  ;;  %v5722_v18 = vld [vmem:[#allocation2 + $0x48] sm:$0xff] }
 0x201   : > { %v4073_v54 = vrot.slane %v4071_v14, 5  ;;  %v4077_v45 = vrot.slane %v4075_v58, 4  ;;  %v4068_v46 = vor.u32 %v4067_v0, %v4064_v5  ;;  %v3212_v0 = vld [vmem:[#allocation2 + $0x54] sm:$0xe] }
 0x203   : > { %v2209_v20 = vpop.f32.mrf.mxu2  ;;  %v1862_v63 = vpop.f32.mrf.mxu1  ;;  %v4078_v57 = vor.u32 %v4077_v45, %v4073_v54 }
 0x204   : > { %5637 = vmatmul.msk.bf16.gmra.mxu3 %vm1518_vm12, %v4361_v43  ;;  %v2255_v15 = vadd.f32 %v2209_v20, %v1858_v61  ;;  %v3146_v38 = vpop.f32.mrf.mxu0  ;;  %v4060_v43 = vsel %vm6088_vm13, %v4055_v27, %v4059_v62  ;;  %v3393_v61 = vunpack.c.l.b16 %v3308_v16  ;;  %v4334_v20 = vunpack.c.l.b16 %v4050_v44 }
 0x205   : > { %v6919_v42 = vadd.f32 %v3146_v38, %v2542_v51  ;;  %v3311_v51 = vsel %vm6395_vm1, %v3309_v13, %v3310_v34  ;;  %v4554_v38 = vld [vmem:[#allocation2 + $0x48] sm:$0xe]  ;;  %v4647_v44 = vrot.slane %v6900_v8, 5  ;;  %v1863_v14 = vadd.f32 %v1862_v63, %v6518_v37  ;;  %v5868_v63 = vld [vmem:[#allocation2 + $0x58] sm:$0xf] }
 0x206   : > { %v3394_v6 = vunpack.c.l.b16 %v3311_v51  ;;  %v5654_v21 = vrot.slane %v4554_v38, 9  ;;  %v4069_v16 = vrot.slane %v4068_v46, 4 }
 0x207   : > { %v2496_v9 = vpop.f32.mrf.mxu3 }
 0x208   : > { %v2543_v30 = vadd.f32 %v2496_v9, %v2254_v33  ;;  %5622 = vmatmul.msk.bf16.gmra.mxu2 %vm1518_vm12, %v5722_v18  ;;  %v4644_v33 = vrot.slane %v6883_v17, 5  ;;  %v4335_v18 = vunpack.c.l.b16 %v4060_v43  ;;  %v3420_v39 = vpack.c.b16 %v3394_v6, %v3393_v61  ;;  %v6932_v9 = vld [vmem:[#allocation2 + $0x5c] sm:$0x1] }
 0x209   : > { %v4081_v43 = vshll.u32 %v6932_v9, 16  ;;  %v4079_v61 = vrot.slane %v4078_v57, 4 }
 0x20a   : > { %v4646_v34 = vrot.slane %v4644_v33, 4  ;;  %v4362_v12 = vpack.c.b16 %v4335_v18, %v4334_v20  ;;  %v4645_v58 = vsel %vm6395_vm1, %v5654_v21, %v4644_v33  ;;  %v5867_v20 = vld [vmem:[#allocation2 + $0x5c] sm:$0x1]  ;;  %v6948_v33 = vld [vmem:[#allocation2 + $0x64] sm:$0xf]  ;;  %v4074_v21 = vsel %vm6088_vm13, %v4069_v16, %v4073_v54 }
 0x20b   : > { %v2212_v27 = vpop.f32.mrf.mxu2  ;;  %v1865_v62 = vpop.f32.mrf.mxu1  ;;  %v4083_v6 = vrot.slane %v4081_v43, 5  ;;  %v3317_v18 = vrot.slane %v5867_v20, 5  ;;  %v4735_v5 = vunpack.c.l.b16 %v4645_v58  ;;  %v4095_v57 = vshll.u32 %v6948_v33, 16 }
 0x20c   : > { %v2256_v28 = vadd.f32 %v2212_v27, %v1861_v4  ;;  %v3149_v25 = vpop.f32.mrf.mxu0  ;;  %v3911_v4 = vld [vmem:[#allocation2 + $0x60] sm:$0xf]  ;;  %v4648_v8 = vsel %vm6395_vm1, %v4646_v34, %v4647_v44  ;;  %v3314_v27 = vrot.slane %v5868_v63, 5  ;;  %v5528_v34 = vrot.slane %v3212_v0, 9 }
 0x20d   : > { %v6935_v50 = vadd.f32 %v3149_v25, %v2543_v30  ;;  %v4086_v38 = vshrl.u32 %v3911_v4, 16  ;;  %v4736_v25 = vunpack.c.l.b16 %v4648_v8  ;;  %v4099_v43 = vshrl.u32 %v6948_v33, 16 }
 0x20e   : > { %5543 = vmatmul.msk.bf16.gmra.mxu1 %vm1518_vm12, %v3420_v39  ;;  %5669 = vmatmul.msk.bf16.gmra.mxu0 %vm1518_vm12, %v4762_v26  ;;  %v5723_v26 = vld [vmem:[#allocation2 + $0x54] sm:$0xff]  ;;  %v4089_v39 = vshll.u32 %v3911_v4, 16  ;;  %v3316_v44 = vrot.slane %v3314_v27, 4  ;;  %v3315_v58 = vsel %vm6395_vm1, %v5528_v34, %v3314_v27  ;;  %v6965_v27 = vld [vmem:[#allocation2 + $0x68] sm:$0x1] }
 0x20f   : > { %v2498_v17 = vpop.f32.mrf.mxu3  ;;  %v4088_v4 = vrot.slane %v4086_v38, 4 }
 0x210   : > { %v2544_v13 = vadd.f32 %v2498_v17, %v2255_v15  ;;  %v3318_v54 = vsel %vm6395_vm1, %v3316_v44, %v3317_v18  ;;  %v4091_v8 = vrot.slane %v4089_v39, 5  ;;  %v4654_v18 = vrot.slane %v6932_v9, 5 }
 0x211   : > { %v3396_v16 = vunpack.c.l.b16 %v3318_v54 }
 0x212   : > { %v4092_v38 = vor.u32 %v4091_v8, %v4088_v4  ;;  %v5869_v4 = vld [vmem:[#allocation2 + $0x68] sm:$0x1] }
 0x213   : > { %v2214_v30 = vpop.f32.mrf.mxu2  ;;  %v6943_v51 = vpop.f32.mrf.mxu1  ;;  %v3324_v8 = vrot.slane %v5869_v4, 5 }
 0x214   : > { %5638 = vmatmul.msk.bf16.gmra.mxu3 %vm1518_vm12, %v4362_v12  ;;  %v2257_v15 = vadd.f32 %v2214_v30, %v1863_v14  ;;  %v3151_v37 = vpop.f32.mrf.mxu0  ;;  %v4084_v12 = vsel %vm6088_vm13, %v4079_v61, %v4083_v6  ;;  %v4651_v14 = vrot.slane %v6915_v36, 5  ;;  %v3395_v30 = vunpack.c.l.b16 %v3315_v58 }
 0x215   : > { %v6950_v45 = vadd.f32 %v3151_v37, %v2544_v13  ;;  %v1866_v13 = vadd.f32 %v1865_v62, %v6532_v11  ;;  %v4336_v61 = vunpack.c.l.b16 %v4074_v21  ;;  %v4337_v6 = vunpack.c.l.b16 %v4084_v12 }
 0x216   : > { %v3421_v11 = vpack.c.b16 %v3396_v16, %v3395_v30  ;;  %v4097_v62 = vrot.slane %v4095_v57, 5  ;;  %v4101_v36 = vrot.slane %v4099_v43, 4  ;;  %v4653_v34 = vrot.slane %v4651_v14, 4  ;;  %v3914_v16 = vld [vmem:[#allocation2 + $0x6c] sm:$0xf] }
 0x217   : > { %v2501_v17 = vpop.f32.mrf.mxu3  ;;  %v4363_v21 = vpack.c.b16 %v4337_v6, %v4336_v61  ;;  %v4105_v12 = vshll.u32 %v6965_v27, 16  ;;  %v1868_v9 = vadd.f32 %v6943_v51, %v6548_v59  ;;  %v5870_v6 = vld [vmem:[#allocation2 + $0x64] sm:$0xf]  ;;  %v3213_v51 = vld [vmem:[#allocation2 + $0x60] sm:$0xe] }
 0x218   : > { %v2545_v46 = vadd.f32 %v2501_v17, %v2256_v28  ;;  %5623 = vmatmul.msk.bf16.gmra.mxu2 %vm1518_vm12, %v5723_v26  ;;  %v4555_v28 = vld [vmem:[#allocation2 + $0x54] sm:$0xe]  ;;  %v4763_v26 = vpack.c.b16 %v4736_v25, %v4735_v5  ;;  %v4102_v44 = vor.u32 %v4101_v36, %v4097_v62  ;;  %v4655_v43 = vsel %vm6395_vm1, %v4653_v34, %v4654_v18 }
 0x219   : > { %v5655_v17 = vrot.slane %v4555_v28, 9  ;;  %v4107_v30 = vrot.slane %v4105_v12, 5  ;;  %v4738_v61 = vunpack.c.l.b16 %v4655_v43  ;;  %v4110_v18 = vshrl.u32 %v3914_v16, 16 }
 0x21a   : > { %v4103_v28 = vrot.slane %v4102_v44, 4 }
 0x21b   : > { %v2217_v20 = vpop.f32.mrf.mxu2  ;;  %v1870_v37 = vpop.f32.mrf.mxu1  ;;  %v4652_v57 = vsel %vm6395_vm1, %v5655_v17, %v4651_v14  ;;  %v5529_v17 = vrot.slane %v3213_v51, 9 }
 0x21c   : > { %v2258_v63 = vadd.f32 %v2217_v20, %v1866_v13  ;;  %v3154_v0 = vpop.f32.mrf.mxu0  ;;  %v4093_v13 = vrot.slane %v4092_v38, 4  ;;  %v4737_v14 = vunpack.c.l.b16 %v4652_v57  ;;  %v3321_v20 = vrot.slane %v5870_v6, 5 }
 0x21d   : > { %v6969_v39 = vadd.f32 %v3154_v0, %v2545_v46  ;;  %v4113_v38 = vshll.u32 %v3914_v16, 16  ;;  %v1871_v43 = vadd.f32 %v1870_v37, %v6565_v29  ;;  %v4112_v16 = vrot.slane %v4110_v18, 4 }
 0x21e   : > { %5544 = vmatmul.msk.bf16.gmra.mxu1 %vm1518_vm12, %v3421_v11  ;;  %5670 = vmatmul.msk.bf16.gmra.mxu0 %vm1518_vm12, %v4763_v26  ;;  %v6980_v11 = vld [vmem:[#allocation2 + $0x70] sm:$0xf]  ;;  %v4098_v59 = vsel %vm6088_vm13, %v4093_v13, %v4097_v62  ;;  %v3323_v34 = vrot.slane %v3321_v20, 4  ;;  %v4764_v57 = vpack.c.b16 %v4738_v61, %v4737_v14  ;;  %v3322_v62 = vsel %vm6395_vm1, %v5529_v17, %v3321_v20 }
 0x21f   : > { %v2503_v5 = vpop.f32.mrf.mxu3  ;;  %v4119_v44 = vshll.u32 %v6980_v11, 16  ;;  %v4123_v12 = vshrl.u32 %v6980_v11, 16  ;;  %v4115_v4 = vrot.slane %v4113_v38, 5  ;;  %v4661_v17 = vrot.slane %v6965_v27, 5  ;;  %v7013_v27 = vld [vmem:[#allocation2 + $0x7c] sm:$0xf] }
 0x220   : > { %v2546_v25 = vadd.f32 %v2503_v5, %v2257_v15  ;;  %v5724_v15 = vld [vmem:[#allocation2 + $0x60] sm:$0xff] }
 0x221   : > { %v6997_v6 = vrot.slane %v4119_v44, 5  ;;  %v4125_v20 = vrot.slane %v4123_v12, 4  ;;  %v4116_v18 = vor.u32 %v4115_v4, %v4112_v16  ;;  %v7689_v44 = vld [vmem:[#allocation3_spill] sm:$0xff] }
 0x223   : > { %v2219_v46 = vpop.f32.mrf.mxu2  ;;  %v1872_v58 = vpop.f32.mrf.mxu1  ;;  %v4126_v38 = vor.u32 %v4125_v20, %v6997_v6  ;;  %v4143_v20 = vshll.u32 %v7013_v27, 16 }
 0x224   : > { %5639 = vmatmul.msk.bf16.gmra.mxu3 %vm1518_vm12, %v4363_v21  ;;  %v2259_v54 = vadd.f32 %v2219_v46, %v1868_v9  ;;  %v3156_v26 = vpop.f32.mrf.mxu0  ;;  %v4108_v21 = vsel %vm6088_vm13, %v4103_v28, %v4107_v30  ;;  %v3397_v9 = vunpack.c.l.b16 %v3322_v62  ;;  %v4338_v46 = vunpack.c.l.b16 %v4098_v59  ;;  %v3917_v62 = vld [vmem:[#allocation2 + $0x78] sm:$0xf] }
 0x225   : > { %v6984_v36 = vadd.f32 %v3156_v26, %v2546_v25  ;;  %v3325_v25 = vsel %vm6395_vm1, %v3323_v34, %v3324_v8  ;;  %v4556_v26 = vld [vmem:[#allocation2 + $0x60] sm:$0xe]  ;;  %v6999_v8 = vld [vmem:[#allocation2 + $0x74] sm:$0x1]  ;;  %v1873_v12 = vadd.f32 %v1872_v58, %v7689_v44  ;;  %v5871_v58 = vld [vmem:[#allocation2 + $0x70] sm:$0xf] }
 0x226   : > { %v3398_v13 = vunpack.c.l.b16 %v3325_v25  ;;  %v5656_v59 = vrot.slane %v4556_v26, 9  ;;  %v3328_v16 = vrot.slane %v5871_v58, 5  ;;  %v4134_v4 = vshrl.u32 %v3917_v62, 16  ;;  %v7691_v44 = vld [vmem:[#allocation4_spill] sm:$0xff] }
 0x227   : > { %7687 = vst [vmem:[#allocation9_spill] sm:$0xff] %v6984_v36  ;;  %v2506_v0 = vpop.f32.mrf.mxu3  ;;  %v4137_v26 = vshll.u32 %v3917_v62, 16 }
 0x228   : > { %v2547_v5 = vadd.f32 %v2506_v0, %v2258_v63  ;;  %5624 = vmatmul.msk.bf16.gmra.mxu2 %vm1518_vm12, %v5724_v15  ;;  %v4658_v63 = vrot.slane %v6948_v33, 5  ;;  %v4339_v15 = vunpack.c.l.b16 %v4108_v21  ;;  %v3422_v61 = vpack.c.b16 %v3398_v13, %v3397_v9 }
 0x229   : > { %v4129_v21 = vshll.u32 %v6999_v8, 16  ;;  %v4117_v13 = vrot.slane %v4116_v18, 4  ;;  %v5872_v18 = vld [vmem:[#allocation2 + $0x74] sm:$0x1] }
 0x22a   : > { %v4364_v37 = vpack.c.b16 %v4339_v15, %v4338_v46  ;;  %v4660_v0 = vrot.slane %v4658_v63, 4  ;;  %v4127_v46 = vrot.slane %v4126_v38, 4  ;;  %v3331_v38 = vrot.slane %v5872_v18, 5 }
 0x22b   : > { %v2222_v28 = vpop.f32.mrf.mxu2  ;;  %v1875_v30 = vpop.f32.mrf.mxu1  ;;  %v4131_v15 = vrot.slane %v4129_v21, 5  ;;  %v4122_v62 = vsel %vm6088_vm13, %v4117_v13, %v6997_v6  ;;  %v4665_v18 = vrot.slane %v6980_v11, 5 }
 0x22c   : > { %v2260_v14 = vadd.f32 %v2222_v28, %v1871_v43  ;;  %v3159_v51 = vpop.f32.mrf.mxu0  ;;  %v4662_v25 = vsel %vm6395_vm1, %v4660_v0, %v4661_v17  ;;  %v3330_v17 = vrot.slane %v3328_v16, 4 }
 0x22d   : > { %v7002_v29 = vadd.f32 %v3159_v51, %v2547_v5  ;;  %v4659_v5 = vsel %vm6395_vm1, %v5656_v59, %v4658_v63  ;;  %v4147_v51 = vshrl.u32 %v7013_v27, 16  ;;  %v4740_v59 = vunpack.c.l.b16 %v4662_v25 }
 0x22e   : > { %5545 = vmatmul.msk.bf16.gmra.mxu1 %vm1518_vm12, %v3422_v61  ;;  %5671 = vmatmul.msk.bf16.gmra.mxu0 %vm1518_vm12, %v4764_v57  ;;  %v5725_v57 = vld [vmem:[#allocation2 + $0x6c] sm:$0xff]  ;;  %v4739_v63 = vunpack.c.l.b16 %v4659_v5  ;;  %v4132_v5 = vsel %vm6088_vm13, %v4127_v46, %v4131_v15  ;;  %v3332_v25 = vsel %vm6395_vm1, %v3330_v17, %v3331_v38  ;;  %v7034_v46 = vld [vmem:[#allocation2 + $0x80] sm:$0x1]  ;;  %v4340_v15 = vunpack.c.l.b16 %v4122_v62 }
 0x22f   : > { %7688 = vst [vmem:[#allocation10_spill] sm:$0xff] %v7002_v29  ;;  %v2508_v33 = vpop.f32.mrf.mxu3  ;;  %v3214_v61 = vld [vmem:[#allocation2 + $0x6c] sm:$0xe] }
 0x230   : > { %v2548_v34 = vadd.f32 %v2508_v33, %v2259_v54  ;;  %v5530_v0 = vrot.slane %v3214_v61, 9  ;;  %v4145_v61 = vrot.slane %v4143_v20, 5  ;;  %v4153_v20 = vshll.u32 %v7034_v46, 16 }
 0x233   : > { %v2224_v43 = vpop.f32.mrf.mxu2  ;;  %v1877_v9 = vpop.f32.mrf.mxu1 }
 0x234   : > { %5640 = vmatmul.msk.bf16.gmra.mxu3 %vm1518_vm12, %v4364_v37  ;;  %v2261_v54 = vadd.f32 %v2224_v43, %v1873_v12  ;;  %v3161_v28 = vpop.f32.mrf.mxu0  ;;  %v1876_v12 = vadd.f32 %v1875_v30, %v7691_v44  ;;  %v4136_v43 = vrot.slane %v4134_v4, 4  ;;  %v3400_v30 = vunpack.c.l.b16 %v3332_v25 }
 0x235   : > { %v7018_v33 = vadd.f32 %v3161_v28, %v2548_v34  ;;  %v3329_v34 = vsel %vm6395_vm1, %v5530_v0, %v3328_v16  ;;  %v4139_v28 = vrot.slane %v4137_v26, 5  ;;  %v4341_v16 = vunpack.c.l.b16 %v4132_v5 }
 0x236   : > { %v3399_v58 = vunpack.c.l.b16 %v3329_v34  ;;  %v7693_v34 = vld [vmem:[#allocation5_spill] sm:$0xff] }
 0x237   : > { %7690 = vst [vmem:[#allocation3_spill] sm:$0xff] %v7018_v33  ;;  %v2511_v37 = vpop.f32.mrf.mxu3  ;;  %v4140_v26 = vor.u32 %v4139_v28, %v4136_v43  ;;  %v4365_v5 = vpack.c.b16 %v4341_v16, %v4340_v15  ;;  %v1878_v25 = vadd.f32 %v1877_v9, %v7693_v34  ;;  %v4155_v28 = vrot.slane %v4153_v20, 5  ;;  %v5873_v15 = vld [vmem:[#allocation2 + $0x7c] sm:$0xf]  ;;  %v7050_v16 = vld [vmem:[#allocation2 + $0x88] sm:$0xf] }
 0x238   : > { %v2549_v21 = vadd.f32 %v2511_v37, %v2260_v14  ;;  %5625 = vmatmul.msk.bf16.gmra.mxu2 %vm1518_vm12, %v5725_v57  ;;  %v4557_v14 = vld [vmem:[#allocation2 + $0x6c] sm:$0xe]  ;;  %v4149_v57 = vrot.slane %v4147_v51, 4  ;;  %v4765_v37 = vpack.c.b16 %v4740_v59, %v4739_v63  ;;  %v3423_v44 = vpack.c.b16 %v3400_v30, %v3399_v58 }
 0x239   : > { %v5657_v4 = vrot.slane %v4557_v14, 9  ;;  %v4667_v51 = vrot.slane %v4665_v18, 4  ;;  %v4668_v59 = vrot.slane %v6999_v8, 5  ;;  %v4141_v14 = vrot.slane %v4140_v26, 4 }
 0x23a   : > { %v4150_v38 = vor.u32 %v4149_v57, %v4145_v61  ;;  %v5726_v57 = vld [vmem:[#allocation2 + $0x78] sm:$0xff] }
 0x23b   : > { %v2227_v6 = vpop.f32.mrf.mxu2  ;;  %v7032_v13 = vpop.f32.mrf.mxu1 }
 0x23c   : > { %v2262_v0 = vadd.f32 %v2227_v6, %v1876_v12  ;;  %v3164_v17 = vpop.f32.mrf.mxu0  ;;  %v4666_v12 = vsel %vm6395_vm1, %v5657_v4, %v4665_v18  ;;  %v4151_v43 = vrot.slane %v4150_v38, 4  ;;  %v3335_v18 = vrot.slane %v5873_v15, 5  ;;  %v3215_v4 = vld [vmem:[#allocation2 + $0x78] sm:$0xe] }
 0x23d   : > { %v7038_v63 = vadd.f32 %v3164_v17, %v2549_v21  ;;  %v4669_v21 = vsel %vm6395_vm1, %v4667_v51, %v4668_v59  ;;  %v4741_v6 = vunpack.c.l.b16 %v4666_v12  ;;  %v5531_v20 = vrot.slane %v3215_v4, 9  ;;  %v5874_v51 = vld [vmem:[#allocation2 + $0x80] sm:$0x1]  ;;  %v4558_v4 = vld [vmem:[#allocation2 + $0x78] sm:$0xe] }
 0x23e   : > { %5546 = vmatmul.msk.bf16.gmra.mxu1 %vm1518_vm12, %v3423_v44  ;;  %5672 = vmatmul.msk.bf16.gmra.mxu0 %vm1518_vm12, %v4765_v37  ;;  %v4742_v9 = vunpack.c.l.b16 %v4669_v21  ;;  %v4146_v44 = vsel %vm6088_vm13, %v4141_v14, %v4145_v61  ;;  %v4156_v17 = vsel %vm6088_vm13, %v4151_v43, %v4155_v28  ;;  %v3338_v59 = vrot.slane %v5874_v51, 5 }
 0x23f   : > { %7692 = vst [vmem:[#allocation4_spill] sm:$0xff] %v7038_v63  ;;  %v2513_v11 = vpop.f32.mrf.mxu3  ;;  %v4171_v61 = vshrl.u32 %v7050_v16, 16  ;;  %v3336_v14 = vsel %vm6395_vm1, %v5531_v20, %v3335_v18  ;;  %v7068_v20 = vld [vmem:[#allocation2 + $0x8c] sm:$0x1] }
 0x240   : > { %v2550_v62 = vadd.f32 %v2513_v11, %v2261_v54  ;;  %v3920_v54 = vld [vmem:[#allocation2 + $0x84] sm:$0xf]  ;;  %v3337_v11 = vrot.slane %v3335_v18, 4  ;;  %v4766_v43 = vpack.c.b16 %v4742_v9, %v4741_v6  ;;  %v3401_v28 = vunpack.c.l.b16 %v3336_v14 }
 0x241   : > { %v4161_v34 = vshll.u32 %v3920_v54, 16  ;;  %v4173_v63 = vrot.slane %v4171_v61, 4  ;;  %v3575_v61 = vadd.f32 %v7032_v13, %v6624_v22 }
 0x243   : > { %v2229_v58 = vpop.f32.mrf.mxu2  ;;  %v7047_v30 = vpop.f32.mrf.mxu1  ;;  %v4163_v51 = vrot.slane %v4161_v34, 5 }
 0x244   : > { %5641 = vmatmul.msk.bf16.gmra.mxu3 %vm1518_vm12, %v4365_v5  ;;  %v2263_v8 = vadd.f32 %v2229_v58, %v1878_v25  ;;  %v3166_v37 = vpop.f32.mrf.mxu0  ;;  %v4158_v5 = vshrl.u32 %v3920_v54, 16  ;;  %v4167_v25 = vshll.u32 %v7050_v16, 16  ;;  %v4342_v58 = vunpack.c.l.b16 %v4146_v44 }
 0x245   : > { %v7056_v26 = vadd.f32 %v3166_v37, %v2550_v62  ;;  %v3339_v62 = vsel %vm6395_vm1, %v3337_v11, %v3338_v59  ;;  %v4343_v37 = vunpack.c.l.b16 %v4156_v17  ;;  %v5658_v17 = vrot.slane %v4558_v4, 9  ;;  %v3216_v4 = vld [vmem:[#allocation2 + $0x84] sm:$0xe] }
 0x246   : > { %v3402_v21 = vunpack.c.l.b16 %v3339_v62  ;;  %v4160_v54 = vrot.slane %v4158_v5, 4  ;;  %v4675_v11 = vrot.slane %v7034_v46, 5 }
 0x247   : > { %7694 = vst [vmem:[#allocation5_spill] sm:$0xff] %v7056_v26  ;;  %v2516_v38 = vpop.f32.mrf.mxu3  ;;  %v4169_v26 = vrot.slane %v4167_v25, 5  ;;  %v4366_v44 = vpack.c.b16 %v4343_v37, %v4342_v58  ;;  %v4177_v25 = vshll.u32 %v7068_v20, 16  ;;  %v5875_v58 = vld [vmem:[#allocation2 + $0x88] sm:$0xf] }
 0x248   : > { %v2551_v12 = vadd.f32 %v2516_v38, %v2262_v0  ;;  %5626 = vmatmul.msk.bf16.gmra.mxu2 %vm1518_vm12, %v5726_v57  ;;  %v4672_v0 = vrot.slane %v7013_v27, 5  ;;  %v3424_v38 = vpack.c.b16 %v3402_v21, %v3401_v28  ;;  %v4164_v5 = vor.u32 %v4163_v51, %v4160_v54  ;;  %v3923_v54 = vld [vmem:[#allocation2 + $0x90] sm:$0xf] }
 0x249   : > { %v4174_v34 = vor.u32 %v4173_v63, %v4169_v26  ;;  %v4179_v63 = vrot.slane %v4177_v25, 5  ;;  %v3342_v37 = vrot.slane %v5875_v58, 5 }
 0x24a   : > { %v4674_v27 = vrot.slane %v4672_v0, 4 }
 0x24b   : > { %v3781_v15 = vpop.f32.mrf.mxu2  ;;  %v7066_v57 = vpop.f32.mrf.mxu1  ;;  %v4175_v28 = vrot.slane %v4174_v34, 4  ;;  %v4185_v34 = vshll.u32 %v3923_v54, 16 }
 0x24c   : > { %v3169_v18 = vpop.f32.mrf.mxu0  ;;  %v4676_v46 = vsel %vm6395_vm1, %v4674_v27, %v4675_v11  ;;  %v3861_v13 = vadd.f32 %v3781_v15, %v3575_v61 }
 0x24d   : > { %v7071_v6 = vadd.f32 %v3169_v18, %v2551_v12  ;;  %v4673_v12 = vsel %vm6395_vm1, %v5658_v17, %v4672_v0  ;;  %v7085_v0 = vld [vmem:[#allocation2 + $0x94] sm:$0xf]  ;;  %v4744_v51 = vunpack.c.l.b16 %v4676_v46  ;;  %v5876_v17 = vld [vmem:[#allocation2 + $0x8c] sm:$0x1]  ;;  %v4180_v15 = vsel %vm6088_vm13, %v4175_v28, %v4179_v63 }
 0x24e   : > { %5547 = vmatmul.msk.bf16.gmra.mxu1 %vm1518_vm12, %v3424_v38  ;;  %5673 = vmatmul.msk.bf16.gmra.mxu0 %vm1518_vm12, %v4766_v43  ;;  %v5727_v43 = vld [vmem:[#allocation2 + $0x84] sm:$0xff]  ;;  %v4743_v22 = vunpack.c.l.b16 %v4673_v12  ;;  %v3345_v27 = vrot.slane %v5876_v17, 5  ;;  %v4191_v61 = vshll.u32 %v7085_v0, 16  ;;  %v4195_v12 = vshrl.u32 %v7085_v0, 16 }
 0x24f   : > { %7695 = vst [vmem:[#allocation11_spill] sm:$0xff] %v7071_v6  ;;  %v2518_v9 = vpop.f32.mrf.mxu3  ;;  %v4679_v63 = vrot.slane %v7050_v16, 5  ;;  %v4187_v17 = vrot.slane %v4185_v34, 5 }
 0x250   : > { %v2552_v59 = vadd.f32 %v2518_v9, %v2263_v8  ;;  %v4165_v8 = vrot.slane %v4164_v5, 4  ;;  %v5532_v9 = vrot.slane %v3216_v4, 9  ;;  %v4182_v5 = vshrl.u32 %v3923_v54, 16  ;;  %v4559_v4 = vld [vmem:[#allocation2 + $0x84] sm:$0xe] }
 0x251   : > { %v4345_v54 = vunpack.c.l.b16 %v4180_v15  ;;  %v4681_v15 = vrot.slane %v4679_v63, 4 }
 0x252   : > { %v4170_v11 = vsel %vm6088_vm13, %v4165_v8, %v4169_v26  ;;  %v4767_v26 = vpack.c.b16 %v4744_v51, %v4743_v22  ;;  %v3576_v8 = vadd.f32 %v7047_v30, %v6634_v32  ;;  %v4193_v22 = vrot.slane %v4191_v61, 5  ;;  %v3926_v61 = vld [vmem:[#allocation2 + $0x9c] sm:$0xf] }
 0x253   : > { %v3783_v14 = vpop.f32.mrf.mxu2  ;;  %v7080_v62 = vpop.f32.mrf.mxu1  ;;  %v4344_v28 = vunpack.c.l.b16 %v4170_v11  ;;  %v4197_v32 = vrot.slane %v4195_v12, 4 }
 0x254   : > { %5642 = vmatmul.msk.bf16.gmra.mxu3 %vm1518_vm12, %v4366_v44  ;;  %v3171_v21 = vpop.f32.mrf.mxu0  ;;  %v3344_v44 = vrot.slane %v3342_v37, 4  ;;  %v3862_v16 = vadd.f32 %v3783_v14, %v3576_v8 }
 0x255   : > { %v7087_v38 = vadd.f32 %v3171_v21, %v2552_v59  ;;  %v3343_v59 = vsel %vm6395_vm1, %v5532_v9, %v3342_v37  ;;  %v4367_v11 = vpack.c.b16 %v4345_v54, %v4344_v28 }
 0x256   : > { %v3346_v25 = vsel %vm6395_vm1, %v3344_v44, %v3345_v27  ;;  %v4184_v44 = vrot.slane %v4182_v5, 4  ;;  %v4682_v5 = vrot.slane %v7068_v20, 5 }
 0x257   : > { %7696 = vst [vmem:[#allocation12_spill] sm:$0xff] %v7087_v38  ;;  %v4438_v18 = vpop.f32.mrf.mxu3  ;;  %v3404_v21 = vunpack.c.l.b16 %v3346_v25 }
 0x258   : > { %5627 = vmatmul.msk.bf16.gmra.mxu2 %vm1518_vm12, %v5727_v43  ;;  %v4518_v46 = vadd.f32 %v4438_v18, %v3861_v13  ;;  %v3403_v43 = vunpack.c.l.b16 %v3343_v59  ;;  %v7114_v13 = vld [vmem:[#allocation2 + $0x98] sm:$0x1]  ;;  %v5659_v18 = vrot.slane %v4559_v4, 9  ;;  %v4188_v34 = vor.u32 %v4187_v17, %v4184_v44 }
 0x259   : > { %v4198_v59 = vor.u32 %v4197_v32, %v4193_v22  ;;  %v4201_v25 = vshll.u32 %v7114_v13, 16  ;;  %v4683_v20 = vsel %vm6395_vm1, %v4681_v15, %v4682_v5  ;;  %v4206_v17 = vshrl.u32 %v3926_v61, 16  ;;  %v5878_v5 = vld [vmem:[#allocation2 + $0x98] sm:$0x1] }
 0x25a   : > { %v3425_v9 = vpack.c.b16 %v3404_v21, %v3403_v43  ;;  %v4680_v12 = vsel %vm6395_vm1, %v5659_v18, %v4679_v63  ;;  %v3577_v21 = vadd.f32 %v7066_v57, %v6643_v2  ;;  %v4189_v8 = vrot.slane %v4188_v34, 4  ;;  %v7131_v63 = vld [vmem:[#allocation2 + $0xa0] sm:$0xf]  ;;  %v3217_v57 = vld [vmem:[#allocation2 + $0x90] sm:$0xe] }
 0x25b   : > { %v3786_v58 = vpop.f32.mrf.mxu2  ;;  %v7104_v37 = vpop.f32.mrf.mxu1  ;;  %v4199_v54 = vrot.slane %v4198_v59, 4  ;;  %v4203_v4 = vrot.slane %v4201_v25, 5  ;;  %v4745_v32 = vunpack.c.l.b16 %v4680_v12  ;;  %v3352_v34 = vrot.slane %v5878_v5, 5 }
 0x25c   : > { %v4835_v27 = vpop.f32.mrf.mxu0  ;;  %v3863_v2 = vadd.f32 %v3786_v58, %v3577_v21  ;;  %v4194_v59 = vsel %vm6088_vm13, %v4189_v8, %v4193_v22  ;;  %v4686_v25 = vrot.slane %v7085_v0, 5  ;;  %v4215_v58 = vshll.u32 %v7131_v63, 16 }
 0x25d   : > { %v7111_v30 = vadd.f32 %v4835_v27, %v4518_v46  ;;  %v4346_v5 = vunpack.c.l.b16 %v4194_v59 }
 0x25e   : > { %5548 = vmatmul.msk.bf16.gmra.mxu1 %vm1518_vm12, %v3425_v9  ;;  %5674 = vmatmul.msk.bf16.gmra.mxu0 %vm1518_vm12, %v4767_v26  ;;  %v5728_v26 = vld [vmem:[#allocation2 + $0x90] sm:$0xff] }
 0x25f   : > { %v4440_v51 = vpop.f32.mrf.mxu3  ;;  %4947 = vst.msk [vmem:[%s7109_s14] sm:$0xff] %vm1518_vm12, %v7111_v30  ;;  %v5877_v9 = vld [vmem:[#allocation2 + $0x94] sm:$0xf] }
 0x260   : > { %v4519_v14 = vadd.f32 %v4440_v51, %v3862_v16  ;;  %v3349_v44 = vrot.slane %v5877_v9, 5  ;;  %v4209_v16 = vshll.u32 %v3926_v61, 16  ;;  %v4746_v51 = vunpack.c.l.b16 %v4683_v20 }
 0x261   : > { %v4204_v61 = vsel %vm6088_vm13, %v4199_v54, %v4203_v4  ;;  %v4208_v20 = vrot.slane %v4206_v17, 4 }
 0x262   : > { %v3351_v15 = vrot.slane %v3349_v44, 4  ;;  %v4211_v8 = vrot.slane %v4209_v16, 5  ;;  %v4768_v0 = vpack.c.b16 %v4746_v51, %v4745_v32  ;;  %v4347_v54 = vunpack.c.l.b16 %v4204_v61 }
 0x263   : > { %v3788_v46 = vpop.f32.mrf.mxu2  ;;  %v7124_v43 = vpop.f32.mrf.mxu1  ;;  %v4689_v16 = vrot.slane %v7114_v13, 5 }
 0x264   : > { %5643 = vmatmul.msk.bf16.gmra.mxu3 %vm1518_vm12, %v4367_v11  ;;  %v4837_v28 = vpop.f32.mrf.mxu0  ;;  %v5533_v11 = vrot.slane %v3217_v57, 9  ;;  %v3353_v21 = vsel %vm6395_vm1, %v3351_v15, %v3352_v34  ;;  %v3578_v57 = vadd.f32 %v7080_v62, %v6652_v40  ;;  %v4212_v40 = vor.u32 %v4211_v8, %v4208_v20 }
 0x265   : > { %v7133_v27 = vadd.f32 %v4837_v28, %v4519_v14  ;;  %v4219_v14 = vshrl.u32 %v7131_v63, 16  ;;  %v4560_v28 = vld [vmem:[#allocation2 + $0x90] sm:$0xe]  ;;  %v3406_v22 = vunpack.c.l.b16 %v3353_v21  ;;  %v4368_v51 = vpack.c.b16 %v4347_v54, %v4346_v5  ;;  %v7174_v54 = vld [vmem:[#allocation2 + $0xac] sm:$0xf] }
 0x266   : > { %v3350_v12 = vsel %vm6395_vm1, %v5533_v11, %v3349_v44  ;;  %v4217_v44 = vrot.slane %v4215_v58, 5  ;;  %v5660_v17 = vrot.slane %v4560_v28, 9  ;;  %v3864_v32 = vadd.f32 %v3788_v46, %v3578_v57  ;;  %v5879_v57 = vld [vmem:[#allocation2 + $0xa0] sm:$0xf] }
 0x267   : > { %v4443_v18 = vpop.f32.mrf.mxu3  ;;  %4948 = vst.msk [vmem:[%s7109_s14 + $0x8] sm:$0xff] %vm1518_vm12, %v7133_v27  ;;  %v3405_v9 = vunpack.c.l.b16 %v3350_v12  ;;  %v4221_v11 = vrot.slane %v4219_v14, 4  ;;  %v4213_v46 = vrot.slane %v4212_v40, 4  ;;  %v3579_v20 = vadd.f32 %v7104_v37, %v6660_v53  ;;  %v3218_v37 = vld [vmem:[#allocation2 + $0x9c] sm:$0xe] }
 0x268   : > { %5628 = vmatmul.msk.bf16.gmra.mxu2 %vm1518_vm12, %v5728_v26  ;;  %v4520_v26 = vadd.f32 %v4443_v18, %v3863_v2  ;;  %v4688_v2 = vrot.slane %v4686_v25, 4  ;;  %v7154_v18 = vld [vmem:[#allocation2 + $0xa4] sm:$0x1]  ;;  %v4687_v61 = vsel %vm6395_vm1, %v5660_v17, %v4686_v25  ;;  %v3356_v5 = vrot.slane %v5879_v57, 5 }
 0x269   : > { %v3426_v4 = vpack.c.b16 %v3406_v22, %v3405_v9  ;;  %v4222_v59 = vor.u32 %v4221_v11, %v4217_v44  ;;  %v4225_v58 = vshll.u32 %v7154_v18, 16  ;;  %v3929_v22 = vld [vmem:[#allocation2 + $0xa8] sm:$0xf]  ;;  %v4218_v53 = vsel %vm6088_vm13, %v4213_v46, %v4217_v44 }
 0x26a   : > { %v4690_v13 = vsel %vm6395_vm1, %v4688_v2, %v4689_v16  ;;  %v5534_v17 = vrot.slane %v3218_v37, 9  ;;  %v3358_v2 = vrot.slane %v3356_v5, 4  ;;  %v4230_v40 = vshrl.u32 %v3929_v22, 16 }
 0x26b   : > { %v3791_v38 = vpop.f32.mrf.mxu2  ;;  %v7152_v6 = vpop.f32.mrf.mxu1  ;;  %v4223_v28 = vrot.slane %v4222_v59, 4  ;;  %v4227_v9 = vrot.slane %v4225_v58, 5  ;;  %v4748_v25 = vunpack.c.l.b16 %v4690_v13  ;;  %v4243_v44 = vshrl.u32 %v7174_v54, 16  ;;  %v7697_v13 = vld [vmem:[#allocation6_spill] sm:$0xff] }
 0x26c   : > { %v4840_v15 = vpop.f32.mrf.mxu0  ;;  %v3865_v11 = vadd.f32 %v3791_v38, %v3579_v20  ;;  %v4239_v38 = vshll.u32 %v7174_v54, 16  ;;  %v3357_v58 = vsel %vm6395_vm1, %v5534_v17, %v3356_v5  ;;  %v3580_v46 = vadd.f32 %v7124_v43, %v7697_v13 }
 0x26d   : > { %v7156_v34 = vadd.f32 %v4840_v15, %v4520_v26  ;;  %v5729_v26 = vld [vmem:[#allocation2 + $0x9c] sm:$0xff]  ;;  %v3407_v20 = vunpack.c.l.b16 %v3357_v58 }
 0x26e   : > { %5549 = vmatmul.msk.bf16.gmra.mxu1 %vm1518_vm12, %v3426_v4  ;;  %5675 = vmatmul.msk.bf16.gmra.mxu0 %vm1518_vm12, %v4768_v0  ;;  %v4747_v0 = vunpack.c.l.b16 %v4687_v61  ;;  %v4241_v17 = vrot.slane %v4239_v38, 5 }
 0x26f   : > { %v4445_v62 = vpop.f32.mrf.mxu3  ;;  %4949 = vst.msk [vmem:[%s7109_s14 + $0x10] sm:$0xff] %vm1518_vm12, %v7156_v34 }
 0x270   : > { %v4521_v14 = vadd.f32 %v4445_v62, %v3864_v32  ;;  %v5880_v32 = vld [vmem:[#allocation2 + $0xa4] sm:$0x1]  ;;  %v4228_v62 = vsel %vm6088_vm13, %v4223_v28, %v4227_v9  ;;  %v4769_v59 = vpack.c.b16 %v4748_v25, %v4747_v0  ;;  %v4693_v9 = vrot.slane %v7131_v63, 5  ;;  %v4561_v25 = vld [vmem:[#allocation2 + $0x9c] sm:$0xe] }
 0x271   : > { %v3359_v16 = vrot.slane %v5880_v32, 5  ;;  %v4349_v28 = vunpack.c.l.b16 %v4228_v62  ;;  %v4232_v0 = vrot.slane %v4230_v40, 4  ;;  %v4696_v62 = vrot.slane %v7154_v18, 5 }
 0x272   : > { %v4695_v40 = vrot.slane %v4693_v9, 4 }
 0x273   : > { %v3793_v12 = vpop.f32.mrf.mxu2  ;;  %v7169_v21 = vpop.f32.mrf.mxu1 }
 0x274   : > { %5644 = vmatmul.msk.bf16.gmra.mxu3 %vm1518_vm12, %v4368_v51  ;;  %v4842_v8 = vpop.f32.mrf.mxu0  ;;  %v4233_v51 = vshll.u32 %v3929_v22, 16  ;;  %v3866_v32 = vadd.f32 %v3793_v12, %v3580_v46  ;;  %v7698_v12 = vld [vmem:[#allocation7_spill] sm:$0xff] }
 0x275   : > { %v7176_v4 = vadd.f32 %v4842_v8, %v4521_v14  ;;  %v3360_v14 = vsel %vm6395_vm1, %v3358_v2, %v3359_v16  ;;  %v4348_v8 = vunpack.c.l.b16 %v4218_v53  ;;  %v4245_v2 = vrot.slane %v4243_v44, 4 }
 0x276   : > { %v4235_v37 = vrot.slane %v4233_v51, 5  ;;  %v5661_v16 = vrot.slane %v4561_v25, 9  ;;  %v5881_v25 = vld [vmem:[#allocation2 + $0xac] sm:$0xf] }
 0x277   : > { %v4448_v15 = vpop.f32.mrf.mxu3  ;;  %4950 = vst.msk [vmem:[%s7109_s14 + $0x18] sm:$0xff] %vm1518_vm12, %v7176_v4  ;;  %v4369_v63 = vpack.c.b16 %v4349_v28, %v4348_v8  ;;  %v4246_v38 = vor.u32 %v4245_v2, %v4241_v17 }
 0x278   : > { %5629 = vmatmul.msk.bf16.gmra.mxu2 %vm1518_vm12, %v5729_v26  ;;  %v4522_v61 = vadd.f32 %v4448_v15, %v3865_v11  ;;  %v3408_v26 = vunpack.c.l.b16 %v3360_v14  ;;  %v7197_v15 = vld [vmem:[#allocation2 + $0xb0] sm:$0x1]  ;;  %v4236_v51 = vor.u32 %v4235_v37, %v4232_v0  ;;  %v3932_v14 = vld [vmem:[#allocation2 + $0xb4] sm:$0xf]  ;;  %v4694_v13 = vsel %vm6395_vm1, %v5661_v16, %v4693_v9 }
 0x279   : > { %v4249_v44 = vshll.u32 %v7197_v15, 16  ;;  %v4247_v8 = vrot.slane %v4246_v38, 4  ;;  %v4254_v37 = vshrl.u32 %v3932_v14, 16  ;;  %v4749_v2 = vunpack.c.l.b16 %v4694_v13 }
 0x27a   : > { %v3427_v5 = vpack.c.b16 %v3408_v26, %v3407_v20  ;;  %v5730_v20 = vld [vmem:[#allocation2 + $0xa8] sm:$0xff]  ;;  %v4237_v26 = vrot.slane %v4236_v51, 4  ;;  %v5882_v51 = vld [vmem:[#allocation2 + $0xb0] sm:$0x1] }
 0x27b   : > { %v3796_v22 = vpop.f32.mrf.mxu2  ;;  %v7195_v57 = vpop.f32.mrf.mxu1  ;;  %v4251_v28 = vrot.slane %v4249_v44, 5  ;;  %v3366_v38 = vrot.slane %v5882_v51, 5 }
 0x27c   : > { %v4845_v11 = vpop.f32.mrf.mxu0  ;;  %v4242_v44 = vsel %vm6088_vm13, %v4237_v26, %v4241_v17 }
 0x27d   : > { %v7199_v43 = vadd.f32 %v4845_v11, %v4522_v61  ;;  %v3581_v61 = vadd.f32 %v7152_v6, %v7698_v12  ;;  %v7217_v6 = vld [vmem:[#allocation2 + $0xb8] sm:$0xf]  ;;  %v4700_v12 = vrot.slane %v7174_v54, 5  ;;  %v4350_v51 = vunpack.c.l.b16 %v4242_v44 }
 0x27e   : > { %5550 = vmatmul.msk.bf16.gmra.mxu1 %vm1518_vm12, %v3427_v5  ;;  %5676 = vmatmul.msk.bf16.gmra.mxu0 %vm1518_vm12, %v4769_v59  ;;  %v4697_v59 = vsel %vm6395_vm1, %v4695_v40, %v4696_v62  ;;  %v3363_v5 = vrot.slane %v5881_v25, 5 }
 0x27f   : > { %v4450_v53 = vpop.f32.mrf.mxu3  ;;  %4951 = vst.msk [vmem:[%s7109_s14 + $0x20] sm:$0xff] %vm1518_vm12, %v7199_v43  ;;  %v3867_v11 = vadd.f32 %v3796_v22, %v3581_v61  ;;  %v4263_v22 = vshll.u32 %v7217_v6, 16 }
 0x280   : > { %v4523_v58 = vadd.f32 %v4450_v53, %v3866_v32  ;;  %v3219_v32 = vld [vmem:[#allocation2 + $0xa8] sm:$0xe]  ;;  %v4257_v53 = vshll.u32 %v3932_v14, 16  ;;  %v3365_v40 = vrot.slane %v3363_v5, 4  ;;  %v4267_v14 = vshrl.u32 %v7217_v6, 16 }
 0x281   : > { %v5535_v62 = vrot.slane %v3219_v32, 9 }
 0x282   : > { %v3367_v13 = vsel %vm6395_vm1, %v3365_v40, %v3366_v38  ;;  %v4259_v26 = vrot.slane %v4257_v53, 5  ;;  %v4269_v36 = vrot.slane %v4267_v14, 4 }
 0x283   : > { %v3798_v46 = vpop.f32.mrf.mxu2  ;;  %v7212_v18 = vpop.f32.mrf.mxu1  ;;  %v3364_v61 = vsel %vm6395_vm1, %v5535_v62, %v3363_v5  ;;  %v3410_v17 = vunpack.c.l.b16 %v3367_v13  ;;  %v4265_v62 = vrot.slane %v4263_v22, 5 }
 0x284   : > { %5645 = vmatmul.msk.bf16.gmra.mxu3 %vm1518_vm12, %v4369_v63  ;;  %v4847_v0 = vpop.f32.mrf.mxu0  ;;  %v4750_v63 = vunpack.c.l.b16 %v4697_v59  ;;  %v4256_v59 = vrot.slane %v4254_v37, 4  ;;  %v3409_v25 = vunpack.c.l.b16 %v3364_v61 }
 0x285   : > { %v7219_v9 = vadd.f32 %v4847_v0, %v4523_v58  ;;  %v4252_v58 = vsel %vm6088_vm13, %v4247_v8, %v4251_v28  ;;  %v4562_v0 = vld [vmem:[#allocation2 + $0xa8] sm:$0xe]  ;;  %v7699_v8 = vld [vmem:[#allocation8_spill] sm:$0xff] }
 0x286   : > { %v4770_v32 = vpack.c.b16 %v4750_v63, %v4749_v2  ;;  %v3582_v28 = vadd.f32 %v7169_v21, %v7699_v8  ;;  %v4351_v54 = vunpack.c.l.b16 %v4252_v58  ;;  %v3428_v5 = vpack.c.b16 %v3410_v17, %v3409_v25  ;;  %v5883_v8 = vld [vmem:[#allocation2 + $0xb8] sm:$0xf] }
 0x287   : > { %v4453_v16 = vpop.f32.mrf.mxu3  ;;  %4952 = vst.msk [vmem:[%s7109_s14 + $0x28] sm:$0xff] %vm1518_vm12, %v7219_v9  ;;  %v5662_v37 = vrot.slane %v4562_v0, 9  ;;  %v4702_v63 = vrot.slane %v4700_v12, 4  ;;  %v4260_v21 = vor.u32 %v4259_v26, %v4256_v59  ;;  %v4270_v58 = vor.u32 %v4269_v36, %v4265_v62  ;;  %v5731_v36 = vld [vmem:[#allocation2 + $0xb4] sm:$0xff] }
 0x288   : > { %5630 = vmatmul.msk.bf16.gmra.mxu2 %vm1518_vm12, %v5730_v20  ;;  %v4524_v20 = vadd.f32 %v4453_v16, %v3867_v11  ;;  %v4703_v11 = vrot.slane %v7197_v15, 5  ;;  %v7241_v16 = vld [vmem:[#allocation2 + $0xbc] sm:$0x1]  ;;  %v3868_v2 = vadd.f32 %v3798_v46, %v3582_v28  ;;  %v4370_v44 = vpack.c.b16 %v4351_v54, %v4350_v51  ;;  %v7260_v51 = vld [vmem:[#allocation2 + $0xc4] sm:$0xf] }
 0x289   : > { %v4273_v22 = vshll.u32 %v7241_v16, 16  ;;  %v4701_v14 = vsel %vm6395_vm1, %v5662_v37, %v4700_v12  ;;  %v4261_v61 = vrot.slane %v4260_v21, 4  ;;  %v3583_v0 = vadd.f32 %v7195_v57, %v6725_v55  ;;  %v3220_v55 = vld [vmem:[#allocation2 + $0xb4] sm:$0xe] }
 0x28a   : > { %v4704_v46 = vsel %vm6395_vm1, %v4702_v63, %v4703_v11  ;;  %v4271_v25 = vrot.slane %v4270_v58, 4  ;;  %v3370_v28 = vrot.slane %v5883_v8, 5  ;;  %v5536_v11 = vrot.slane %v3220_v55, 9  ;;  %v5884_v63 = vld [vmem:[#allocation2 + $0xbc] sm:$0x1] }
 0x28b   : > { %v3801_v33 = vpop.f32.mrf.mxu2  ;;  %v7238_v29 = vpop.f32.mrf.mxu1  ;;  %v4275_v17 = vrot.slane %v4273_v22, 5  ;;  %v4752_v12 = vunpack.c.l.b16 %v4704_v46  ;;  %v3373_v21 = vrot.slane %v5884_v63, 5  ;;  %v3584_v22 = vadd.f32 %v7212_v18, %v6739_v24  ;;  %v333_v46 = vld [vmem:[#allocation2 + $0xcc] sm:$0x1]  ;;  %v389_v24 = vld [vmem:[#allocation2 + $0xd4] sm:$0x1] }
 0x28c   : > { %v4850_v40 = vpop.f32.mrf.mxu0  ;;  %v4563_v18 = vld [vmem:[#allocation2 + $0xb4] sm:$0xe] }
 0x28d   : > { %v7243_v53 = vadd.f32 %v4850_v40, %v4524_v20  ;;  %v3935_v20 = vld [vmem:[#allocation2 + $0xc0] sm:$0xf]  ;;  %v4266_v40 = vsel %vm6088_vm13, %v4261_v61, %v4265_v62  ;;  %v4291_v62 = vshrl.u32 %v7260_v51, 16 }
 0x28e   : > { %5551 = vmatmul.msk.bf16.gmra.mxu1 %vm1518_vm12, %v3428_v5  ;;  %5677 = vmatmul.msk.bf16.gmra.mxu0 %vm1518_vm12, %v4770_v32  ;;  %v4751_v32 = vunpack.c.l.b16 %v4701_v14  ;;  %v3869_v5 = vadd.f32 %v3801_v33, %v3583_v0  ;;  %v4278_v57 = vshrl.u32 %v3935_v20, 16  ;;  %v4287_v33 = vshll.u32 %v7260_v51, 16 }
 0x28f   : > { %v4455_v38 = vpop.f32.mrf.mxu3  ;;  %4953 = vst.msk [vmem:[%s7109_s14 + $0x30] sm:$0xff] %vm1518_vm12, %v7243_v53 }
 0x290   : > { %v4525_v15 = vadd.f32 %v4455_v38, %v3868_v2  ;;  %v3372_v2 = vrot.slane %v3370_v28, 4  ;;  %v4281_v38 = vshll.u32 %v3935_v20, 16  ;;  %v4771_v58 = vpack.c.b16 %v4752_v12, %v4751_v32 }
 0x291   : > { %v4352_v20 = vunpack.c.l.b16 %v4266_v40  ;;  %v4280_v32 = vrot.slane %v4278_v57, 4 }
 0x292   : > { %v3374_v14 = vsel %vm6395_vm1, %v3372_v2, %v3373_v21  ;;  %v4283_v12 = vrot.slane %v4281_v38, 5  ;;  %v5663_v38 = vrot.slane %v4563_v18, 9 }
 0x293   : > { %v3803_v13 = vpop.f32.mrf.mxu2  ;;  %v7255_v59 = vpop.f32.mrf.mxu1 }
 0x294   : > { %5646 = vmatmul.msk.bf16.gmra.mxu3 %vm1518_vm12, %v4370_v44  ;;  %v4852_v26 = vpop.f32.mrf.mxu0  ;;  %v4276_v44 = vsel %vm6088_vm13, %v4271_v25, %v4275_v17  ;;  %v4707_v17 = vrot.slane %v7217_v6, 5  ;;  %v390_v6 = vsel %vm5954_vm4, 0, %v389_v24  ;;  %v3870_v57 = vadd.f32 %v3803_v13, %v3584_v22  ;;  %v3221_v24 = vld [vmem:[#allocation2 + $0xc0] sm:$0xe] }
 0x295   : > { %v7262_v54 = vadd.f32 %v4852_v26, %v4525_v15  ;;  %v3371_v15 = vsel %vm6395_vm1, %v5536_v11, %v3370_v28  ;;  %v4353_v25 = vunpack.c.l.b16 %v4276_v44  ;;  %v7283_v28 = vrot.slane %v4287_v33, 5  ;;  %391 = vst [vmem:[#allocation2 + $0xd4] sm:$0x1] %v390_v6  ;;  %v5886_v6 = vld [vmem:[#allocation2 + $0xc8] sm:$0x1] }
 0x296   : > { %v3411_v0 = vunpack.c.l.b16 %v3371_v15  ;;  %v4293_v11 = vrot.slane %v4291_v62, 4  ;;  %v4710_v44 = vrot.slane %v7241_v16, 5  ;;  %v4709_v3 = vrot.slane %v4707_v17, 4 }
 0x297   : > { %v4458_v37 = vpop.f32.mrf.mxu3  ;;  %4954 = vst.msk [vmem:[%s7109_s14 + $0x38] sm:$0xff] %vm1518_vm12, %v7262_v54  ;;  %v4371_v21 = vpack.c.b16 %v4353_v25, %v4352_v20  ;;  %v4284_v33 = vor.u32 %v4283_v12, %v4280_v32  ;;  %v3585_v22 = vadd.f32 %v7238_v29, %v6751_v49  ;;  %v4708_v15 = vsel %vm6395_vm1, %v5663_v38, %v4707_v17  ;;  %v5885_v25 = vld [vmem:[#allocation2 + $0xc4] sm:$0xf]  ;;  %v7310_v49 = vld [vmem:[#allocation2 + $0xd0] sm:$0xf] }
 0x298   : > { %5631 = vmatmul.msk.bf16.gmra.mxu2 %vm1518_vm12, %v5731_v36  ;;  %v4526_v61 = vadd.f32 %v4458_v37, %v3869_v5  ;;  %v3412_v36 = vunpack.c.l.b16 %v3374_v14  ;;  %v334_v5 = vsel %vm5946_vm3, 0, %v333_v46  ;;  %v7287_v37 = vld [vmem:[#allocation2 + $0xc8] sm:$0x1]  ;;  %v4294_v7 = vor.u32 %v4293_v11, %v7283_v28  ;;  %v5732_v46 = vld [vmem:[#allocation2 + $0xc0] sm:$0xff] }
 0x299   : > { %335 = vst [vmem:[#allocation2 + $0xcc] sm:$0x1] %v334_v5  ;;  %v4297_v62 = vshll.u32 %v7287_v37, 16  ;;  %v3377_v32 = vrot.slane %v5885_v25, 5  ;;  %v4753_v17 = vunpack.c.l.b16 %v4708_v15  ;;  %v5537_v5 = vrot.slane %v3221_v24, 9 }
 0x29a   : > { %v3429_v55 = vpack.c.b16 %v3412_v36, %v3411_v0  ;;  %v4295_v20 = vrot.slane %v4294_v7, 4  ;;  %v4315_v38 = vshrl.u32 %v7310_v49, 16 }
 0x29b   : > { %v3806_v26 = vpop.f32.mrf.mxu2  ;;  %v7281_v8 = vpop.f32.mrf.mxu1  ;;  %v4299_v0 = vrot.slane %v4297_v62, 5 }
 0x29c   : > { %v4855_v40 = vpop.f32.mrf.mxu0  ;;  %v3871_v12 = vadd.f32 %v3806_v26, %v3585_v22 }
 0x29d   : > { %v7291_v2 = vadd.f32 %v4855_v40, %v4526_v61  ;;  %v4285_v61 = vrot.slane %v4284_v33, 4  ;;  %v3379_v40 = vrot.slane %v3377_v32, 4  ;;  %v4300_v26 = vsel %vm6088_vm13, %v4295_v20, %v4299_v0 }
 0x29e   : > { %5552 = vmatmul.msk.bf16.gmra.mxu1 %vm1518_vm12, %v3429_v55  ;;  %5678 = vmatmul.msk.bf16.gmra.mxu0 %vm1518_vm12, %v4771_v58  ;;  %v4711_v58 = vsel %vm6395_vm1, %v4709_v3, %v4710_v44  ;;  %v3378_v44 = vsel %vm6395_vm1, %v5537_v5, %v3377_v32  ;;  %v4355_v20 = vunpack.c.l.b16 %v4300_v26  ;;  %v4714_v0 = vrot.slane %v7260_v51, 5  ;;  %v4564_v32 = vld [vmem:[#allocation2 + $0xc0] sm:$0xe] }
 0x29f   : > { %v4460_v63 = vpop.f32.mrf.mxu3  ;;  %4955 = vst.msk [vmem:[%s7109_s14 + $0x40] sm:$0xff] %vm1518_vm12, %v7291_v2  ;;  %v4754_v55 = vunpack.c.l.b16 %v4711_v58 }
 0x2a0   : > { %v4527_v13 = vadd.f32 %v4460_v63, %v3870_v57  ;;  %v3938_v18 = vld [vmem:[#allocation2 + $0xcc] sm:$0xf]  ;;  %v3380_v57 = vrot.slane %v5886_v6, 5  ;;  %v4290_v63 = vsel %vm6088_vm13, %v4285_v61, %v7283_v28  ;;  %v3586_v28 = vadd.f32 %v7255_v59, %v6762_v19  ;;  %v3940_v19 = vld [vmem:[#allocation2 + $0xd4] sm:$0x1] }
 0x2a1   : > { %v4302_v33 = vshrl.u32 %v3938_v18, 16  ;;  %v4305_v7 = vshll.u32 %v3938_v18, 16  ;;  %v4772_v15 = vpack.c.b16 %v4754_v55, %v4753_v17  ;;  %v4354_v61 = vunpack.c.l.b16 %v4290_v63 }
 0x2a2   : > { %v3381_v3 = vsel %vm6395_vm1, %v3379_v40, %v3380_v57  ;;  %v5664_v55 = vrot.slane %v4564_v32, 9  ;;  %v4717_v40 = vrot.slane %v7287_v37, 5  ;;  %v4716_v6 = vrot.slane %v4714_v0, 4 }
 0x2a3   : > { %v3808_v14 = vpop.f32.mrf.mxu2  ;;  %v7305_v16 = vpop.f32.mrf.mxu1  ;;  %v3414_v22 = vunpack.c.l.b16 %v3381_v3  ;;  %v4304_v24 = vrot.slane %v4302_v33, 4  ;;  %v4307_v18 = vrot.slane %v4305_v7, 5  ;;  %v4372_v51 = vpack.c.b16 %v4355_v20, %v4354_v61  ;;  %v5733_v33 = vld [vmem:[#allocation2 + $0xcc] sm:$0xff] }
 0x2a4   : > { %5647 = vmatmul.msk.bf16.gmra.mxu3 %vm1518_vm12, %v4371_v21  ;;  %v4857_v36 = vpop.f32.mrf.mxu0  ;;  %v4311_v21 = vshll.u32 %v7310_v49, 16  ;;  %v3872_v17 = vadd.f32 %v3808_v14, %v3586_v28  ;;  %v4321_v26 = vshll.u32 %v3940_v19, 16  ;;  %v4715_v3 = vsel %vm6395_vm1, %v5664_v55, %v4714_v0 }
 0x2a5   : > { %v7312_v29 = vadd.f32 %v4857_v36, %v4527_v13  ;;  %v3413_v13 = vunpack.c.l.b16 %v3378_v44  ;;  %v4308_v57 = vor.u32 %v4307_v18, %v4304_v24  ;;  %v3587_v44 = vadd.f32 %v7281_v8, %v6775_v35 }
 0x2a6   : > { %v4718_v37 = vsel %vm6395_vm1, %v4716_v6, %v4717_v40  ;;  %v4755_v35 = vunpack.c.l.b16 %v4715_v3 }
 0x2a7   : > { %v4463_v11 = vpop.f32.mrf.mxu3  ;;  %4956 = vst.msk [vmem:[%s7109_s14 + $0x48] sm:$0xff] %vm1518_vm12, %v7312_v29  ;;  %v3430_v36 = vpack.c.b16 %v3414_v22, %v3413_v13  ;;  %v4323_v22 = vrot.slane %v4321_v26, 5  ;;  %v4756_v8 = vunpack.c.l.b16 %v4718_v37 }
 0x2a8   : > { %5632 = vmatmul.msk.bf16.gmra.mxu2 %vm1518_vm12, %v5732_v46  ;;  %v4528_v62 = vadd.f32 %v4463_v11, %v3871_v12  ;;  %v4313_v12 = vrot.slane %v4311_v21, 5  ;;  %v4317_v11 = vrot.slane %v4315_v38, 4 }
 0x2a9   : > { %v4773_v24 = vpack.c.b16 %v4756_v8, %v4755_v35 }
 0x2aa   : > { %v4318_v63 = vor.u32 %v4317_v11, %v4313_v12 }
 0x2ab   : > { %v3811_v58 = vpop.f32.mrf.mxu2  ;;  %v7331_v46 = vpop.f32.mrf.mxu1 }
 0x2ac   : > { %v4860_v25 = vpop.f32.mrf.mxu0  ;;  %v4319_v13 = vrot.slane %v4318_v63, 4  ;;  %v3873_v28 = vadd.f32 %v3811_v58, %v3587_v44  ;;  %v3588_v58 = vadd.f32 %v7305_v16, %v6789_v56  ;;  %v4724_v56 = vrot.slane %v3940_v19, 5 }
 0x2ad   : > { %v7334_v5 = vadd.f32 %v4860_v25, %v4528_v62  ;;  %v4309_v62 = vrot.slane %v4308_v57, 4 }
 0x2ae   : > { %5553 = vmatmul.msk.bf16.gmra.mxu1 %vm1518_vm12, %v3430_v36  ;;  %5679 = vmatmul.msk.bf16.gmra.mxu0 %vm1518_vm12, %v4772_v15  ;;  %v4324_v0 = vsel %vm6088_vm13, %v4319_v13, %v4323_v22 }
 0x2af   : > { %v4465_v59 = vpop.f32.mrf.mxu3  ;;  %4957 = vst.msk [vmem:[%s7109_s14 + $0x50] sm:$0xff] %vm1518_vm12, %v7334_v5  ;;  %v4314_v20 = vsel %vm6088_vm13, %v4309_v62, %v4313_v12  ;;  %v4357_v11 = vunpack.c.l.b16 %v4324_v0  ;;  %v4565_v12 = vld [vmem:[#allocation2 + $0xcc] sm:$0xe] }
 0x2b0   : > { %v4529_v21 = vadd.f32 %v4465_v59, %v3872_v17  ;;  %v4356_v18 = vunpack.c.l.b16 %v4314_v20  ;;  %v4721_v59 = vrot.slane %v7310_v49, 5  ;;  %v5665_v6 = vrot.slane %v4565_v12, 9 }
 0x2b1   : > { %v3589_v49 = vadd.f32 %v7331_v46, %v6805_v47 }
 0x2b2   : > { %v4373_v41 = vpack.c.b16 %v4357_v11, %v4356_v18  ;;  %v4723_v57 = vrot.slane %v4721_v59, 4 }
 0x2b3   : > { %v3813_v14 = vpop.f32.mrf.mxu2  ;;  %v3532_v38 = vpop.f32.mrf.mxu1 }
 0x2b4   : > { %5648 = vmatmul.msk.bf16.gmra.mxu3 %vm1518_vm12, %v4372_v51  ;;  %v4862_v7 = vpop.f32.mrf.mxu0  ;;  %v3874_v55 = vadd.f32 %v3813_v14, %v3588_v58  ;;  %v4722_v14 = vsel %vm6395_vm1, %v5665_v6, %v4721_v59  ;;  %v4725_v44 = vsel %vm6395_vm1, %v4723_v57, %v4724_v56  ;;  %v3590_v22 = vadd.f32 %v3532_v38, %v6820_v1 }
 0x2b5   : > { %v7349_v15 = vadd.f32 %v4862_v7, %v4529_v21  ;;  %v4757_v7 = vunpack.c.l.b16 %v4722_v14  ;;  %v4758_v37 = vunpack.c.l.b16 %v4725_v44 }
 0x2b7   : > { %v4468_v61 = vpop.f32.mrf.mxu3  ;;  %4958 = vst.msk [vmem:[%s7109_s14 + $0x58] sm:$0xff] %vm1518_vm12, %v7349_v15  ;;  %v4774_v13 = vpack.c.b16 %v4758_v37, %v4757_v7 }
 0x2b8   : > { %5633 = vmatmul.msk.bf16.gmra.mxu2 %vm1518_vm12, %v5733_v33  ;;  %v4530_v36 = vadd.f32 %v4468_v61, %v3873_v28 }
 0x2bb   : > { %v3816_v25 = vpop.f32.mrf.mxu2  ;;  %v3535_v32 = vpop.f32.mrf.mxu1 }
 0x2bc   : > { %v4865_v17 = vpop.f32.mrf.mxu0  ;;  %v3875_v33 = vadd.f32 %v3816_v25, %v3589_v49 }
 0x2bd   : > { %v7362_v51 = vadd.f32 %v4865_v17, %v4530_v36  ;;  %v3591_v36 = vadd.f32 %v3535_v32, %v6839_v31 }
 0x2be   : > { %5680 = vmatmul.msk.bf16.gmra.mxu0 %vm1518_vm12, %v4773_v24 }
 0x2bf   : > { %v4470_v40 = vpop.f32.mrf.mxu3  ;;  %4959 = vst.msk [vmem:[%s7109_s14 + $0x60] sm:$0xff] %vm1518_vm12, %v7362_v51 }
 0x2c0   : > { %v4531_v16 = vadd.f32 %v4470_v40, %v3874_v55 }
 0x2c3   : > { %v3818_v63 = vpop.f32.mrf.mxu2  ;;  %v3537_v26 = vpop.f32.mrf.mxu1 }
 0x2c4   : > { %5649 = vmatmul.msk.bf16.gmra.mxu3 %vm1518_vm12, %v4373_v41  ;;  %v4867_v21 = vpop.f32.mrf.mxu0  ;;  %v3876_v61 = vadd.f32 %v3818_v63, %v3590_v22  ;;  %v3592_v17 = vadd.f32 %v3537_v26, %v6854_v23 }
 0x2c5   : > { %v7375_v3 = vadd.f32 %v4867_v21, %v4531_v16 }
 0x2c7   : > { %v4473_v19 = vpop.f32.mrf.mxu3  ;;  %4960 = vst.msk [vmem:[%s7109_s14 + $0x68] sm:$0xff] %vm1518_vm12, %v7375_v3 }
 0x2c8   : > { %v4532_v47 = vadd.f32 %v4473_v19, %v3875_v33 }
 0x2cb   : > { %v3821_v46 = vpop.f32.mrf.mxu2  ;;  %v3540_v62 = vpop.f32.mrf.mxu1 }
 0x2cc   : > { %v4870_v28 = vpop.f32.mrf.mxu0  ;;  %v3877_v1 = vadd.f32 %v3821_v46, %v3591_v36  ;;  %v3593_v41 = vadd.f32 %v3540_v62, %v6870_v48 }
 0x2cd   : > { %v7381_v10 = vadd.f32 %v4870_v28, %v4532_v47 }
 0x2ce   : > { %5681 = vmatmul.msk.bf16.gmra.mxu0 %vm1518_vm12, %v4774_v13 }
 0x2cf   : > { %v4475_v35 = vpop.f32.mrf.mxu3  ;;  %4961 = vst.msk [vmem:[%s7109_s14 + $0x70] sm:$0xff] %vm1518_vm12, %v7381_v10 }
 0x2d0   : > { %v4533_v8 = vadd.f32 %v4475_v35, %v3876_v61 }
 0x2d3   : > { %v3823_v20 = vpop.f32.mrf.mxu2  ;;  %v3542_v0 = vpop.f32.mrf.mxu1 }
 0x2d4   : > { %v4872_v25 = vpop.f32.mrf.mxu0  ;;  %v3878_v12 = vadd.f32 %v3823_v20, %v3592_v17  ;;  %v3594_v49 = vadd.f32 %v3542_v0, %v6885_v52  ;;  %v4984_v17 = vsel %vm1518_vm12, %v7176_v4, 0.0 }
 0x2d5   : > { %v7388_v24 = vadd.f32 %v4872_v25, %v4533_v8 }
 0x2d7   : > { %v4478_v38 = vpop.f32.mrf.mxu3  ;;  %4962 = vst.msk [vmem:[%s7109_s14 + $0x78] sm:$0xff] %vm1518_vm12, %v7388_v24 }
 0x2d8   : > { %v4534_v58 = vadd.f32 %v4478_v38, %v3877_v1  ;;  %v4979_v38 = vsel %vm1518_vm12, %v7111_v30, 0.0 }
 0x2db   : > { %v3826_v18 = vpop.f32.mrf.mxu2  ;;  %v3545_v11 = vpop.f32.mrf.mxu1 }
 0x2dc   : > { %v4875_v59 = vpop.f32.mrf.mxu0  ;;  %v3879_v16 = vadd.f32 %v3826_v18, %v3593_v41  ;;  %v3595_v37 = vadd.f32 %v3545_v11, %v6904_v60  ;;  %v4980_v60 = vsel %vm1518_vm12, %v7133_v27, 0.0 }
 0x2dd   : > { %v7394_v55 = vadd.f32 %v4875_v59, %v4534_v58  ;;  %v4981_v18 = vadd.f32 %v4980_v60, %v4979_v38 }
 0x2df   : > { %v4480_v40 = vpop.f32.mrf.mxu3  ;;  %4963 = vst.msk [vmem:[%s7109_s14 + $0x80] sm:$0xff] %vm1518_vm12, %v7394_v55 }
 0x2e0   : > { %v4535_v31 = vadd.f32 %v4480_v40, %v3878_v12 }
 0x2e3   : > { %v3828_v32 = vpop.f32.mrf.mxu2  ;;  %v3547_v57 = vpop.f32.mrf.mxu1 }
 0x2e4   : > { %v4877_v6 = vpop.f32.mrf.mxu0  ;;  %v3880_v44 = vadd.f32 %v3828_v32, %v3594_v49  ;;  %v3596_v61 = vadd.f32 %v3547_v57, %v6919_v42  ;;  %v4982_v42 = vsel %vm1518_vm12, %v7156_v34, 0.0  ;;  %v4986_v32 = vsel %vm1518_vm12, %v7199_v43, 0.0 }
 0x2e5   : > { %v7400_v56 = vadd.f32 %v4877_v6, %v4535_v31  ;;  %v4983_v40 = vadd.f32 %v4982_v42, %v4981_v18  ;;  %v5002_v42 = vsel %vm1518_vm12, %v7362_v51, 0.0 }
 0x2e7   : > { %v4483_v63 = vpop.f32.mrf.mxu3  ;;  %4964 = vst.msk [vmem:[%s7109_s14 + $0x88] sm:$0xff] %vm1518_vm12, %v7400_v56  ;;  %v4985_v41 = vadd.f32 %v4984_v17, %v4983_v40  ;;  %v5006_v17 = vsel %vm1518_vm12, %v7381_v10, 0.0 }
 0x2e8   : > { %v4536_v23 = vadd.f32 %v4483_v63, %v3879_v16  ;;  %v4990_v63 = vsel %vm1518_vm12, %v7243_v53, 0.0 }
 0x2e9   : > { %v4987_v57 = vadd.f32 %v4986_v32, %v4985_v41  ;;  %v5008_v41 = vsel %vm1518_vm12, %v7388_v24, 0.0 }
 0x2eb   : > { %v3831_v26 = vpop.f32.mrf.mxu2  ;;  %v3550_v48 = vpop.f32.mrf.mxu1 }
 0x2ec   : > { %v4880_v21 = vpop.f32.mrf.mxu0  ;;  %v3881_v62 = vadd.f32 %v3831_v26, %v3595_v37  ;;  %v3597_v58 = vadd.f32 %v3550_v48, %v6935_v50  ;;  %v4988_v50 = vsel %vm1518_vm12, %v7219_v9, 0.0  ;;  %v4994_v37 = vsel %vm1518_vm12, %v7291_v2, 0.0 }
 0x2ed   : > { %v7406_v14 = vadd.f32 %v4880_v21, %v4536_v23  ;;  %v4989_v26 = vadd.f32 %v4988_v50, %v4987_v57 }
 0x2ef   : > { %v4485_v33 = vpop.f32.mrf.mxu3  ;;  %4965 = vst.msk [vmem:[%s7109_s14 + $0x90] sm:$0xff] %vm1518_vm12, %v7406_v14 }
 0x2f0   : > { %v4537_v19 = vadd.f32 %v4485_v33, %v3880_v44  ;;  %v4992_v44 = vsel %vm1518_vm12, %v7262_v54, 0.0 }
 0x2f3   : > { %v3833_v7 = vpop.f32.mrf.mxu2  ;;  %v3552_v52 = vpop.f32.mrf.mxu1 }
 0x2f4   : > { %v4882_v47 = vpop.f32.mrf.mxu0  ;;  %v3882_v20 = vadd.f32 %v3833_v7, %v3596_v61  ;;  %v3598_v23 = vadd.f32 %v3552_v52, %v6950_v45  ;;  %v4996_v45 = vsel %vm1518_vm12, %v7312_v29, 0.0 }
 0x2f5   : > { %v7412_v46 = vadd.f32 %v4882_v47, %v4537_v19  ;;  %v4991_v19 = vadd.f32 %v4990_v63, %v4989_v26  ;;  %v5010_v63 = vsel %vm1518_vm12, %v7394_v55, 0.0 }
 0x2f7   : > { %v4488_v13 = vpop.f32.mrf.mxu3  ;;  %4966 = vst.msk [vmem:[%s7109_s14 + $0x98] sm:$0xff] %vm1518_vm12, %v7412_v46  ;;  %v4993_v47 = vadd.f32 %v4992_v44, %v4991_v19  ;;  %v5014_v19 = vsel %vm1518_vm12, %v7406_v14, 0.0 }
 0x2f8   : > { %v4538_v22 = vadd.f32 %v4488_v13, %v3881_v62 }
 0x2f9   : > { %v4995_v13 = vadd.f32 %v4994_v37, %v4993_v47 }
 0x2fb   : > { %v3836_v28 = vpop.f32.mrf.mxu2  ;;  %v3555_v1 = vpop.f32.mrf.mxu1  ;;  %v4997_v61 = vadd.f32 %v4996_v45, %v4995_v13 }
 0x2fc   : > { %v4885_v35 = vpop.f32.mrf.mxu0  ;;  %v3883_v12 = vadd.f32 %v3836_v28, %v3597_v58  ;;  %v3599_v28 = vadd.f32 %v3555_v1, %v6969_v39  ;;  %v5004_v39 = vsel %vm1518_vm12, %v7375_v3, 0.0 }
 0x2fd   : > { %v7418_v8 = vadd.f32 %v4885_v35, %v4538_v22  ;;  %v4998_v22 = vsel %vm1518_vm12, %v7334_v5, 0.0 }
 0x2ff   : > { %v4490_v0 = vpop.f32.mrf.mxu3  ;;  %4967 = vst.msk [vmem:[%s7109_s14 + $0xa0] sm:$0xff] %vm1518_vm12, %v7418_v8 }
 0x300   : > { %v4539_v36 = vadd.f32 %v4490_v0, %v3882_v20  ;;  %v5000_v20 = vsel %vm1518_vm12, %v7349_v15, 0.0 }
 0x303   : > { %v3838_v25 = vpop.f32.mrf.mxu2  ;;  %v3557_v21 = vpop.f32.mrf.mxu1 }
 0x304   : > { %v4887_v11 = vpop.f32.mrf.mxu0  ;;  %v3884_v48 = vadd.f32 %v3838_v25, %v3598_v23 }
 0x305   : > { %v7432_v59 = vadd.f32 %v4887_v11, %v4539_v36  ;;  %v4999_v36 = vadd.f32 %v4998_v22, %v4997_v61  ;;  %v5018_v61 = vsel %vm1518_vm12, %v7418_v8, 0.0 }
 0x307   : > { %v4493_v31 = vpop.f32.mrf.mxu3  ;;  %4968 = vst.msk [vmem:[%s7109_s14 + $0xa8] sm:$0xff] %vm1518_vm12, %v7432_v59  ;;  %v5001_v58 = vadd.f32 %v5000_v20, %v4999_v36  ;;  %v5020_v20 = vsel %vm1518_vm12, %v7432_v59, 0.0 }
 0x308   : > { %v4540_v6 = vadd.f32 %v4493_v31, %v3883_v12  ;;  %v7700_v12 = vld [vmem:[#allocation9_spill] sm:$0xff] }
 0x309   : > { %v5003_v18 = vadd.f32 %v5002_v42, %v5001_v58  ;;  %v3600_v40 = vadd.f32 %v3557_v21, %v7700_v12  ;;  %v7702_v42 = vld [vmem:[#allocation3_spill] sm:$0xff] }
 0x30b   : > { %v3841_v16 = vpop.f32.mrf.mxu2  ;;  %v3560_v38 = vpop.f32.mrf.mxu1  ;;  %v5005_v31 = vadd.f32 %v5004_v39, %v5003_v18 }
 0x30c   : > { %v4890_v49 = vpop.f32.mrf.mxu0  ;;  %v3885_v60 = vadd.f32 %v3841_v16, %v3599_v28 }
 0x30d   : > { %v7446_v33 = vadd.f32 %v4890_v49, %v4540_v6  ;;  %v5007_v57 = vadd.f32 %v5006_v17, %v5005_v31  ;;  %v5012_v49 = vsel %vm1518_vm12, %v7400_v56, 0.0 }
 0x30f   : > { %v4495_v7 = vpop.f32.mrf.mxu3  ;;  %4969 = vst.msk [vmem:[%s7109_s14 + $0xb0] sm:$0xff] %vm1518_vm12, %v7446_v33  ;;  %v5009_v23 = vadd.f32 %v5008_v41, %v5007_v57 }
 0x310   : > { %v4541_v62 = vadd.f32 %v4495_v7, %v3884_v48  ;;  %v7701_v7 = vld [vmem:[#allocation10_spill] sm:$0xff] }
 0x311   : > { %v5011_v44 = vadd.f32 %v5010_v63, %v5009_v23  ;;  %v3601_v37 = vadd.f32 %v3560_v38, %v7701_v7  ;;  %v5022_v38 = vsel %vm1518_vm12, %v7446_v33, 0.0  ;;  %v7703_v23 = vld [vmem:[#allocation4_spill] sm:$0xff] }
 0x313   : > { %v3843_v52 = vpop.f32.mrf.mxu2  ;;  %v3562_v26 = vpop.f32.mrf.mxu1  ;;  %v5013_v47 = vadd.f32 %v5012_v49, %v5011_v44 }
 0x314   : > { %v4892_v35 = vpop.f32.mrf.mxu0  ;;  %v3886_v6 = vadd.f32 %v3843_v52, %v3600_v40  ;;  %v3602_v58 = vadd.f32 %v3562_v26, %v7702_v42 }
 0x315   : > { %v7460_v0 = vadd.f32 %v4892_v35, %v4541_v62  ;;  %v5016_v62 = vsel %vm1518_vm12, %v7412_v46, 0.0  ;;  %v5015_v22 = vadd.f32 %v5014_v19, %v5013_v47 }
 0x317   : > { %v4498_v25 = vpop.f32.mrf.mxu3  ;;  %4970 = vst.msk [vmem:[%s7109_s14 + $0xb8] sm:$0xff] %vm1518_vm12, %v7460_v0  ;;  %v5017_v35 = vadd.f32 %v5016_v62, %v5015_v22  ;;  %v7704_v22 = vld [vmem:[#allocation5_spill] sm:$0xff] }
 0x318   : > { %v4542_v1 = vadd.f32 %v4498_v25, %v3885_v60 }
 0x319   : > { %v5019_v36 = vadd.f32 %v5018_v61, %v5017_v35 }
 0x31b   : > { %v3846_v11 = vpop.f32.mrf.mxu2  ;;  %v3565_v25 = vpop.f32.mrf.mxu1  ;;  %v5021_v39 = vadd.f32 %v5020_v20, %v5019_v36 }
 0x31c   : > { %v4895_v32 = vpop.f32.mrf.mxu0  ;;  %v3887_v52 = vadd.f32 %v3846_v11, %v3601_v37  ;;  %v5024_v11 = vsel %vm1518_vm12, %v7460_v0, 0.0  ;;  %v3603_v26 = vadd.f32 %v3565_v25, %v7703_v23 }
 0x31d   : > { %v7474_v50 = vadd.f32 %v4895_v32, %v4542_v1  ;;  %v5023_v40 = vadd.f32 %v5022_v38, %v5021_v39  ;;  %v7705_v39 = vld [vmem:[#allocation11_spill] sm:$0xff] }
 0x31f   : > { %v4500_v16 = vpop.f32.mrf.mxu3  ;;  %4971 = vst.msk [vmem:[%s7109_s14 + $0xc0] sm:$0xff] %vm1518_vm12, %v7474_v50  ;;  %v5026_v32 = vsel %vm1518_vm12, %v7474_v50, 0.0  ;;  %v5025_v41 = vadd.f32 %v5024_v11, %v5023_v40 }
 0x320   : > { %v4543_v21 = vadd.f32 %v4500_v16, %v3886_v6 }
 0x321   : > { %v5027_v16 = vadd.f32 %v5026_v32, %v5025_v41 }
 0x323   : > { %v3848_v48 = vpop.f32.mrf.mxu2  ;;  %v3567_v44 = vpop.f32.mrf.mxu1 }
 0x324   : > { %v4897_v45 = vpop.f32.mrf.mxu0  ;;  %v3888_v12 = vadd.f32 %v3848_v48, %v3602_v58 }
 0x325   : > { %v7488_v13 = vadd.f32 %v4897_v45, %v4543_v21 }
 0x327   : > { %v4503_v28 = vpop.f32.mrf.mxu3  ;;  %4972 = vst.msk [vmem:[%s7109_s14 + $0xc8] sm:$0xff] %vm1518_vm12, %v7488_v13  ;;  %v5028_v6 = vsel %vm1518_vm12, %v7488_v13, 0.0 }
 0x328   : > { %v4544_v60 = vadd.f32 %v4503_v28, %v3887_v52  ;;  %v5029_v49 = vadd.f32 %v5028_v6, %v5027_v16  ;;  %v3604_v28 = vadd.f32 %v3567_v44, %v7704_v22  ;;  %v7706_v16 = vld [vmem:[#allocation12_spill] sm:$0xff] }
 0x32b   : > { %v3851_v18 = vpop.f32.mrf.mxu2  ;;  %v3570_v36 = vpop.f32.mrf.mxu1 }
 0x32c   : > { %v4900_v1 = vpop.f32.mrf.mxu0  ;;  %v3889_v19 = vadd.f32 %v3851_v18, %v3603_v26 }
 0x32d   : > { %v7502_v17 = vadd.f32 %v4900_v1, %v4544_v60  ;;  %v3605_v1 = vadd.f32 %v3570_v36, %v7705_v39 }
 0x32f   : > { %v4505_v31 = vpop.f32.mrf.mxu3  ;;  %4973 = vst.msk [vmem:[%s7109_s14 + $0xd0] sm:$0xff] %vm1518_vm12, %v7502_v17  ;;  %v5030_v63 = vsel %vm1518_vm12, %v7502_v17, 0.0 }
 0x330   : > { %v4545_v57 = vadd.f32 %v4505_v31, %v3888_v12  ;;  %v5031_v7 = vadd.f32 %v5030_v63, %v5029_v49 }
 0x333   : > { %v3853_v47 = vpop.f32.mrf.mxu2  ;;  %v3572_v41 = vpop.f32.mrf.mxu1 }
 0x334   : > { %v4902_v21 = vpop.f32.mrf.mxu0  ;;  %v3890_v20 = vadd.f32 %v3853_v47, %v3604_v28  ;;  %v3606_v63 = vadd.f32 %v3572_v41, %v7706_v16 }
 0x335   : > { %v4942_v48 = vadd.f32 %v4902_v21, %v4545_v57 }
 0x337   : > { %v4508_v37 = vpop.f32.mrf.mxu3  ;;  %4974 = vst.msk [vmem:[%s7109_s14 + $0xd8] sm:$0xff] %vm1518_vm12, %v4942_v48  ;;  %v5032_v45 = vsel %vm1518_vm12, %v4942_v48, 0.0 }
 0x338   : > { %v5033_v62 = vadd.f32 %v5032_v45, %v5031_v7  ;;  %v4546_v52 = vadd.f32 %v4508_v37, %v3889_v19 }
 0x33b   : > { %v3856_v42 = vpop.f32.mrf.mxu2 }
 0x33c   : > { %v4905_v61 = vpop.f32.mrf.mxu0  ;;  %v3891_v12 = vadd.f32 %v3856_v42, %v3605_v1 }
 0x33d   : > { %v4943_v35 = vadd.f32 %v4905_v61, %v4546_v52 }
 0x33f   : > { %v4510_v60 = vpop.f32.mrf.mxu3  ;;  %4975 = vst.msk [vmem:[%s7109_s14 + $0xe0] sm:$0xff] %vm1518_vm12, %v4943_v35  ;;  %v5034_v25 = vsel %vm1518_vm12, %v4943_v35, 0.0 }
 0x340   : > { %v5035_v38 = vadd.f32 %v5034_v25, %v5033_v62  ;;  %v4547_v58 = vadd.f32 %v4510_v60, %v3890_v20 }
 0x343   : > { %v3858_v57 = vpop.f32.mrf.mxu2 }
 0x344   : > { %v4907_v18 = vpop.f32.mrf.mxu0  ;;  %v3892_v49 = vadd.f32 %v3858_v57, %v3606_v63 }
 0x345   : > { %v4944_v11 = vadd.f32 %v4907_v18, %v4547_v58 }
 0x347   : > { %v4513_v40 = vpop.f32.mrf.mxu3  ;;  %4976 = vst.msk [vmem:[%s7109_s14 + $0xe8] sm:$0xff] %vm1518_vm12, %v4944_v11  ;;  %v5036_v31 = vsel %vm1518_vm12, %v4944_v11, 0.0 }
 0x348   : > { %v5037_v32 = vadd.f32 %v5036_v31, %v5035_v38  ;;  %v4548_v6 = vadd.f32 %v4513_v40, %v3891_v12 }
 0x34c   : > { %v4910_v23 = vpop.f32.mrf.mxu0 }
 0x34d   : > { %v4945_v26 = vadd.f32 %v4910_v23, %v4548_v6 }
 0x34f   : > { %4977 = vst.msk [vmem:[%s7109_s14 + $0xf0] sm:$0xff] %vm1518_vm12, %v4945_v26  ;;  %v5038_v21 = vsel %vm1518_vm12, %v4945_v26, 0.0  ;;  %v4515_v19 = vpop.f32.mrf.mxu3 }
 0x350   : > { %v5039_v44 = vadd.f32 %v5038_v21, %v5037_v32  ;;  %v4549_v7 = vadd.f32 %v4515_v19, %v3892_v49 }
 0x354   : > { %v4912_v37 = vpop.f32.mrf.mxu0 }
 0x355   : > { %v4946_v47 = vadd.f32 %v4912_v37, %v4549_v7 }
 0x357   : > { %4978 = vst.msk [vmem:[%s7109_s14 + $0xf8] sm:$0xff] %vm1518_vm12, %v4946_v47  ;;  %v5040_v45 = vsel %vm1518_vm12, %v4946_v47, 0.0 }
 0x358   : > { %v5041_v62 = vadd.f32 %v5040_v45, %v5039_v44 }
 0x35a   : > { %v5042_v52 = vrot.slane %v5041_v62, 4 }
 0x35c   : > { %v5043_v22 = vadd.f32 %v5042_v52, %v5041_v62 }
 0x35e   : > { %v5044_v28 = vrot.slane %v5043_v22, 2 }
 0x360   : > { %v5045_v61 = vadd.f32 %v5044_v28, %v5043_v22 }
 0x362   : > { %v5046_v20 = vrot.slane %v5045_v61, 1 }
 0x364   : > { %v5047_v60 = vadd.f32 %v5046_v20, %v5045_v61 }
 0x366   : > { %5081 = vst.msk [vmem:[%s265_s17] sm:$0x1] %vm273_vm0, %v5047_v60  ;;  %v7537_v36 = vmul.f32 0.00390625, %v5047_v60 }
 0x368   : > { %v7541_v25 = vsub.f32 %v7502_v17, %v7537_v36  ;;  %v7544_v38 = vsub.f32 %v4942_v48, %v7537_v36  ;;  %v7547_v42 = vsub.f32 %v4943_v35, %v7537_v36  ;;  %v7550_v58 = vsub.f32 %v4944_v11, %v7537_v36 }
 0x369   : > { %v7553_v39 = vsub.f32 %v4945_v26, %v7537_v36  ;;  %v7556_v1 = vsub.f32 %v4946_v47, %v7537_v36  ;;  %v5049_v18 = vsub.f32 %v7111_v30, %v7537_v36  ;;  %v5050_v17 = vsub.f32 %v7133_v27, %v7537_v36 }
 0x36a   : > { %v5051_v48 = vsub.f32 %v7156_v34, %v7537_v36  ;;  %v5052_v35 = vsub.f32 %v7176_v4, %v7537_v36  ;;  %v5053_v40 = vsub.f32 %v7199_v43, %v7537_v36  ;;  %v5054_v32 = vsub.f32 %v7219_v9, %v7537_v36 }
 0x36b   : > { %v5082_v11 = vmul.f32 %v5049_v18, %v5049_v18  ;;  %v5083_v12 = vmul.f32 %v5050_v17, %v5050_v17  ;;  %v5055_v34 = vsub.f32 %v7243_v53, %v7537_v36  ;;  %v5056_v43 = vsub.f32 %v7262_v54, %v7537_v36 }
 0x36c   : > { %v5084_v31 = vmul.f32 %v5051_v48, %v5051_v48  ;;  %v5085_v41 = vmul.f32 %v5052_v35, %v5052_v35  ;;  %v5086_v57 = vmul.f32 %v5053_v40, %v5053_v40  ;;  %v5087_v63 = vmul.f32 %v5054_v32, %v5054_v32 }
 0x36d   : > { %v5114_v30 = vsel %vm1518_vm12, %v5082_v11, 0.0  ;;  %v5115_v27 = vsel %vm1518_vm12, %v5083_v12, 0.0  ;;  %v5057_v26 = vsub.f32 %v7291_v2, %v7537_v36  ;;  %v5088_v49 = vmul.f32 %v5055_v34, %v5055_v34 }
 0x36e   : > { %v5116_v6 = vadd.f32 %v5115_v27, %v5114_v30  ;;  %v5117_v4 = vsel %vm1518_vm12, %v5084_v31, 0.0  ;;  %v5119_v23 = vsel %vm1518_vm12, %v5085_v41, 0.0  ;;  %v5121_v21 = vsel %vm1518_vm12, %v5086_v57, 0.0 }
 0x36f   : > { %v5058_v53 = vsub.f32 %v7312_v29, %v7537_v36  ;;  %v5089_v19 = vmul.f32 %v5056_v43, %v5056_v43  ;;  %v5123_v7 = vsel %vm1518_vm12, %v5087_v63, 0.0  ;;  %v5059_v54 = vsub.f32 %v7334_v5, %v7537_v36 }
 0x370   : > { %v5118_v16 = vadd.f32 %v5117_v4, %v5116_v6  ;;  %v5090_v47 = vmul.f32 %v5057_v26, %v5057_v26  ;;  %v5125_v45 = vsel %vm1518_vm12, %v5088_v49, 0.0  ;;  %v5060_v2 = vsub.f32 %v7349_v15, %v7537_v36 }
 0x371   : > { %v5091_v52 = vmul.f32 %v5058_v53, %v5058_v53  ;;  %v5127_v22 = vsel %vm1518_vm12, %v5089_v19, 0.0  ;;  %v5061_v29 = vsub.f32 %v7362_v51, %v7537_v36  ;;  %v5092_v61 = vmul.f32 %v5059_v54, %v5059_v54 }
 0x372   : > { %v5120_v9 = vadd.f32 %v5119_v23, %v5118_v16  ;;  %v5129_v20 = vsel %vm1518_vm12, %v5090_v47, 0.0  ;;  %v5062_v5 = vsub.f32 %v7375_v3, %v7537_v36  ;;  %v5093_v18 = vmul.f32 %v5060_v2, %v5060_v2 }
 0x373   : > { %v5131_v17 = vsel %vm1518_vm12, %v5091_v52, 0.0  ;;  %v5063_v15 = vsub.f32 %v7381_v10, %v7537_v36  ;;  %v5094_v35 = vmul.f32 %v5061_v29, %v5061_v29  ;;  %v5133_v11 = vsel %vm1518_vm12, %v5092_v61, 0.0 }
 0x374   : > { %v5122_v44 = vadd.f32 %v5121_v21, %v5120_v9  ;;  %v5064_v51 = vsub.f32 %v7388_v24, %v7537_v36  ;;  %v5095_v40 = vmul.f32 %v5062_v5, %v5062_v5  ;;  %v5135_v31 = vsel %vm1518_vm12, %v5093_v18, 0.0 }
 0x375   : > { %v5065_v3 = vsub.f32 %v7394_v55, %v7537_v36  ;;  %v5096_v41 = vmul.f32 %v5063_v15, %v5063_v15  ;;  %v5137_v30 = vsel %vm1518_vm12, %v5094_v35, 0.0  ;;  %v5066_v10 = vsub.f32 %v7400_v56, %v7537_v36 }
 0x376   : > { %v5124_v37 = vadd.f32 %v5123_v7, %v5122_v44  ;;  %v5097_v6 = vmul.f32 %v5064_v51, %v5064_v51  ;;  %v5139_v34 = vsel %vm1518_vm12, %v5095_v40, 0.0  ;;  %v5067_v24 = vsub.f32 %v7406_v14, %v7537_v36 }
 0x377   : > { %v5098_v4 = vmul.f32 %v5065_v3, %v5065_v3  ;;  %v5141_v16 = vsel %vm1518_vm12, %v5096_v41, 0.0  ;;  %v5068_v55 = vsub.f32 %v7412_v46, %v7537_v36  ;;  %v5099_v63 = vmul.f32 %v5066_v10, %v5066_v10 }
 0x378   : > { %v5126_v62 = vadd.f32 %v5125_v45, %v5124_v37  ;;  %v5143_v23 = vsel %vm1518_vm12, %v5097_v6, 0.0  ;;  %v5069_v56 = vsub.f32 %v7418_v8, %v7537_v36  ;;  %v5100_v26 = vmul.f32 %v5067_v24, %v5067_v24 }
 0x379   : > { %v5145_v49 = vsel %vm1518_vm12, %v5098_v4, 0.0  ;;  %v5070_v14 = vsub.f32 %v7432_v59, %v7537_v36  ;;  %v5101_v44 = vmul.f32 %v5068_v55, %v5068_v55  ;;  %v5147_v53 = vsel %vm1518_vm12, %v5099_v63, 0.0 }
 0x37a   : > { %v5128_v28 = vadd.f32 %v5127_v22, %v5126_v62  ;;  %v5071_v46 = vsub.f32 %v7446_v33, %v7537_v36  ;;  %v5102_v7 = vmul.f32 %v5069_v56, %v5069_v56  ;;  %v5149_v37 = vsel %vm1518_vm12, %v5100_v26, 0.0 }
 0x37b   : > { %v5072_v8 = vsub.f32 %v7460_v0, %v7537_v36  ;;  %v5103_v47 = vmul.f32 %v5070_v14, %v5070_v14  ;;  %v5151_v45 = vsel %vm1518_vm12, %v5101_v44, 0.0  ;;  %v5073_v59 = vsub.f32 %v7474_v50, %v7537_v36 }
 0x37c   : > { %v5130_v60 = vadd.f32 %v5129_v20, %v5128_v28  ;;  %v5104_v2 = vmul.f32 %v5071_v46, %v5071_v46  ;;  %v5153_v52 = vsel %vm1518_vm12, %v5102_v7, 0.0  ;;  %v5074_v33 = vsub.f32 %v7488_v13, %v7537_v36 }
 0x37d   : > { %v5105_v28 = vmul.f32 %v5072_v8, %v5072_v8  ;;  %v5155_v29 = vsel %vm1518_vm12, %v5103_v47, 0.0  ;;  %v5106_v20 = vmul.f32 %v5073_v59, %v5073_v59  ;;  %v5108_v50 = vmul.f32 %v7541_v25, %v7541_v25 }
 0x37e   : > { %v5132_v48 = vadd.f32 %v5131_v17, %v5130_v60  ;;  %v5157_v0 = vsel %vm1518_vm12, %v5104_v2, 0.0  ;;  %v5107_v5 = vmul.f32 %v5074_v33, %v5074_v33  ;;  %v5109_v13 = vmul.f32 %v7544_v38, %v7544_v38 }
 0x37f   : > { %v5159_v18 = vsel %vm1518_vm12, %v5105_v28, 0.0  ;;  %v5111_v40 = vmul.f32 %v7550_v58, %v7550_v58  ;;  %v5113_v41 = vmul.f32 %v7556_v1, %v7556_v1 }
 0x380   : > { %v5134_v12 = vadd.f32 %v5133_v11, %v5132_v48  ;;  %v5161_v48 = vsel %vm1518_vm12, %v5106_v20, 0.0  ;;  %v5163_v36 = vsel %vm1518_vm12, %v5107_v5, 0.0  ;;  %v5110_v11 = vmul.f32 %v7547_v42, %v7547_v42 }
 0x381   : > { %v5167_v25 = vsel %vm1518_vm12, %v5109_v13, 0.0  ;;  %v5171_v42 = vsel %vm1518_vm12, %v5111_v40, 0.0  ;;  %v5175_v58 = vsel %vm1518_vm12, %v5113_v41, 0.0 }
 0x382   : > { %v5136_v32 = vadd.f32 %v5135_v31, %v5134_v12  ;;  %v5165_v12 = vsel %vm1518_vm12, %v5108_v50, 0.0  ;;  %v5169_v38 = vsel %vm1518_vm12, %v5110_v11, 0.0 }
 0x384   : > { %v5138_v27 = vadd.f32 %v5137_v30, %v5136_v32  ;;  %v5112_v32 = vmul.f32 %v7553_v39, %v7553_v39 }
 0x386   : > { %v5140_v57 = vadd.f32 %v5139_v34, %v5138_v27  ;;  %v5173_v27 = vsel %vm1518_vm12, %v5112_v32, 0.0 }
 0x388   : > { %v5142_v43 = vadd.f32 %v5141_v16, %v5140_v57 }
 0x38a   : > { %v5144_v9 = vadd.f32 %v5143_v23, %v5142_v43 }
 0x38c   : > { %v5146_v21 = vadd.f32 %v5145_v49, %v5144_v9 }
 0x38e   : > { %v5148_v19 = vadd.f32 %v5147_v53, %v5146_v21 }
 0x390   : > { %v5150_v54 = vadd.f32 %v5149_v37, %v5148_v19 }
 0x392   : > { %v5152_v62 = vadd.f32 %v5151_v45, %v5150_v54 }
 0x394   : > { %v5154_v22 = vadd.f32 %v5153_v52, %v5152_v62 }
 0x396   : > { %v5156_v61 = vadd.f32 %v5155_v29, %v5154_v22 }
 0x398   : > { %v5158_v60 = vadd.f32 %v5157_v0, %v5156_v61 }
 0x39a   : > { %v5160_v17 = vadd.f32 %v5159_v18, %v5158_v60 }
 0x39c   : > { %v5162_v15 = vadd.f32 %v5161_v48, %v5160_v17 }
 0x39e   : > { %v5164_v35 = vadd.f32 %v5163_v36, %v5162_v15 }
 0x3a0   : > { %v5166_v51 = vadd.f32 %v5165_v12, %v5164_v35 }
 0x3a2   : > { %v5168_v31 = vadd.f32 %v5167_v25, %v5166_v51 }
 0x3a4   : > { %v5170_v3 = vadd.f32 %v5169_v38, %v5168_v31 }
 0x3a6   : > { %v5172_v30 = vadd.f32 %v5171_v42, %v5170_v3 }
 0x3a8   : > { %v5174_v10 = vadd.f32 %v5173_v27, %v5172_v30 }
 0x3aa   : > { %v5176_v6 = vadd.f32 %v5175_v58, %v5174_v10 }
 0x3ac   : > { %v5177_v34 = vrot.slane %v5176_v6, 4 }
 0x3ae   : > { %v5178_v57 = vadd.f32 %v5177_v34, %v5176_v6 }
 0x3b0   : > { %v5179_v24 = vrot.slane %v5178_v57, 2 }
 0x3b2   : > { %v5180_v4 = vadd.f32 %v5179_v24, %v5178_v57 }
 0x3b4   : > { %v5181_v39 = vrot.slane %v5180_v4, 1 }
 0x3b6   : > { %v5182_v16 = vadd.f32 %v5181_v39, %v5180_v4 }
 0x3b8   : > { %5183 = vst.msk [vmem:[%s268_s20] sm:$0x1] %vm273_vm0, %v5182_v16 }
 0x3b9 PF: > { %s17_s21 = sadd.s32 1, %s5893_s21  }
 0x3ba   : > { %p14_p4 = scmp.ge.s32.totalorder %s17_s21, 4  }
 0x3bc   :  { %16 = sbr.rel (!%p14_p4) target bundleno = 1 (0x1), region = 93 }

</bundles_post_ra>
